<compile_context>
chip_gen: v5e
topology: v5e:2x2
jax: 0.10.0
libtpu: 0.0.40
codegen_flags: <defaults>
</compile_context>

<pallas_src>
import jax
import jax.numpy as jnp
from jax import lax
from jax.experimental import pallas as pl
from jax.experimental.pallas import tpu as pltpu

# SOT hyper-parameters (match the PyTorch defaults).
OT_REG = 0.1
SINKHORN_ITERATIONS = 5
DIAGONAL_VAL = 1000.0
USE_SIGMOID = True
MAX_TEMPERATURE = True

# TODO(synk): the y_support / positive_support_mask few-shot branch is not
# implemented (forward assumes y_support=None, as in the default call).
# TODO(synk): only the 'euclidean' distance_metric branch is implemented.


def _sot_instance(x):
    """One SOT instance: (N, D) f32 -> (N, N) f32 transformed features."""
    n = x.shape[0]

    # --- pairwise squared euclidean distances (torch.cdist(X, X, p=2)^2) ---
    # Gram on the MXU, contracting dim 1 of both operands (no x.T / XLU
    # transpose feeding the MXU).
    gram = lax.dot_general(x, x, (((1,), (1,)), ((), ())),
                           preferred_element_type=jnp.float32)        # (N, N)
    sq = jnp.sum(x * x, axis=1, keepdims=True)                        # (N, 1)
    d2 = jnp.maximum(sq + sq.T - 2.0 * gram, 0.0)                     # (N, N)

    # --- row-max normalization folded into a single per-row scale ---
    # sqrt is monotone, so the row max is taken on d2; the whole
    # (row_max * OT_REG) normalization becomes ONE exact (N, 1) divide and
    # the (N, N) matrix only ever sees multiplies.
    rm2 = jnp.max(d2, axis=1, keepdims=True)                          # (N, 1)
    # TODO(synk): a row of all-identical samples gives rm2 == 0 -> inf/NaN,
    # matching the reference / PyTorch behaviour (no guard added).
    row_scale = -1.0 / (jnp.sqrt(rm2) * OT_REG)                       # exact, small operand

    # --- stabilized LINEAR-space Sinkhorn ---
    # K = exp(-m / OT_REG): off-diagonal entries lie in [exp(-1/OT_REG), 1]
    # and the diagonal entry exp(-DIAGONAL_VAL / OT_REG) is exactly 0, so
    # plain f32 sums cannot under/overflow for the default hyper-parameters.
    # (A log-domain stabilization vector would be needed if OT_REG were made
    # much smaller or the distance normalization removed.)
    ri = lax.broadcasted_iota(jnp.int32, (n, n), 0)
    ci = lax.broadcasted_iota(jnp.int32, (n, n), 1)
    K = jnp.where(ri == ci, 0.0, jnp.exp(jnp.sqrt(d2) * row_scale))   # (N, N)

    def body(_, carry):
        u, v = carry
        u = 1.0 / jnp.sum(K * v, axis=1, keepdims=True)               # (N, 1) exact divide
        v = 1.0 / jnp.sum(K * u, axis=0, keepdims=True)               # (1, N) exact divide
        return (u, v)

    u, v = lax.fori_loop(
        0, SINKHORN_ITERATIONS, body,
        (jnp.zeros((n, 1), jnp.float32), jnp.ones((1, n), jnp.float32)),
        unroll=True)

    P = u * K * v                                                     # (N, N)

    # sigmoid(log_P) == P / (1 + P): one exact (N, N) divide instead of an
    # (N, N) exp followed by an (N, N) divide.
    feat = P / (1.0 + P) if USE_SIGMOID else P

    if MAX_TEMPERATURE:
        gmax = jnp.max(feat, axis=(0, 1), keepdims=True)              # (1, 1)
        feat = feat * (1.0 / gmax)                                    # (1,1) exact divide

    # Fresh iotas for the final diagonal fill (not kept live across the
    # unrolled Sinkhorn iterations).
    ri2 = lax.broadcasted_iota(jnp.int32, (n, n), 0)
    ci2 = lax.broadcasted_iota(jnp.int32, (n, n), 1)
    return jnp.where(ri2 == ci2, 1.0, feat)


def sot_kernel(x_ref, out_ref):
    # x_ref: (bb, N, D), out_ref: (bb, N, N). Static unroll over the per-step
    # batch block: bb independent 2-D instance bodies amortize per-step
    # overhead and give the scheduler separate EUP / reduction chains.
    bb = x_ref.shape[0]
    for b in range(bb):
        x = x_ref[b].astype(jnp.float32)
        out_ref[b] = _sot_instance(x).astype(out_ref.dtype)


def sot_forward(x, block_batch=None):
    """Batched SOT forward.

    x: (B, N, D) batch of SOT instances, or (N, D) for a single instance.
    Returns (B, N, N) (or (N, N)) float32 transformed features.

    Blocking: bb full (N, D) -> (N, N) problems per grid step, held entirely
    in VMEM (bb = 2 when B allows, so the grid keeps >= 2 parallel steps for
    v7x's two TensorCores).  With a handful of live (N, N) f32 intermediates
    plus double-buffered in/out blocks, the 32 MiB scoped-VMEM cap is safe to
    roughly N ~ 1000 on v5e/v6e (128 MiB physical VMEM) but only to roughly
    N ~ 600-700 on v7x (64 MiB physical per TensorCore).  For larger N,
    re-derive the cap per generation (pltpu.get_tpu_info()) and switch to a
    row-tiled Sinkhorn (grid over row blocks, u/v normalizers in VMEM
    scratch) instead of one block per instance.
    """
    squeeze = x.ndim == 2
    if squeeze:
        x = x[None]
    b, n, d = x.shape

    if block_batch is not None:
        bb = block_batch
    elif b >= 4 and b % 2 == 0:
        bb = 2   # amortize per-step overhead, keep >= 2 parallel grid steps
    else:
        bb = 1
    assert b % bb == 0, (b, bb)
    grid = (b // bb,)

    # Advisory cost: this call is compute-heavy (transcendentals) despite
    # tiny I/O, so tell XLA's scheduler.
    cost = pl.CostEstimate(
        flops=b * (2 * n * n * d + (4 * SINKHORN_ITERATIONS + 20) * n * n),
        transcendentals=b * 3 * n * n,           # sqrt + exp + sigmoid-divide
        bytes_accessed=b * 4 * (n * d + n * n),
    )

    out = pl.pallas_call(
        sot_kernel,
        out_shape=jax.ShapeDtypeStruct((b, n, n), jnp.float32),
        grid=grid,
        in_specs=[pl.BlockSpec((bb, n, d), lambda i: (i, 0, 0))],
        out_specs=pl.BlockSpec((bb, n, n), lambda i: (i, 0, 0)),
        compiler_params=pltpu.CompilerParams(
            # Batch axis is fully independent -> shard across TCs on v7x.
            dimension_semantics=("parallel",),
            vmem_limit_bytes=32 * 1024 * 1024,
        ),
        cost_estimate=cost,
    )(x)
    return out[0] if squeeze else out


def sot_reference(x):
    """Pure-JAX log-space reference mirroring PyTorch SOT.forward (no y_support)."""
    x = x.astype(jnp.float32)
    n = x.shape[0]
    gram = x @ x.T
    sq = jnp.sum(x * x, axis=1, keepdims=True)
    dist = jnp.sqrt(jnp.maximum(sq + sq.T - 2.0 * gram, 0.0))
    m = dist / jnp.max(dist, axis=1, keepdims=True)
    eye = jnp.eye(n, dtype=bool)
    m = jnp.where(eye, DIAGONAL_VAL, m)
    log_K = -m / OT_REG
    log_u = jnp.zeros((n, 1), jnp.float32)
    log_v = jnp.zeros((1, n), jnp.float32)
    for _ in range(SINKHORN_ITERATIONS):
        log_u = -jax.nn.logsumexp(log_K + log_v, axis=1, keepdims=True)
        log_v = -jax.nn.logsumexp(log_u + log_K, axis=0, keepdims=True)
    log_P = log_u + log_K + log_v
    feat = jax.nn.sigmoid(log_P) if USE_SIGMOID else jnp.exp(log_P)
    if MAX_TEMPERATURE:
        feat = feat / jnp.max(feat)
    return jnp.where(eye, 1.0, feat)


if __name__ == "__main__":
    # B=4 independent SOT instances, N=128 samples each (lane-dense (N,N)
    # tiles), D=32 feature dim. Deterministic input.
    key = jax.random.PRNGKey(0)
    B, N, D = 4, 128, 32
    X = jax.random.normal(key, (B, N, D), dtype=jnp.float32)

    out = jax.block_until_ready(sot_forward(X))

    ref = jax.vmap(sot_reference)(X)
    assert out.shape == (B, N, N)
    max_err = jnp.max(jnp.abs(out - ref))
    assert jnp.allclose(out, ref, atol=1e-4, rtol=1e-4), (
        f"max abs err {max_err}")

    print("KERNEL_OK")
</pallas_src>

<mosaic_0001>
module attributes {stable_mosaic.version = 11 : i64} {
  func.func @sot_kernel(%arg0: i32, %arg1: memref<2x128x32xf32, #tpu.memory_space<vmem>>, %arg2: memref<2x128x128xf32, #tpu.memory_space<vmem>>) attributes {dimension_semantics = [#tpu.dimension_semantics<parallel>], iteration_bounds = array<i64: 2>, scalar_prefetch = 0 : i64, scratch_operands = 0 : i64, tpu.core_type = #tpu.core_type<tc>, window_params = [{transform_indices = @transform_0, window_bounds = array<i64: 2, 128, 32>}, {transform_indices = @transform_1, window_bounds = array<i64: 2, 128, 128>}]} {
    %c0 = arith.constant 0 : index
    %c0_0 = arith.constant 0 : index
    %c0_1 = arith.constant 0 : index
    %0 = vector.load %arg1[%c0, %c0_0, %c0_1] : memref<2x128x32xf32, #tpu.memory_space<vmem>>, vector<1x128x32xf32>
    %1 = vector.shape_cast %0 : vector<1x128x32xf32> to vector<128x32xf32>
    %cst = arith.constant dense<0.000000e+00> : vector<128x128xf32>
    %2 = tpu.matmul %1, %1, %cst {dimension_numbers = #tpu.dot_dimension_numbers<[1], [1], [0], [0], [0, 0, 1, 0], [], []>} : vector<128x32xf32>, vector<128x32xf32>, vector<128x128xf32> -> vector<128x128xf32>
    %3 = arith.mulf %1, %1 : vector<128x32xf32>
    %cst_2 = arith.constant dense<0.000000e+00> : vector<128xf32>
    %4 = vector.multi_reduction <add>, %3, %cst_2 [1] : vector<128x32xf32> to vector<128xf32>
    %5 = vector.shape_cast %4 : vector<128xf32> to vector<128x1xf32>
    %6 = tpu.transpose %5, [1, 0] : vector<128x1xf32> -> vector<1x128xf32>
    %7 = vector.broadcast %5 : vector<128x1xf32> to vector<128x128xf32>
    %8 = vector.broadcast %6 : vector<1x128xf32> to vector<128x128xf32>
    %9 = arith.addf %7, %8 : vector<128x128xf32>
    %cst_3 = arith.constant 2.000000e+00 : f32
    %10 = vector.broadcast %cst_3 : f32 to vector<128x128xf32>
    %11 = arith.mulf %10, %2 : vector<128x128xf32>
    %12 = arith.subf %9, %11 : vector<128x128xf32>
    %cst_4 = arith.constant 0.000000e+00 : f32
    %13 = vector.broadcast %cst_4 : f32 to vector<128x128xf32>
    %14 = arith.maximumf %12, %13 : vector<128x128xf32>
    %cst_5 = arith.constant dense<0xFF800000> : vector<128xf32>
    %15 = vector.multi_reduction <maximumf>, %14, %cst_5 [1] : vector<128x128xf32> to vector<128xf32>
    %16 = vector.shape_cast %15 : vector<128xf32> to vector<128x1xf32>
    %17 = math.sqrt %16 : vector<128x1xf32>
    %cst_6 = arith.constant 1.000000e-01 : f32
    %18 = vector.broadcast %cst_6 : f32 to vector<128x1xf32>
    %19 = arith.mulf %17, %18 : vector<128x1xf32>
    %cst_7 = arith.constant -1.000000e+00 : f32
    %20 = vector.broadcast %cst_7 : f32 to vector<128x1xf32>
    %21 = arith.divf %20, %19 : vector<128x1xf32>
    %22 = tpu.iota {dimensions = array<i32: 0>} : vector<128x128xi32>
    %23 = tpu.iota {dimensions = array<i32: 1>} : vector<128x128xi32>
    %24 = arith.cmpi eq, %22, %23 : vector<128x128xi32>
    %25 = math.sqrt %14 : vector<128x128xf32>
    %26 = vector.broadcast %21 : vector<128x1xf32> to vector<128x128xf32>
    %27 = arith.mulf %25, %26 : vector<128x128xf32>
    %28 = math.exp %27 : vector<128x128xf32>
    %cst_8 = arith.constant 0.000000e+00 : f32
    %29 = vector.broadcast %cst_8 : f32 to vector<128x128xf32>
    %30 = arith.select %24, %29, %28 : vector<128x128xi1>, vector<128x128xf32>
    %cst_9 = arith.constant 0.000000e+00 : f32
    %31 = vector.broadcast %cst_9 : f32 to vector<128x1xf32>
    %cst_10 = arith.constant 1.000000e+00 : f32
    %32 = vector.broadcast %cst_10 : f32 to vector<1x128xf32>
    %c0_i32 = arith.constant 0 : i32
    %33 = vector.broadcast %32 : vector<1x128xf32> to vector<128x128xf32>
    %34 = arith.mulf %30, %33 : vector<128x128xf32>
    %cst_11 = arith.constant dense<0.000000e+00> : vector<128xf32>
    %35 = vector.multi_reduction <add>, %34, %cst_11 [1] : vector<128x128xf32> to vector<128xf32>
    %36 = vector.shape_cast %35 : vector<128xf32> to vector<128x1xf32>
    %cst_12 = arith.constant 1.000000e+00 : f32
    %37 = vector.broadcast %cst_12 : f32 to vector<128x1xf32>
    %38 = arith.divf %37, %36 : vector<128x1xf32>
    %39 = vector.broadcast %38 : vector<128x1xf32> to vector<128x128xf32>
    %40 = arith.mulf %30, %39 : vector<128x128xf32>
    %cst_13 = arith.constant dense<0.000000e+00> : vector<128xf32>
    %41 = vector.multi_reduction <add>, %40, %cst_13 [0] : vector<128x128xf32> to vector<128xf32>
    %42 = vector.shape_cast %41 : vector<128xf32> to vector<1x128xf32>
    %cst_14 = arith.constant 1.000000e+00 : f32
    %43 = vector.broadcast %cst_14 : f32 to vector<1x128xf32>
    %44 = arith.divf %43, %42 : vector<1x128xf32>
    %c1_i32 = arith.constant 1 : i32
    %45 = vector.broadcast %44 : vector<1x128xf32> to vector<128x128xf32>
    %46 = arith.mulf %30, %45 : vector<128x128xf32>
    %cst_15 = arith.constant dense<0.000000e+00> : vector<128xf32>
    %47 = vector.multi_reduction <add>, %46, %cst_15 [1] : vector<128x128xf32> to vector<128xf32>
    %48 = vector.shape_cast %47 : vector<128xf32> to vector<128x1xf32>
    %cst_16 = arith.constant 1.000000e+00 : f32
    %49 = vector.broadcast %cst_16 : f32 to vector<128x1xf32>
    %50 = arith.divf %49, %48 : vector<128x1xf32>
    %51 = vector.broadcast %50 : vector<128x1xf32> to vector<128x128xf32>
    %52 = arith.mulf %30, %51 : vector<128x128xf32>
    %cst_17 = arith.constant dense<0.000000e+00> : vector<128xf32>
    %53 = vector.multi_reduction <add>, %52, %cst_17 [0] : vector<128x128xf32> to vector<128xf32>
    %54 = vector.shape_cast %53 : vector<128xf32> to vector<1x128xf32>
    %cst_18 = arith.constant 1.000000e+00 : f32
    %55 = vector.broadcast %cst_18 : f32 to vector<1x128xf32>
    %56 = arith.divf %55, %54 : vector<1x128xf32>
    %c2_i32 = arith.constant 2 : i32
    %57 = vector.broadcast %56 : vector<1x128xf32> to vector<128x128xf32>
    %58 = arith.mulf %30, %57 : vector<128x128xf32>
    %cst_19 = arith.constant dense<0.000000e+00> : vector<128xf32>
    %59 = vector.multi_reduction <add>, %58, %cst_19 [1] : vector<128x128xf32> to vector<128xf32>
    %60 = vector.shape_cast %59 : vector<128xf32> to vector<128x1xf32>
    %cst_20 = arith.constant 1.000000e+00 : f32
    %61 = vector.broadcast %cst_20 : f32 to vector<128x1xf32>
    %62 = arith.divf %61, %60 : vector<128x1xf32>
    %63 = vector.broadcast %62 : vector<128x1xf32> to vector<128x128xf32>
    %64 = arith.mulf %30, %63 : vector<128x128xf32>
    %cst_21 = arith.constant dense<0.000000e+00> : vector<128xf32>
    %65 = vector.multi_reduction <add>, %64, %cst_21 [0] : vector<128x128xf32> to vector<128xf32>
    %66 = vector.shape_cast %65 : vector<128xf32> to vector<1x128xf32>
    %cst_22 = arith.constant 1.000000e+00 : f32
    %67 = vector.broadcast %cst_22 : f32 to vector<1x128xf32>
    %68 = arith.divf %67, %66 : vector<1x128xf32>
    %c3_i32 = arith.constant 3 : i32
    %69 = vector.broadcast %68 : vector<1x128xf32> to vector<128x128xf32>
    %70 = arith.mulf %30, %69 : vector<128x128xf32>
    %cst_23 = arith.constant dense<0.000000e+00> : vector<128xf32>
    %71 = vector.multi_reduction <add>, %70, %cst_23 [1] : vector<128x128xf32> to vector<128xf32>
    %72 = vector.shape_cast %71 : vector<128xf32> to vector<128x1xf32>
    %cst_24 = arith.constant 1.000000e+00 : f32
    %73 = vector.broadcast %cst_24 : f32 to vector<128x1xf32>
    %74 = arith.divf %73, %72 : vector<128x1xf32>
    %75 = vector.broadcast %74 : vector<128x1xf32> to vector<128x128xf32>
    %76 = arith.mulf %30, %75 : vector<128x128xf32>
    %cst_25 = arith.constant dense<0.000000e+00> : vector<128xf32>
    %77 = vector.multi_reduction <add>, %76, %cst_25 [0] : vector<128x128xf32> to vector<128xf32>
    %78 = vector.shape_cast %77 : vector<128xf32> to vector<1x128xf32>
    %cst_26 = arith.constant 1.000000e+00 : f32
    %79 = vector.broadcast %cst_26 : f32 to vector<1x128xf32>
    %80 = arith.divf %79, %78 : vector<1x128xf32>
    %c4_i32 = arith.constant 4 : i32
    %81 = vector.broadcast %80 : vector<1x128xf32> to vector<128x128xf32>
    %82 = arith.mulf %30, %81 : vector<128x128xf32>
    %cst_27 = arith.constant dense<0.000000e+00> : vector<128xf32>
    %83 = vector.multi_reduction <add>, %82, %cst_27 [1] : vector<128x128xf32> to vector<128xf32>
    %84 = vector.shape_cast %83 : vector<128xf32> to vector<128x1xf32>
    %cst_28 = arith.constant 1.000000e+00 : f32
    %85 = vector.broadcast %cst_28 : f32 to vector<128x1xf32>
    %86 = arith.divf %85, %84 : vector<128x1xf32>
    %87 = vector.broadcast %86 : vector<128x1xf32> to vector<128x128xf32>
    %88 = arith.mulf %30, %87 : vector<128x128xf32>
    %cst_29 = arith.constant dense<0.000000e+00> : vector<128xf32>
    %89 = vector.multi_reduction <add>, %88, %cst_29 [0] : vector<128x128xf32> to vector<128xf32>
    %90 = vector.shape_cast %89 : vector<128xf32> to vector<1x128xf32>
    %cst_30 = arith.constant 1.000000e+00 : f32
    %91 = vector.broadcast %cst_30 : f32 to vector<1x128xf32>
    %92 = arith.divf %91, %90 : vector<1x128xf32>
    %93 = vector.broadcast %86 : vector<128x1xf32> to vector<128x128xf32>
    %94 = arith.mulf %93, %30 : vector<128x128xf32>
    %95 = vector.broadcast %92 : vector<1x128xf32> to vector<128x128xf32>
    %96 = arith.mulf %94, %95 : vector<128x128xf32>
    %cst_31 = arith.constant 1.000000e+00 : f32
    %97 = vector.broadcast %cst_31 : f32 to vector<128x128xf32>
    %98 = arith.addf %97, %96 : vector<128x128xf32>
    %99 = arith.divf %96, %98 : vector<128x128xf32>
    %100 = vector.shape_cast %99 : vector<128x128xf32> to vector<1x128x128xf32>
    %cst_32 = arith.constant dense<0xFF800000> : vector<1xf32>
    %101 = vector.multi_reduction <maximumf>, %100, %cst_32 [1, 2] : vector<1x128x128xf32> to vector<1xf32>
    %102 = vector.shape_cast %101 : vector<1xf32> to vector<1x1x1xf32>
    %103 = vector.extract %102[0, 0, 0] : f32 from vector<1x1x1xf32>
    %104 = vector.broadcast %103 : f32 to vector<1x1xf32>
    %cst_33 = arith.constant 1.000000e+00 : f32
    %105 = vector.broadcast %cst_33 : f32 to vector<1x1xf32>
    %106 = arith.divf %105, %104 : vector<1x1xf32>
    %107 = vector.broadcast %106 : vector<1x1xf32> to vector<128x128xf32>
    %108 = arith.mulf %99, %107 : vector<128x128xf32>
    %109 = tpu.iota {dimensions = array<i32: 0>} : vector<128x128xi32>
    %110 = tpu.iota {dimensions = array<i32: 1>} : vector<128x128xi32>
    %111 = arith.cmpi eq, %109, %110 : vector<128x128xi32>
    %cst_34 = arith.constant 1.000000e+00 : f32
    %112 = vector.broadcast %cst_34 : f32 to vector<128x128xf32>
    %113 = arith.select %111, %112, %108 : vector<128x128xi1>, vector<128x128xf32>
    %c0_35 = arith.constant 0 : index
    %c0_36 = arith.constant 0 : index
    %c0_37 = arith.constant 0 : index
    %114 = vector.load %arg2[%c0_35, %c0_36, %c0_37] : memref<2x128x128xf32, #tpu.memory_space<vmem>>, vector<1x128x128xf32>
    %115 = vector.shape_cast %114 : vector<1x128x128xf32> to vector<128x128xf32>
    %116 = vector.shape_cast %113 : vector<128x128xf32> to vector<1x128x128xf32>
    tpu.vector_store %arg2[%c0_35, %c0_36, %c0_37], %116 {strides = array<i32>} : memref<2x128x128xf32, #tpu.memory_space<vmem>>, vector<1x128x128xf32>,
    %c1 = arith.constant 1 : index
    %c0_38 = arith.constant 0 : index
    %c0_39 = arith.constant 0 : index
    %117 = vector.load %arg1[%c1, %c0_38, %c0_39] : memref<2x128x32xf32, #tpu.memory_space<vmem>>, vector<1x128x32xf32>
    %118 = vector.shape_cast %117 : vector<1x128x32xf32> to vector<128x32xf32>
    %cst_40 = arith.constant dense<0.000000e+00> : vector<128x128xf32>
    %119 = tpu.matmul %118, %118, %cst_40 {dimension_numbers = #tpu.dot_dimension_numbers<[1], [1], [0], [0], [0, 0, 1, 0], [], []>} : vector<128x32xf32>, vector<128x32xf32>, vector<128x128xf32> -> vector<128x128xf32>
    %120 = arith.mulf %118, %118 : vector<128x32xf32>
    %cst_41 = arith.constant dense<0.000000e+00> : vector<128xf32>
    %121 = vector.multi_reduction <add>, %120, %cst_41 [1] : vector<128x32xf32> to vector<128xf32>
    %122 = vector.shape_cast %121 : vector<128xf32> to vector<128x1xf32>
    %123 = tpu.transpose %122, [1, 0] : vector<128x1xf32> -> vector<1x128xf32>
    %124 = vector.broadcast %122 : vector<128x1xf32> to vector<128x128xf32>
    %125 = vector.broadcast %123 : vector<1x128xf32> to vector<128x128xf32>
    %126 = arith.addf %124, %125 : vector<128x128xf32>
    %cst_42 = arith.constant 2.000000e+00 : f32
    %127 = vector.broadcast %cst_42 : f32 to vector<128x128xf32>
    %128 = arith.mulf %127, %119 : vector<128x128xf32>
    %129 = arith.subf %126, %128 : vector<128x128xf32>
    %cst_43 = arith.constant 0.000000e+00 : f32
    %130 = vector.broadcast %cst_43 : f32 to vector<128x128xf32>
    %131 = arith.maximumf %129, %130 : vector<128x128xf32>
    %cst_44 = arith.constant dense<0xFF800000> : vector<128xf32>
    %132 = vector.multi_reduction <maximumf>, %131, %cst_44 [1] : vector<128x128xf32> to vector<128xf32>
    %133 = vector.shape_cast %132 : vector<128xf32> to vector<128x1xf32>
    %134 = math.sqrt %133 : vector<128x1xf32>
    %cst_45 = arith.constant 1.000000e-01 : f32
    %135 = vector.broadcast %cst_45 : f32 to vector<128x1xf32>
    %136 = arith.mulf %134, %135 : vector<128x1xf32>
    %cst_46 = arith.constant -1.000000e+00 : f32
    %137 = vector.broadcast %cst_46 : f32 to vector<128x1xf32>
    %138 = arith.divf %137, %136 : vector<128x1xf32>
    %139 = tpu.iota {dimensions = array<i32: 0>} : vector<128x128xi32>
    %140 = tpu.iota {dimensions = array<i32: 1>} : vector<128x128xi32>
    %141 = arith.cmpi eq, %139, %140 : vector<128x128xi32>
    %142 = math.sqrt %131 : vector<128x128xf32>
    %143 = vector.broadcast %138 : vector<128x1xf32> to vector<128x128xf32>
    %144 = arith.mulf %142, %143 : vector<128x128xf32>
    %145 = math.exp %144 : vector<128x128xf32>
    %cst_47 = arith.constant 0.000000e+00 : f32
    %146 = vector.broadcast %cst_47 : f32 to vector<128x128xf32>
    %147 = arith.select %141, %146, %145 : vector<128x128xi1>, vector<128x128xf32>
    %cst_48 = arith.constant 0.000000e+00 : f32
    %148 = vector.broadcast %cst_48 : f32 to vector<128x1xf32>
    %cst_49 = arith.constant 1.000000e+00 : f32
    %149 = vector.broadcast %cst_49 : f32 to vector<1x128xf32>
    %c0_i32_50 = arith.constant 0 : i32
    %150 = vector.broadcast %149 : vector<1x128xf32> to vector<128x128xf32>
    %151 = arith.mulf %147, %150 : vector<128x128xf32>
    %cst_51 = arith.constant dense<0.000000e+00> : vector<128xf32>
    %152 = vector.multi_reduction <add>, %151, %cst_51 [1] : vector<128x128xf32> to vector<128xf32>
    %153 = vector.shape_cast %152 : vector<128xf32> to vector<128x1xf32>
    %cst_52 = arith.constant 1.000000e+00 : f32
    %154 = vector.broadcast %cst_52 : f32 to vector<128x1xf32>
    %155 = arith.divf %154, %153 : vector<128x1xf32>
    %156 = vector.broadcast %155 : vector<128x1xf32> to vector<128x128xf32>
    %157 = arith.mulf %147, %156 : vector<128x128xf32>
    %cst_53 = arith.constant dense<0.000000e+00> : vector<128xf32>
    %158 = vector.multi_reduction <add>, %157, %cst_53 [0] : vector<128x128xf32> to vector<128xf32>
    %159 = vector.shape_cast %158 : vector<128xf32> to vector<1x128xf32>
    %cst_54 = arith.constant 1.000000e+00 : f32
    %160 = vector.broadcast %cst_54 : f32 to vector<1x128xf32>
    %161 = arith.divf %160, %159 : vector<1x128xf32>
    %c1_i32_55 = arith.constant 1 : i32
    %162 = vector.broadcast %161 : vector<1x128xf32> to vector<128x128xf32>
    %163 = arith.mulf %147, %162 : vector<128x128xf32>
    %cst_56 = arith.constant dense<0.000000e+00> : vector<128xf32>
    %164 = vector.multi_reduction <add>, %163, %cst_56 [1] : vector<128x128xf32> to vector<128xf32>
    %165 = vector.shape_cast %164 : vector<128xf32> to vector<128x1xf32>
    %cst_57 = arith.constant 1.000000e+00 : f32
    %166 = vector.broadcast %cst_57 : f32 to vector<128x1xf32>
    %167 = arith.divf %166, %165 : vector<128x1xf32>
    %168 = vector.broadcast %167 : vector<128x1xf32> to vector<128x128xf32>
    %169 = arith.mulf %147, %168 : vector<128x128xf32>
    %cst_58 = arith.constant dense<0.000000e+00> : vector<128xf32>
    %170 = vector.multi_reduction <add>, %169, %cst_58 [0] : vector<128x128xf32> to vector<128xf32>
    %171 = vector.shape_cast %170 : vector<128xf32> to vector<1x128xf32>
    %cst_59 = arith.constant 1.000000e+00 : f32
    %172 = vector.broadcast %cst_59 : f32 to vector<1x128xf32>
    %173 = arith.divf %172, %171 : vector<1x128xf32>
    %c2_i32_60 = arith.constant 2 : i32
    %174 = vector.broadcast %173 : vector<1x128xf32> to vector<128x128xf32>
    %175 = arith.mulf %147, %174 : vector<128x128xf32>
    %cst_61 = arith.constant dense<0.000000e+00> : vector<128xf32>
    %176 = vector.multi_reduction <add>, %175, %cst_61 [1] : vector<128x128xf32> to vector<128xf32>
    %177 = vector.shape_cast %176 : vector<128xf32> to vector<128x1xf32>
    %cst_62 = arith.constant 1.000000e+00 : f32
    %178 = vector.broadcast %cst_62 : f32 to vector<128x1xf32>
    %179 = arith.divf %178, %177 : vector<128x1xf32>
    %180 = vector.broadcast %179 : vector<128x1xf32> to vector<128x128xf32>
    %181 = arith.mulf %147, %180 : vector<128x128xf32>
    %cst_63 = arith.constant dense<0.000000e+00> : vector<128xf32>
    %182 = vector.multi_reduction <add>, %181, %cst_63 [0] : vector<128x128xf32> to vector<128xf32>
    %183 = vector.shape_cast %182 : vector<128xf32> to vector<1x128xf32>
    %cst_64 = arith.constant 1.000000e+00 : f32
    %184 = vector.broadcast %cst_64 : f32 to vector<1x128xf32>
    %185 = arith.divf %184, %183 : vector<1x128xf32>
    %c3_i32_65 = arith.constant 3 : i32
    %186 = vector.broadcast %185 : vector<1x128xf32> to vector<128x128xf32>
    %187 = arith.mulf %147, %186 : vector<128x128xf32>
    %cst_66 = arith.constant dense<0.000000e+00> : vector<128xf32>
    %188 = vector.multi_reduction <add>, %187, %cst_66 [1] : vector<128x128xf32> to vector<128xf32>
    %189 = vector.shape_cast %188 : vector<128xf32> to vector<128x1xf32>
    %cst_67 = arith.constant 1.000000e+00 : f32
    %190 = vector.broadcast %cst_67 : f32 to vector<128x1xf32>
    %191 = arith.divf %190, %189 : vector<128x1xf32>
    %192 = vector.broadcast %191 : vector<128x1xf32> to vector<128x128xf32>
    %193 = arith.mulf %147, %192 : vector<128x128xf32>
    %cst_68 = arith.constant dense<0.000000e+00> : vector<128xf32>
    %194 = vector.multi_reduction <add>, %193, %cst_68 [0] : vector<128x128xf32> to vector<128xf32>
    %195 = vector.shape_cast %194 : vector<128xf32> to vector<1x128xf32>
    %cst_69 = arith.constant 1.000000e+00 : f32
    %196 = vector.broadcast %cst_69 : f32 to vector<1x128xf32>
    %197 = arith.divf %196, %195 : vector<1x128xf32>
    %c4_i32_70 = arith.constant 4 : i32
    %198 = vector.broadcast %197 : vector<1x128xf32> to vector<128x128xf32>
    %199 = arith.mulf %147, %198 : vector<128x128xf32>
    %cst_71 = arith.constant dense<0.000000e+00> : vector<128xf32>
    %200 = vector.multi_reduction <add>, %199, %cst_71 [1] : vector<128x128xf32> to vector<128xf32>
    %201 = vector.shape_cast %200 : vector<128xf32> to vector<128x1xf32>
    %cst_72 = arith.constant 1.000000e+00 : f32
    %202 = vector.broadcast %cst_72 : f32 to vector<128x1xf32>
    %203 = arith.divf %202, %201 : vector<128x1xf32>
    %204 = vector.broadcast %203 : vector<128x1xf32> to vector<128x128xf32>
    %205 = arith.mulf %147, %204 : vector<128x128xf32>
    %cst_73 = arith.constant dense<0.000000e+00> : vector<128xf32>
    %206 = vector.multi_reduction <add>, %205, %cst_73 [0] : vector<128x128xf32> to vector<128xf32>
    %207 = vector.shape_cast %206 : vector<128xf32> to vector<1x128xf32>
    %cst_74 = arith.constant 1.000000e+00 : f32
    %208 = vector.broadcast %cst_74 : f32 to vector<1x128xf32>
    %209 = arith.divf %208, %207 : vector<1x128xf32>
    %210 = vector.broadcast %203 : vector<128x1xf32> to vector<128x128xf32>
    %211 = arith.mulf %210, %147 : vector<128x128xf32>
    %212 = vector.broadcast %209 : vector<1x128xf32> to vector<128x128xf32>
    %213 = arith.mulf %211, %212 : vector<128x128xf32>
    %cst_75 = arith.constant 1.000000e+00 : f32
    %214 = vector.broadcast %cst_75 : f32 to vector<128x128xf32>
    %215 = arith.addf %214, %213 : vector<128x128xf32>
    %216 = arith.divf %213, %215 : vector<128x128xf32>
    %217 = vector.shape_cast %216 : vector<128x128xf32> to vector<1x128x128xf32>
    %cst_76 = arith.constant dense<0xFF800000> : vector<1xf32>
    %218 = vector.multi_reduction <maximumf>, %217, %cst_76 [1, 2] : vector<1x128x128xf32> to vector<1xf32>
    %219 = vector.shape_cast %218 : vector<1xf32> to vector<1x1x1xf32>
    %220 = vector.extract %219[0, 0, 0] : f32 from vector<1x1x1xf32>
    %221 = vector.broadcast %220 : f32 to vector<1x1xf32>
    %cst_77 = arith.constant 1.000000e+00 : f32
    %222 = vector.broadcast %cst_77 : f32 to vector<1x1xf32>
    %223 = arith.divf %222, %221 : vector<1x1xf32>
    %224 = vector.broadcast %223 : vector<1x1xf32> to vector<128x128xf32>
    %225 = arith.mulf %216, %224 : vector<128x128xf32>
    %226 = tpu.iota {dimensions = array<i32: 0>} : vector<128x128xi32>
    %227 = tpu.iota {dimensions = array<i32: 1>} : vector<128x128xi32>
    %228 = arith.cmpi eq, %226, %227 : vector<128x128xi32>
    %cst_78 = arith.constant 1.000000e+00 : f32
    %229 = vector.broadcast %cst_78 : f32 to vector<128x128xf32>
    %230 = arith.select %228, %229, %225 : vector<128x128xi1>, vector<128x128xf32>
    %c1_79 = arith.constant 1 : index
    %c0_80 = arith.constant 0 : index
    %c0_81 = arith.constant 0 : index
    %231 = vector.load %arg2[%c1_79, %c0_80, %c0_81] : memref<2x128x128xf32, #tpu.memory_space<vmem>>, vector<1x128x128xf32>
    %232 = vector.shape_cast %231 : vector<1x128x128xf32> to vector<128x128xf32>
    %233 = vector.shape_cast %230 : vector<128x128xf32> to vector<1x128x128xf32>
    tpu.vector_store %arg2[%c1_79, %c0_80, %c0_81], %233 {strides = array<i32>} : memref<2x128x128xf32, #tpu.memory_space<vmem>>, vector<1x128x128xf32>,
    return
  }
  func.func @transform_0(%arg0: i32) -> (i32, i32, i32) {
    %c0_i32 = arith.constant 0 : i32
    %c0_i32_0 = arith.constant 0 : i32
    %c0_i32_1 = arith.constant 0 : i32
    return %arg0, %c0_i32, %c0_i32_0 : i32, i32, i32
  }
  func.func @transform_1(%arg0: i32) -> (i32, i32, i32) {
    %c0_i32 = arith.constant 0 : i32
    %c0_i32_0 = arith.constant 0 : i32
    %c0_i32_1 = arith.constant 0 : i32
    return %arg0, %c0_i32, %c0_i32_0 : i32, i32, i32
  }
}

</mosaic_0001>

<bundles_post_ra>
// kernel: tpu_custom_call.1
= control target key start
LH: loop header
LB: loop body
LE: loop exit
PB: predicated region body
PF: predicated region fallthrough
CT: control target
= control target key end

     0   :  { %6 = vsyncpa [#allocation3], 0  ;;  %s15560_s0 = inlined_call_operand.vmem [shape: f32[4,128,32], index: 0, kind: input, shape index: {}]   ;;  %s15561_s1 = inlined_call_operand.hbm [shape: f32[4,128,128], index: 1, kind: output, shape index: {}]  }
   0x1   :  { %8 = vsyncpa [#allocation3 + $0x1], 0  ;;  %s7308_s6 = smov 0   ;;  %s7310_s7 = smov 0  }
   0x2   :  { %s7312_s8 = smov 0   ;;  %s7314_s9 = smov 0  }
   0x3 LB: > { %s7329_s10 = sadd.s32 4294967295, %s7294_s9   ;;  %s6378_s11 = sadd.s32 4294967294, %s7294_s9   ;;  %s7294_s9 = sphi %s7314_s9, %s16600_s9   ;;  %s7290_s8 = sphi %s7312_s8, %s16599_s8   ;;  %s7286_s7 = sphi %s7310_s7, %s16598_s7   ;;  %s7282_s6 = sphi %s7308_s6, %s16597_s6  }
   0x4   : > { %s7333_s12 = sadd.s32 1, %s7294_s9   ;;  %s47_s13 = sadd.s32 1, %s7290_s8 }
   0x5   : > { %s44_s14 = ssub.s32 %s7294_s9, %s7333_s12  ;;  %p57_p0 = scmp.ne.s32.totalorder %s7290_s8, %s7286_s7 }
   0x6   : > { %p45_p1 = scmp.eq.s32.totalorder %s44_s14, 0  ;;  %p58_p2 = scmp.eq.s32.totalorder %s7329_s10, 1 }
   0x7   : > { %p63_p3 = scmp.ne.s32.totalorder %s7286_s7, %s7282_s6  ;;  %p64_p4 = scmp.eq.s32.totalorder %s6378_s11, 1 }
   0x8   : > { %s7344_s15 = scalar_select %p45_p1, %s7290_s8, %s47_s13  }
   0x9   : > { %p7346_p5 = por %p58_p2, %p57_p0  ;;  %p7350_p6 = por %p64_p4, %p63_p3 }
   0xa   : > { %p6381_p7 = scmp.ge.s32.totalorder %s7294_s9, 1  ;;  %p92_p8 = scmp.lt.s32.totalorder %s7294_s9, 3 }
   0xc   : > { %p93_p9 = pnand %p6381_p7, %p92_p8 }
   0xe   : > { %96 = sbr.rel (%p93_p9) target bundleno = 2405 (0x965), region = 24 }
  0x13   : > { %s6383_s18 = sshll.u32 %s7329_s10, 1  ;;  %vm137_vm0 = vcmask 261120   ;;  %s110_s25 = sand.u32 1, %s7286_s7  }
  0x14   : > { %p114_p10 = scmp.lt.s32.totalorder %s6383_s18, 3  ;;  %s6382_s26 = sshll.u32 %s110_s25, 8 }
  0x15   : > { %s15377_s27 = scalar_lea.vmem [#allocation2], %s6382_s26  ;;  %s6490_s28 = sshll.u32 %s7329_s10, 8 }
  0x16   : > { %s16602_s18 = smov (!%p114_p10, %s6383_s18), 3  ;;  %s6312_s2 = scalar_lea.hbm %s15561_s1, %s6490_s28 }
  0x17   : > { %s6488_s19 = sshll.u32 %s16602_s18, 7  ;;  %s6313_s3 = sshll.u32 %s15377_s27, 4  ;;  %s6314_s3 = int_to_ptr.vmem [resolvable:$true] %s6313_s3 }
  0x18   : > { %s7360_s22 = scalar_lea.vmem %s15560_s0, %s6488_s19  ;;  %s6315_s4 = sshll.u32 %s6312_s2, 4  ;;  %s6316_s4 = int_to_ptr.hbm [resolvable:$true] %s6315_s4 }
  0x19   : > { %v7363_v0 = vld [vmem:[%s7360_s22] sm:$0xff]  ;;  %v7366_v1 = vld [vmem:[%s7360_s22 + $0x10] sm:$0xff]  ;;  %v7369_v2 = vld [vmem:[%s7360_s22 + $0x8] sm:$0xff]  ;;  %s6300_s5 = scalar_lea.sflag [#allocation3], %s110_s25  ;;  %s7246_s10 = sshra.s32 %s6316_s4, 4  ;;  %s7247_s10 = int_to_ptr.hbm [resolvable:$true] %s7246_s10 }
  0x1a   : > { %v251_v3 = vmul.f32 %v7363_v0, %v7363_v0  ;;  %v253_v4 = vmul.f32 %v7366_v1, %v7366_v1  ;;  %v252_v5 = vmul.f32 %v7369_v2, %v7369_v2  ;;  %v7378_v6 = vld [vmem:[%s7360_s22 + $0x80] sm:$0xff]  ;;  %v7381_v7 = vld [vmem:[%s7360_s22 + $0x90] sm:$0xff]  ;;  %v7384_v8 = vld [vmem:[%s7360_s22 + $0x78] sm:$0xff]  ;;  %s7248_s11 = scalar_lea.hbm %s7247_s10, 256  ;;  %s7252_s18 = scalar_lea.hbm %s15561_s1, 512 }
  0x1b   : > { %v7390_v12 = vld [vmem:[%s7360_s22 + $0x88] sm:$0xff]  ;;  %6491 = vmatpush.xpose.msk.msra.mxu2 %vm137_vm0, %v7384_v8  ;;  %6386 = vmatpush.xpose.msk.msra.mxu0 %vm137_vm0, %v7384_v8  ;;  %v7397_v13 = vld [vmem:[%s7360_s22 + $0x70] sm:$0xff]  ;;  %v3357_v14 = vmul.f32 %v7378_v6, %v7378_v6  ;;  %v3359_v15 = vmul.f32 %v7381_v7, %v7381_v7  ;;  %v7406_v17 = vld [vmem:[%s7360_s22 + $0xf8] sm:$0xff]  ;;  %p7249_p11 = scmp.ne.s32.totalorder %s7247_s10, %s7248_s11  ;;  %p7253_p0 = scmp.lt.s32.totalorder %s7247_s10, %s15561_s1 }
  0x1c   : > { %v267_v9 = vsel %vm137_vm0, %v251_v3, 0.0  ;;  %v273_v10 = vsel %vm137_vm0, %v253_v4, 0.0  ;;  %v270_v11 = vsel %vm137_vm0, %v252_v5, 0.0  ;;  %v3358_v16 = vmul.f32 %v7390_v12, %v7390_v12  ;;  %v7413_v18 = vld [vmem:[%s7360_s22 + $0x68] sm:$0xff]  ;;  %6507 = vmatpush.xpose.msk.msra.mxu3 %vm137_vm0, %v7406_v17  ;;  %6434 = vmatpush.xpose.msk.msra.mxu1 %vm137_vm0, %v7406_v17  ;;  %v7423_v22 = vld [vmem:[%s7360_s22 + $0x20] sm:$0xff]  ;;  %v7426_v23 = vld [vmem:[%s7360_s22 + $0x18] sm:$0xff]  ;;  %p7254_p1 = scmp.lt.s32.totalorder %s7252_s18, %s7248_s11 }
  0x1d   : > { %268 = vadd.xlane.f32.xlu0 %v267_v9  ;;  %274 = vadd.xlane.f32.xlu2 %v273_v10  ;;  %v3373_v19 = vsel %vm137_vm0, %v3357_v14, 0.0  ;;  %v3379_v20 = vsel %vm137_vm0, %v3359_v15, 0.0  ;;  %v7431_v24 = vld [vmem:[%s7360_s22 + $0x98] sm:$0xff]  ;;  %v7436_v25 = vld [vmem:[%s7360_s22 + $0x60] sm:$0xff]  ;;  %v7439_v26 = vld [vmem:[%s7360_s22 + $0xf0] sm:$0xff]  ;;  %v255_v27 = vmul.f32 %v7423_v22, %v7423_v22  ;;  %v254_v28 = vmul.f32 %v7426_v23, %v7426_v23  ;;  %p7250_p12 = pnand %p7249_p11, %p7346_p5 }
  0x1e   : > { %271 = vadd.xlane.f32.xlu1 %v270_v11  ;;  %v3376_v21 = vsel %vm137_vm0, %v3358_v16, 0.0  ;;  %v3360_v29 = vmul.f32 %v7431_v24, %v7431_v24  ;;  %v7450_v30 = vld [vmem:[%s7360_s22 + $0xe8] sm:$0xff]  ;;  %v7459_v31 = vld [vmem:[%s7360_s22 + $0x58] sm:$0xff]  ;;  %v7469_v35 = vld [vmem:[%s7360_s22 + $0xa0] sm:$0xff]  ;;  %p7255_p2 = por %p7254_p1, %p7253_p0 }
  0x1f   : > { %6492 = vmatpush.xpose.msk.msra.mxu2 %vm137_vm0, %v7397_v13  ;;  %6387 = vmatpush.xpose.msk.msra.mxu0 %vm137_vm0, %v7397_v13  ;;  %v279_v32 = vsel %vm137_vm0, %v255_v27, 0.0  ;;  %v276_v33 = vsel %vm137_vm0, %v254_v28, 0.0  ;;  %v7466_v34 = vld [vmem:[%s7360_s22 + $0xa8] sm:$0xff]  ;;  %v7482_v38 = vld [vmem:[%s7360_s22 + $0x50] sm:$0xff]  ;;  %v7485_v39 = vld [vmem:[%s7360_s22 + $0xe0] sm:$0xff]  ;;  %v3361_v41 = vmul.f32 %v7469_v35, %v7469_v35  ;;  %v262_v27 = vmul.f32 %v7459_v31, %v7459_v31  ;;  %p7251_p13 = pneg %p7250_p12 }
  0x20   : > { %6508 = vmatpush.xpose.msk.msra.mxu3 %vm137_vm0, %v7439_v26  ;;  %6435 = vmatpush.xpose.msk.msra.mxu1 %vm137_vm0, %v7439_v26  ;;  %v3382_v36 = vsel %vm137_vm0, %v3360_v29, 0.0  ;;  %v7477_v37 = vld [vmem:[%s7360_s22 + $0x28] sm:$0xff]  ;;  %v3362_v40 = vmul.f32 %v7466_v34, %v7466_v34  ;;  %v7496_v43 = vld [vmem:[%s7360_s22 + $0xd8] sm:$0xff]  ;;  %v7515_v48 = vld [vmem:[%s7360_s22 + $0x30] sm:$0xff]  ;;  %v261_v10 = vmul.f32 %v7482_v38, %v7482_v38 }
  0x21   : > { %v256_v42 = vmul.f32 %v7477_v37, %v7477_v37  ;;  %v7505_v44 = vld [vmem:[%s7360_s22 + $0x48] sm:$0xff]  ;;  %v3385_v46 = vsel %vm137_vm0, %v3361_v41, 0.0  ;;  %v7512_v47 = vld [vmem:[%s7360_s22 + $0x38] sm:$0xff]  ;;  %v7525_v50 = vld [vmem:[%s7360_s22 + $0xb0] sm:$0xff]  ;;  %v257_v54 = vmul.f32 %v7515_v48, %v7515_v48  ;;  %p7256_p3 = pnand %p7255_p2, %p7251_p13 }
  0x22   : > { %v3388_v45 = vsel %vm137_vm0, %v3362_v40, 0.0  ;;  %v7528_v51 = vld [vmem:[%s7360_s22 + $0x40] sm:$0xff]  ;;  %v7531_v52 = vld [vmem:[%s7360_s22 + $0xd0] sm:$0xff]  ;;  %v258_v53 = vmul.f32 %v7512_v47, %v7512_v47  ;;  %v3363_v55 = vmul.f32 %v7525_v50, %v7525_v50  ;;  %v7542_v56 = vld [vmem:[%s7360_s22 + $0xc8] sm:$0xff]  ;;  %v260_v11 = vmul.f32 %v7505_v44, %v7505_v44 }
  0x23   : > { %6493 = vmatpush.xpose.msk.msra.mxu2 %vm137_vm0, %v7413_v18  ;;  %6388 = vmatpush.xpose.msk.msra.mxu0 %vm137_vm0, %v7413_v18  ;;  %v282_v49 = vsel %vm137_vm0, %v256_v42, 0.0  ;;  %v285_v58 = vsel %vm137_vm0, %v257_v54, 0.0  ;;  %v7555_v59 = vld [vmem:[%s7360_s22 + $0xc0] sm:$0xff]  ;;  %v7558_v60 = vld [vmem:[%s7360_s22 + $0xb8] sm:$0xff]  ;;  %v259_v3 = vmul.f32 %v7528_v51, %v7528_v51  ;;  %v3366_v14 = vmul.f32 %v7542_v56, %v7542_v56 }
  0x24   : > { %6509 = vmatpush.xpose.msk.msra.mxu3 %vm137_vm0, %v7450_v30  ;;  %6436 = vmatpush.xpose.msk.msra.mxu1 %vm137_vm0, %v7450_v30  ;;  %v288_v57 = vsel %vm137_vm0, %v258_v53, 0.0  ;;  %v3391_v61 = vsel %vm137_vm0, %v3363_v55, 0.0  ;;  %v3365_v62 = vmul.f32 %v7555_v59, %v7555_v59  ;;  %v3364_v63 = vmul.f32 %v7558_v60, %v7558_v60 }
  0x25   : > { %3374 = vadd.xlane.f32.xlu0 %v3373_v19  ;;  %3380 = vadd.xlane.f32.xlu2 %v3379_v20  ;;  %v291_v9 = vsel %vm137_vm0, %v259_v3, 0.0  ;;  %v297_v15 = vsel %vm137_vm0, %v261_v10, 0.0  ;;  %v294_v16 = vsel %vm137_vm0, %v260_v11, 0.0  ;;  %v3400_v19 = vsel %vm137_vm0, %v3366_v14, 0.0 }
  0x26   : > { %3377 = vadd.xlane.f32.xlu1 %v3376_v21  ;;  %v3397_v4 = vsel %vm137_vm0, %v3365_v62, 0.0  ;;  %v3394_v5 = vsel %vm137_vm0, %v3364_v63, 0.0  ;;  %v3368_v20 = vmul.f32 %v7496_v43, %v7496_v43  ;;  %v3367_v21 = vmul.f32 %v7531_v52, %v7531_v52 }
  0x27   : > { %6494 = vmatpush.xpose.msk.msra.mxu2 %vm137_vm0, %v7436_v25  ;;  %6389 = vmatpush.xpose.msk.msra.mxu0 %vm137_vm0, %v7436_v25  ;;  %v3369_v40 = vmul.f32 %v7485_v39, %v7485_v39  ;;  %v266_v55 = vmul.f32 %v7384_v8, %v7384_v8 }
  0x28   : > { %6510 = vmatpush.xpose.msk.msra.mxu3 %vm137_vm0, %v7485_v39  ;;  %6437 = vmatpush.xpose.msk.msra.mxu1 %vm137_vm0, %v7485_v39  ;;  %v3406_v28 = vsel %vm137_vm0, %v3368_v20, 0.0  ;;  %v3403_v29 = vsel %vm137_vm0, %v3367_v21, 0.0 }
  0x2b   : > { %6495 = vmatpush.xpose.msk.msra.mxu2 %vm137_vm0, %v7459_v31  ;;  %6390 = vmatpush.xpose.msk.msra.mxu0 %vm137_vm0, %v7459_v31 }
  0x2c   : > { %6511 = vmatpush.xpose.msk.msra.mxu3 %vm137_vm0, %v7496_v43  ;;  %6438 = vmatpush.xpose.msk.msra.mxu1 %vm137_vm0, %v7496_v43 }
  0x2d   : > { %280 = vadd.xlane.f32.xlu2 %v279_v32  ;;  %277 = vadd.xlane.f32.xlu0 %v276_v33  ;;  %v300_v32 = vsel %vm137_vm0, %v262_v27, 0.0  ;;  %v264_v33 = vmul.f32 %v7413_v18, %v7413_v18 }
  0x2e   : > { %3383 = vadd.xlane.f32.xlu1 %v3382_v36  ;;  %v263_v36 = vmul.f32 %v7436_v25, %v7436_v25 }
  0x2f   : > { %6496 = vmatpush.xpose.msk.msra.mxu2 %vm137_vm0, %v7482_v38  ;;  %6391 = vmatpush.xpose.msk.msra.mxu0 %vm137_vm0, %v7482_v38  ;;  %v306_v41 = vsel %vm137_vm0, %v264_v33, 0.0 }
  0x30   : > { %6512 = vmatpush.xpose.msk.msra.mxu3 %vm137_vm0, %v7531_v52  ;;  %6439 = vmatpush.xpose.msk.msra.mxu1 %vm137_vm0, %v7531_v52  ;;  %v303_v42 = vsel %vm137_vm0, %v263_v36, 0.0 }
  0x33   : > { %6497 = vmatpush.xpose.msk.msra.mxu2 %vm137_vm0, %v7505_v44  ;;  %6392 = vmatpush.xpose.msk.msra.mxu0 %vm137_vm0, %v7505_v44 }
  0x34   : > { %6513 = vmatpush.xpose.msk.msra.mxu3 %vm137_vm0, %v7542_v56  ;;  %6440 = vmatpush.xpose.msk.msra.mxu1 %vm137_vm0, %v7542_v56 }
  0x35   : > { %3389 = vadd.xlane.f32.xlu2 %v3388_v45  ;;  %3386 = vadd.xlane.f32.xlu0 %v3385_v46  ;;  %v3409_v45 = vsel %vm137_vm0, %v3369_v40, 0.0  ;;  %v3371_v46 = vmul.f32 %v7439_v26, %v7439_v26 }
  0x36   : > { %283 = vadd.xlane.f32.xlu1 %v282_v49  ;;  %v3370_v49 = vmul.f32 %v7450_v30, %v7450_v30 }
  0x37   : > { %6498 = vmatpush.xpose.msk.msra.mxu2 %vm137_vm0, %v7528_v51  ;;  %6393 = vmatpush.xpose.msk.msra.mxu0 %vm137_vm0, %v7528_v51 }
  0x38   : > { %6514 = vmatpush.xpose.msk.msra.mxu3 %vm137_vm0, %v7555_v59  ;;  %6441 = vmatpush.xpose.msk.msra.mxu1 %vm137_vm0, %v7555_v59  ;;  %v3412_v53 = vsel %vm137_vm0, %v3370_v49, 0.0 }
  0x3b   : > { %6499 = vmatpush.xpose.msk.msra.mxu2 %vm137_vm0, %v7512_v47  ;;  %6394 = vmatpush.xpose.msk.msra.mxu0 %vm137_vm0, %v7512_v47 }
  0x3c   : > { %6515 = vmatpush.xpose.msk.msra.mxu3 %vm137_vm0, %v7558_v60  ;;  %6442 = vmatpush.xpose.msk.msra.mxu1 %vm137_vm0, %v7558_v60 }
  0x3d   : > { %289 = vadd.xlane.f32.xlu2 %v288_v57  ;;  %286 = vadd.xlane.f32.xlu0 %v285_v58  ;;  %v312_v57 = vsel %vm137_vm0, %v266_v55, 0.0 }
  0x3e   : > { %3392 = vadd.xlane.f32.xlu1 %v3391_v61 }
  0x3f   : > { %6500 = vmatpush.xpose.msk.msra.mxu2 %vm137_vm0, %v7515_v48  ;;  %6395 = vmatpush.xpose.msk.msra.mxu0 %vm137_vm0, %v7515_v48 }
  0x40   : > { %6516 = vmatpush.xpose.msk.msra.mxu3 %vm137_vm0, %v7525_v50  ;;  %6443 = vmatpush.xpose.msk.msra.mxu1 %vm137_vm0, %v7525_v50 }
  0x43   : > { %6501 = vmatpush.xpose.msk.msra.mxu2 %vm137_vm0, %v7477_v37  ;;  %6396 = vmatpush.xpose.msk.msra.mxu0 %vm137_vm0, %v7477_v37 }
  0x44   : > { %6517 = vmatpush.xpose.msk.msra.mxu3 %vm137_vm0, %v7466_v34  ;;  %6444 = vmatpush.xpose.msk.msra.mxu1 %vm137_vm0, %v7466_v34 }
  0x45   : > { %3398 = vadd.xlane.f32.xlu2 %v3397_v4  ;;  %3395 = vadd.xlane.f32.xlu0 %v3394_v5 }
  0x46   : > { %292 = vadd.xlane.f32.xlu1 %v291_v9 }
  0x47   : > { %6502 = vmatpush.xpose.msk.msra.mxu2 %vm137_vm0, %v7423_v22  ;;  %6397 = vmatpush.xpose.msk.msra.mxu0 %vm137_vm0, %v7423_v22 }
  0x48   : > { %6518 = vmatpush.xpose.msk.msra.mxu3 %vm137_vm0, %v7469_v35  ;;  %6445 = vmatpush.xpose.msk.msra.mxu1 %vm137_vm0, %v7469_v35 }
  0x4b   : > { %6503 = vmatpush.xpose.msk.msra.mxu2 %vm137_vm0, %v7426_v23  ;;  %6398 = vmatpush.xpose.msk.msra.mxu0 %vm137_vm0, %v7426_v23 }
  0x4c   : > { %6519 = vmatpush.xpose.msk.msra.mxu3 %vm137_vm0, %v7431_v24  ;;  %6446 = vmatpush.xpose.msk.msra.mxu1 %vm137_vm0, %v7431_v24 }
  0x4d   : > { %298 = vadd.xlane.f32.xlu2 %v297_v15  ;;  %295 = vadd.xlane.f32.xlu0 %v294_v16 }
  0x4e   : > { %3401 = vadd.xlane.f32.xlu1 %v3400_v19 }
  0x4f   : > { %6504 = vmatpush.xpose.msk.msra.mxu2 %vm137_vm0, %v7366_v1  ;;  %6399 = vmatpush.xpose.msk.msra.mxu0 %vm137_vm0, %v7366_v1 }
  0x50   : > { %6520 = vmatpush.xpose.msk.msra.mxu3 %vm137_vm0, %v7381_v7  ;;  %6447 = vmatpush.xpose.msk.msra.mxu1 %vm137_vm0, %v7381_v7 }
  0x53   : > { %6505 = vmatpush.xpose.msk.msra.mxu2 %vm137_vm0, %v7369_v2  ;;  %6400 = vmatpush.xpose.msk.msra.mxu0 %vm137_vm0, %v7369_v2 }
  0x54   : > { %6521 = vmatpush.xpose.msk.msra.mxu3 %vm137_vm0, %v7390_v12  ;;  %6448 = vmatpush.xpose.msk.msra.mxu1 %vm137_vm0, %v7390_v12 }
  0x55   : > { %3407 = vadd.xlane.f32.xlu2 %v3406_v28  ;;  %3404 = vadd.xlane.f32.xlu0 %v3403_v29 }
  0x56   : > { %301 = vadd.xlane.f32.xlu1 %v300_v32 }
  0x57   : > { %6506 = vmatpush.xpose.msk.msra.mxu2 %vm137_vm0, %v7363_v0  ;;  %6401 = vmatpush.xpose.msk.msra.mxu0 %vm137_vm0, %v7363_v0 }
  0x58   : > { %6522 = vmatpush.xpose.msk.msra.mxu3 %vm137_vm0, %v7378_v6  ;;  %6449 = vmatpush.xpose.msk.msra.mxu1 %vm137_vm0, %v7378_v6 }
  0x5a   : > { %6410 = vmatmul.msk.f32.vlgmr.msra.gmra.mxu2 %vm137_vm0, %v7528_v51  ;;  %6402 = vmatmul.msk.f32.vlgmr.msra.gmra.mxu0 %vm137_vm0, %v7363_v0  ;;  %v265_v0 = vmul.f32 %v7397_v13, %v7397_v13  ;;  %v3415_v51 = vsel %vm137_vm0, %v3371_v46, 0.0 }
  0x5b   : > { %6458 = vmatmul.msk.f32.vlgmr.msra.gmra.mxu3 %vm137_vm0, %v7555_v59  ;;  %6450 = vmatmul.msk.f32.vlgmr.msra.gmra.mxu1 %vm137_vm0, %v7378_v6 }
  0x5c   : > { %v309_v54 = vsel %vm137_vm0, %v265_v0, 0.0 }
  0x5d   : > { %307 = vadd.xlane.f32.xlu2 %v306_v41  ;;  %304 = vadd.xlane.f32.xlu0 %v303_v42 }
  0x5e   : > { %3410 = vadd.xlane.f32.xlu1 %v3409_v45 }
  0x62   : > { %6411 = vmatmul.msk.f32.gmra.mxu2 %vm137_vm0, %v7505_v44  ;;  %6403 = vmatmul.msk.f32.gmra.mxu0 %vm137_vm0, %v7369_v2 }
  0x63   : > { %6459 = vmatmul.msk.f32.gmra.mxu3 %vm137_vm0, %v7542_v56  ;;  %6451 = vmatmul.msk.f32.gmra.mxu1 %vm137_vm0, %v7390_v12 }
  0x65   : > { %3416 = vadd.xlane.f32.xlu2 %v3415_v51  ;;  %3413 = vadd.xlane.f32.xlu0 %v3412_v53 }
  0x66   : > { %310 = vadd.xlane.f32.xlu1 %v309_v54 }
  0x6a   : > { %6412 = vmatmul.msk.f32.gmra.mxu2 %vm137_vm0, %v7482_v38  ;;  %6404 = vmatmul.msk.f32.gmra.mxu0 %vm137_vm0, %v7366_v1  ;;  %v3372_v1 = vmul.f32 %v7406_v17, %v7406_v17 }
  0x6b   : > { %6460 = vmatmul.msk.f32.gmra.mxu3 %vm137_vm0, %v7531_v52  ;;  %6452 = vmatmul.msk.f32.gmra.mxu1 %vm137_vm0, %v7381_v7 }
  0x6c   : > { %v3418_v2 = vsel %vm137_vm0, %v3372_v1, 0.0 }
  0x6d   : > { %313 = vadd.xlane.f32.xlu0 %v312_v57 }
  0x6e   : > { %3419 = vadd.xlane.f32.xlu1 %v3418_v2 }
  0x72   : > { %6413 = vmatmul.msk.f32.gmra.mxu2 %vm137_vm0, %v7459_v31  ;;  %6405 = vmatmul.msk.f32.gmra.mxu0 %vm137_vm0, %v7426_v23 }
  0x73   : > { %6461 = vmatmul.msk.f32.gmra.mxu3 %vm137_vm0, %v7496_v43  ;;  %6453 = vmatmul.msk.f32.gmra.mxu1 %vm137_vm0, %v7431_v24 }
  0x7a   : > { %6414 = vmatmul.msk.f32.gmra.mxu2 %vm137_vm0, %v7436_v25  ;;  %6406 = vmatmul.msk.f32.gmra.mxu0 %vm137_vm0, %v7423_v22 }
  0x7b   : > { %6462 = vmatmul.msk.f32.gmra.mxu3 %vm137_vm0, %v7485_v39  ;;  %6454 = vmatmul.msk.f32.gmra.mxu1 %vm137_vm0, %v7469_v35 }
  0x82   : > { %6415 = vmatmul.msk.f32.gmra.mxu2 %vm137_vm0, %v7413_v18  ;;  %6407 = vmatmul.msk.f32.gmra.mxu0 %vm137_vm0, %v7477_v37 }
  0x83   : > { %6463 = vmatmul.msk.f32.gmra.mxu3 %vm137_vm0, %v7450_v30  ;;  %6455 = vmatmul.msk.f32.gmra.mxu1 %vm137_vm0, %v7466_v34 }
  0x8a   : > { %6416 = vmatmul.msk.f32.gmra.mxu2 %vm137_vm0, %v7397_v13  ;;  %6408 = vmatmul.msk.f32.gmra.mxu0 %vm137_vm0, %v7515_v48 }
  0x8b   : > { %6464 = vmatmul.msk.f32.gmra.mxu3 %vm137_vm0, %v7439_v26  ;;  %6456 = vmatmul.msk.f32.gmra.mxu1 %vm137_vm0, %v7525_v50 }
  0x90   : > { %v7734_v6 = vpop.xlane.xlu0 %268  ;;  %v7753_v13 = vpop.xlane.xlu2 %274 }
  0x91   : > { %315 = vxpose.xlu2.b32.start [1/16] (narrow) %v7734_v6, 8  ;;  %v7743_v7 = vpop.xlane.xlu1 %271 }
  0x92   : > { %6417 = vmatmul.msk.f32.gmra.mxu2 %vm137_vm0, %v7384_v8  ;;  %6409 = vmatmul.msk.f32.gmra.mxu0 %vm137_vm0, %v7512_v47 }
  0x93   : > { %6465 = vmatmul.msk.f32.gmra.mxu3 %vm137_vm0, %v7406_v17  ;;  %6457 = vmatmul.msk.f32.gmra.mxu1 %vm137_vm0, %v7558_v60 }
  0x98   : > { %v7747_v12 = vpop.xlane.xlu0 %3374  ;;  %v7761_v18 = vpop.xlane.xlu2 %3380 }
  0x99   : > { %316 = vxpose.xlu2.b32.cont [2/16] (narrow) %v7743_v7, 8  ;;  %3421 = vxpose.xlu0.b32.start [1/16] (narrow) %v7747_v12, 8  ;;  %v7757_v8 = vpop.xlane.xlu1 %3377 }
  0xa0   : > { %v7763_v22 = vpop.xlane.xlu0 %277  ;;  %v7769_v23 = vpop.xlane.xlu2 %280 }
  0xa1   : > { %317 = vxpose.xlu2.b32.cont [3/16] (narrow) %v7753_v13, 8  ;;  %3422 = vxpose.xlu0.b32.cont [2/16] (narrow) %v7757_v8, 8  ;;  %v7767_v17 = vpop.xlane.xlu1 %3383 }
  0xa8   : > { %v7773_v24 = vpop.xlane.xlu0 %3386  ;;  %v7779_v26 = vpop.xlane.xlu2 %3389 }
  0xa9   : > { %3423 = vxpose.xlu0.b32.cont [3/16] (narrow) %v7761_v18, 8  ;;  %318 = vxpose.xlu2.b32.cont [4/16] (narrow) %v7763_v22, 8  ;;  %v7775_v25 = vpop.xlane.xlu1 %283 }
  0xb0   : > { %v7781_v30 = vpop.xlane.xlu0 %286  ;;  %v7787_v34 = vpop.xlane.xlu2 %289 }
  0xb1   : > { %3424 = vxpose.xlu0.b32.cont [4/16] (narrow) %v7767_v17, 8  ;;  %319 = vxpose.xlu2.b32.cont [5/16] (narrow) %v7769_v23, 8  ;;  %v7785_v31 = vpop.xlane.xlu1 %3392 }
  0xb8   : > { %v7791_v35 = vpop.xlane.xlu0 %3395  ;;  %v7794_v38 = vpop.xlane.xlu2 %3398 }
  0xb9   : > { %320 = vxpose.xlu2.b32.cont [6/16] (narrow) %v7775_v25, 8  ;;  %3425 = vxpose.xlu0.b32.cont [5/16] (narrow) %v7773_v24, 8  ;;  %v293_v37 = vpop.xlane.xlu1 %292 }
  0xc0   : > { %v296_v39 = vpop.xlane.xlu0 %295  ;;  %v7799_v44 = vpop.xlane.xlu2 %298 }
  0xc1   : > { %3426 = vxpose.xlu0.b32.cont [6/16] (narrow) %v7779_v26, 8  ;;  %321 = vxpose.xlu2.b32.cont [7/16] (narrow) %v7781_v30, 8  ;;  %v7797_v43 = vpop.xlane.xlu1 %3401 }
  0xc8   : > { %v7803_v47 = vpop.xlane.xlu0 %3404  ;;  %v7809_v50 = vpop.xlane.xlu2 %3407 }
  0xc9   : > { %3427 = vxpose.xlu0.b32.cont [7/16] (narrow) %v7785_v31, 8  ;;  %322 = vxpose.xlu2.b32.cont [8/16] (narrow) %v7787_v34, 8  ;;  %v7805_v48 = vpop.xlane.xlu1 %301 }
  0xd0   : > { %v7811_v52 = vpop.xlane.xlu0 %304  ;;  %v7817_v58 = vpop.xlane.xlu2 %307 }
  0xd1   : > { %323 = vxpose.xlu2.b32.cont [9/16] (narrow) %v293_v37, 8  ;;  %3428 = vxpose.xlu0.b32.cont [8/16] (narrow) %v7791_v35, 8  ;;  %v7815_v56 = vpop.xlane.xlu1 %3410 }
  0xd7   : > { %v203_v3 = vpop.f32.mrf.mxu0 }
  0xd8   : > { %v7821_v59 = vpop.xlane.xlu0 %3413  ;;  %v7827_v61 = vpop.xlane.xlu2 %3416  ;;  %v364_v9 = vmul.f32 2.0, %v203_v3 }
  0xd9   : > { %3429 = vxpose.xlu0.b32.cont [9/16] (narrow) %v7794_v38, 8  ;;  %324 = vxpose.xlu2.b32.cont [10/16] (narrow) %v296_v39, 8  ;;  %v7823_v60 = vpop.xlane.xlu1 %310  ;;  %v3309_v41 = vpop.f32.mrf.mxu1 }
  0xda   : > { %v3470_v49 = vmul.f32 2.0, %v3309_v41 }
  0xdd   : > { %v227_v4 = vpop.f32.mrf.mxu2 }
  0xde   : > { %v7844_v21 = vmul.f32 2.0, %v227_v4 }
  0xdf   : > { %v206_v15 = vpop.f32.mrf.mxu0 }
  0xe0   : > { %v7829_v62 = vpop.xlane.xlu0 %313  ;;  %v365_v16 = vmul.f32 2.0, %v206_v15 }
  0xe1   : > { %3430 = vxpose.xlu0.b32.cont [10/16] (narrow) %v7797_v43, 8  ;;  %325 = vxpose.xlu2.b32.cont [11/16] (narrow) %v7799_v44, 8  ;;  %v7833_v63 = vpop.xlane.xlu1 %3419  ;;  %v3312_v54 = vpop.f32.mrf.mxu1 }
  0xe2   : > { %v3471_v55 = vmul.f32 2.0, %v3312_v54 }
  0xe5   : > { %v230_v27 = vpop.f32.mrf.mxu2 }
  0xe6   : > { %v7847_v28 = vmul.f32 2.0, %v230_v27 }
  0xe7   : > { %v209_v45 = vpop.f32.mrf.mxu0 }
  0xe9   : > { %326 = vxpose.xlu2.b32.cont [12/16] (narrow) %v7805_v48, 8  ;;  %3431 = vxpose.xlu0.b32.cont [11/16] (narrow) %v7803_v47, 8  ;;  %v3315_v4 = vpop.f32.mrf.mxu1 }
  0xef   : > { %v212_v2 = vpop.f32.mrf.mxu0 }
  0xf1   : > { %3432 = vxpose.xlu0.b32.cont [12/16] (narrow) %v7809_v50, 8  ;;  %327 = vxpose.xlu2.b32.cont [13/16] (narrow) %v7811_v52, 8 }
  0xf9   : > { %3433 = vxpose.xlu0.b32.cont [13/16] (narrow) %v7815_v56, 8  ;;  %328 = vxpose.xlu2.b32.cont [14/16] (narrow) %v7817_v58, 8 }
 0x101   : > { %329 = vxpose.xlu2.b32.cont [15/16] (narrow) %v7823_v60, 8  ;;  %3434 = vxpose.xlu0.b32.cont [14/16] (narrow) %v7821_v59, 8 }
 0x109   : > { %3435 = vxpose.xlu0.b32.cont [15/16] (narrow) %v7827_v61, 8  ;;  %330 = vxpose.xlu2.b32.end [16/16] (narrow) %v7829_v62, 8 }
 0x111   : > { %3436 = vxpose.xlu0.b32.end [16/16] (narrow) %v7833_v63, 8 }
 0x12a   : > { %v331_v5 = vpop.trf.xlu2 }
 0x12b   : > { %v7836_v10 = vperm.slane %v331_v5, 0  ;;  %v215_v5 = vpop.f32.mrf.mxu0 }
 0x12d   : > { %v348_v11 = vadd.f32 %v7836_v10, %v7734_v6  ;;  %v349_v20 = vadd.f32 %v7836_v10, %v7743_v7  ;;  %v7850_v32 = vadd.f32 %v7836_v10, %v293_v37  ;;  %v7853_v33 = vadd.f32 %v7836_v10, %v296_v39  ;;  %v7871_v7 = vpop.f32.mrf.mxu3  ;;  %v233_v39 = vpop.f32.mrf.mxu2 }
 0x12e   : > { %v366_v37 = vmul.f32 2.0, %v209_v45  ;;  %v351_v45 = vadd.f32 %v7836_v10, %v7763_v22 }
 0x12f   : > { %v380_v14 = vsub.f32 %v348_v11, %v364_v9  ;;  %v381_v29 = vsub.f32 %v349_v20, %v365_v16  ;;  %v388_v36 = vsub.f32 %v7850_v32, %v7844_v21  ;;  %v3318_v20 = vpop.f32.mrf.mxu1 }
 0x130   : > { %v3473_v54 = vmul.f32 2.0, %v3318_v20 }
 0x131   : > { %v7840_v19 = vmax.f32 %v380_v14, 0.0  ;;  %v7859_v42 = vmax.f32 %v381_v29, 0.0 }
 0x133   : > { %412 = vmax.xlane.f32.xlu1 %v7840_v19  ;;  %v218_v29 = vpop.f32.mrf.mxu0  ;;  %vm934_vm7 = vcmp.eq.f32.partialorder %v7840_v19, inf  ;;  %vm936_vm11 = vcmp.eq.f32.partialorder %v7840_v19, 0.0  ;;  %vm946_vm13 = vcmp.eq.f32.partialorder %v7859_v42, inf  ;;  %vm948_vm14 = vcmp.eq.f32.partialorder %v7859_v42, 0.0 }
 0x135   : > { %v7878_v11 = vpop.f32.mrf.mxu3  ;;  %v236_v16 = vpop.f32.mrf.mxu2 }
 0x13b   : > { %414 = vmax.xlane.f32.xlu1 %v7859_v42 }
 0x13d   : > { %v3437_v46 = vpop.trf.xlu0 }
 0x13e   : > { %v7862_v0 = vperm.slane %v3437_v46, 0  ;;  %v7889_v46 = vpop.f32.mrf.mxu3 }
 0x140   : > { %v3454_v51 = vadd.f32 %v7862_v0, %v7747_v12  ;;  %v3455_v1 = vadd.f32 %v7862_v0, %v7757_v8  ;;  %v350_v12 = vadd.f32 %v7836_v10, %v7753_v13  ;;  %v3472_v8 = vmul.f32 2.0, %v3315_v4 }
 0x141   : > { %v3456_v15 = vadd.f32 %v7862_v0, %v7761_v18  ;;  %v367_v13 = vmul.f32 2.0, %v212_v2  ;;  %v3321_v18 = vpop.f32.mrf.mxu1 }
 0x142   : > { %v3486_v53 = vsub.f32 %v3454_v51, %v3470_v49  ;;  %v3487_v6 = vsub.f32 %v3455_v1, %v3471_v55  ;;  %v382_v9 = vsub.f32 %v350_v12, %v366_v37  ;;  %v7892_v49 = vpop.f32.mrf.mxu2  ;;  %v3457_v1 = vadd.f32 %v7862_v0, %v7767_v17 }
 0x143   : > { %v3488_v27 = vsub.f32 %v3456_v15, %v3472_v8  ;;  %v383_v51 = vsub.f32 %v351_v45, %v367_v13  ;;  %v368_v12 = vmul.f32 2.0, %v215_v5  ;;  %v374_v15 = vmul.f32 2.0, %v233_v39 }
 0x144   : > { %v7866_v57 = vmax.f32 %v3486_v53, 0.0  ;;  %v7873_v3 = vmax.f32 %v3487_v6, 0.0  ;;  %v7880_v14 = vmax.f32 %v382_v9, 0.0  ;;  %v7894_v53 = vpop.f32.mrf.mxu0  ;;  %v3489_v22 = vsub.f32 %v3457_v1, %v3473_v54 }
 0x145   : > { %v7885_v41 = vmax.f32 %v3488_v27, 0.0  ;;  %v7896_v55 = vmax.f32 %v383_v51, 0.0  ;;  %v352_v9 = vadd.f32 %v7836_v10, %v7769_v23  ;;  %v355_v17 = vadd.f32 %v7836_v10, %v7787_v34 }
 0x146   : > { %3518 = vmax.xlane.f32.xlu1 %v7866_v57  ;;  %v7901_v2 = vpop.f32.mrf.mxu3  ;;  %v7905_v4 = vmax.f32 %v3489_v22, 0.0  ;;  %v358_v13 = vadd.f32 %v7836_v10, %v7799_v44  ;;  %v3474_v5 = vmul.f32 2.0, %v3321_v18  ;;  %v3458_v39 = vadd.f32 %v7862_v0, %v7773_v24 }
 0x147   : > { %v384_v27 = vsub.f32 %v352_v9, %v368_v12  ;;  %v375_v34 = vmul.f32 2.0, %v236_v16  ;;  %v359_v18 = vadd.f32 %v7836_v10, %v7805_v48  ;;  %v353_v16 = vadd.f32 %v7836_v10, %v7775_v25 }
 0x148   : > { %v390_v23 = vsub.f32 %v358_v13, %v374_v15  ;;  %v3490_v9 = vsub.f32 %v3458_v39, %v3474_v5  ;;  %vm958_vm2 = vcmp.eq.f32.partialorder %v7880_v14, inf  ;;  %vm960_vm3 = vcmp.eq.f32.partialorder %v7880_v14, 0.0 }
 0x149   : > { %v3324_v37 = vpop.f32.mrf.mxu1  ;;  %v7918_v1 = vmax.f32 %v384_v27, 0.0  ;;  %vm970_vm5 = vcmp.eq.f32.partialorder %v7896_v55, inf  ;;  %vm4041_vm6 = vcmp.eq.f32.partialorder %v7905_v4, inf  ;;  %vm972_vm8 = vcmp.eq.f32.partialorder %v7896_v55, 0.0 }
 0x14a   : > { %v7903_v6 = vpop.f32.mrf.mxu2  ;;  %v7927_v44 = vmax.f32 %v390_v23, 0.0  ;;  %v7935_v24 = vmax.f32 %v3490_v9, 0.0  ;;  %v3461_v23 = vadd.f32 %v7862_v0, %v7791_v35  ;;  %v3459_v9 = vadd.f32 %v7862_v0, %v7779_v26 }
 0x14b   : > { %v354_v26 = vadd.f32 %v7836_v10, %v7781_v30  ;;  %v376_v30 = vmul.f32 2.0, %v7892_v49  ;;  %vm4043_vm10 = vcmp.eq.f32.partialorder %v7905_v4, 0.0 }
 0x14c   : > { %v224_v8 = vpop.f32.mrf.mxu0  ;;  %vm4053_vm9 = vcmp.eq.f32.partialorder %v7935_v24, inf  ;;  %vm4055_vm12 = vcmp.eq.f32.partialorder %v7935_v24, 0.0 }
 0x14d   : > { %v371_v20 = vmul.f32 2.0, %v224_v8  ;;  %v369_v8 = vmul.f32 2.0, %v218_v29  ;;  %v363_v29 = vadd.f32 %v7836_v10, %v7829_v62 }
 0x14e   : > { %3520 = vmax.xlane.f32.xlu1 %v7873_v3  ;;  %v7914_v45 = vpop.f32.mrf.mxu3 }
 0x14f   : > { %v387_v54 = vsub.f32 %v355_v17, %v371_v20  ;;  %v391_v17 = vsub.f32 %v359_v18, %v375_v34  ;;  %v385_v48 = vsub.f32 %v353_v16, %v369_v8  ;;  %v3475_v34 = vmul.f32 2.0, %v3324_v37 }
 0x150   : > { %v370_v37 = vmul.f32 2.0, %v7894_v53  ;;  %v7973_v53 = vmul.f32 2.0, %v7889_v46  ;;  %v7986_v46 = vmul.f32 2.0, %v7901_v2 }
 0x151   : > { %v7922_v22 = vpop.f32.mrf.mxu1  ;;  %v7925_v12 = vmax.f32 %v387_v54, 0.0  ;;  %v7940_v13 = vmax.f32 %v391_v17, 0.0  ;;  %v7947_v25 = vmax.f32 %v385_v48, 0.0  ;;  %v3491_v62 = vsub.f32 %v3459_v9, %v3475_v34 }
 0x152   : > { %v7916_v51 = vpop.f32.mrf.mxu2  ;;  %v386_v9 = vsub.f32 %v354_v26, %v370_v37 }
 0x153   : > { %6568 = vrsqrt.f32 %v7925_v12  ;;  %v378_v49 = vmul.f32 2.0, %v7916_v51  ;;  %v3476_v51 = vmul.f32 2.0, %v7922_v22  ;;  %vm1018_vm1 = vcmp.eq.f32.partialorder %v7925_v12, inf }
 0x154   : > { %6570 = vrsqrt.f32 %v7880_v14  ;;  %vm994_vm15 = vcmp.eq.f32.partialorder %v7947_v25, inf  ;;  %vm996_vm0 = vcmp.eq.f32.partialorder %v7947_v25, 0.0 }
 0x156   : > { %416 = vmax.xlane.f32.xlu1 %v7880_v14  ;;  %v7933_v15 = vpop.f32.mrf.mxu3 }
 0x157   : > { %v8015_v22 = vmul.f32 2.0, %v7933_v15  ;;  %v3464_v15 = vadd.f32 %v7862_v0, %v7803_v47 }
 0x159   : > { %v3330_v27 = vpop.f32.mrf.mxu1  ;;  %v6569_v54 = vpop.eup %6568 }
 0x15a   : > { %v248_v20 = vpop.f32.mrf.mxu2  ;;  %v3477_v39 = vmul.f32 2.0, %v3330_v27  ;;  %v1012_v18 = vmul.f32 %v6569_v54, %v7925_v12  ;;  %v7959_v27 = vmax.f32 %v3491_v62, 0.0  ;;  %v8002_v62 = vmax.f32 %v386_v9, 0.0 }
 0x15b   : > { %v379_v5 = vmul.f32 2.0, %v248_v20 }
 0x15c   : > { %v3493_v16 = vsub.f32 %v3461_v23, %v3477_v39  ;;  %v1013_v20 = vmul.f32 %v6569_v54, %v1012_v18  ;;  %v7975_v23 = vpop.eup %6570  ;;  %v377_v39 = vmul.f32 2.0, %v7903_v6  ;;  %v362_v6 = vadd.f32 %v7836_v10, %v7823_v60 }
 0x15d   : > { %v395_v8 = vsub.f32 %v363_v29, %v379_v5  ;;  %v7967_v29 = vmul.f32 2.0, %v7871_v7  ;;  %v7970_v5 = vmul.f32 2.0, %v7878_v11  ;;  %v360_v7 = vadd.f32 %v7836_v10, %v7811_v52 }
 0x15e   : > { %3522 = vmax.xlane.f32.xlu1 %v7885_v41  ;;  %v3351_v17 = vpop.f32.mrf.mxu3  ;;  %v7955_v35 = vmax.f32 %v3493_v16, 0.0  ;;  %v1014_v48 = vmul.f32 0.5, %v1013_v20  ;;  %v361_v11 = vadd.f32 %v7836_v10, %v7817_v58  ;;  %v3469_v52 = vadd.f32 %v7862_v0, %v7833_v63 }
 0x15f   : > { %v7953_v40 = vmax.f32 %v395_v8, 0.0  ;;  %v952_v58 = vmul.f32 %v7975_v23, %v7880_v14  ;;  %v3460_v60 = vadd.f32 %v7862_v0, %v7785_v31  ;;  %v8008_v10 = vmul.f32 2.0, %v7914_v45 }
 0x160   : > { %v1015_v18 = vsub.f32 1.5, %v1014_v48  ;;  %v392_v20 = vsub.f32 %v360_v7, %v376_v30  ;;  %v393_v37 = vsub.f32 %v361_v11, %v377_v39  ;;  %v8021_v45 = vmul.f32 2.0, %v3351_v17 }
 0x161   : > { %15714 = vst [vmem:[#allocation5_spill] sm:$0xff] %v7953_v40  ;;  %6572 = vrsqrt.f32 %v7953_v40  ;;  %v953_v39 = vmul.f32 %v7975_v23, %v952_v58  ;;  %v8033_v7 = vmax.f32 %v388_v36, 0.0  ;;  %v3466_v36 = vadd.f32 %v7862_v0, %v7815_v56 }
 0x162   : > { %6574 = vrsqrt.f32 %v7955_v35  ;;  %v1016_v63 = vmul.f32 %v6569_v54, %v1015_v18  ;;  %v3492_v18 = vsub.f32 %v3460_v60, %v3476_v51  ;;  %vm4089_vm4 = vcmp.eq.f32.partialorder %v7955_v35, inf }
 0x163   : > { %6576 = vrsqrt.f32 %v7896_v55 }
 0x164   : > { %6578 = vrsqrt.f32 %v7840_v19  ;;  %v1017_v11 = vmul.f32 %v1016_v63, %v7925_v12 }
 0x165   : > { %6580 = vrsqrt.f32 %v7905_v4 }
 0x166   : > { %418 = vmax.xlane.f32.xlu1 %v7896_v55  ;;  %v3354_v34 = vpop.f32.mrf.mxu3  ;;  %6582 = vrsqrt.f32 %v7935_v24 }
 0x167   : > { %v7992_v8 = vpop.eup %6572  ;;  %v3485_v16 = vmul.f32 2.0, %v3354_v34  ;;  %6584 = vrsqrt.f32 %v7859_v42  ;;  %v394_v34 = vsub.f32 %v362_v6, %v378_v49  ;;  %v15716_v49 = vsub.f32 %v7853_v33, %v7847_v28 }
 0x168   : > { %15715 = vst [vmem:[#allocation6_spill] sm:$0xff] %v7992_v8  ;;  %v7999_v2 = vpop.eup %6574  ;;  %v1108_v48 = vmul.f32 %v7992_v8, %v7953_v40  ;;  %6586 = vrsqrt.f32 %v7947_v25  ;;  %v954_v33 = vmul.f32 0.5, %v953_v39 }
 0x169   : > { %v8010_v26 = vpop.eup %6576  ;;  %v4083_v54 = vmul.f32 %v7999_v2, %v7955_v35  ;;  %v3501_v30 = vsub.f32 %v3469_v52, %v3485_v16  ;;  %v8041_v6 = vmax.f32 %v15716_v49, 0.0  ;;  %v8043_v52 = vmax.f32 %v392_v20, 0.0 }
 0x16a   : > { %v8019_v31 = vpop.eup %6578  ;;  %v8045_v16 = vmax.f32 %v393_v37, 0.0  ;;  %v8050_v51 = vmul.f32 %v7992_v8, %v1108_v48  ;;  %v8053_v32 = vmax.f32 %v394_v34, 0.0  ;;  %v964_v63 = vmul.f32 %v8010_v26, %v7896_v55 }
 0x16b   : > { %v8026_v9 = vpop.eup %6580  ;;  %15717 = vst [vmem:[#allocation7_spill] sm:$0xff] %v8043_v52  ;;  %v4084_v60 = vmul.f32 %v7999_v2, %v4083_v54  ;;  %v8057_v28 = vmax.f32 %v3501_v30, 0.0  ;;  %v8063_v37 = vmax.f32 %v3492_v18, 0.0  ;;  %v3462_v48 = vadd.f32 %v7862_v0, %v7794_v38 }
 0x16c   : > { %v8035_v17 = vpop.eup %6582  ;;  %15718 = vst [vmem:[#allocation8_spill] sm:$0xff] %v8045_v16  ;;  %v4035_v34 = vmul.f32 %v8026_v9, %v7905_v4  ;;  %v928_v49 = vmul.f32 %v8019_v31, %v7840_v19  ;;  %v8074_v54 = vsel %vm1018_vm1, %v7925_v12, %v1017_v11  ;;  %v3463_v30 = vadd.f32 %v7862_v0, %v7797_v43 }
 0x16d   : > { %v8047_v58 = vpop.eup %6584  ;;  %15719 = vst [vmem:[#allocation9_spill] sm:$0xff] %v8050_v51  ;;  %v4047_v39 = vmul.f32 %v8035_v17, %v7935_v24  ;;  %v3465_v11 = vadd.f32 %v7862_v0, %v7809_v50  ;;  %v4085_v43 = vmul.f32 0.5, %v4084_v60  ;;  %v955_v21 = vsub.f32 1.5, %v954_v33 }
 0x16e   : > { %3524 = vmax.xlane.f32.xlu1 %v7905_v4  ;;  %15720 = vst [vmem:[#allocation10_spill] sm:$0xff] %v8053_v32  ;;  %v8061_v20 = vpop.eup %6586  ;;  %v940_v38 = vmul.f32 %v8047_v58, %v7859_v42  ;;  %v965_v8 = vmul.f32 %v8010_v26, %v964_v63  ;;  %v3494_v18 = vsub.f32 %v3462_v48, %v7967_v29  ;;  %6588 = vrsqrt.f32 %v7866_v57 }
 0x16f   : > { %v988_v51 = vmul.f32 %v8061_v20, %v7947_v25  ;;  %v4036_v40 = vmul.f32 %v8026_v9, %v4035_v34  ;;  %v929_v32 = vmul.f32 %v8019_v31, %v928_v49  ;;  %v3495_v47 = vsub.f32 %v3463_v30, %v7970_v5 }
 0x170   : > { %v4048_v50 = vmul.f32 %v8035_v17, %v4047_v39  ;;  %v941_v56 = vmul.f32 %v8047_v58, %v940_v38  ;;  %6590 = vrsqrt.f32 %v8002_v62  ;;  %v3496_v60 = vsub.f32 %v3464_v15, %v7973_v53 }
 0x171   : > { %v3497_v33 = vsub.f32 %v3465_v11, %v7986_v46  ;;  %v3498_v29 = vsub.f32 %v3466_v36, %v8008_v10  ;;  %v3467_v63 = vadd.f32 %v7862_v0, %v7821_v59  ;;  %v4086_v48 = vsub.f32 1.5, %v4085_v43 }
 0x172   : > { %v956_v5 = vmul.f32 %v7975_v23, %v955_v21  ;;  %v966_v34 = vmul.f32 0.5, %v965_v8  ;;  %v989_v49 = vmul.f32 %v8061_v20, %v988_v51  ;;  %6592 = vrsqrt.f32 %v8057_v28 }
 0x173   : > { %v3468_v53 = vadd.f32 %v7862_v0, %v7827_v61  ;;  %v4037_v15 = vmul.f32 0.5, %v4036_v40  ;;  %v930_v46 = vmul.f32 0.5, %v929_v32  ;;  %v8112_v30 = vmax.f32 %v3494_v18, 0.0 }
 0x174   : > { %v8114_v10 = vmax.f32 %v3495_v47, 0.0  ;;  %v4049_v59 = vmul.f32 0.5, %v4048_v50  ;;  %v942_v36 = vmul.f32 0.5, %v941_v56  ;;  %v8117_v39 = vpop.eup %6588  ;;  %v8123_v8 = vmax.f32 %v3496_v60, 0.0 }
 0x175   : > { %v8125_v61 = vmax.f32 %v3497_v33, 0.0  ;;  %v8127_v40 = vmax.f32 %v3498_v29, 0.0  ;;  %v3499_v0 = vsub.f32 %v3467_v63, %v8015_v22  ;;  %v4087_v21 = vmul.f32 %v7999_v2, %v4086_v48 }
 0x176   : > { %420 = vmax.xlane.f32.xlu1 %v7918_v1  ;;  %15721 = vst [vmem:[#allocation11_spill] sm:$0xff] %v8123_v8  ;;  %v8130_v51 = vpop.eup %6590  ;;  %v957_v32 = vmul.f32 %v956_v5, %v7880_v14  ;;  %v967_v38 = vsub.f32 1.5, %v966_v34  ;;  %v990_v18 = vmul.f32 0.5, %v989_v49  ;;  %v3500_v11 = vsub.f32 %v3468_v53, %v8021_v45 }
 0x177   : > { %15722 = vst [vmem:[#allocation12_spill] sm:$0xff] %v8125_v61  ;;  %v4038_v43 = vsub.f32 1.5, %v4037_v15  ;;  %v931_v47 = vsub.f32 1.5, %v930_v46  ;;  %6594 = vrsqrt.f32 %v7918_v1  ;;  %v4050_v50 = vsub.f32 1.5, %v4049_v59 }
 0x178   : > { %15723 = vst [vmem:[#allocation13_spill] sm:$0xff] %v8127_v40  ;;  %v943_v56 = vsub.f32 1.5, %v942_v36  ;;  %v3999_v22 = vmul.f32 %v8117_v39, %v7866_v57  ;;  %v8139_v60 = vpop.eup %6592  ;;  %v8141_v2 = vmax.f32 %v3499_v0, 0.0  ;;  %v1000_v45 = vmul.f32 %v8130_v51, %v8002_v62 }
 0x179   : > { %15724 = vst [vmem:[#allocation14_spill] sm:$0xff] %v8139_v60  ;;  %v4088_v29 = vmul.f32 %v4087_v21, %v7955_v35  ;;  %v959_v63 = vsel %vm958_vm2, %v7880_v14, %v957_v32  ;;  %v968_v48 = vmul.f32 %v8010_v26, %v967_v38  ;;  %v991_v5 = vsub.f32 1.5, %v990_v18 }
 0x17a   : > { %432 = vmax.xlane.f32.xlu2 %v7927_v44  ;;  %15725 = vst [vmem:[#allocation15_spill] sm:$0xff] %v8141_v2  ;;  %v8155_v34 = vmax.f32 %v3500_v11, 0.0  ;;  %v4039_v49 = vmul.f32 %v8026_v9, %v4038_v43  ;;  %v932_v53 = vmul.f32 %v8019_v31, %v931_v47  ;;  %v937_v15 = vand.u32 2147483648, %v7840_v19 }
 0x17b   : > { %v4051_v46 = vmul.f32 %v8035_v17, %v4050_v50  ;;  %v944_v59 = vmul.f32 %v8047_v58, %v943_v56  ;;  %v4000_v36 = vmul.f32 %v8117_v39, %v3999_v22  ;;  %v15727_v0 = vand.u32 2147483648, %v7880_v14 }
 0x17c   : > { %15726 = vst [vmem:[#allocation16_spill] sm:$0xff] %v8155_v34  ;;  %v4056_v31 = vand.u32 2147483648, %v7935_v24  ;;  %v1001_v17 = vmul.f32 %v8130_v51, %v1000_v45  ;;  %v8182_v21 = vsel %vm4089_vm4, %v7955_v35, %v4088_v29  ;;  %v969_v32 = vmul.f32 %v968_v48, %v7896_v55 }
 0x17d   : > { %v8164_v26 = vpop.eup %6594  ;;  %v8171_v9 = vsel %vm960_vm3, %v15727_v0, %v959_v63  ;;  %v992_v14 = vmul.f32 %v8061_v20, %v991_v5  ;;  %v4040_v18 = vmul.f32 %v4039_v49, %v7905_v4  ;;  %v933_v11 = vmul.f32 %v932_v53, %v7840_v19 }
 0x17e   : > { %3526 = vmax.xlane.f32.xlu1 %v7935_v24  ;;  %v4052_v47 = vmul.f32 %v4051_v46, %v7935_v24  ;;  %v945_v50 = vmul.f32 %v944_v59, %v7859_v42  ;;  %v4001_v56 = vmul.f32 0.5, %v4000_v36  ;;  %v976_v20 = vmul.f32 %v8164_v26, %v7918_v1 }
 0x17f   : > { %v949_v45 = vand.u32 2147483648, %v7859_v42  ;;  %v1002_v29 = vmul.f32 0.5, %v1001_v17  ;;  %v971_v48 = vsel %vm970_vm5, %v7896_v55, %v969_v32  ;;  %v993_v5 = vmul.f32 %v992_v14, %v7947_v25 }
 0x180   : > { %v4042_v53 = vsel %vm4041_vm6, %v7905_v4, %v4040_v18  ;;  %v935_v46 = vsel %vm934_vm7, %v7840_v19, %v933_v11  ;;  %v4054_v36 = vsel %vm4053_vm9, %v7935_v24, %v4052_v47  ;;  %v947_v0 = vsel %vm946_vm13, %v7859_v42, %v945_v50 }
 0x181   : > { %v4002_v17 = vsub.f32 1.5, %v4001_v56  ;;  %v977_v32 = vmul.f32 %v8164_v26, %v976_v20  ;;  %v1003_v18 = vsub.f32 1.5, %v1002_v29  ;;  %v15728_v33 = vand.u32 2147483648, %v7896_v55 }
 0x182   : > { %434 = vmax.xlane.f32.xlu0 %v7940_v13  ;;  %v995_v50 = vsel %vm994_vm15, %v7947_v25, %v993_v5  ;;  %v997_v56 = vand.u32 2147483648, %v7947_v25  ;;  %v15729_v29 = vand.u32 2147483648, %v7905_v4  ;;  %v8258_v55 = vsel %vm936_vm11, %v937_v15, %v935_v46 }
 0x183   : > { %v8241_v47 = vsel %vm972_vm8, %v15728_v33, %v971_v48  ;;  %v8262_v33 = vsel %vm4055_vm12, %v4056_v31, %v4054_v36  ;;  %v4003_v4 = vmul.f32 %v8117_v39, %v4002_v17  ;;  %vm4005_vm1 = vcmp.eq.f32.partialorder %v7866_v57, inf }
 0x184   : > { %v8254_v60 = vsel %vm4043_vm10, %v15729_v29, %v4042_v53  ;;  %15730 = vst [vmem:[#allocation17_spill] sm:$0xff] %v8262_v33  ;;  %v978_v19 = vmul.f32 0.5, %v977_v32  ;;  %v8278_v24 = vsel %vm996_vm0, %v997_v56, %v995_v50  ;;  %v1004_v31 = vmul.f32 %v8130_v51, %v1003_v18 }
 0x185   : > { %15731 = vst [vmem:[#allocation18_spill] sm:$0xff] %v8278_v24  ;;  %vm4007_vm2 = vcmp.eq.f32.partialorder %v7866_v57, 0.0  ;;  %v4008_v42 = vand.u32 2147483648, %v7866_v57  ;;  %vm1006_vm3 = vcmp.eq.f32.partialorder %v8002_v62, inf  ;;  %vm1008_vm4 = vcmp.eq.f32.partialorder %v8002_v62, 0.0 }
 0x186   : > { %422 = vmax.xlane.f32.xlu1 %v7947_v25  ;;  %v1009_v25 = vand.u32 2147483648, %v8002_v62  ;;  %v4004_v17 = vmul.f32 %v4003_v4, %v7866_v57  ;;  %v979_v32 = vsub.f32 1.5, %v978_v19  ;;  %v1005_v18 = vmul.f32 %v1004_v31, %v8002_v62 }
 0x187   : > { %vm1020_vm5 = vcmp.eq.f32.partialorder %v7925_v12, 0.0  ;;  %vm982_vm6 = vcmp.eq.f32.partialorder %v7918_v1, inf  ;;  %vm1030_vm7 = vcmp.eq.f32.partialorder %v8033_v7, inf  ;;  %vm984_vm8 = vcmp.eq.f32.partialorder %v7918_v1, 0.0 }
 0x188   : > { %v980_v4 = vmul.f32 %v8164_v26, %v979_v32  ;;  %vm1032_vm9 = vcmp.eq.f32.partialorder %v8033_v7, 0.0  ;;  %vm1042_vm11 = vcmp.eq.f32.partialorder %v8041_v6, inf  ;;  %vm1054_vm12 = vcmp.eq.f32.partialorder %v7927_v44, inf }
 0x189   : > { %vm4017_vm15 = vcmp.eq.f32.partialorder %v7873_v3, inf  ;;  %vm1044_vm0 = vcmp.eq.f32.partialorder %v8041_v6, 0.0 }
 0x18e   : > { %3528 = vmax.xlane.f32.xlu1 %v7959_v27 }
 0x196   : > { %424 = vmax.xlane.f32.xlu1 %v8002_v62 }
 0x19e   : > { %3530 = vmax.xlane.f32.xlu1 %v8063_v37 }
 0x1a6   : > { %v8120_v23 = vpop.xlane.xlu1 %412  ;;  %426 = vmax.xlane.f32.xlu1 %v7925_v12 }
 0x1a7   : > { %6596 = vrsqrt.f32 %v8120_v23  ;;  %vm451_vm10 = vcmp.eq.f32.partialorder %v8120_v23, inf  ;;  %vm453_vm13 = vcmp.eq.f32.partialorder %v8120_v23, 0.0 }
 0x1a8   : > { %6598 = vrsqrt.f32 %v8033_v7 }
 0x1a9   : > { %6600 = vrsqrt.f32 %v8041_v6 }
 0x1aa   : > { %6602 = vrsqrt.f32 %v7927_v44 }
 0x1ab   : > { %6604 = vrsqrt.f32 %v7940_v13 }
 0x1ad   : > { %v8177_v58 = vpop.eup %6596 }
 0x1ae   : > { %3532 = vmax.xlane.f32.xlu1 %v7955_v35  ;;  %v8190_v38 = vpop.eup %6598  ;;  %v8196_v43 = vpop.xlane.xlu1 %414  ;;  %v445_v22 = vmul.f32 %v8177_v58, %v8120_v23 }
 0x1af   : > { %v8206_v63 = vpop.eup %6600  ;;  %v1024_v49 = vmul.f32 %v8190_v38, %v8033_v7  ;;  %6606 = vrsqrt.f32 %v8196_v43 }
 0x1b0   : > { %v8223_v59 = vpop.eup %6602  ;;  %v446_v14 = vmul.f32 %v8177_v58, %v445_v22  ;;  %6608 = vrsqrt.f32 %v7873_v3  ;;  %v1036_v11 = vmul.f32 %v8206_v63, %v8041_v6 }
 0x1b1   : > { %v1025_v20 = vmul.f32 %v8190_v38, %v1024_v49  ;;  %v8248_v22 = vpop.eup %6604  ;;  %v1048_v48 = vmul.f32 %v8223_v59, %v7927_v44  ;;  %v8270_v49 = vsel %vm948_vm14, %v949_v45, %v947_v0  ;;  %6610 = vrsqrt.f32 %v7885_v41 }
 0x1b2   : > { %v447_v53 = vmul.f32 0.5, %v446_v14  ;;  %v1037_v46 = vmul.f32 %v8206_v63, %v1036_v11  ;;  %v1060_v45 = vmul.f32 %v8248_v22, %v7940_v13  ;;  %6612 = vrsqrt.f32 %v8063_v37 }
 0x1b3   : > { %v1026_v39 = vmul.f32 0.5, %v1025_v20  ;;  %v1049_v51 = vmul.f32 %v8223_v59, %v1048_v48  ;;  %6614 = vrsqrt.f32 %v7959_v27  ;;  %vm1066_vm14 = vcmp.eq.f32.partialorder %v7940_v13, inf }
 0x1b4   : > { %v448_v14 = vsub.f32 1.5, %v447_v53  ;;  %v1038_v11 = vmul.f32 0.5, %v1037_v46  ;;  %6616 = vrsqrt.f32 %v8112_v30  ;;  %v1061_v20 = vmul.f32 %v8248_v22, %v1060_v45 }
 0x1b5   : > { %v8274_v15 = vpop.eup %6606  ;;  %v1027_v56 = vsub.f32 1.5, %v1026_v39  ;;  %v1050_v19 = vmul.f32 0.5, %v1049_v51  ;;  %v4006_v39 = vsel %vm4005_vm1, %v7866_v57, %v4004_v17  ;;  %v1007_v51 = vsel %vm1006_vm3, %v8002_v62, %v1005_v18 }
 0x1b6   : > { %428 = vmax.xlane.f32.xlu1 %v8033_v7  ;;  %v8287_v36 = vpop.eup %6608  ;;  %v457_v0 = vmul.f32 %v8274_v15, %v8196_v43  ;;  %v449_v29 = vmul.f32 %v8177_v58, %v448_v14  ;;  %6618 = vrsqrt.f32 %v8043_v52  ;;  %v1039_v24 = vsub.f32 1.5, %v1038_v11 }
 0x1b7   : > { %v4011_v50 = vmul.f32 %v8287_v36, %v7873_v3  ;;  %v8308_v53 = vpop.eup %6610  ;;  %v1028_v45 = vmul.f32 %v8190_v38, %v1027_v56  ;;  %v1062_v58 = vmul.f32 0.5, %v1061_v20  ;;  %v8334_v18 = vsel %vm4007_vm2, %v4008_v42, %v4006_v39 }
 0x1b8   : > { %v458_v31 = vmul.f32 %v8274_v15, %v457_v0  ;;  %v8326_v0 = vpop.eup %6612  ;;  %v4023_v26 = vmul.f32 %v8308_v53, %v7885_v41  ;;  %v1051_v32 = vsub.f32 1.5, %v1050_v19  ;;  %6620 = vrsqrt.f32 %v8114_v10 }
 0x1b9   : > { %v8266_v5 = vpop.xlane.xlu1 %3518  ;;  %v4012_v17 = vmul.f32 %v8287_v36, %v4011_v50  ;;  %v8330_v14 = vpop.eup %6614  ;;  %v8344_v38 = vsel %vm1008_vm4, %v1009_v25, %v1007_v51  ;;  %v450_v57 = vmul.f32 %v449_v29, %v8120_v23  ;;  %v4071_v42 = vmul.f32 %v8326_v0, %v8063_v37 }
 0x1ba   : > { %v8339_v48 = vpop.eup %6616  ;;  %v459_v33 = vmul.f32 0.5, %v458_v31  ;;  %6622 = vrsqrt.f32 %v8266_v5  ;;  %v981_v62 = vmul.f32 %v980_v4, %v7918_v1  ;;  %v1029_v19 = vmul.f32 %v1028_v45, %v8033_v7 }
 0x1bb   : > { %v4013_v20 = vmul.f32 0.5, %v4012_v17  ;;  %v4024_v31 = vmul.f32 %v8308_v53, %v4023_v26  ;;  %v4059_v39 = vmul.f32 %v8330_v14, %v7959_v27  ;;  %v15733_v51 = vand.u32 2147483648, %v7925_v12 }
 0x1bc   : > { %v8358_v29 = vpop.eup %6618  ;;  %v4095_v4 = vmul.f32 %v8339_v48, %v8112_v30  ;;  %v460_v45 = vsub.f32 1.5, %v459_v33  ;;  %v1040_v26 = vmul.f32 %v8206_v63, %v1039_v24  ;;  %v1052_v56 = vmul.f32 %v8223_v59, %v1051_v32 }
 0x1bd   : > { %15732 = vst [vmem:[#allocation19_spill] sm:$0xff] %v8358_v29  ;;  %v8368_v17 = vsel %vm1020_vm5, %v15733_v51, %v8074_v54  ;;  %v452_v12 = vsel %vm451_vm10, %v8120_v23, %v450_v57  ;;  %v4072_v54 = vmul.f32 %v8326_v0, %v4071_v42  ;;  %v1063_v51 = vsub.f32 1.5, %v1062_v58 }
 0x1be   : > { %3534 = vmax.xlane.f32.xlu1 %v8112_v30  ;;  %15734 = vst [vmem:[#allocation20_spill] sm:$0xff] %v8368_v17  ;;  %v8379_v11 = vpop.eup %6620  ;;  %v454_v33 = vand.u32 2147483648, %v8120_v23  ;;  %v4014_v50 = vsub.f32 1.5, %v4013_v20  ;;  %v983_v63 = vsel %vm982_vm6, %v7918_v1, %v981_v62  ;;  %v1031_v59 = vsel %vm1030_vm7, %v8033_v7, %v1029_v19 }
 0x1bf   : > { %v4025_v32 = vmul.f32 0.5, %v4024_v31  ;;  %v4060_v57 = vmul.f32 %v8330_v14, %v4059_v39  ;;  %v4096_v58 = vmul.f32 %v8339_v48, %v4095_v4  ;;  %v461_v20 = vmul.f32 %v8274_v15, %v460_v45 }
 0x1c0   : > { %v8391_v24 = vpop.eup %6622  ;;  %v455_v42 = vsel %vm453_vm13, %v454_v33, %v452_v12  ;;  %v4107_v62 = vmul.f32 %v8379_v11, %v8114_v10  ;;  %v4073_v23 = vmul.f32 0.5, %v4072_v54  ;;  %v1041_v19 = vmul.f32 %v1040_v26, %v8041_v6 }
 0x1c1   : > { %v8311_v46 = vpop.xlane.xlu1 %3520  ;;  %v1053_v31 = vmul.f32 %v1052_v56, %v7927_v44  ;;  %v1064_v39 = vmul.f32 %v8248_v22, %v1063_v51  ;;  %v3551_v15 = vmul.f32 %v8391_v24, %v8266_v5  ;;  %v4015_v4 = vmul.f32 %v8287_v36, %v4014_v50 }
 0x1c2   : > { %v15735_v45 = vand.u32 2147483648, %v7918_v1  ;;  %v8417_v54 = vmul.f32 0.1, %v455_v42  ;;  %v4026_v56 = vsub.f32 1.5, %v4025_v32  ;;  %v4061_v22 = vmul.f32 0.5, %v4060_v57 }
 0x1c3   : > { %v15736_v51 = vand.u32 2147483648, %v8033_v7  ;;  %vm1056_vm1 = vcmp.eq.f32.partialorder %v7927_v44, 0.0  ;;  %v462_v1 = vmul.f32 %v461_v20, %v8196_v43  ;;  %vm4019_vm2 = vcmp.eq.f32.partialorder %v7873_v3, 0.0 }
 0x1c4   : > { %v8413_v12 = vsel %vm984_vm8, %v15735_v45, %v983_v63  ;;  %v4097_v42 = vmul.f32 0.5, %v4096_v58  ;;  %v4108_v32 = vmul.f32 %v8379_v11, %v4107_v62  ;;  %vm1068_vm3 = vcmp.eq.f32.partialorder %v7940_v13, 0.0 }
 0x1c5   : > { %v8423_v36 = vsel %vm1032_vm9, %v15736_v51, %v1031_v59  ;;  %v4074_v57 = vsub.f32 1.5, %v4073_v23  ;;  %v1043_v7 = vsel %vm1042_vm11, %v8041_v6, %v1041_v19  ;;  %v1055_v59 = vsel %vm1054_vm12, %v7927_v44, %v1053_v31 }
 0x1c6   : > { %430 = vmax.xlane.f32.xlu1 %v8041_v6  ;;  %15737 = vst [vmem:[#allocation21_spill] sm:$0xff] %v8423_v36  ;;  %v1065_v20 = vmul.f32 %v1064_v39, %v7940_v13  ;;  %v3552_v51 = vmul.f32 %v8391_v24, %v3551_v15  ;;  %v4016_v62 = vmul.f32 %v4015_v4, %v7873_v3  ;;  %vm463_vm4 = vcmp.eq.f32.partialorder %v8196_v43, inf }
 0x1c7   : > { %v4027_v23 = vmul.f32 %v8308_v53, %v4026_v56  ;;  %v4062_v19 = vsub.f32 1.5, %v4061_v22  ;;  %v464_v31 = vsel %vm463_vm4, %v8196_v43, %v462_v1  ;;  %v4098_v39 = vsub.f32 1.5, %v4097_v42 }
 0x1c8   : > { %v4109_v36 = vmul.f32 0.5, %v4108_v32  ;;  %v466_v17 = vand.u32 2147483648, %v8196_v43  ;;  %vm4029_vm5 = vcmp.eq.f32.partialorder %v7885_v41, inf  ;;  %v4075_v4 = vmul.f32 %v8326_v0, %v4074_v57 }
 0x1c9   : > { %v8373_v25 = vpop.xlane.xlu1 %416  ;;  %v1067_v53 = vsel %vm1066_vm14, %v7940_v13, %v1065_v20  ;;  %vm4091_vm6 = vcmp.eq.f32.partialorder %v7955_v35, 0.0  ;;  %vm465_vm7 = vcmp.eq.f32.partialorder %v8196_v43, 0.0  ;;  %v3553_v56 = vmul.f32 0.5, %v3552_v51 }
 0x1ca   : > { %6624 = vrsqrt.f32 %v8373_v25  ;;  %v4018_v1 = vsel %vm4017_vm15, %v7873_v3, %v4016_v62  ;;  %vm4077_vm8 = vcmp.eq.f32.partialorder %v8063_v37, inf  ;;  %v4063_v42 = vmul.f32 %v8330_v14, %v4062_v19 }
 0x1cb   : > { %6626 = vrsqrt.f32 %v8311_v46  ;;  %vm4065_vm9 = vcmp.eq.f32.partialorder %v7959_v27, inf  ;;  %vm4101_vm10 = vcmp.eq.f32.partialorder %v8112_v30, inf  ;;  %v15738_v0 = vand.u32 2147483648, %v8041_v6 }
 0x1cc   : > { %6628 = vrsqrt.f32 %v8123_v8  ;;  %vm4031_vm11 = vcmp.eq.f32.partialorder %v7885_v41, 0.0  ;;  %v4099_v14 = vmul.f32 %v8339_v48, %v4098_v39  ;;  %v15740_v20 = vand.u32 2147483648, %v7927_v44 }
 0x1cd   : > { %6630 = vrcp.f32 %v8417_v54  ;;  %v8471_v43 = vsel %vm1044_vm0, %v15738_v0, %v1043_v7  ;;  %v4110_v6 = vsub.f32 1.5, %v4109_v36  ;;  %v15742_v19 = vand.u32 2147483648, %v7873_v3 }
 0x1ce   : > { %3536 = vmax.xlane.f32.xlu1 %v8114_v10  ;;  %15739 = vst [vmem:[#allocation22_spill] sm:$0xff] %v8471_v43  ;;  %v8485_v51 = vsel %vm1056_vm1, %v15740_v20, %v1055_v59  ;;  %v15743_v48 = vand.u32 2147483648, %v7940_v13  ;;  %v3554_v36 = vsub.f32 1.5, %v3553_v56  ;;  %v4076_v59 = vmul.f32 %v4075_v4, %v8063_v37 }
 0x1cf   : > { %15741 = vst [vmem:[#allocation23_spill] sm:$0xff] %v8485_v51  ;;  %vm4079_vm12 = vcmp.eq.f32.partialorder %v8063_v37, 0.0  ;;  %vm4067_vm13 = vcmp.eq.f32.partialorder %v7959_v27, 0.0  ;;  %vm4103_vm14 = vcmp.eq.f32.partialorder %v8112_v30, 0.0  ;;  %vm4113_vm15 = vcmp.eq.f32.partialorder %v8114_v10, inf }
 0x1d0   : > { %v6625_v26 = vpop.eup %6624  ;;  %vm475_vm0 = vcmp.eq.f32.partialorder %v8373_v25, inf  ;;  %v4111_v4 = vmul.f32 %v8379_v11, %v4110_v6  ;;  %vm477_vm1 = vcmp.eq.f32.partialorder %v8373_v25, 0.0  ;;  %v15745_v0 = vand.u32 2147483648, %v7955_v35 }
 0x1d1   : > { %v469_v50 = vmul.f32 %v6625_v26, %v8373_v25  ;;  %v8428_v63 = vpop.xlane.xlu1 %3522  ;;  %v8440_v45 = vpop.eup %6626  ;;  %v1072_v35 = vmul.f32 %v8358_v29, %v8043_v52  ;;  %vm3559_vm4 = vcmp.eq.f32.partialorder %v8266_v5, 0.0 }
 0x1d2   : > { %v3563_v15 = vmul.f32 %v8440_v45, %v8311_v46  ;;  %v8474_v32 = vpop.eup %6628 }
 0x1d3   : > { %v470_v58 = vmul.f32 %v6625_v26, %v469_v50  ;;  %v467_v50 = vsel %vm465_vm7, %v466_v17, %v464_v31  ;;  %v4028_v17 = vmul.f32 %v4027_v23, %v7885_v41  ;;  %v8487_v7 = vpop.eup %6630  ;;  %v8494_v23 = vsel %vm4019_vm2, %v15742_v19, %v4018_v1 }
 0x1d4   : > { %v8500_v31 = vsel %vm1068_vm3, %v15743_v48, %v1067_v53  ;;  %v8502_v44 = vmul.f32 0.1, %v467_v50  ;;  %v4119_v13 = vmul.f32 %v8474_v32, %v8123_v8  ;;  %v653_v39 = vmul.f32 %v8487_v7, %v8417_v54 }
 0x1d5   : > { %v471_v33 = vmul.f32 0.5, %v470_v58  ;;  %v3564_v58 = vmul.f32 %v8440_v45, %v3563_v15  ;;  %15744 = vst [vmem:[#allocation24_spill] sm:$0xff] %v8500_v31  ;;  %v4100_v15 = vmul.f32 %v4099_v14, %v8112_v30  ;;  %v3555_v1 = vmul.f32 %v8391_v24, %v3554_v36 }
 0x1d6   : > { %3538 = vmax.xlane.f32.xlu1 %v8123_v8  ;;  %v4030_v50 = vsel %vm4029_vm5, %v7885_v41, %v4028_v17  ;;  %vm4115_vm2 = vcmp.eq.f32.partialorder %v8114_v10, 0.0  ;;  %v8539_v14 = vsel %vm4091_vm6, %v15745_v0, %v8182_v21  ;;  %v15747_v48 = vand.u32 2147483648, %v7885_v41 }
 0x1d7   : > { %v472_v22 = vsub.f32 1.5, %v471_v33  ;;  %v4116_v33 = vand.u32 2147483648, %v8114_v10  ;;  %v3565_v53 = vmul.f32 0.5, %v3564_v58  ;;  %v4102_v6 = vsel %vm4101_vm10, %v8112_v30, %v4100_v15 }
 0x1d8   : > { %v4112_v58 = vmul.f32 %v4111_v4, %v8114_v10  ;;  %v8559_v36 = vsel %vm4031_vm11, %v15747_v48, %v4030_v50  ;;  %v15749_v41 = vand.u32 2147483648, %v7959_v27  ;;  %vm3557_vm3 = vcmp.eq.f32.partialorder %v8266_v5, inf }
 0x1d9   : > { %v8476_v57 = vpop.xlane.xlu1 %418  ;;  %v473_v62 = vmul.f32 %v6625_v26, %v472_v22  ;;  %v4064_v26 = vmul.f32 %v4063_v42, %v7959_v27  ;;  %v478_v22 = vand.u32 2147483648, %v8373_v25  ;;  %v4078_v42 = vsel %vm4077_vm8, %v8063_v37, %v4076_v59 }
 0x1da   : > { %6632 = vrsqrt.f32 %v8476_v57  ;;  %v3566_v19 = vsub.f32 1.5, %v3565_v53  ;;  %v661_v48 = vand.u32 2147483647, %v8417_v54  ;;  %vm658_vm5 = vweird.f32 %v8487_v7 }
 0x1db   : > { %v474_v3 = vmul.f32 %v473_v62, %v8373_v25  ;;  %6634 = vrsqrt.f32 %v8125_v61  ;;  %v4066_v17 = vsel %vm4065_vm9, %v7959_v27, %v4064_v26  ;;  %v654_v62 = vsub.f32 1.0, %v653_v39 }
 0x1dc   : > { %6636 = vrsqrt.f32 %v8428_v63  ;;  %v15748_v39 = vand.u32 2147483648, %v8063_v37  ;;  %v8579_v53 = vsel %vm4067_vm13, %v15749_v41, %v4066_v17  ;;  %v4114_v37 = vsel %vm4113_vm15, %v8114_v10, %v4112_v58 }
 0x1dd   : > { %v476_v56 = vsel %vm475_vm0, %v8373_v25, %v474_v3  ;;  %6638 = vrcp.f32 %v8502_v44  ;;  %v4120_v25 = vmul.f32 %v8474_v32, %v4119_v13  ;;  %v3556_v3 = vmul.f32 %v3555_v1, %v8266_v5 }
 0x1de   : > { %3540 = vmax.xlane.f32.xlu1 %v8125_v61  ;;  %v479_v11 = vsel %vm477_vm1, %v478_v22, %v476_v56  ;;  %v8573_v4 = vsel %vm4079_vm12, %v15748_v39, %v4078_v42  ;;  %v15750_v56 = vand.u32 2147483648, %v8112_v30  ;;  %v8593_v42 = vmul.f32 %v8358_v29, %v1072_v35 }
 0x1df   : > { %v8563_v26 = vmul.f32 0.1, %v479_v11  ;;  %v4121_v1 = vmul.f32 0.5, %v4120_v25  ;;  %v655_v27 = vmul.f32 %v8487_v7, %v654_v62  ;;  %v3567_v30 = vmul.f32 %v8440_v45, %v3566_v19 }
 0x1e0   : > { %v6633_v24 = vpop.eup %6632  ;;  %v8585_v22 = vsel %vm4103_vm14, %v15750_v56, %v4102_v6  ;;  %15751 = vst [vmem:[#allocation26_spill] sm:$0xff] %v8593_v42  ;;  %v3558_v25 = vsel %vm3557_vm3, %v8266_v5, %v3556_v3  ;;  %v3560_v35 = vand.u32 2147483648, %v8266_v5  ;;  %v8613_v45 = vsel %vm4115_vm2, %v4116_v33, %v4114_v37 }
 0x1e1   : > { %v8542_v20 = vpop.xlane.xlu1 %3524  ;;  %v8553_v21 = vpop.eup %6634  ;;  %v481_v13 = vmul.f32 %v6633_v24, %v8476_v57  ;;  %15752 = vst [vmem:[#allocation27_spill] sm:$0xff] %v8613_v45  ;;  %v4122_v62 = vsub.f32 1.5, %v4121_v1  ;;  %v663_v39 = vand.u32 2147483648, %v8417_v54  ;;  %v3568_v56 = vmul.f32 %v3567_v30, %v8311_v46 }
 0x1e2   : > { %15746 = vst [vmem:[#allocation25_spill] sm:$0xff] %v8553_v21  ;;  %6640 = vrsqrt.f32 %v8542_v20  ;;  %v8567_v15 = vpop.eup %6636  ;;  %v4131_v0 = vmul.f32 %v8553_v21, %v8125_v61  ;;  %v3561_v41 = vsel %vm3559_vm4, %v3560_v35, %v3558_v25  ;;  %v656_v1 = vadd.f32 %v8487_v7, %v655_v27 }
 0x1e3   : > { %v8587_v50 = vpop.eup %6638  ;;  %v482_v11 = vmul.f32 %v6633_v24, %v481_v13  ;;  %6642 = vrsqrt.f32 %v8127_v40  ;;  %v3575_v17 = vmul.f32 %v8567_v15, %v8428_v63  ;;  %v8632_v25 = vmul.f32 %v8474_v32, %v4122_v62 }
 0x1e4   : > { %6644 = vrcp.f32 %v8563_v26  ;;  %v668_v58 = vmul.f32 %v8587_v50, %v8502_v44  ;;  %vm657_vm6 = vweird.f32 %v8417_v54  ;;  %vm8637_vm7 = vcmp.eq.f32.partialorder %v661_v48, 8.507059e+37 }
 0x1e5   : > { %v483_v6 = vmul.f32 0.5, %v482_v11  ;;  %6646 = vrsqrt.f32 %v8045_v16  ;;  %v3576_v5 = vmul.f32 %v8567_v15, %v3575_v17  ;;  %v8629_v11 = vmul.f32 %v8553_v21, %v4131_v0  ;;  %15755 = vst [vmem:[#allocation30_spill] sm:$0xff] %v8632_v25  ;;  %vm8644_vm9 = vmor %vm657_vm6, %vm658_vm5 }
 0x1e6   : > { %436 = vmax.xlane.f32.xlu1 %v8043_v52  ;;  %v669_v37 = vsub.f32 1.0, %v668_v58  ;;  %v8641_v27 = vmul.f32 0.1, %v3561_v41  ;;  %vm3569_vm8 = vcmp.eq.f32.partialorder %v8311_v46, inf  ;;  %vm3571_vm10 = vcmp.eq.f32.partialorder %v8311_v46, 0.0 }
 0x1e7   : > { %v484_v3 = vsub.f32 1.5, %v483_v6  ;;  %15754 = vst [vmem:[#allocation29_spill] sm:$0xff] %v8629_v11  ;;  %v3570_v32 = vsel %vm3569_vm8, %v8311_v46, %v3568_v56  ;;  %vm672_vm11 = vweird.f32 %v8502_v44  ;;  %v3572_v58 = vand.u32 2147483648, %v8311_v46 }
 0x1e8   : > { %v6641_v19 = vpop.eup %6640  ;;  %v3577_v62 = vmul.f32 0.5, %v3576_v5  ;;  %v660_v48 = vsel %vm8644_vm9, %v8487_v7, %v656_v1  ;;  %v676_v56 = vand.u32 2147483647, %v8502_v44  ;;  %6648 = vrcp.f32 %v8641_v27 }
 0x1e9   : > { %v8617_v13 = vpop.xlane.xlu1 %420  ;;  %v3587_v10 = vmul.f32 %v6641_v19, %v8542_v20  ;;  %v8623_v33 = vpop.eup %6642  ;;  %v485_v6 = vmul.f32 %v6633_v24, %v484_v3  ;;  %v664_v24 = vor.u32 1.1754944e-38, %v663_v39  ;;  %v670_v3 = vmul.f32 %v8587_v50, %v669_v37 }
 0x1ea   : > { %15753 = vst [vmem:[#allocation28_spill] sm:$0xff] %v8623_v33  ;;  %v8634_v30 = vpop.eup %6644  ;;  %v3573_v46 = vsel %vm3571_vm10, %v3572_v58, %v3570_v32  ;;  %6650 = vrsqrt.f32 %v8617_v13  ;;  %v892_v7 = vlaneseq  ;;  %vm673_vm12 = vweird.f32 %v8587_v50 }
 0x1eb   : > { %v3588_v59 = vmul.f32 %v6641_v19, %v3587_v10  ;;  %v8651_v54 = vpop.eup %6646  ;;  %v683_v39 = vmul.f32 %v8634_v30, %v8563_v26  ;;  %v678_v10 = vand.u32 2147483648, %v8502_v44  ;;  %v665_v1 = vsel %vm8637_vm7, %v664_v24, %v660_v48  ;;  %vm8697_vm0 = vmor %vm672_vm11, %vm673_vm12 }
 0x1ec   : > { %15760 = vst [vmem:[#allocation31_spill] sm:$0xff] %v8651_v54  ;;  %v3578_v37 = vsub.f32 1.5, %v3577_v62  ;;  %vm487_vm13 = vcmp.eq.f32.partialorder %v8476_v57, inf  ;;  %v8674_v0 = vmul.f32 0.1, %v3573_v46  ;;  %vm8677_vm14 = vcmp.eq.f32.partialorder %v676_v56, 8.507059e+37 }
 0x1ed   : > { %v3589_v17 = vmul.f32 0.5, %v3588_v59  ;;  %v486_v59 = vmul.f32 %v485_v6, %v8476_v57  ;;  %v671_v6 = vadd.f32 %v8587_v50, %v670_v3  ;;  %v684_v32 = vsub.f32 1.0, %v683_v39  ;;  %v8684_v48 = vpop.xlane.xlu2 %432 }
 0x1ee   : > { %3542 = vmax.xlane.f32.xlu1 %v8127_v40  ;;  %v679_v35 = vor.u32 1.1754944e-38, %v678_v10  ;;  %v490_v24 = vand.u32 2147483648, %v8476_v57  ;;  %v666_v58 = vmul.f32 -1.0, %v665_v1  ;;  %vm489_vm15 = vcmp.eq.f32.partialorder %v8476_v57, 0.0 }
 0x1ef   : > { %v3590_v41 = vsub.f32 1.5, %v3589_v17  ;;  %v8687_v3 = vshrl.u32 %v892_v7, 7  ;;  %v8689_v39 = vand.u32 127, %v892_v7  ;;  %v3579_v56 = vmul.f32 %v8567_v15, %v3578_v37 }
 0x1f0   : > { %v685_v7 = vmul.f32 %v8634_v30, %v684_v32  ;;  %vm3581_vm1 = vcmp.eq.f32.partialorder %v8428_v63, inf  ;;  %v675_v44 = vsel %vm8697_vm0, %v8587_v50, %v671_v6  ;;  %vm3583_vm2 = vcmp.eq.f32.partialorder %v8428_v63, 0.0 }
 0x1f1   : > { %v8665_v5 = vpop.xlane.xlu1 %3526  ;;  %v3591_v54 = vmul.f32 %v6641_v19, %v3590_v41  ;;  %v488_v19 = vsel %vm487_vm13, %v8476_v57, %v486_v59  ;;  %15763 = vst [vmem:[#allocation32_spill] sm:$0xff] %v8687_v3  ;;  %v8691_v59 = vpop.eup %6648  ;;  %vm3593_vm3 = vcmp.eq.f32.partialorder %v8542_v20, inf  ;;  %v1119_v37 = vmul.f32 %v8258_v55, %v666_v58 }
 0x1f2   : > { %6652 = vrsqrt.f32 %v8665_v5  ;;  %15764 = vst [vmem:[#allocation33_spill] sm:$0xff] %v8689_v39  ;;  %v491_v10 = vsel %vm489_vm15, %v490_v24, %v488_v19  ;;  %v8704_v46 = vpop.eup %6650  ;;  %v3580_v6 = vmul.f32 %v3579_v56, %v8428_v63  ;;  %v3596_v41 = vand.u32 2147483648, %v8542_v20 }
 0x1f3   : > { %v3592_v62 = vmul.f32 %v3591_v54, %v8542_v20  ;;  %v3769_v54 = vand.u32 2147483648, %v8641_v27  ;;  %6654 = vrcp.f32 %v8674_v0  ;;  %v8718_v19 = vmul.f32 0.1, %v491_v10 }
 0x1f4   : > { %6656 = vrsqrt.f32 %v8684_v48  ;;  %v680_v57 = vsel %vm8677_vm14, %v679_v35, %v675_v44  ;;  %vm688_vm4 = vweird.f32 %v8634_v30  ;;  %vm3595_vm5 = vcmp.eq.f32.partialorder %v8542_v20, 0.0 }
 0x1f5   : > { %v3594_v32 = vsel %vm3593_vm3, %v8542_v20, %v3592_v62  ;;  %v8723_v50 = vor.u32 1.1754944e-38, %v3769_v54  ;;  %v493_v55 = vmul.f32 %v8704_v46, %v8617_v13  ;;  %v8734_v58 = vpop.xlane.xlu0 %434  ;;  %v3759_v62 = vmul.f32 %v8691_v59, %v8641_v27 }
 0x1f6   : > { %438 = vmax.xlane.f32.xlu1 %v8045_v16  ;;  %v686_v16 = vadd.f32 %v8634_v30, %v685_v7  ;;  %v693_v54 = vand.u32 2147483648, %v8563_v26  ;;  %v3597_v56 = vsel %vm3595_vm5, %v3596_v41, %v3594_v32  ;;  %vm687_vm6 = vweird.f32 %v8563_v26 }
 0x1f7   : > { %v691_v35 = vand.u32 2147483647, %v8563_v26  ;;  %v1135_v20 = vmul.f32 1.442695, %v1119_v37  ;;  %vm8749_vm7 = vmor %vm687_vm6, %vm688_vm4  ;;  %v3582_v32 = vsel %vm3581_vm1, %v8428_v63, %v3580_v6  ;;  %v681_v26 = vmul.f32 -1.0, %v680_v57 }
 0x1f8   : > { %v6653_v1 = vpop.eup %6652  ;;  %v3584_v52 = vand.u32 2147483648, %v8428_v63  ;;  %v8758_v37 = vmul.f32 0.1, %v3597_v56  ;;  %v494_v29 = vmul.f32 %v8704_v46, %v493_v55  ;;  %v690_v33 = vsel %vm8749_vm7, %v8634_v30, %v686_v16 }
 0x1f9   : > { %v8715_v15 = vpop.xlane.xlu1 %422  ;;  %v3599_v24 = vmul.f32 %v6653_v1, %v8665_v5  ;;  %v8739_v17 = vpop.eup %6654  ;;  %v3760_v40 = vsub.f32 1.0, %v3759_v62  ;;  %v694_v61 = vor.u32 1.1754944e-38, %v693_v54  ;;  %vm692_vm8 = vcmp.eq.f32.partialorder %v691_v35, 8.507059e+37 }
 0x1fa   : > { %6658 = vrsqrt.f32 %v8715_v15  ;;  %v8745_v7 = vpop.eup %6656  ;;  %v3774_v57 = vmul.f32 %v8739_v17, %v8674_v0  ;;  %v3585_v56 = vsel %vm3583_vm2, %v3584_v52, %v3582_v32  ;;  %vm15711_vm9 = vcmp.eq.s32.totalorder %v8687_v3, %v8689_v39 }
 0x1fb   : > { %v3600_v10 = vmul.f32 %v6653_v1, %v3599_v24  ;;  %6660 = vrcp.f32 %v8718_v19  ;;  %v565_v55 = vmul.f32 %v8745_v7, %v8684_v48  ;;  %vm3764_vm10 = vweird.f32 %v8691_v59 }
 0x1fc   : > { %6662 = vrsqrt.f32 %v8734_v58  ;;  %v695_v30 = vsel %vm692_vm8, %v694_v61, %v690_v33  ;;  %v1120_v62 = vmul.f32 %v8270_v49, %v681_v26  ;;  %v495_v52 = vmul.f32 0.5, %v494_v29  ;;  %v15769_v26 = vld [vmem:[#allocation10_spill] sm:$0xff] }
 0x1fd   : > { %v3601_v24 = vmul.f32 0.5, %v3600_v10  ;;  %6664 = vpow2.f32 %v1135_v20  ;;  %v3761_v32 = vmul.f32 %v8691_v59, %v3760_v40  ;;  %vm3763_vm11 = vweird.f32 %v8641_v27 }
 0x1fe   : > { %3544 = vmax.xlane.f32.xlu1 %v8141_v2  ;;  %6666 = vrcp.f32 %v8758_v37  ;;  %v8786_v61 = vmul.f32 0.1, %v3585_v56  ;;  %v3775_v33 = vsub.f32 1.0, %v3774_v57  ;;  %vm3605_vm12 = vcmp.eq.f32.partialorder %v8665_v5, inf  ;;  %vm8833_vm14 = vmor %vm3763_vm11, %vm3764_vm10 }
 0x1ff   : > { %v3602_v21 = vsub.f32 1.5, %v3601_v24  ;;  %v696_v24 = vmul.f32 -1.0, %v695_v30  ;;  %v3608_v40 = vand.u32 2147483648, %v8665_v5  ;;  %v496_v35 = vsub.f32 1.5, %v495_v52 }
 0x200   : > { %v6659_v41 = vpop.eup %6658  ;;  %v8799_v30 = vadd.f32 %v8691_v59, %v3761_v32  ;;  %6668 = vrcp.f32 %v8786_v61  ;;  %vm3607_vm13 = vcmp.eq.f32.partialorder %v8665_v5, 0.0  ;;  %vm499_vm15 = vcmp.eq.f32.partialorder %v8617_v13, inf }
 0x201   : > { %v505_v6 = vmul.f32 %v6659_v41, %v8715_v15  ;;  %v8765_v10 = vpop.xlane.xlu1 %3528  ;;  %v3603_v16 = vmul.f32 %v6653_v1, %v3602_v21  ;;  %v8777_v54 = vpop.eup %6660  ;;  %v3784_v21 = vand.u32 2147483648, %v8674_v0  ;;  %v566_v1 = vmul.f32 %v8745_v7, %v565_v55 }
 0x202   : > { %v8781_v44 = vpop.eup %6662  ;;  %v698_v29 = vmul.f32 %v8777_v54, %v8718_v19  ;;  %v1121_v31 = vmul.f32 %v8171_v9, %v696_v24  ;;  %vm501_vm0 = vcmp.eq.f32.partialorder %v8617_v13, 0.0  ;;  %vm511_vm1 = vcmp.eq.f32.partialorder %v8715_v15, inf }
 0x203   : > { %v506_v63 = vmul.f32 %v6659_v41, %v505_v6  ;;  %v3604_v49 = vmul.f32 %v3603_v16, %v8665_v5  ;;  %v1137_v6 = vmul.f32 1.442695, %v1120_v62  ;;  %v577_v57 = vmul.f32 %v8781_v44, %v8734_v58  ;;  %v6665_v55 = vpop.eup %6664 }
 0x204   : > { %v8807_v62 = vpop.eup %6666  ;;  %v567_v52 = vmul.f32 0.5, %v566_v1  ;;  %v699_v32 = vsub.f32 1.0, %v698_v29  ;;  %v1139_v9 = vmul.f32 1.442695, %v1121_v31  ;;  %v514_v29 = vand.u32 2147483648, %v8715_v15 }
 0x205   : > { %v507_v20 = vmul.f32 0.5, %v506_v63  ;;  %v3606_v56 = vsel %vm3605_vm12, %v8665_v5, %v3604_v49  ;;  %v8801_v63 = vor.u32 1.1754944e-38, %v3784_v21  ;;  %v8816_v21 = vadd.s32 8, %v8687_v3 }
 0x206   : > { %440 = vmax.xlane.f32.xlu1 %v15769_v26  ;;  %v3609_v49 = vsel %vm3607_vm13, %v3608_v40, %v3606_v56  ;;  %v497_v5 = vmul.f32 %v8704_v46, %v496_v35  ;;  %v578_v25 = vmul.f32 %v8781_v44, %v577_v57  ;;  %6670 = vpow2.f32 %v1137_v6  ;;  %v8841_v1 = vpop.eup %6668 }
 0x207   : > { %v508_v16 = vsub.f32 1.5, %v507_v20  ;;  %v8811_v20 = vmul.f32 %v8739_v17, %v3775_v33  ;;  %v8813_v45 = vmul.f32 0.1, %v3609_v49  ;;  %15770 = vst [vmem:[#allocation34_spill] sm:$0xff] %v8816_v21  ;;  %v8827_v33 = vsel %vm15711_vm9, 0.0, %v6665_v55 }
 0x208   : > { %15771 = vst [vmem:[#allocation35_spill] sm:$0xff] %v8827_v33  ;;  %v502_v35 = vand.u32 2147483648, %v8617_v13  ;;  %v568_v31 = vsub.f32 1.5, %v567_v52  ;;  %v700_v24 = vmul.f32 %v8777_v54, %v699_v32  ;;  %vm15695_vm2 = vcmp.eq.s32.totalorder %v8816_v21, %v8689_v39 }
 0x209   : > { %v8805_v26 = vpop.xlane.xlu1 %424  ;;  %v509_v42 = vmul.f32 %v6659_v41, %v508_v16  ;;  %v3804_v41 = vmul.f32 %v8807_v62, %v8758_v37  ;;  %6672 = vrcp.f32 %v8813_v45  ;;  %v498_v6 = vmul.f32 %v497_v5, %v8617_v13 }
 0x20a   : > { %v579_v56 = vmul.f32 0.5, %v578_v25  ;;  %vm513_vm3 = vcmp.eq.f32.partialorder %v8715_v15, 0.0  ;;  %vm571_vm4 = vcmp.eq.f32.partialorder %v8684_v48, inf  ;;  %v8858_v52 = vadd.s32 16, %v8687_v3 }
 0x20b   : > { %v510_v2 = vmul.f32 %v509_v42, %v8715_v15  ;;  %v3805_v16 = vsub.f32 1.0, %v3804_v41  ;;  %6674 = vpow2.f32 %v1139_v9  ;;  %v3789_v40 = vmul.f32 %v8841_v1, %v8786_v61 }
 0x20c   : > { %15774 = vst [vmem:[#allocation36_spill] sm:$0xff] %v8858_v52  ;;  %v6671_v32 = vpop.eup %6670  ;;  %v706_v25 = vand.u32 2147483647, %v8718_v19  ;;  %v701_v41 = vadd.f32 %v8777_v54, %v700_v24  ;;  %vm703_vm5 = vweird.f32 %v8777_v54  ;;  %v708_v9 = vand.u32 2147483648, %v8718_v19 }
 0x20d   : > { %v512_v57 = vsel %vm511_vm1, %v8715_v15, %v510_v2  ;;  %v569_v2 = vmul.f32 %v8745_v7, %v568_v31  ;;  %6676 = vrsqrt.f32 %v8805_v26  ;;  %vm702_vm6 = vweird.f32 %v8718_v19 }
 0x20e   : > { %3546 = vmax.xlane.f32.xlu1 %v8155_v34  ;;  %v515_v55 = vsel %vm513_vm3, %v514_v29, %v512_v57  ;;  %v500_v29 = vsel %vm499_vm15, %v8617_v13, %v498_v6  ;;  %vm573_vm7 = vcmp.eq.f32.partialorder %v8684_v48, 0.0  ;;  %v574_v7 = vand.u32 2147483648, %v8684_v48  ;;  %vm8886_vm10 = vmor %vm702_vm6, %vm703_vm5 }
 0x20f   : > { %v8866_v5 = vmul.f32 0.1, %v515_v55  ;;  %v8868_v15 = vpop.eup %6672  ;;  %v580_v31 = vsub.f32 1.5, %v579_v56  ;;  %v3806_v57 = vmul.f32 %v8807_v62, %v3805_v16  ;;  %vm15693_vm8 = vcmp.eq.s32.totalorder %v8858_v52, %v8689_v39  ;;  %v15779_v16 = vld [vmem:[#allocation5_spill] sm:$0xff] }
 0x210   : > { %v3819_v24 = vmul.f32 %v8868_v15, %v8813_v45  ;;  %v3790_v19 = vsub.f32 1.0, %v3789_v40  ;;  %vm8890_vm11 = vcmp.eq.f32.partialorder %v706_v25, 8.507059e+37  ;;  %v570_v56 = vmul.f32 %v569_v2, %v8684_v48 }
 0x211   : > { %v8860_v49 = vpop.xlane.xlu1 %3530  ;;  %6678 = vrcp.f32 %v8866_v5  ;;  %v6675_v42 = vpop.eup %6674  ;;  %v709_v34 = vor.u32 1.1754944e-38, %v708_v9  ;;  %v3812_v8 = vand.u32 2147483647, %v8758_v37  ;;  %v3814_v40 = vand.u32 2147483648, %v8758_v37 }
 0x212   : > { %6680 = vrsqrt.f32 %v8765_v10  ;;  %v705_v43 = vsel %vm8886_vm10, %v8777_v54, %v701_v41  ;;  %vm3809_vm12 = vweird.f32 %v8807_v62  ;;  %v503_v25 = vsel %vm501_vm0, %v502_v35, %v500_v29 }
 0x213   : > { %v581_v2 = vmul.f32 %v8781_v44, %v580_v31  ;;  %v6677_v9 = vpop.eup %6676  ;;  %v3807_v11 = vadd.f32 %v8807_v62, %v3806_v57  ;;  %v3820_v51 = vsub.f32 1.0, %v3819_v24  ;;  %v710_v54 = vsel %vm8890_vm11, %v709_v34, %v705_v43 }
 0x214   : > { %6682 = vrsqrt.f32 %v8860_v49  ;;  %v572_v44 = vsel %vm571_vm4, %v8684_v48, %v570_v56  ;;  %v711_v35 = vmul.f32 -1.0, %v710_v54  ;;  %v8925_v41 = vsel %vm15695_vm2, 0.0, %v6671_v32 }
 0x215   : > { %15781 = vst [vmem:[#allocation38_spill] sm:$0xff] %v8925_v41  ;;  %v8930_v34 = vmul.f32 %v8841_v1, %v3790_v19  ;;  %vm3808_vm13 = vweird.f32 %v8758_v37  ;;  %vm3813_vm15 = vcmp.eq.f32.partialorder %v3812_v8, 8.507059e+37  ;;  %vm583_vm0 = vcmp.eq.f32.partialorder %v8734_v58, inf }
 0x216   : > { %442 = vmax.xlane.f32.xlu1 %v15779_v16  ;;  %v8909_v16 = vsel %vm15693_vm8, 0.0, %v6675_v42  ;;  %v517_v42 = vmul.f32 %v6677_v9, %v8805_v26  ;;  %vm3810_vm1 = vmor %vm3808_vm13, %vm3809_vm12  ;;  %v3815_v31 = vor.u32 1.1754944e-38, %v3814_v40  ;;  %v8938_v57 = vmul.f32 0.1, %v503_v25 }
 0x217   : > { %15780 = vst [vmem:[#allocation37_spill] sm:$0xff] %v8909_v16  ;;  %1187 = vadd.xlane.f32.xlu2 %v8909_v16  ;;  %v8927_v29 = vpop.eup %6678  ;;  %v1122_v24 = vmul.f32 %v8241_v47, %v711_v35  ;;  %v575_v19 = vsel %vm573_vm7, %v574_v7, %v572_v44  ;;  %v3821_v55 = vmul.f32 %v8868_v15, %v3820_v51  ;;  %v3827_v47 = vand.u32 2147483647, %v8813_v45 }
 0x218   : > { %v8934_v43 = vpop.eup %6680  ;;  %v518_v32 = vmul.f32 %v6677_v9, %v517_v42  ;;  %v582_v8 = vmul.f32 %v581_v2, %v8734_v58  ;;  %v3811_v37 = vsel %vm3810_vm1, %v8807_v62, %v3807_v11  ;;  %v728_v6 = vmul.f32 %v8927_v29, %v8866_v5 }
 0x219   : > { %v8916_v13 = vpop.xlane.xlu1 %426  ;;  %v1141_v54 = vmul.f32 1.442695, %v1122_v24  ;;  %v3816_v40 = vsel %vm3813_vm15, %v3815_v31, %v3811_v37  ;;  %v3829_v48 = vand.u32 2147483648, %v8813_v45  ;;  %v3611_v51 = vmul.f32 %v8934_v43, %v8765_v10 }
 0x21a   : > { %v519_v56 = vmul.f32 0.5, %v518_v32  ;;  %v6683_v25 = vpop.eup %6682  ;;  %v3817_v7 = vmul.f32 -1.0, %v3816_v40  ;;  %v8954_v11 = vadd.s32 24, %v8687_v3  ;;  %v3822_v44 = vadd.f32 %v8868_v15, %v3821_v55 }
 0x21b   : > { %6684 = vpow2.f32 %v1141_v54  ;;  %v3623_v62 = vmul.f32 %v6683_v25, %v8860_v49  ;;  %vm3824_vm3 = vweird.f32 %v8868_v15  ;;  %vm585_vm4 = vcmp.eq.f32.partialorder %v8734_v58, 0.0 }
 0x21c   : > { %v520_v2 = vsub.f32 1.5, %v519_v56  ;;  %15782 = vst [vmem:[#allocation39_spill] sm:$0xff] %v8954_v11  ;;  %6686 = vrcp.f32 %v8938_v57  ;;  %v4193_v42 = vmul.f32 %v8254_v60, %v3817_v7  ;;  %v729_v31 = vsub.f32 1.0, %v728_v6 }
 0x21d   : > { %v3624_v24 = vmul.f32 %v6683_v25, %v3623_v62  ;;  %v8965_v37 = vmul.f32 0.1, %v575_v19  ;;  %vm3823_vm5 = vweird.f32 %v8813_v45  ;;  %v584_v55 = vsel %vm583_vm0, %v8734_v58, %v582_v8 }
 0x21e   : > { %3548 = vmax.xlane.f32.xlu1 %v8057_v28  ;;  %v521_v32 = vmul.f32 %v6677_v9, %v520_v2  ;;  %v4212_v56 = vmul.f32 1.442695, %v4193_v42  ;;  %vm8971_vm6 = vcmp.eq.f32.partialorder %v3827_v47, 8.507059e+37  ;;  %v3830_v60 = vor.u32 1.1754944e-38, %v3829_v48  ;;  %vm8980_vm10 = vmor %vm3823_vm5, %vm3824_vm3 }
 0x21f   : > { %v3612_v6 = vmul.f32 %v8934_v43, %v3611_v51  ;;  %vm15589_vm7 = vcmp.eq.s32.totalorder %v8954_v11, %v8689_v39  ;;  %vm523_vm11 = vcmp.eq.f32.partialorder %v8805_v26, inf  ;;  %v3625_v19 = vmul.f32 0.5, %v3624_v24 }
 0x220   : > { %v522_v45 = vmul.f32 %v521_v32, %v8805_v26  ;;  %v730_v40 = vmul.f32 %v8927_v29, %v729_v31  ;;  %v526_v47 = vand.u32 2147483648, %v8805_v26  ;;  %v3826_v48 = vsel %vm8980_vm10, %v8868_v15, %v3822_v44 }
 0x221   : > { %v8962_v35 = vpop.xlane.xlu1 %3532  ;;  %v6685_v8 = vpop.eup %6684  ;;  %vm525_vm12 = vcmp.eq.f32.partialorder %v8805_v26, 0.0  ;;  %v3626_v62 = vsub.f32 1.5, %v3625_v19  ;;  %v586_v31 = vand.u32 2147483648, %v8734_v58  ;;  %v3613_v32 = vmul.f32 0.5, %v3612_v6 }
 0x222   : > { %6688 = vrsqrt.f32 %v8962_v35  ;;  %v8993_v51 = vpop.eup %6686  ;;  %v524_v7 = vsel %vm523_vm11, %v8805_v26, %v522_v45  ;;  %v9000_v2 = vsel %vm15589_vm7, 0.0, %v6685_v8  ;;  %v3831_v15 = vsel %vm8971_vm6, %v3830_v60, %v3826_v48 }
 0x223   : > { %6690 = vpow2.f32 %v4212_v56  ;;  %15787 = vst [vmem:[#allocation40_spill] sm:$0xff] %v9000_v2  ;;  %v527_v24 = vsel %vm525_vm12, %v526_v47, %v524_v7  ;;  %1189 = vadd.xlane.f32.xlu0 %v9000_v2  ;;  %v15788_v44 = vand.u32 2147483647, %v8641_v27  ;;  %v3627_v9 = vmul.f32 %v6683_v25, %v3626_v62 }
 0x224   : > { %6692 = vrsqrt.f32 %v8916_v13  ;;  %v9015_v56 = vmul.f32 0.1, %v527_v24  ;;  %v587_v45 = vsel %vm585_vm4, %v586_v31, %v584_v55  ;;  %v731_v54 = vadd.f32 %v8927_v29, %v730_v40  ;;  %v15794_v31 = vld [vmem:[#allocation17_spill] sm:$0xff] }
 0x225   : > { %vm9010_vm13 = vcmp.eq.f32.partialorder %v15788_v44, 8.507059e+37  ;;  %6694 = vrcp.f32 %v8965_v37  ;;  %vm733_vm15 = vweird.f32 %v8927_v29  ;;  %v3832_v27 = vmul.f32 -1.0, %v3831_v15 }
 0x226   : > { %1183 = vadd.xlane.f32.xlu1 %v8827_v33  ;;  %v9027_v8 = vmul.f32 %v8993_v51, %v8938_v57  ;;  %vm732_vm0 = vweird.f32 %v8866_v5  ;;  %v736_v25 = vand.u32 2147483647, %v8866_v5  ;;  %v738_v47 = vand.u32 2147483648, %v8866_v5 }
 0x227   : > { %v3614_v55 = vsub.f32 1.5, %v3613_v32  ;;  %6696 = vrcp.f32 %v9015_v56  ;;  %v3628_v40 = vmul.f32 %v3627_v9, %v8860_v49  ;;  %v9041_v7 = vmul.f32 0.1, %v587_v45  ;;  %vm9043_vm1 = vmor %vm732_vm0, %vm733_vm15 }
 0x228   : > { %v9002_v42 = vpop.eup %6688  ;;  %vm3629_vm3 = vcmp.eq.f32.partialorder %v8860_v49, inf  ;;  %v4194_v32 = vmul.f32 %v15794_v31, %v3832_v27  ;;  %v3632_v15 = vand.u32 2147483648, %v8860_v49  ;;  %v735_v44 = vsel %vm9043_vm1, %v8927_v29, %v731_v54 }
 0x229   : > { %v3635_v6 = vmul.f32 %v9002_v42, %v8962_v35  ;;  %v9023_v60 = vpop.xlane.xlu1 %428  ;;  %v6691_v19 = vpop.eup %6690  ;;  %v3630_v24 = vsel %vm3629_vm3, %v8860_v49, %v3628_v40  ;;  %v739_v45 = vor.u32 1.1754944e-38, %v738_v47  ;;  %vm3631_vm4 = vcmp.eq.f32.partialorder %v8860_v49, 0.0 }
 0x22a   : > { %v9032_v58 = vpop.eup %6692  ;;  %v9039_v48 = vsel %vm15589_vm7, 0.0, %v6691_v19  ;;  %6698 = vrsqrt.f32 %v9023_v60  ;;  %vm737_vm5 = vcmp.eq.f32.partialorder %v736_v25, 8.507059e+37  ;;  %v3615_v19 = vmul.f32 %v8934_v43, %v3614_v55 }
 0x22b   : > { %15791 = vst [vmem:[#allocation41_spill] sm:$0xff] %v9039_v48  ;;  %4260 = vadd.xlane.f32.xlu2 %v9039_v48  ;;  %v3636_v5 = vmul.f32 %v9002_v42, %v3635_v6  ;;  %v9058_v9 = vpop.eup %6694  ;;  %v529_v6 = vmul.f32 %v9032_v58, %v8916_v13  ;;  %v3633_v40 = vsel %vm3631_vm4, %v3632_v15, %v3630_v24  ;;  %v4214_v31 = vmul.f32 1.442695, %v4194_v32 }
 0x22c   : > { %v9066_v11 = vadd.f32 %v8739_v17, %v8811_v20  ;;  %v723_v54 = vand.u32 2147483648, %v8938_v57  ;;  %v740_v47 = vsel %vm737_vm5, %v739_v45, %v735_v44  ;;  %v9074_v49 = vadd.f32 %v8841_v1, %v8930_v34 }
 0x22d   : > { %v3637_v27 = vmul.f32 0.5, %v3636_v5  ;;  %v9070_v62 = vpop.eup %6696  ;;  %v15795_v25 = vand.u32 2147483648, %v8786_v61  ;;  %v15796_v20 = vsel %vm8833_vm14, %v8691_v59, %v8799_v30  ;;  %vm3779_vm6 = vweird.f32 %v8739_v17 }
 0x22e   : > { %1185 = vadd.xlane.f32.xlu1 %v8925_v41  ;;  %v3771_v5 = vsel %vm9010_vm13, %v8723_v50, %v15796_v20  ;;  %v714_v32 = vsub.f32 1.0, %v9027_v8  ;;  %6700 = vrcp.f32 %v9041_v7  ;;  %v9091_v34 = vmul.f32 0.1, %v3633_v40  ;;  %v15798_v40 = vld [vmem:[#allocation18_spill] sm:$0xff] }
 0x22f   : > { %v9078_v43 = vor.u32 1.1754944e-38, %v15795_v25  ;;  %v3638_v55 = vsub.f32 1.5, %v3637_v27  ;;  %v530_v24 = vmul.f32 %v9032_v58, %v529_v6  ;;  %v803_v46 = vmul.f32 %v9058_v9, %v8965_v37 }
 0x230   : > { %v9094_v15 = vpop.eup %6698  ;;  %v3616_v59 = vmul.f32 %v3615_v19, %v8765_v10  ;;  %6702 = vpow2.f32 %v4214_v31  ;;  %v741_v30 = vmul.f32 -1.0, %v740_v47  ;;  %vm3778_vm14 = vweird.f32 %v8674_v0 }
 0x231   : > { %v9099_v50 = vpop.xlane.xlu1 %3534  ;;  %v9103_v8 = vor.u32 1.1754944e-38, %v723_v54  ;;  %v743_v44 = vmul.f32 %v9070_v62, %v9015_v56  ;;  %v9108_v45 = vadd.s32 32, %v8687_v3  ;;  %v3639_v27 = vmul.f32 %v9002_v42, %v3638_v55  ;;  %vm9163_vm1 = vmor %vm3778_vm14, %vm3779_vm6 }
 0x232   : > { %v541_v19 = vmul.f32 %v9094_v15, %v9023_v60  ;;  %v1124_v31 = vmul.f32 %v15798_v40, %v741_v30  ;;  %vm3617_vm10 = vcmp.eq.f32.partialorder %v8765_v10, inf  ;;  %6704 = vrcp.f32 %v9091_v34 }
 0x233   : > { %15797 = vst [vmem:[#allocation17_spill] sm:$0xff] %v9108_v45  ;;  %v531_v54 = vmul.f32 0.5, %v530_v24  ;;  %v715_v25 = vmul.f32 %v8993_v51, %v714_v32  ;;  %v804_v20 = vsub.f32 1.0, %v803_v46  ;;  %v3618_v26 = vsel %vm3617_vm10, %v8765_v10, %v3616_v59 }
 0x234   : > { %v542_v6 = vmul.f32 %v9094_v15, %v541_v19  ;;  %v9121_v42 = vpop.eup %6700  ;;  %v15799_v55 = vand.u32 2147483647, %v8674_v0  ;;  %vm3619_vm12 = vcmp.eq.f32.partialorder %v8765_v10, 0.0  ;;  %v3620_v40 = vand.u32 2147483648, %v8765_v10 }
 0x235   : > { %v744_v24 = vsub.f32 1.0, %v743_v44  ;;  %vm15688_vm13 = vcmp.eq.s32.totalorder %v9108_v45, %v8689_v39  ;;  %v3640_v46 = vmul.f32 %v3639_v27, %v8962_v35  ;;  %v1145_v19 = vmul.f32 1.442695, %v1124_v31 }
 0x236   : > { %vm9125_vm11 = vcmp.eq.f32.partialorder %v15799_v55, 8.507059e+37  ;;  %v6703_v32 = vpop.eup %6702  ;;  %v543_v59 = vmul.f32 0.5, %v542_v6  ;;  %6706 = vrsqrt.f32 %v9099_v50  ;;  %v3621_v47 = vsel %vm3619_vm12, %v3620_v40, %v3618_v26 }
 0x237   : > { %v532_v55 = vsub.f32 1.5, %v531_v54  ;;  %v9138_v29 = vsel %vm15688_vm13, 0.0, %v6703_v32  ;;  %v3772_v41 = vmul.f32 -1.0, %v3771_v5  ;;  %v9141_v10 = vadd.f32 %v8993_v51, %v715_v25 }
 0x238   : > { %15802 = vst [vmem:[#allocation18_spill] sm:$0xff] %v9138_v29  ;;  %4262 = vadd.xlane.f32.xlu0 %v9138_v29  ;;  %v544_v44 = vsub.f32 1.5, %v543_v59  ;;  %v9145_v27 = vadd.s32 40, %v8687_v3  ;;  %6708 = vpow2.f32 %v1145_v19  ;;  %v9147_v6 = vpop.eup %6704  ;;  %vm3794_vm15 = vweird.f32 %v8841_v1 }
 0x239   : > { %v9151_v26 = vmul.f32 %v9058_v9, %v804_v20  ;;  %v9155_v5 = vmul.f32 %v9121_v42, %v9041_v7  ;;  %v745_v31 = vmul.f32 %v9070_v62, %v744_v24  ;;  %vm3641_vm0 = vcmp.eq.f32.partialorder %v8962_v35, inf  ;;  %v9173_v24 = vpop.xlane.xlu1 %430 }
 0x23a   : > { %15803 = vst [vmem:[#allocation42_spill] sm:$0xff] %v9145_v27  ;;  %v9167_v25 = vmul.f32 0.1, %v3621_v47  ;;  %vm535_vm3 = vcmp.eq.f32.partialorder %v8916_v13, inf  ;;  %v3642_v20 = vsel %vm3641_vm0, %v8962_v35, %v3640_v46  ;;  %vm3643_vm4 = vcmp.eq.f32.partialorder %v8962_v35, 0.0 }
 0x23b   : > { %v3644_v40 = vand.u32 2147483648, %v8962_v35  ;;  %vm3793_vm5 = vweird.f32 %v8786_v61  ;;  %v533_v0 = vmul.f32 %v9032_v58, %v532_v55  ;;  %v4190_v32 = vmul.f32 %v8334_v18, %v3772_v41 }
 0x23c   : > { %6710 = vrsqrt.f32 %v9173_v24  ;;  %v3781_v47 = vsel %vm9163_vm1, %v8739_v17, %v9066_v11  ;;  %v9183_v46 = vpop.eup %6706  ;;  %vm748_vm6 = vweird.f32 %v9070_v62  ;;  %v3849_v35 = vmul.f32 %v9147_v6, %v9091_v34 }
 0x23d   : > { %v545_v59 = vmul.f32 %v9094_v15, %v544_v44  ;;  %vm15590_vm14 = vcmp.eq.s32.totalorder %v9145_v27, %v8689_v39  ;;  %v746_v18 = vadd.f32 %v9070_v62, %v745_v31  ;;  %v3645_v41 = vsel %vm3643_vm4, %v3644_v40, %v3642_v20 }
 0x23e   : > { %v3647_v58 = vmul.f32 %v9183_v46, %v9099_v50  ;;  %v4206_v19 = vmul.f32 1.442695, %v4190_v32  ;;  %v6709_v17 = vpop.eup %6708  ;;  %vm718_vm10 = vweird.f32 %v8993_v51  ;;  %vm747_vm12 = vweird.f32 %v9015_v56 }
 0x23f   : > { %v751_v11 = vand.u32 2147483647, %v9015_v56  ;;  %v753_v55 = vand.u32 2147483648, %v9015_v56  ;;  %v3786_v15 = vsel %vm9125_vm11, %v8801_v63, %v3781_v47  ;;  %v15806_v44 = vand.u32 2147483647, %v8786_v61  ;;  %vm9217_vm11 = vmor %vm747_vm12, %vm748_vm6 }
 0x240   : > { %v534_v54 = vmul.f32 %v533_v0, %v8916_v13  ;;  %v9211_v20 = vsel %vm15590_vm14, 0.0, %v6709_v17  ;;  %v3648_v40 = vmul.f32 %v9183_v46, %v3647_v58  ;;  %6712 = vpow2.f32 %v4206_v19 }
 0x241   : > { %vm9203_vm0 = vcmp.eq.f32.partialorder %v15806_v44, 8.507059e+37  ;;  %15809 = vst [vmem:[#allocation43_spill] sm:$0xff] %v9211_v20  ;;  %vm717_vm1 = vweird.f32 %v8938_v57  ;;  %v3850_v56 = vsub.f32 1.0, %v3849_v35  ;;  %vm537_vm4 = vcmp.eq.f32.partialorder %v8916_v13, 0.0  ;;  %1193 = vadd.xlane.f32.xlu2 %v9211_v20 }
 0x242   : > { %v9222_v30 = vmul.f32 0.1, %v3645_v41  ;;  %v546_v0 = vmul.f32 %v545_v59, %v9023_v60  ;;  %v9226_v32 = vpop.eup %6710  ;;  %v538_v47 = vand.u32 2147483648, %v8916_v13  ;;  %v3649_v58 = vmul.f32 0.5, %v3648_v40 }
 0x243   : > { %v3787_v19 = vmul.f32 -1.0, %v3786_v15  ;;  %v750_v17 = vsel %vm9217_vm11, %v9070_v62, %v746_v18  ;;  %6714 = vrcp.f32 %v9167_v25  ;;  %vm752_vm6 = vcmp.eq.f32.partialorder %v751_v11, 8.507059e+37  ;;  %v9247_v11 = vpop.xlane.xlu1 %3536  ;;  %vm9253_vm11 = vmor %vm3793_vm5, %vm3794_vm15 }
 0x244   : > { %v754_v35 = vor.u32 1.1754944e-38, %v753_v55  ;;  %vm547_vm12 = vcmp.eq.f32.partialorder %v9023_v60, inf  ;;  %v15812_v59 = vand.u32 2147483647, %v8938_v57  ;;  %v536_v15 = vsel %vm535_vm3, %v8916_v13, %v534_v54  ;;  %vm9290_vm5 = vmor %vm717_vm1, %vm718_vm10 }
 0x245   : > { %vm549_vm14 = vcmp.eq.f32.partialorder %v9023_v60, 0.0  ;;  %v553_v62 = vmul.f32 %v9226_v32, %v9173_v24  ;;  %v4191_v18 = vmul.f32 %v8494_v23, %v3787_v19  ;;  %v3851_v44 = vmul.f32 %v9147_v6, %v3850_v56 }
 0x246   : > { %vm9236_vm7 = vcmp.eq.f32.partialorder %v15812_v59, 8.507059e+37  ;;  %6716 = vrcp.f32 %v9222_v30  ;;  %v548_v54 = vsel %vm547_vm12, %v9023_v60, %v546_v0  ;;  %v755_v40 = vsel %vm752_vm6, %v754_v35, %v750_v17  ;;  %v6713_v63 = vpop.eup %6712 }
 0x247   : > { %v3650_v59 = vsub.f32 1.5, %v3649_v58  ;;  %v554_v23 = vmul.f32 %v9226_v32, %v553_v62  ;;  %v4208_v19 = vmul.f32 1.442695, %v4191_v18  ;;  %v3796_v61 = vsel %vm9253_vm11, %v8841_v1, %v9074_v49 }
 0x248   : > { %v550_v20 = vand.u32 2147483648, %v9023_v60  ;;  %v9269_v56 = vsel %vm15711_vm9, 0.0, %v6713_v63  ;;  %v756_v29 = vmul.f32 -1.0, %v755_v40  ;;  %6718 = vrsqrt.f32 %v9247_v11 }
 0x249   : > { %vm3853_vm15 = vweird.f32 %v9091_v34  ;;  %vm3854_vm3 = vweird.f32 %v9147_v6  ;;  %v539_v0 = vsel %vm537_vm4, %v538_v47, %v536_v15  ;;  %4254 = vadd.xlane.f32.xlu1 %v9269_v56  ;;  %6720 = vpow2.f32 %v4208_v19  ;;  %v9277_v1 = vpop.eup %6714 }
 0x24a   : > { %v3852_v49 = vadd.f32 %v9147_v6, %v3851_v44  ;;  %v551_v58 = vsel %vm549_vm14, %v550_v20, %v548_v54  ;;  %v1125_v17 = vmul.f32 %v8344_v38, %v756_v29  ;;  %v3801_v35 = vsel %vm9203_vm0, %v9078_v43, %v3796_v61  ;;  %vm9312_vm14 = vmor %vm3853_vm15, %vm3854_vm3 }
 0x24b   : > { %v3857_v47 = vand.u32 2147483647, %v9091_v34  ;;  %v3859_v15 = vand.u32 2147483648, %v9091_v34  ;;  %v3651_v60 = vmul.f32 %v9183_v46, %v3650_v59  ;;  %v555_v20 = vmul.f32 0.5, %v554_v23  ;;  %v9329_v23 = vpop.xlane.xlu1 %3538 }
 0x24c   : > { %v9297_v38 = vpop.eup %6716  ;;  %v9299_v29 = vmul.f32 0.1, %v539_v0  ;;  %v1147_v43 = vmul.f32 1.442695, %v1125_v17  ;;  %v3802_v31 = vmul.f32 -1.0, %v3801_v35  ;;  %v720_v57 = vsel %vm9290_vm5, %v8993_v51, %v9141_v10 }
 0x24d   : > { %v819_v62 = vsub.f32 1.0, %v9155_v5  ;;  %v3834_v18 = vmul.f32 %v9277_v1, %v9167_v25  ;;  %v9316_v55 = vmul.f32 0.1, %v551_v58  ;;  %v9319_v44 = vadd.s32 48, %v8687_v3 }
 0x24e   : > { %v6719_v54 = vpop.eup %6718  ;;  %6722 = vpow2.f32 %v1147_v43  ;;  %v4192_v51 = vmul.f32 %v8559_v36, %v3802_v31  ;;  %v3856_v10 = vsel %vm9312_vm14, %v9147_v6, %v3852_v49  ;;  %v725_v34 = vsel %vm9236_vm7, %v9103_v8, %v720_v57 }
 0x24f   : > { %15821 = vst [vmem:[#allocation44_spill] sm:$0xff] %v9319_v44  ;;  %v6721_v5 = vpop.eup %6720  ;;  %vm3858_vm10 = vcmp.eq.f32.partialorder %v3857_v47, 8.507059e+37  ;;  %v3860_v40 = vor.u32 1.1754944e-38, %v3859_v15  ;;  %v3652_v63 = vmul.f32 %v3651_v60, %v9099_v50  ;;  %v556_v59 = vsub.f32 1.5, %v555_v20 }
 0x250   : > { %6724 = vrcp.f32 %v9299_v29  ;;  %vm3653_vm0 = vcmp.eq.f32.partialorder %v9099_v50, inf  ;;  %v9336_v36 = vsel %vm15695_vm2, 0.0, %v6721_v5  ;;  %v3659_v6 = vmul.f32 %v6719_v54, %v9247_v11 }
 0x251   : > { %15822 = vst [vmem:[#allocation45_spill] sm:$0xff] %v9336_v36  ;;  %v3864_v8 = vmul.f32 %v9297_v38, %v9222_v30  ;;  %4256 = vadd.xlane.f32.xlu1 %v9336_v36  ;;  %v4210_v41 = vmul.f32 1.442695, %v4192_v51  ;;  %v3861_v19 = vsel %vm3858_vm10, %v3860_v40, %v3856_v10  ;;  %v726_v61 = vmul.f32 -1.0, %v725_v34 }
 0x252   : > { %6726 = vrcp.f32 %v9316_v55  ;;  %vm15687_vm7 = vcmp.eq.s32.totalorder %v9319_v44, %v8689_v39  ;;  %v3660_v0 = vmul.f32 %v6719_v54, %v3659_v6  ;;  %v3862_v49 = vmul.f32 -1.0, %v3861_v19 }
 0x253   : > { %v3835_v58 = vsub.f32 1.0, %v3834_v18  ;;  %v3654_v17 = vsel %vm3653_vm0, %v9099_v50, %v3652_v63  ;;  %v557_v35 = vmul.f32 %v9226_v32, %v556_v59  ;;  %6728 = vpow2.f32 %v4210_v41 }
 0x254   : > { %v6723_v13 = vpop.eup %6722  ;;  %v3656_v47 = vand.u32 2147483648, %v9099_v50  ;;  %v3661_v15 = vmul.f32 0.5, %v3660_v0  ;;  %v4196_v60 = vmul.f32 %v8573_v4, %v3862_v49  ;;  %6730 = vrsqrt.f32 %v9329_v23 }
 0x255   : > { %v15823_v20 = vand.u32 2147483648, %v8965_v37  ;;  %vm3655_vm1 = vcmp.eq.f32.partialorder %v9099_v50, 0.0  ;;  %v9358_v31 = vsel %vm15687_vm7, 0.0, %v6723_v13  ;;  %v1123_v32 = vmul.f32 %v8413_v12, %v726_v61 }
 0x256   : > { %15824 = vst [vmem:[#allocation46_spill] sm:$0xff] %v9358_v31  ;;  %v9361_v57 = vpop.eup %6724  ;;  %v9365_v4 = vadd.f32 %v9058_v9, %v9151_v26  ;;  %v3842_v18 = vand.u32 2147483647, %v9167_v25  ;;  %v3865_v46 = vsub.f32 1.0, %v3864_v8  ;;  %v3657_v51 = vsel %vm3655_vm1, %v3656_v47, %v3654_v17  ;;  %1195 = vadd.xlane.f32.xlu0 %v9358_v31 }
 0x257   : > { %v9352_v43 = vor.u32 1.1754944e-38, %v15823_v20  ;;  %v9370_v50 = vmul.f32 %v9121_v42, %v819_v62  ;;  %v558_v10 = vmul.f32 %v557_v35, %v9173_v24  ;;  %v3662_v34 = vsub.f32 1.5, %v3661_v15  ;;  %v9383_v62 = vpop.xlane.xlu1 %3540 }
 0x258   : > { %v4218_v5 = vmul.f32 1.442695, %v4196_v60  ;;  %v9373_v12 = vpop.eup %6726  ;;  %v3836_v40 = vmul.f32 %v9277_v1, %v3835_v58  ;;  %vm3838_vm4 = vweird.f32 %v9167_v25  ;;  %v3844_v26 = vand.u32 2147483648, %v9167_v25 }
 0x259   : > { %v1143_v63 = vmul.f32 1.442695, %v1123_v32  ;;  %v6729_v59 = vpop.eup %6728  ;;  %v758_v6 = vmul.f32 %v9361_v57, %v9299_v29  ;;  %v9380_v8 = vmul.f32 0.1, %v3657_v51  ;;  %vm559_vm6 = vcmp.eq.f32.partialorder %v9173_v24, inf }
 0x25a   : > { %6732 = vpow2.f32 %v4218_v5  ;;  %v9385_v41 = vpop.eup %6730  ;;  %vm9387_vm12 = vcmp.eq.f32.partialorder %v3842_v18, 8.507059e+37  ;;  %v3866_v61 = vmul.f32 %v9297_v38, %v3865_v46  ;;  %v3663_v0 = vmul.f32 %v6719_v54, %v3662_v34 }
 0x25b   : > { %v9395_v49 = vsel %vm15693_vm8, 0.0, %v6729_v59  ;;  %6734 = vpow2.f32 %v1143_v63  ;;  %v773_v58 = vmul.f32 %v9373_v12, %v9316_v55  ;;  %v560_v17 = vsel %vm559_vm6, %v9173_v24, %v558_v10 }
 0x25c   : > { %15827 = vst [vmem:[#allocation47_spill] sm:$0xff] %v9395_v49  ;;  %4258 = vadd.xlane.f32.xlu1 %v9395_v49  ;;  %v3671_v35 = vmul.f32 %v9385_v41, %v9329_v23  ;;  %6736 = vrsqrt.f32 %v9383_v62  ;;  %v3837_v54 = vadd.f32 %v9277_v1, %v3836_v40  ;;  %vm3839_vm11 = vweird.f32 %v9277_v1 }
 0x25d   : > { %v3845_v13 = vor.u32 1.1754944e-38, %v3844_v26  ;;  %v562_v47 = vand.u32 2147483648, %v9173_v24  ;;  %v3874_v15 = vand.u32 2147483648, %v9222_v30  ;;  %6738 = vrcp.f32 %v9380_v8  ;;  %vm9416_vm5 = vmor %vm3838_vm4, %vm3839_vm11 }
 0x25e   : > { %vm561_vm15 = vcmp.eq.f32.partialorder %v9173_v24, 0.0  ;;  %v3672_v60 = vmul.f32 %v9385_v41, %v3671_v35  ;;  %v3867_v20 = vadd.f32 %v9297_v38, %v3866_v61  ;;  %vm3869_vm3 = vweird.f32 %v9297_v38 }
 0x25f   : > { %v563_v32 = vsel %vm561_vm15, %v562_v47, %v560_v17  ;;  %v3664_v18 = vmul.f32 %v3663_v0, %v9247_v11  ;;  %v759_v10 = vsub.f32 1.0, %v758_v6  ;;  %v766_v34 = vand.u32 2147483647, %v9299_v29 }
 0x260   : > { %v6733_v46 = vpop.eup %6732  ;;  %vm3868_vm14 = vweird.f32 %v9222_v30  ;;  %v774_v24 = vsub.f32 1.0, %v773_v58  ;;  %vm762_vm10 = vweird.f32 %v9299_v29  ;;  %v3872_v40 = vand.u32 2147483647, %v9222_v30  ;;  %v9445_v58 = vpop.xlane.xlu1 %436 }
 0x261   : > { %v6735_v5 = vpop.eup %6734  ;;  %v9427_v26 = vsel %vm15687_vm7, 0.0, %v6733_v46  ;;  %v3673_v25 = vmul.f32 0.5, %v3672_v60  ;;  %v3841_v63 = vsel %vm9416_vm5, %v9277_v1, %v3837_v54  ;;  %v768_v6 = vand.u32 2147483648, %v9299_v29  ;;  %vm9437_vm0 = vmor %vm3868_vm14, %vm3869_vm3 }
 0x262   : > { %v9432_v59 = vpop.eup %6736  ;;  %v3875_v30 = vor.u32 1.1754944e-38, %v3874_v15  ;;  %v9441_v0 = vmul.f32 0.1, %v563_v32  ;;  %vm3665_vm1 = vcmp.eq.f32.partialorder %v9247_v11, inf  ;;  %4266 = vadd.xlane.f32.xlu2 %v9427_v26  ;;  %v9451_v17 = vsel %vm15688_vm13, 0.0, %v6735_v5 }
 0x263   : > { %v3666_v1 = vsel %vm3665_vm1, %v9247_v11, %v3664_v18  ;;  %15832 = vst [vmem:[#allocation48_spill] sm:$0xff] %v9451_v17  ;;  %v3683_v35 = vmul.f32 %v9432_v59, %v9383_v62  ;;  %v3871_v54 = vsel %vm9437_vm0, %v9297_v38, %v3867_v20  ;;  %v9458_v47 = vpop.eup %6738  ;;  %v760_v15 = vmul.f32 %v9361_v57, %v759_v10 }
 0x264   : > { %v775_v60 = vmul.f32 %v9373_v12, %v774_v24  ;;  %v3668_v32 = vand.u32 2147483648, %v9247_v11  ;;  %1191 = vadd.xlane.f32.xlu1 %v9451_v17  ;;  %v3846_v18 = vsel %vm9387_vm12, %v3845_v13, %v3841_v63  ;;  %vm3873_vm4 = vcmp.eq.f32.partialorder %v3872_v40, 8.507059e+37 }
 0x265   : > { %vm3667_vm6 = vcmp.eq.f32.partialorder %v9247_v11, 0.0  ;;  %v3674_v46 = vsub.f32 1.5, %v3673_v25  ;;  %v3847_v51 = vmul.f32 -1.0, %v3846_v18  ;;  %vm808_vm11 = vweird.f32 %v9058_v9 }
 0x266   : > { %vm763_vm15 = vweird.f32 %v9361_v57  ;;  %6740 = vrcp.f32 %v9441_v0  ;;  %v3669_v38 = vsel %vm3667_vm6, %v3668_v32, %v3666_v1  ;;  %v3876_v20 = vsel %vm3873_vm4, %v3875_v30, %v3871_v54 }
 0x267   : > { %v3879_v10 = vmul.f32 %v9458_v47, %v9380_v8  ;;  %v3684_v24 = vmul.f32 %v9432_v59, %v3683_v35  ;;  %v4195_v19 = vmul.f32 %v8579_v53, %v3847_v51  ;;  %v3877_v13 = vmul.f32 -1.0, %v3876_v20  ;;  %vm9492_vm5 = vmor %vm762_vm10, %vm763_vm15 }
 0x268   : > { %vm807_vm12 = vweird.f32 %v8965_v37  ;;  %v761_v11 = vadd.f32 %v9361_v57, %v760_v15  ;;  %v776_v5 = vadd.f32 %v9373_v12, %v775_v60  ;;  %vm778_vm3 = vweird.f32 %v9373_v12 }
 0x269   : > { %6742 = vrsqrt.f32 %v9445_v58  ;;  %v781_v40 = vand.u32 2147483647, %v9316_v55  ;;  %v783_v25 = vand.u32 2147483648, %v9316_v55  ;;  %v9481_v63 = vmul.f32 0.1, %v3669_v38 }
 0x26a   : > { %v3675_v61 = vmul.f32 %v9385_v41, %v3674_v46  ;;  %v9486_v53 = vadd.f32 %v9121_v42, %v9370_v50  ;;  %vm777_vm14 = vweird.f32 %v9316_v55  ;;  %v4216_v1 = vmul.f32 1.442695, %v4195_v19 }
 0x26b   : > { %v4197_v35 = vmul.f32 %v8539_v14, %v3877_v13  ;;  %vm9498_vm0 = vcmp.eq.f32.partialorder %v766_v34, 8.507059e+37  ;;  %v769_v41 = vor.u32 1.1754944e-38, %v768_v6  ;;  %vm9502_vm1 = vmor %vm777_vm14, %vm778_vm3  ;;  %v3880_v15 = vsub.f32 1.0, %v3879_v10  ;;  %v9514_v34 = vpop.xlane.xlu1 %3542 }
 0x26c   : > { %v3685_v29 = vmul.f32 0.5, %v3684_v24  ;;  %v9506_v60 = vpop.eup %6740  ;;  %6744 = vpow2.f32 %v4216_v1  ;;  %v765_v55 = vsel %vm9492_vm5, %v9361_v57, %v761_v11  ;;  %v780_v14 = vsel %vm9502_vm1, %v9373_v12, %v776_v5  ;;  %vm9542_vm3 = vmor %vm807_vm12, %vm808_vm11 }
 0x26d   : > { %v4220_v32 = vmul.f32 1.442695, %v4197_v35  ;;  %v15839_v6 = vand.u32 2147483647, %v8965_v37  ;;  %vm782_vm4 = vcmp.eq.f32.partialorder %v781_v40, 8.507059e+37  ;;  %v784_v46 = vor.u32 1.1754944e-38, %v783_v25 }
 0x26e   : > { %6746 = vrcp.f32 %v9481_v63  ;;  %v3676_v51 = vmul.f32 %v3675_v61, %v9329_v23  ;;  %v3887_v57 = vand.u32 2147483647, %v9380_v8  ;;  %v3889_v12 = vand.u32 2147483648, %v9380_v8  ;;  %v15845_v37 = vld [vmem:[#allocation20_spill] sm:$0xff] }
 0x26f   : > { %vm9518_vm10 = vcmp.eq.f32.partialorder %v15839_v6, 8.507059e+37  ;;  %v9524_v38 = vpop.eup %6742  ;;  %vm3677_vm6 = vcmp.eq.f32.partialorder %v9329_v23, inf  ;;  %6748 = vpow2.f32 %v4220_v32  ;;  %v3881_v20 = vmul.f32 %v9458_v47, %v3880_v15 }
 0x270   : > { %v788_v10 = vmul.f32 %v9506_v60, %v9441_v0  ;;  %v770_v24 = vsel %vm9498_vm0, %v769_v41, %v765_v55  ;;  %v785_v19 = vsel %vm782_vm4, %v784_v46, %v780_v14  ;;  %vm3679_vm15 = vcmp.eq.f32.partialorder %v9329_v23, 0.0  ;;  %v15848_v55 = vld [vmem:[#allocation21_spill] sm:$0xff] }
 0x271   : > { %v3686_v13 = vsub.f32 1.5, %v3685_v29  ;;  %v9536_v11 = vadd.s32 56, %v8687_v3  ;;  %v771_v5 = vmul.f32 -1.0, %v770_v24  ;;  %v3678_v25 = vsel %vm3677_vm6, %v9329_v23, %v3676_v51 }
 0x272   : > { %v589_v61 = vmul.f32 %v9524_v38, %v9445_v58  ;;  %v786_v30 = vmul.f32 -1.0, %v785_v19  ;;  %6750 = vrsqrt.f32 %v9514_v34  ;;  %v6745_v1 = vpop.eup %6744  ;;  %vm823_vm5 = vweird.f32 %v9121_v42 }
 0x273   : > { %15842 = vst [vmem:[#allocation49_spill] sm:$0xff] %v9536_v11  ;;  %vm3884_vm14 = vweird.f32 %v9458_v47  ;;  %v3680_v35 = vand.u32 2147483648, %v9329_v23  ;;  %v1126_v54 = vmul.f32 %v15845_v37, %v771_v5  ;;  %v810_v41 = vsel %vm9542_vm3, %v9058_v9, %v9365_v4 }
 0x274   : > { %v9558_v50 = vpop.eup %6746  ;;  %v3882_v15 = vadd.f32 %v9458_v47, %v3881_v20  ;;  %v789_v29 = vsub.f32 1.0, %v788_v10  ;;  %vm15846_vm11 = vcmp.eq.s32.totalorder %v9145_v27, %v8689_v39  ;;  %v1127_v14 = vmul.f32 %v15848_v55, %v786_v30 }
 0x275   : > { %v9564_v32 = vsel %vm15846_vm11, 0.0, %v6745_v1  ;;  %v6749_v6 = vpop.eup %6748  ;;  %vm822_vm12 = vweird.f32 %v9041_v7  ;;  %vm3883_vm0 = vweird.f32 %v9380_v8  ;;  %v3681_v9 = vsel %vm3679_vm15, %v3680_v35, %v3678_v25  ;;  %v9585_v8 = vpop.xlane.xlu1 %438 }
 0x276   : > { %15847 = vst [vmem:[#allocation20_spill] sm:$0xff] %v9564_v32  ;;  %v3687_v4 = vmul.f32 %v9432_v59, %v3686_v13  ;;  %4264 = vadd.xlane.f32.xlu1 %v9564_v32  ;;  %vm15658_vm1 = vcmp.eq.s32.totalorder %v9536_v11, %v8689_v39  ;;  %vm9575_vm4 = vcmp.eq.f32.partialorder %v3887_v57, 8.507059e+37  ;;  %v3890_v51 = vor.u32 1.1754944e-38, %v3889_v12  ;;  %vm3885_vm6 = vmor %vm3883_vm0, %vm3884_vm14 }
 0x277   : > { %v9582_v20 = vsel %vm15658_vm1, 0.0, %v6749_v6  ;;  %v590_v23 = vmul.f32 %v9524_v38, %v589_v61  ;;  %vm792_vm15 = vweird.f32 %v9441_v0  ;;  %v1149_v59 = vmul.f32 1.442695, %v1126_v54  ;;  %vm9624_vm14 = vmor %vm822_vm12, %vm823_vm5 }
 0x278   : > { %4268 = vadd.xlane.f32.xlu0 %v9582_v20  ;;  %v1151_v57 = vmul.f32 1.442695, %v1127_v14  ;;  %v815_v12 = vsel %vm9518_vm10, %v9352_v43, %v810_v41  ;;  %v9594_v10 = vpop.eup %6750  ;;  %v790_v24 = vmul.f32 %v9506_v60, %v789_v29  ;;  %v3894_v19 = vmul.f32 %v9558_v50, %v9481_v63 }
 0x279   : > { %v9599_v13 = vmul.f32 0.1, %v3681_v9  ;;  %v3886_v5 = vsel %vm3885_vm6, %v9458_v47, %v3882_v15  ;;  %v3688_v40 = vmul.f32 %v3687_v4, %v9383_v62  ;;  %6752 = vpow2.f32 %v1149_v59 }
 0x27a   : > { %v3695_v25 = vmul.f32 %v9594_v10, %v9514_v34  ;;  %v3891_v43 = vsel %vm9575_vm4, %v3890_v51, %v3886_v5  ;;  %v591_v18 = vmul.f32 0.5, %v590_v23  ;;  %v9608_v61 = vadd.s32 64, %v8687_v3  ;;  %v15856_v23 = vld [vmem:[#allocation23_spill] sm:$0xff] }
 0x27b   : > { %6754 = vpow2.f32 %v1151_v57  ;;  %v3892_v30 = vmul.f32 -1.0, %v3891_v43  ;;  %vm793_vm10 = vweird.f32 %v9506_v60  ;;  %vm3689_vm3 = vcmp.eq.f32.partialorder %v9383_v62, inf }
 0x27c   : > { %15851 = vst [vmem:[#allocation21_spill] sm:$0xff] %v9608_v61  ;;  %6756 = vrsqrt.f32 %v9585_v8  ;;  %v816_v47 = vmul.f32 -1.0, %v815_v12  ;;  %v791_v1 = vadd.f32 %v9506_v60, %v790_v24  ;;  %v3895_v35 = vsub.f32 1.0, %v3894_v19  ;;  %vm9637_vm5 = vmor %vm792_vm15, %vm793_vm10 }
 0x27d   : > { %6758 = vrcp.f32 %v9599_v13  ;;  %v4198_v37 = vmul.f32 %v8585_v22, %v3892_v30  ;;  %v796_v54 = vand.u32 2147483647, %v9441_v0  ;;  %v798_v41 = vand.u32 2147483648, %v9441_v0  ;;  %v9647_v19 = vpop.xlane.xlu1 %3544 }
 0x27e   : > { %v3690_v15 = vsel %vm3689_vm3, %v9383_v62, %v3688_v40  ;;  %v3696_v29 = vmul.f32 %v9594_v10, %v3695_v25  ;;  %v3692_v14 = vand.u32 2147483648, %v9383_v62  ;;  %v592_v6 = vsub.f32 1.5, %v591_v18 }
 0x27f   : > { %vm15604_vm11 = vcmp.eq.s32.totalorder %v9608_v61, %v8689_v39  ;;  %v4222_v22 = vmul.f32 1.442695, %v4198_v37  ;;  %v6753_v9 = vpop.eup %6752  ;;  %v826_v4 = vand.u32 2147483647, %v9041_v7  ;;  %v828_v46 = vand.u32 2147483648, %v9041_v7  ;;  %v15874_v61 = vld [vmem:[#allocation28_spill] sm:$0xff] }
 0x280   : > { %vm3691_vm12 = vcmp.eq.f32.partialorder %v9383_v62, 0.0  ;;  %v1129_v59 = vmul.f32 %v15856_v23, %v816_v47  ;;  %v3896_v12 = vmul.f32 %v9558_v50, %v3895_v35  ;;  %v795_v7 = vsel %vm9637_vm5, %v9506_v60, %v791_v1 }
 0x281   : > { %v6755_v57 = vpop.eup %6754  ;;  %v3693_v24 = vsel %vm3691_vm12, %v3692_v14, %v3690_v15  ;;  %v825_v0 = vsel %vm9624_vm14, %v9121_v42, %v9486_v53  ;;  %v799_v62 = vor.u32 1.1754944e-38, %v798_v41  ;;  %v9658_v40 = vsel %vm15658_vm1, 0.0, %v6753_v9 }
 0x282   : > { %v9653_v5 = vpop.eup %6756  ;;  %v9663_v25 = vsel %vm15604_vm11, 0.0, %v6755_v57  ;;  %v3697_v60 = vmul.f32 0.5, %v3696_v29  ;;  %vm797_vm0 = vcmp.eq.f32.partialorder %v796_v54, 8.507059e+37  ;;  %v3902_v18 = vand.u32 2147483647, %v9481_v63  ;;  %1197 = vadd.xlane.f32.xlu1 %v9658_v40  ;;  %v15857_v29 = vld [vmem:[#allocation29_spill] sm:$0xff] }
 0x283   : > { %v9665_v43 = vpop.eup %6758  ;;  %v593_v42 = vmul.f32 %v9524_v38, %v592_v6  ;;  %1199 = vadd.xlane.f32.xlu2 %v9663_v25  ;;  %6760 = vpow2.f32 %v4222_v22  ;;  %v3904_v53 = vand.u32 2147483648, %v9481_v63  ;;  %v9672_v30 = vmul.f32 0.1, %v3693_v24  ;;  %v15858_v6 = vld [vmem:[#allocation22_spill] sm:$0xff] }
 0x284   : > { %v800_v47 = vsel %vm797_vm0, %v799_v62, %v795_v7  ;;  %v1155_v1 = vmul.f32 1.442695, %v1129_v59  ;;  %v3897_v35 = vadd.f32 %v9558_v50, %v3896_v12  ;;  %vm3899_vm4 = vweird.f32 %v9558_v50 }
 0x285   : > { %v601_v37 = vmul.f32 %v9653_v5, %v9585_v8  ;;  %v801_v54 = vmul.f32 -1.0, %v800_v47  ;;  %v829_v38 = vor.u32 1.1754944e-38, %v828_v46  ;;  %v3909_v41 = vmul.f32 %v9665_v43, %v9599_v13 }
 0x286   : > { %v3698_v15 = vsub.f32 1.5, %v3697_v60  ;;  %v9681_v55 = vmul.f32 0.5, %v15857_v29  ;;  %vm827_vm6 = vcmp.eq.f32.partialorder %v826_v4, 8.507059e+37  ;;  %vm3898_vm15 = vweird.f32 %v9481_v63  ;;  %v9711_v60 = vpop.xlane.xlu1 %440 }
 0x287   : > { %v594_v14 = vmul.f32 %v593_v42, %v9445_v58  ;;  %v1128_v22 = vmul.f32 %v15858_v6, %v801_v54  ;;  %vm9686_vm10 = vmor %vm3898_vm15, %vm3899_vm4  ;;  %vm9690_vm3 = vcmp.eq.f32.partialorder %v3902_v18, 8.507059e+37  ;;  %v3905_v51 = vor.u32 1.1754944e-38, %v3904_v53 }
 0x288   : > { %6762 = vrcp.f32 %v9672_v30  ;;  %v830_v23 = vsel %vm827_vm6, %v829_v38, %v825_v0  ;;  %v602_v4 = vmul.f32 %v9653_v5, %v601_v37  ;;  %v3901_v57 = vsel %vm9686_vm10, %v9558_v50, %v3897_v35  ;;  %v15866_v35 = vld [vmem:[#allocation15_spill] sm:$0xff] }
 0x289   : > { %v6761_v59 = vpop.eup %6760  ;;  %v1153_v63 = vmul.f32 1.442695, %v1128_v22  ;;  %6764 = vpow2.f32 %v1155_v1  ;;  %v3910_v12 = vsub.f32 1.0, %v3909_v41  ;;  %vm595_vm14 = vcmp.eq.f32.partialorder %v9445_v58, inf  ;;  %v15865_v1 = vld [vmem:[#allocation11_spill] sm:$0xff]  ;;  %v15867_v41 = vld [vmem:[#allocation30_spill] sm:$0xff] }
 0x28a   : > { %v3699_v24 = vmul.f32 %v9594_v10, %v3698_v15  ;;  %6766 = vrsqrt.f32 %v9647_v19  ;;  %v596_v7 = vsel %vm595_vm14, %v9445_v58, %v594_v14  ;;  %v9706_v0 = vsel %vm15604_vm11, 0.0, %v6761_v59 }
 0x28b   : > { %v9709_v62 = vadd.s32 72, %v8687_v3  ;;  %6768 = vpow2.f32 %v1153_v63  ;;  %v598_v50 = vand.u32 2147483648, %v9445_v58  ;;  %4270 = vadd.xlane.f32.xlu1 %v9706_v0  ;;  %v9716_v10 = vadd.s32 80, %v8687_v3 }
 0x28c   : > { %v3906_v18 = vsel %vm9690_vm3, %v3905_v51, %v3901_v57  ;;  %v831_v42 = vmul.f32 -1.0, %v830_v23  ;;  %vm597_vm5 = vcmp.eq.f32.partialorder %v9445_v58, 0.0  ;;  %v603_v53 = vmul.f32 0.5, %v602_v4  ;;  %v15868_v58 = vld [vmem:[#allocation27_spill] sm:$0xff]  ;;  %v15869_v23 = vld [vmem:[#allocation24_spill] sm:$0xff] }
 0x28d   : > { %15863 = vst [vmem:[#allocation23_spill] sm:$0xff] %v9709_v62  ;;  %v3907_v47 = vmul.f32 -1.0, %v3906_v18  ;;  %vm4125_vm12 = vcmp.eq.f32.partialorder %v15865_v1, inf  ;;  %6770 = vrsqrt.f32 %v15866_v35  ;;  %v599_v54 = vsel %vm597_vm5, %v598_v50, %v596_v7 }
 0x28e   : > { %15864 = vst [vmem:[#allocation29_spill] sm:$0xff] %v9716_v10  ;;  %v9723_v37 = vpop.eup %6762  ;;  %v3700_v38 = vmul.f32 %v3699_v24, %v9514_v34  ;;  %6772 = vrsqrt.f32 %v9711_v60  ;;  %v4124_v15 = vmul.f32 %v15867_v41, %v15865_v1  ;;  %v3911_v14 = vmul.f32 %v9665_v43, %v3910_v12 }
 0x28f   : > { %v6765_v29 = vpop.eup %6764  ;;  %vm15603_vm0 = vcmp.eq.s32.totalorder %v9709_v62, %v8689_v39  ;;  %v4199_v6 = vmul.f32 %v15868_v58, %v3907_v47  ;;  %v4134_v22 = vsub.f32 1.5, %v9681_v55  ;;  %v3917_v46 = vand.u32 2147483647, %v9599_v13 }
 0x290   : > { %v9734_v9 = vpop.eup %6766  ;;  %v3919_v51 = vand.u32 2147483648, %v9599_v13  ;;  %vm15644_vm4 = vcmp.eq.s32.totalorder %v9716_v10, %v8689_v39  ;;  %v1130_v59 = vmul.f32 %v15869_v23, %v831_v42  ;;  %v3924_v63 = vmul.f32 %v9723_v37, %v9672_v30 }
 0x291   : > { %v6769_v4 = vpop.eup %6768  ;;  %v9743_v57 = vmul.f32 0.1, %v599_v54  ;;  %vm3701_vm6 = vcmp.eq.f32.partialorder %v9514_v34, inf  ;;  %v604_v55 = vsub.f32 1.5, %v603_v53  ;;  %vm4127_vm15 = vcmp.eq.f32.partialorder %v15865_v1, 0.0 }
 0x292   : > { %vm3914_vm10 = vweird.f32 %v9665_v43  ;;  %v3702_v12 = vsel %vm3701_vm6, %v9514_v34, %v3700_v38  ;;  %v9752_v24 = vsel %vm15603_vm0, 0.0, %v6769_v4  ;;  %v4224_v7 = vmul.f32 1.442695, %v4199_v6  ;;  %v15870_v38 = vld [vmem:[#allocation26_spill] sm:$0xff]  ;;  %v9774_v6 = vpop.xlane.xlu1 %3546  ;;  %v15871_v4 = vld [vmem:[#allocation25_spill] sm:$0xff] }
 0x293   : > { %v9754_v50 = vpop.eup %6770  ;;  %v3912_v18 = vadd.f32 %v9665_v43, %v3911_v14  ;;  %v3704_v42 = vand.u32 2147483648, %v9514_v34  ;;  %1201 = vadd.xlane.f32.xlu0 %v9752_v24  ;;  %v9762_v53 = vsel %vm15644_vm4, 0.0, %v6765_v29  ;;  %v3707_v47 = vmul.f32 %v9734_v9, %v9647_v19 }
 0x294   : > { %v9766_v54 = vpop.eup %6772  ;;  %vm3913_vm3 = vweird.f32 %v9599_v13  ;;  %vm3703_vm14 = vcmp.eq.f32.partialorder %v9514_v34, 0.0  ;;  %1203 = vadd.xlane.f32.xlu1 %v9762_v53  ;;  %6774 = vpow2.f32 %v4224_v7  ;;  %v1074_v41 = vmul.f32 0.5, %v15870_v38  ;;  %v15872_v38 = vld [vmem:[#allocation12_spill] sm:$0xff] }
 0x295   : > { %v3925_v14 = vsub.f32 1.0, %v3924_v63  ;;  %6776 = vrcp.f32 %v9743_v57  ;;  %v3705_v58 = vsel %vm3703_vm14, %v3704_v42, %v3702_v12  ;;  %v605_v29 = vmul.f32 %v9653_v5, %v604_v55  ;;  %vm3915_vm5 = vmor %vm3913_vm3, %vm3914_vm10 }
 0x296   : > { %v3920_v23 = vor.u32 1.1754944e-38, %v3919_v51  ;;  %v1157_v13 = vmul.f32 1.442695, %v1130_v59  ;;  %v4126_v34 = vsel %vm4125_vm12, %v15865_v1, %v4124_v15  ;;  %v4135_v7 = vmul.f32 %v15871_v4, %v4134_v22  ;;  %v15873_v59 = vld [vmem:[#allocation13_spill] sm:$0xff] }
 0x297   : > { %vm3918_vm6 = vcmp.eq.f32.partialorder %v3917_v46, 8.507059e+37  ;;  %v3708_v63 = vmul.f32 %v9734_v9, %v3707_v47  ;;  %v613_v12 = vmul.f32 %v9766_v54, %v9711_v60  ;;  %v3916_v5 = vsel %vm3915_vm5, %v9665_v43, %v3912_v18 }
 0x298   : > { %v9786_v55 = vmul.f32 0.1, %v3705_v58  ;;  %v3921_v42 = vsel %vm3918_vm6, %v3920_v23, %v3916_v5  ;;  %vm4137_vm10 = vcmp.eq.f32.partialorder %v15872_v38, inf  ;;  %v1075_v51 = vsub.f32 1.5, %v1074_v41 }
 0x299   : > { %v4143_v11 = vmul.f32 %v15874_v61, %v15873_v59  ;;  %v3926_v15 = vmul.f32 %v9723_v37, %v3925_v14  ;;  %v606_v22 = vmul.f32 %v605_v29, %v9585_v8  ;;  %v3922_v46 = vmul.f32 -1.0, %v3921_v42 }
 0x29a   : > { %6778 = vrsqrt.f32 %v9774_v6  ;;  %v6775_v47 = vpop.eup %6774  ;;  %v9795_v4 = vadd.s32 88, %v8687_v3  ;;  %v15876_v43 = vand.u32 2147483648, %v15865_v1  ;;  %v4136_v41 = vmul.f32 %v4135_v7, %v15872_v38  ;;  %v9827_v62 = vpop.xlane.xlu1 %442 }
 0x29b   : > { %6780 = vpow2.f32 %v1157_v13  ;;  %v9802_v58 = vpop.eup %6776  ;;  %v3709_v14 = vmul.f32 0.5, %v3708_v63  ;;  %v9807_v29 = vsel %vm15603_vm0, 0.0, %v6775_v47  ;;  %v614_v23 = vmul.f32 %v9766_v54, %v613_v12 }
 0x29c   : > { %15875 = vst [vmem:[#allocation22_spill] sm:$0xff] %v9795_v4  ;;  %v4129_v18 = vsel %vm4127_vm15, %v15876_v43, %v4126_v34  ;;  %v3932_v13 = vand.u32 2147483647, %v9672_v30  ;;  %v3934_v42 = vand.u32 2147483648, %v9672_v30  ;;  %6782 = vrcp.f32 %v9786_v55  ;;  %4272 = vadd.xlane.f32.xlu2 %v9807_v29 }
 0x29d   : > { %v4200_v5 = vmul.f32 %v4129_v18, %v3922_v46  ;;  %vm607_vm12 = vcmp.eq.f32.partialorder %v9585_v8, inf  ;;  %vm4139_vm15 = vcmp.eq.f32.partialorder %v15872_v38, 0.0  ;;  %v3927_v1 = vadd.f32 %v9723_v37, %v3926_v15  ;;  %v15877_v46 = vld [vmem:[#allocation19_spill] sm:$0xff] }
 0x29e   : > { %vm3929_vm3 = vweird.f32 %v9723_v37  ;;  %v608_v34 = vsel %vm607_vm12, %v9585_v8, %v606_v22  ;;  %vm3928_vm14 = vweird.f32 %v9672_v30  ;;  %v833_v63 = vmul.f32 %v9802_v58, %v9743_v57  ;;  %v15878_v22 = vld [vmem:[#allocation7_spill] sm:$0xff] }
 0x29f   : > { %v4226_v7 = vmul.f32 1.442695, %v4200_v5  ;;  %v610_v12 = vand.u32 2147483648, %v9585_v8  ;;  %v1076_v47 = vmul.f32 %v15877_v46, %v1075_v51  ;;  %vm609_vm5 = vcmp.eq.f32.partialorder %v9585_v8, 0.0  ;;  %vm3930_vm12 = vmor %vm3928_vm14, %vm3929_vm3 }
 0x2a0   : > { %v9824_v43 = vpop.eup %6778  ;;  %v3710_v18 = vsub.f32 1.5, %v3709_v14  ;;  %v615_v15 = vmul.f32 0.5, %v614_v23  ;;  %vm1078_vm6 = vcmp.eq.f32.partialorder %v15878_v22, inf  ;;  %v3935_v30 = vor.u32 1.1754944e-38, %v3934_v42 }
 0x2a1   : > { %6784 = vpow2.f32 %v4226_v7  ;;  %v6781_v5 = vpop.eup %6780  ;;  %v611_v44 = vsel %vm609_vm5, %v610_v12, %v608_v34  ;;  %vm15643_vm0 = vcmp.eq.s32.totalorder %v9795_v4, %v8689_v39  ;;  %v4144_v51 = vmul.f32 %v15874_v61, %v4143_v11 }
 0x2a2   : > { %vm3933_vm11 = vcmp.eq.f32.partialorder %v3932_v13, 8.507059e+37  ;;  %v3931_v8 = vsel %vm3930_vm12, %v9723_v37, %v3927_v1  ;;  %v4138_v14 = vsel %vm4137_vm10, %v15872_v38, %v4136_v41  ;;  %v4140_v23 = vand.u32 2147483648, %v15872_v38  ;;  %v9840_v7 = vpop.eup %6782 }
 0x2a3   : > { %v834_v46 = vsub.f32 1.0, %v833_v63  ;;  %v3719_v42 = vmul.f32 %v9824_v43, %v9774_v6  ;;  %v3936_v34 = vsel %vm3933_vm11, %v3935_v30, %v3931_v8  ;;  %6786 = vrsqrt.f32 %v9827_v62 }
 0x2a4   : > { %v9845_v12 = vmul.f32 0.1, %v611_v44  ;;  %v3711_v11 = vmul.f32 %v9734_v9, %v3710_v18  ;;  %v616_v37 = vsub.f32 1.5, %v615_v15  ;;  %v9851_v41 = vsel %vm15643_vm0, 0.0, %v6781_v5  ;;  %v15880_v15 = vld [vmem:[#allocation10_spill] sm:$0xff] }
 0x2a5   : > { %15879 = vst [vmem:[#allocation11_spill] sm:$0xff] %v9851_v41  ;;  %1205 = vadd.xlane.f32.xlu2 %v9851_v41  ;;  %v3937_v13 = vmul.f32 -1.0, %v3936_v34  ;;  %v1077_v1 = vmul.f32 %v1076_v47, %v15878_v22  ;;  %v4145_v30 = vmul.f32 0.5, %v4144_v51  ;;  %v3939_v44 = vmul.f32 %v9840_v7, %v9786_v55 }
 0x2a6   : > { %v4141_v9 = vsel %vm4139_vm15, %v4140_v23, %v4138_v14  ;;  %6788 = vrsqrt.f32 %v15880_v15  ;;  %v835_v5 = vmul.f32 %v9802_v58, %v834_v46  ;;  %v3720_v51 = vmul.f32 %v9824_v43, %v3719_v42  ;;  %v15882_v14 = vld [vmem:[#allocation8_spill] sm:$0xff]  ;;  %v15883_v23 = vld [vmem:[#allocation31_spill] sm:$0xff] }
 0x2a7   : > { %v6785_v8 = vpop.eup %6784  ;;  %v4201_v34 = vmul.f32 %v4141_v9, %v3937_v13  ;;  %6790 = vrcp.f32 %v9845_v12  ;;  %v3712_v63 = vmul.f32 %v3711_v11, %v9647_v19  ;;  %v617_v38 = vmul.f32 %v9766_v54, %v616_v37 }
 0x2a8   : > { %v9866_v47 = vsel %vm15644_vm4, 0.0, %v6785_v8  ;;  %v1084_v18 = vmul.f32 %v15883_v23, %v15882_v14  ;;  %v841_v10 = vand.u32 2147483647, %v9743_v57  ;;  %v1079_v42 = vsel %vm1078_vm6, %v15878_v22, %v1077_v1 }
 0x2a9   : > { %15881 = vst [vmem:[#allocation15_spill] sm:$0xff] %v9866_v47  ;;  %4274 = vadd.xlane.f32.xlu0 %v9866_v47  ;;  %v9875_v46 = vpop.eup %6786  ;;  %v4228_v8 = vmul.f32 1.442695, %v4201_v34  ;;  %v4146_v13 = vsub.f32 1.5, %v4145_v30  ;;  %v843_v9 = vand.u32 2147483648, %v9743_v57  ;;  %v3940_v11 = vsub.f32 1.0, %v3939_v44 }
 0x2aa   : > { %vm3713_vm11 = vcmp.eq.f32.partialorder %v9647_v19, inf  ;;  %vm1080_vm10 = vcmp.eq.f32.partialorder %v15878_v22, 0.0  ;;  %v4155_v54 = vmul.f32 %v9754_v50, %v15866_v35  ;;  %v836_v37 = vadd.f32 %v9802_v58, %v835_v5 }
 0x2ab   : > { %vm838_vm15 = vweird.f32 %v9802_v58  ;;  %v3721_v34 = vmul.f32 0.5, %v3720_v51  ;;  %6792 = vpow2.f32 %v4228_v8  ;;  %v3714_v1 = vsel %vm3713_vm11, %v9647_v19, %v3712_v63  ;;  %v9901_v51 = vpop.xlane.xlu1 %3548 }
 0x2ac   : > { %v9888_v27 = vpop.eup %6788  ;;  %v618_v30 = vmul.f32 %v617_v38, %v9711_v60  ;;  %v625_v44 = vmul.f32 %v9875_v46, %v9827_v62  ;;  %v1085_v45 = vmul.f32 %v15883_v23, %v1084_v18  ;;  %vm837_vm3 = vweird.f32 %v9743_v57 }
 0x2ad   : > { %vm9896_vm14 = vcmp.eq.f32.partialorder %v841_v10, 8.507059e+37  ;;  %v3716_v5 = vand.u32 2147483648, %v9647_v19  ;;  %v4147_v8 = vmul.f32 %v15874_v61, %v4146_v13  ;;  %v9904_v63 = vpop.eup %6790  ;;  %vm9906_vm5 = vmor %vm837_vm3, %vm838_vm15  ;;  %v844_v21 = vor.u32 1.1754944e-38, %v843_v9 }
 0x2ae   : > { %v3941_v18 = vmul.f32 %v9840_v7, %v3940_v11  ;;  %v3947_v10 = vand.u32 2147483647, %v9786_v55  ;;  %vm3715_vm6 = vcmp.eq.f32.partialorder %v9647_v19, 0.0  ;;  %vm4149_vm12 = vcmp.eq.f32.partialorder %v15873_v59, inf }
 0x2af   : > { %v3717_v57 = vsel %vm3715_vm6, %v3716_v5, %v3714_v1  ;;  %vm619_vm11 = vcmp.eq.f32.partialorder %v9711_v60, inf  ;;  %v3722_v47 = vsub.f32 1.5, %v3721_v34  ;;  %v840_v61 = vsel %vm9906_vm5, %v9802_v58, %v836_v37 }
 0x2b0   : > { %v3949_v13 = vand.u32 2147483648, %v9786_v55  ;;  %v620_v9 = vsel %vm619_vm11, %v9711_v60, %v618_v30  ;;  %v626_v11 = vmul.f32 %v9875_v46, %v625_v44  ;;  %6794 = vrsqrt.f32 %v9901_v51 }
 0x2b1   : > { %v6793_v41 = vpop.eup %6792  ;;  %v848_v19 = vmul.f32 %v9904_v63, %v9845_v12  ;;  %vm621_vm15 = vcmp.eq.f32.partialorder %v9711_v60, 0.0  ;;  %v622_v34 = vand.u32 2147483648, %v9711_v60  ;;  %v845_v1 = vsel %vm9896_vm14, %v844_v21, %v840_v61 }
 0x2b2   : > { %vm4151_vm3 = vcmp.eq.f32.partialorder %v15873_v59, 0.0  ;;  %v3942_v58 = vadd.f32 %v9840_v7, %v3941_v18  ;;  %vm3944_vm5 = vweird.f32 %v9840_v7  ;;  %v9931_v37 = vmul.f32 0.1, %v3717_v57 }
 0x2b3   : > { %v9936_v30 = vsel %vm15643_vm0, 0.0, %v6793_v41  ;;  %v623_v44 = vsel %vm621_vm15, %v622_v34, %v620_v9  ;;  %v3723_v5 = vmul.f32 %v9824_v43, %v3722_v47  ;;  %v15888_v21 = vand.u32 2147483648, %v15878_v22 }
 0x2b4   : > { %4276 = vadd.xlane.f32.xlu1 %v9936_v30  ;;  %v4148_v60 = vmul.f32 %v4147_v8, %v15873_v59  ;;  %vm3943_vm14 = vweird.f32 %v9786_v55  ;;  %v627_v38 = vmul.f32 0.5, %v626_v11  ;;  %v846_v18 = vmul.f32 -1.0, %v845_v1 }
 0x2b5   : > { %v1082_v52 = vsel %vm1080_vm10, %v15888_v21, %v1079_v42  ;;  %v1086_v57 = vmul.f32 0.5, %v1085_v45  ;;  %vm3945_vm6 = vmor %vm3943_vm14, %vm3944_vm5  ;;  %vm3948_vm11 = vcmp.eq.f32.partialorder %v3947_v10, 8.507059e+37  ;;  %v3950_v41 = vor.u32 1.1754944e-38, %v3949_v13 }
 0x2b6   : > { %v849_v61 = vsub.f32 1.0, %v848_v19  ;;  %v4156_v43 = vmul.f32 %v9754_v50, %v4155_v54  ;;  %v6795_v47 = vpop.eup %6794  ;;  %6796 = vrcp.f32 %v9931_v37  ;;  %v9948_v9 = vmul.f32 0.1, %v623_v44  ;;  %v15889_v19 = vld [vmem:[#allocation16_spill] sm:$0xff] }
 0x2b7   : > { %v1131_v22 = vmul.f32 %v1082_v52, %v846_v18  ;;  %v3946_v42 = vsel %vm3945_vm6, %v9840_v7, %v3942_v58  ;;  %v3724_v8 = vmul.f32 %v3723_v5, %v9774_v6  ;;  %v3731_v55 = vmul.f32 %v6795_v47, %v9901_v51 }
 0x2b8   : > { %v3951_v11 = vsel %vm3948_vm11, %v3950_v41, %v3946_v42  ;;  %v4150_v45 = vsel %vm4149_vm12, %v15873_v59, %v4148_v60  ;;  %v628_v10 = vsub.f32 1.5, %v627_v38  ;;  %v1087_v54 = vsub.f32 1.5, %v1086_v57 }
 0x2b9   : > { %v1159_v13 = vmul.f32 1.442695, %v1131_v22  ;;  %6798 = vrsqrt.f32 %v15889_v19  ;;  %v3732_v34 = vmul.f32 %v6795_v47, %v3731_v55  ;;  %v3952_v1 = vmul.f32 -1.0, %v3951_v11 }
 0x2ba   : > { %v4157_v44 = vmul.f32 0.5, %v4156_v43  ;;  %v1096_v7 = vmul.f32 %v9888_v27, %v15880_v15  ;;  %v850_v58 = vmul.f32 %v9904_v63, %v849_v61  ;;  %6800 = vrcp.f32 %v9948_v9 }
 0x2bb   : > { %vm3725_vm10 = vcmp.eq.f32.partialorder %v9774_v6, inf  ;;  %v15890_v5 = vand.u32 2147483648, %v15873_v59  ;;  %v9968_v60 = vadd.s32 96, %v8687_v3  ;;  %6802 = vpow2.f32 %v1159_v13 }
 0x2bc   : > { %v3726_v52 = vsel %vm3725_vm10, %v9774_v6, %v3724_v8  ;;  %v3733_v38 = vmul.f32 0.5, %v3732_v34  ;;  %v9970_v18 = vpop.eup %6796  ;;  %v3728_v57 = vand.u32 2147483648, %v9774_v6  ;;  %v629_v41 = vmul.f32 %v9875_v46, %v628_v10 }
 0x2bd   : > { %v4153_v21 = vsel %vm4151_vm3, %v15890_v5, %v4150_v45  ;;  %15891 = vst [vmem:[#allocation30_spill] sm:$0xff] %v9968_v60  ;;  %v1088_v43 = vmul.f32 %v15883_v23, %v1087_v54  ;;  %vm3727_vm12 = vcmp.eq.f32.partialorder %v9774_v6, 0.0  ;;  %vm1090_vm15 = vcmp.eq.f32.partialorder %v15882_v14, inf }
 0x2be   : > { %v4202_v61 = vmul.f32 %v4153_v21, %v3952_v1  ;;  %v3734_v59 = vsub.f32 1.5, %v3733_v38  ;;  %v1097_v22 = vmul.f32 %v9888_v27, %v1096_v7  ;;  %v856_v8 = vand.u32 2147483647, %v9845_v12 }
 0x2bf   : > { %v9978_v42 = vpop.eup %6798  ;;  %v858_v55 = vand.u32 2147483648, %v9845_v12  ;;  %v3729_v11 = vsel %vm3727_vm12, %v3728_v57, %v3726_v52  ;;  %v851_v46 = vadd.f32 %v9904_v63, %v850_v58  ;;  %vm853_vm3 = vweird.f32 %v9904_v63 }
 0x2c0   : > { %v4230_v45 = vmul.f32 1.442695, %v4202_v61  ;;  %v3954_v6 = vmul.f32 %v9970_v18, %v9931_v37  ;;  %vm15642_vm5 = vcmp.eq.s32.totalorder %v9968_v60, %v8689_v39  ;;  %vm1092_vm14 = vcmp.eq.f32.partialorder %v15882_v14, 0.0  ;;  %v9989_v23 = vpop.eup %6800 }
 0x2c1   : > { %v630_v10 = vmul.f32 %v629_v41, %v9827_v62  ;;  %v1089_v13 = vmul.f32 %v1088_v43, %v15882_v14  ;;  %v4158_v54 = vsub.f32 1.5, %v4157_v44  ;;  %v6803_v34 = vpop.eup %6802  ;;  %vm852_vm6 = vweird.f32 %v9845_v12 }
 0x2c2   : > { %6804 = vpow2.f32 %v4230_v45  ;;  %v9994_v1 = vmul.f32 0.1, %v3729_v11  ;;  %v3735_v7 = vmul.f32 %v6795_v47, %v3734_v59  ;;  %v4167_v58 = vmul.f32 %v9978_v42, %v15889_v19  ;;  %vm854_vm11 = vmor %vm852_vm6, %vm853_vm3 }
 0x2c3   : > { %vm857_vm10 = vcmp.eq.f32.partialorder %v856_v8, 8.507059e+37  ;;  %v859_v5 = vor.u32 1.1754944e-38, %v858_v55  ;;  %v10001_v21 = vsel %vm15642_vm5, 0.0, %v6803_v34  ;;  %v1098_v52 = vmul.f32 0.5, %v1097_v22 }
 0x2c4   : > { %v3955_v38 = vsub.f32 1.0, %v3954_v6  ;;  %v863_v44 = vmul.f32 %v9989_v23, %v9948_v9  ;;  %vm631_vm12 = vcmp.eq.f32.partialorder %v9827_v62, inf  ;;  %1207 = vadd.xlane.f32.xlu0 %v10001_v21  ;;  %v855_v12 = vsel %vm854_vm11, %v9904_v63, %v851_v46 }
 0x2c5   : > { %v632_v47 = vsel %vm631_vm12, %v9827_v62, %v630_v10  ;;  %v860_v57 = vsel %vm857_vm10, %v859_v5, %v855_v12  ;;  %v1091_v41 = vsel %vm1090_vm15, %v15882_v14, %v1089_v13  ;;  %v4159_v61 = vmul.f32 %v9754_v50, %v4158_v54 }
 0x2c6   : > { %6806 = vrcp.f32 %v9994_v1  ;;  %v634_v43 = vand.u32 2147483648, %v9827_v62  ;;  %v3736_v59 = vmul.f32 %v3735_v7, %v9901_v51  ;;  %v861_v22 = vmul.f32 -1.0, %v860_v57 }
 0x2c7   : > { %vm633_vm3 = vcmp.eq.f32.partialorder %v9827_v62, 0.0  ;;  %v1093_v63 = vand.u32 2147483648, %v15882_v14  ;;  %vm4161_vm6 = vcmp.eq.f32.partialorder %v15866_v35, inf  ;;  %v4168_v55 = vmul.f32 %v9978_v42, %v4167_v58 }
 0x2c8   : > { %v6805_v8 = vpop.eup %6804  ;;  %v3956_v11 = vmul.f32 %v9970_v18, %v3955_v38  ;;  %v864_v45 = vsub.f32 1.0, %v863_v44  ;;  %v635_v50 = vsel %vm633_vm3, %v634_v43, %v632_v47  ;;  %v1099_v46 = vsub.f32 1.5, %v1098_v52 }
 0x2c9   : > { %vm3737_vm15 = vcmp.eq.f32.partialorder %v9901_v51, inf  ;;  %v10025_v6 = vsel %vm15642_vm5, 0.0, %v6805_v8  ;;  %v1094_v62 = vsel %vm1092_vm14, %v1093_v63, %v1091_v41  ;;  %v4160_v10 = vmul.f32 %v4159_v61, %v15866_v35 }
 0x2ca   : > { %v3962_v13 = vand.u32 2147483647, %v9931_v37  ;;  %v3738_v54 = vsel %vm3737_vm15, %v9901_v51, %v3736_v59  ;;  %4278 = vadd.xlane.f32.xlu2 %v10025_v6  ;;  %v1132_v34 = vmul.f32 %v1094_v62, %v861_v22  ;;  %vm4163_vm11 = vcmp.eq.f32.partialorder %v15866_v35, 0.0 }
 0x2cb   : > { %vm3959_vm10 = vweird.f32 %v9970_v18  ;;  %v3964_v7 = vand.u32 2147483648, %v9931_v37  ;;  %v10036_v58 = vmul.f32 0.1, %v635_v50  ;;  %v3740_v14 = vand.u32 2147483648, %v9901_v51 }
 0x2cc   : > { %v10039_v5 = vpop.eup %6806  ;;  %v3957_v52 = vadd.f32 %v9970_v18, %v3956_v11  ;;  %v865_v38 = vmul.f32 %v9989_v23, %v864_v45  ;;  %vm3739_vm14 = vcmp.eq.f32.partialorder %v9901_v51, 0.0  ;;  %v1161_v44 = vmul.f32 1.442695, %v1132_v34 }
 0x2cd   : > { %v3741_v12 = vsel %vm3739_vm14, %v3740_v14, %v3738_v54  ;;  %v4162_v47 = vsel %vm4161_vm6, %v15866_v35, %v4160_v10  ;;  %v1100_v57 = vmul.f32 %v9888_v27, %v1099_v46  ;;  %v4169_v41 = vmul.f32 0.5, %v4168_v55  ;;  %v15893_v46 = vld [vmem:[#allocation9_spill] sm:$0xff] }
 0x2ce   : > { %vm3958_vm12 = vweird.f32 %v9931_v37  ;;  %vm3963_vm3 = vcmp.eq.f32.partialorder %v3962_v13, 8.507059e+37  ;;  %v10050_v61 = vadd.s32 104, %v8687_v3  ;;  %6808 = vpow2.f32 %v1161_v44 }
 0x2cf   : > { %vm3960_vm15 = vmor %vm3958_vm12, %vm3959_vm10  ;;  %v3965_v51 = vor.u32 1.1754944e-38, %v3964_v7  ;;  %v873_v43 = vand.u32 2147483648, %v9948_v9  ;;  %v3969_v59 = vmul.f32 %v10039_v5, %v9994_v1  ;;  %6810 = vrcp.f32 %v10036_v58 }
 0x2d0   : > { %15892 = vst [vmem:[#allocation27_spill] sm:$0xff] %v10050_v61  ;;  %v866_v27 = vadd.f32 %v9989_v23, %v865_v38  ;;  %vm868_vm6 = vweird.f32 %v9989_v23  ;;  %v10060_v37 = vmul.f32 0.1, %v3741_v12  ;;  %v3961_v22 = vsel %vm3960_vm15, %v9970_v18, %v3957_v52  ;;  %v15896_v52 = vld [vmem:[#allocation14_spill] sm:$0xff] }
 0x2d1   : > { %v871_v8 = vand.u32 2147483647, %v9948_v9  ;;  %v3966_v63 = vsel %vm3963_vm3, %v3965_v51, %v3961_v22  ;;  %v4164_v55 = vand.u32 2147483648, %v15866_v35  ;;  %v1101_v11 = vmul.f32 %v1100_v57, %v15880_v15 }
 0x2d2   : > { %vm867_vm10 = vweird.f32 %v9948_v9  ;;  %vm15619_vm14 = vcmp.eq.s32.totalorder %v10050_v61, %v8689_v39  ;;  %v3967_v45 = vmul.f32 -1.0, %v3966_v63  ;;  %v4170_v50 = vsub.f32 1.5, %v4169_v41 }
 0x2d3   : > { %v1110_v62 = vmul.f32 0.5, %v15893_v46  ;;  %vm10070_vm12 = vmor %vm867_vm10, %vm868_vm6  ;;  %v3970_v18 = vsub.f32 1.0, %v3969_v59  ;;  %v4165_v13 = vsel %vm4163_vm11, %v4164_v55, %v4162_v47  ;;  %vm1102_vm3 = vcmp.eq.f32.partialorder %v15880_v15, inf }
 0x2d4   : > { %v6809_v54 = vpop.eup %6808  ;;  %v874_v34 = vor.u32 1.1754944e-38, %v873_v43  ;;  %6812 = vrcp.f32 %v10060_v37  ;;  %v4203_v9 = vmul.f32 %v4165_v13, %v3967_v45  ;;  %v870_v7 = vsel %vm10070_vm12, %v9989_v23, %v866_v27 }
 0x2d5   : > { %v10081_v14 = vpop.eup %6810  ;;  %v4179_v38 = vmul.f32 %v15896_v52, %v8057_v28  ;;  %vm872_vm15 = vcmp.eq.f32.partialorder %v871_v8, 8.507059e+37  ;;  %v10088_v35 = vsel %vm15619_vm14, 0.0, %v6809_v54  ;;  %v1103_v44 = vsel %vm1102_vm3, %v15880_v15, %v1101_v11 }
 0x2d6   : > { %1209 = vadd.xlane.f32.xlu1 %v10088_v35  ;;  %v4232_v12 = vmul.f32 1.442695, %v4203_v9  ;;  %v875_v47 = vsel %vm872_vm15, %v874_v34, %v870_v7  ;;  %v1105_v57 = vand.u32 2147483648, %v15880_v15  ;;  %v4171_v23 = vmul.f32 %v9978_v42, %v4170_v50 }
 0x2d7   : > { %v3971_v41 = vmul.f32 %v10039_v5, %v3970_v18  ;;  %v876_v51 = vmul.f32 -1.0, %v875_v47  ;;  %vm1104_vm11 = vcmp.eq.f32.partialorder %v15880_v15, 0.0  ;;  %v878_v43 = vmul.f32 %v10081_v14, %v10036_v58  ;;  %v15898_v18 = vld [vmem:[#allocation6_spill] sm:$0xff] }
 0x2d8   : > { %6814 = vpow2.f32 %v4232_v12  ;;  %v1106_v59 = vsel %vm1104_vm11, %v1105_v57, %v1103_v44  ;;  %v1111_v8 = vsub.f32 1.5, %v1110_v62  ;;  %v4180_v63 = vmul.f32 %v15896_v52, %v4179_v38 }
 0x2d9   : > { %v1133_v27 = vmul.f32 %v1106_v59, %v876_v51  ;;  %v3979_v55 = vand.u32 2147483648, %v9994_v1  ;;  %v4172_v42 = vmul.f32 %v4171_v23, %v15889_v19  ;;  %v3972_v11 = vadd.f32 %v10039_v5, %v3971_v41  ;;  %v15899_v51 = vld [vmem:[#allocation5_spill] sm:$0xff] }
 0x2da   : > { %v10098_v22 = vpop.eup %6812  ;;  %vm3974_vm6 = vweird.f32 %v10039_v5  ;;  %v3977_v15 = vand.u32 2147483647, %v9994_v1  ;;  %v879_v50 = vsub.f32 1.0, %v878_v43  ;;  %vm3973_vm10 = vweird.f32 %v9994_v1 }
 0x2db   : > { %v1163_v45 = vmul.f32 1.442695, %v1133_v27  ;;  %v3984_v46 = vmul.f32 %v10098_v22, %v10060_v37  ;;  %v10110_v62 = vadd.s32 112, %v8687_v3  ;;  %v1112_v13 = vmul.f32 %v15898_v18, %v1111_v8  ;;  %vm3975_vm12 = vmor %vm3973_vm10, %vm3974_vm6 }
 0x2dc   : > { %v4181_v54 = vmul.f32 0.5, %v4180_v63  ;;  %v3980_v34 = vor.u32 1.1754944e-38, %v3979_v55  ;;  %vm4173_vm3 = vcmp.eq.f32.partialorder %v15889_v19, inf  ;;  %vm3978_vm15 = vcmp.eq.f32.partialorder %v3977_v15, 8.507059e+37 }
 0x2dd   : > { %15897 = vst [vmem:[#allocation24_spill] sm:$0xff] %v10110_v62  ;;  %6816 = vpow2.f32 %v1163_v45  ;;  %v3976_v9 = vsel %vm3975_vm12, %v10039_v5, %v3972_v11  ;;  %v4174_v7 = vsel %vm4173_vm3, %v15889_v19, %v4172_v42  ;;  %v880_v38 = vmul.f32 %v10081_v14, %v879_v50 }
 0x2de   : > { %v6815_v10 = vpop.eup %6814  ;;  %v3981_v44 = vsel %vm3978_vm15, %v3980_v34, %v3976_v9  ;;  %v4176_v12 = vand.u32 2147483648, %v15889_v19  ;;  %v3985_v47 = vsub.f32 1.0, %v3984_v46  ;;  %vm15623_vm11 = vcmp.eq.s32.totalorder %v10110_v62, %v8689_v39 }
 0x2df   : > { %v10117_v1 = vsel %vm15619_vm14, 0.0, %v6815_v10  ;;  %v3982_v57 = vmul.f32 -1.0, %v3981_v44  ;;  %vm4175_vm6 = vcmp.eq.f32.partialorder %v15889_v19, 0.0  ;;  %v1113_v5 = vmul.f32 %v1112_v13, %v15899_v51 }
 0x2e0   : > { %4280 = vadd.xlane.f32.xlu0 %v10117_v1  ;;  %v4177_v23 = vsel %vm4175_vm6, %v4176_v12, %v4174_v7  ;;  %v4182_v43 = vsub.f32 1.5, %v4181_v54  ;;  %v888_v59 = vand.u32 2147483648, %v10036_v58  ;;  %v881_v8 = vadd.f32 %v10081_v14, %v880_v38  ;;  %v10152_v7 = vpop.xlane.xlu1 %1183 }
 0x2e1   : > { %v4204_v27 = vmul.f32 %v4177_v23, %v3982_v57  ;;  %vm883_vm10 = vweird.f32 %v10081_v14  ;;  %v886_v63 = vand.u32 2147483647, %v10036_v58  ;;  %v3986_v19 = vmul.f32 %v10098_v22, %v3985_v47 }
 0x2e2   : > { %vm882_vm12 = vweird.f32 %v10036_v58  ;;  %vm1114_vm3 = vcmp.eq.f32.partialorder %v15899_v51, inf  ;;  %v4183_v11 = vmul.f32 %v15896_v52, %v4182_v43  ;;  %v889_v15 = vor.u32 1.1754944e-38, %v888_v59 }
 0x2e3   : > { %v6817_v41 = vpop.eup %6816  ;;  %v4234_v42 = vmul.f32 1.442695, %v4204_v27  ;;  %vm884_vm15 = vmor %vm882_vm12, %vm883_vm10  ;;  %v1115_v45 = vsel %vm1114_vm3, %v15899_v51, %v1113_v5  ;;  %vm887_vm6 = vcmp.eq.f32.partialorder %v886_v63, 8.507059e+37  ;;  %v3994_v50 = vand.u32 2147483648, %v10060_v37  ;;  %v1188_v63 = vpop.xlane.xlu2 %1187 }
 0x2e4   : > { %v10135_v55 = vsel %vm15623_vm11, 0.0, %v6817_v41  ;;  %v885_v46 = vsel %vm884_vm15, %v10081_v14, %v881_v8  ;;  %v3987_v10 = vadd.f32 %v10098_v22, %v3986_v19  ;;  %vm3989_vm14 = vweird.f32 %v10098_v22 }
 0x2e5   : > { %15900 = vst [vmem:[#allocation26_spill] sm:$0xff] %v10135_v55  ;;  %1211 = vadd.xlane.f32.xlu2 %v10135_v55  ;;  %6818 = vpow2.f32 %v4234_v42  ;;  %v3992_v58 = vand.u32 2147483647, %v10060_v37  ;;  %v890_v18 = vsel %vm887_vm6, %v889_v15, %v885_v46  ;;  %v1117_v13 = vand.u32 2147483648, %v15899_v51 }
 0x2e6   : > { %vm1116_vm10 = vcmp.eq.f32.partialorder %v15899_v51, 0.0  ;;  %v4184_v52 = vmul.f32 %v4183_v11, %v8057_v28  ;;  %vm3988_vm12 = vweird.f32 %v10060_v37  ;;  %v891_v54 = vmul.f32 -1.0, %v890_v18  ;;  %v10186_v11 = vpop.xlane.xlu0 %1189 }
 0x2e7   : > { %vm3990_vm3 = vmor %vm3988_vm12, %vm3989_vm14  ;;  %v3995_v34 = vor.u32 1.1754944e-38, %v3994_v50  ;;  %v1118_v9 = vsel %vm1116_vm10, %v1117_v13, %v1115_v45  ;;  %vm3993_vm15 = vcmp.eq.f32.partialorder %v3992_v58, 8.507059e+37  ;;  %vm4185_vm6 = vcmp.eq.f32.partialorder %v8057_v28, inf }
 0x2e8   : > { %v1134_v38 = vmul.f32 %v1118_v9, %v891_v54  ;;  %v3991_v44 = vsel %vm3990_vm3, %v10098_v22, %v3987_v10  ;;  %v4186_v37 = vsel %vm4185_vm6, %v8057_v28, %v4184_v52  ;;  %v4188_v23 = vand.u32 2147483648, %v8057_v28  ;;  %v10170_v27 = vpop.xlane.xlu1 %1185 }
 0x2e9   : > { %v3996_v47 = vsel %vm3993_vm15, %v3995_v34, %v3991_v44  ;;  %vm4187_vm14 = vcmp.eq.f32.partialorder %v8057_v28, 0.0  ;;  %v10166_v41 = vadd.s32 120, %v8687_v3  ;;  %vm1250_vm3 = vweird.f32 %v1188_v63 }
 0x2ea   : > { %v1165_v57 = vmul.f32 1.442695, %v1134_v38  ;;  %v3997_v22 = vmul.f32 -1.0, %v3996_v47  ;;  %v4189_v51 = vsel %vm4187_vm14, %v4188_v23, %v4186_v37  ;;  %vm1265_vm6 = vweird.f32 %v10186_v11 }
 0x2eb   : > { %v6819_v14 = vpop.eup %6818  ;;  %15902 = vst [vmem:[#allocation12_spill] sm:$0xff] %v10166_v41  ;;  %vm15622_vm10 = vcmp.eq.s32.totalorder %v10166_v41, %v8689_v39  ;;  %v10188_v15 = vpop.xlane.xlu2 %4260 }
 0x2ec   : > { %v10159_v12 = vsel %vm15623_vm11, 0.0, %v6819_v14  ;;  %6820 = vpow2.f32 %v1165_v57  ;;  %v4205_v5 = vmul.f32 %v4189_v51, %v3997_v22  ;;  %v1256_v57 = vand.u32 2147483648, %v1188_v63 }
 0x2ed   : > { %15901 = vst [vmem:[#allocation25_spill] sm:$0xff] %v10159_v12  ;;  %4282 = vadd.xlane.f32.xlu1 %v10159_v12 }
 0x2ee   : > { %v4236_v43 = vmul.f32 1.442695, %v4205_v5  ;;  %v10198_v18 = vpop.xlane.xlu0 %4262 }
 0x2f0   : > { %6822 = vpow2.f32 %v4236_v43  ;;  %v10184_v42 = vpop.xlane.xlu1 %4254 }
 0x2f1   : > { %6824 = vrcp.f32 %v1188_v63 }
 0x2f2   : > { %v6821_v59 = vpop.eup %6820  ;;  %6826 = vrcp.f32 %v10186_v11 }
 0x2f3   : > { %v10175_v8 = vsel %vm15622_vm10, 0.0, %v6821_v59  ;;  %6828 = vrcp.f32 %v10188_v15 }
 0x2f4   : > { %15903 = vst [vmem:[#allocation13_spill] sm:$0xff] %v10175_v8  ;;  %1213 = vadd.xlane.f32.xlu0 %v10175_v8  ;;  %6830 = vrcp.f32 %v10152_v7 }
 0x2f5   : > { %6832 = vrcp.f32 %v10198_v18 }
 0x2f6   : > { %v6823_v28 = vpop.eup %6822  ;;  %6834 = vrcp.f32 %v10170_v27 }
 0x2f7   : > { %v10181_v19 = vsel %vm15622_vm10, 0.0, %v6823_v28  ;;  %v6825_v45 = vpop.eup %6824  ;;  %v10225_v28 = vpop.xlane.xlu2 %1193 }
 0x2f8   : > { %15904 = vst [vmem:[#allocation28_spill] sm:$0xff] %v10181_v19  ;;  %4284 = vadd.xlane.f32.xlu2 %v10181_v19  ;;  %v1246_v50 = vmul.f32 %v6825_v45, %v1188_v63  ;;  %v10192_v46 = vpop.xlane.xlu1 %4256  ;;  %v10194_v10 = vpop.eup %6826  ;;  %vm1251_vm12 = vweird.f32 %v6825_v45  ;;  %6836 = vrcp.f32 %v10225_v28 }
 0x2f9   : > { %v10196_v58 = vpop.eup %6828  ;;  %v1261_v52 = vmul.f32 %v10194_v10, %v10186_v11  ;;  %vm10217_vm15 = vmor %vm1250_vm3, %vm1251_vm12  ;;  %vm1266_vm14 = vweird.f32 %v10194_v10  ;;  %6838 = vrcp.f32 %v10184_v42  ;;  %vm4306_vm0 = vweird.f32 %v10192_v46 }
 0x2fa   : > { %v1247_v13 = vsub.f32 1.0, %v1246_v50  ;;  %v4332_v54 = vmul.f32 %v10196_v58, %v10188_v15  ;;  %v10209_v44 = vpop.eup %6830  ;;  %vm4337_vm12 = vweird.f32 %v10196_v58  ;;  %vm10241_vm3 = vmor %vm1265_vm6, %vm1266_vm14  ;;  %6840 = vrcp.f32 %v10192_v46 }
 0x2fb   : > { %v1262_v9 = vsub.f32 1.0, %v1261_v52  ;;  %v10211_v47 = vpop.eup %6832  ;;  %v1216_v43 = vmul.f32 %v10209_v44, %v10152_v7  ;;  %v1257_v52 = vor.u32 1.1754944e-38, %v1256_v57  ;;  %vm1221_vm14 = vweird.f32 %v10209_v44 }
 0x2fc   : > { %v1248_v34 = vmul.f32 %v6825_v45, %v1247_v13  ;;  %v4333_v14 = vsub.f32 1.0, %v4332_v54  ;;  %v10213_v23 = vpop.eup %6834  ;;  %v4347_v59 = vmul.f32 %v10211_v47, %v10198_v18  ;;  %v1254_v13 = vand.u32 2147483647, %v1188_v63 }
 0x2fd   : > { %v1263_v22 = vmul.f32 %v10194_v10, %v1262_v9  ;;  %v1231_v54 = vmul.f32 %v10213_v23, %v10170_v27  ;;  %v1271_v9 = vand.u32 2147483648, %v10186_v11  ;;  %v4342_v63 = vand.u32 2147483648, %v10188_v15 }
 0x2fe   : > { %v1249_v37 = vadd.f32 %v6825_v45, %v1248_v34  ;;  %v4334_v51 = vmul.f32 %v10196_v58, %v4333_v14  ;;  %v1269_v34 = vand.u32 2147483647, %v10186_v11  ;;  %v4340_v11 = vand.u32 2147483647, %v10188_v15  ;;  %v10263_v60 = vpop.eup %6836 }
 0x2ff   : > { %v1264_v14 = vadd.f32 %v10194_v10, %v1263_v22  ;;  %v1232_v22 = vsub.f32 1.0, %v1231_v54  ;;  %vm1255_vm10 = vcmp.eq.f32.partialorder %v1254_v13, 8.507059e+37  ;;  %v4343_v54 = vor.u32 1.1754944e-38, %v4342_v63 }
 0x300   : > { %v10207_v38 = vpop.xlane.xlu1 %4258  ;;  %v1253_v50 = vsel %vm10217_vm15, %v6825_v45, %v1249_v37  ;;  %v4335_v41 = vadd.f32 %v10196_v58, %v4334_v51  ;;  %v1217_v45 = vsub.f32 1.0, %v1216_v43  ;;  %v4348_v37 = vsub.f32 1.0, %v4347_v59 }
 0x301   : > { %vm4336_vm15 = vweird.f32 %v10188_v15  ;;  %v1258_v43 = vsel %vm1255_vm10, %v1257_v52, %v1253_v50  ;;  %v1268_v59 = vsel %vm10241_vm3, %v10194_v10, %v1264_v14  ;;  %6842 = vrcp.f32 %v10207_v38  ;;  %v10266_v52 = vpop.eup %6838 }
 0x302   : > { %vm10250_vm11 = vmor %vm4336_vm15, %vm4337_vm12  ;;  %v1272_v15 = vor.u32 1.1754944e-38, %v1271_v9  ;;  %v1218_v61 = vmul.f32 %v10209_v44, %v1217_v45  ;;  %v4349_v13 = vmul.f32 %v10211_v47, %v4348_v37  ;;  %vm1270_vm6 = vcmp.eq.f32.partialorder %v1269_v34, 8.507059e+37  ;;  %v10272_v14 = vpop.eup %6840  ;;  %v10282_v37 = vpop.xlane.xlu0 %1195 }
 0x303   : > { %v4339_v62 = vsel %vm10250_vm11, %v10196_v58, %v4335_v41  ;;  %vm4341_vm10 = vcmp.eq.f32.partialorder %v4340_v11, 8.507059e+37  ;;  %v1233_v50 = vmul.f32 %v10213_v23, %v1232_v22  ;;  %v10269_v10 = vmul.f32 %v1258_v43, %v8909_v16 }
 0x304   : > { %v1273_v41 = vsel %vm1270_vm6, %v1272_v15, %v1268_v59  ;;  %v4344_v58 = vsel %vm4341_vm10, %v4343_v54, %v4339_v62  ;;  %v1224_v9 = vand.u32 2147483647, %v10152_v7  ;;  %vm1220_vm11 = vweird.f32 %v10152_v7  ;;  %v10304_v54 = vpop.xlane.xlu2 %4266 }
 0x305   : > { %v1226_v34 = vand.u32 2147483648, %v10152_v7  ;;  %vm4351_vm12 = vweird.f32 %v10198_v18  ;;  %v1219_v63 = vadd.f32 %v10209_v44, %v1218_v61  ;;  %v4350_v45 = vadd.f32 %v10211_v47, %v4349_v13  ;;  %vm10292_vm6 = vmor %vm1220_vm11, %vm1221_vm14 }
 0x306   : > { %vm4352_vm3 = vweird.f32 %v10211_v47  ;;  %v4355_v62 = vand.u32 2147483647, %v10198_v18  ;;  %v1234_v11 = vadd.f32 %v10213_v23, %v1233_v50  ;;  %vm1236_vm15 = vweird.f32 %v10213_v23 }
 0x307   : > { %v10284_v57 = vpop.eup %6842  ;;  %v1291_v7 = vmul.f32 %v10263_v60, %v10225_v28  ;;  %v4287_v61 = vmul.f32 %v10266_v52, %v10184_v42  ;;  %vm10296_vm10 = vcmp.eq.f32.partialorder %v1224_v9, 8.507059e+37  ;;  %v4357_v43 = vand.u32 2147483648, %v10198_v18  ;;  %vm10310_vm11 = vmor %vm4351_vm12, %vm4352_vm3 }
 0x308   : > { %v10248_v51 = vpop.xlane.xlu1 %1191  ;;  %v1241_v59 = vand.u32 2147483648, %v10170_v27  ;;  %v4302_v15 = vmul.f32 %v10272_v14, %v10192_v46  ;;  %v1227_v13 = vor.u32 1.1754944e-38, %v1226_v34  ;;  %vm1235_vm14 = vweird.f32 %v10170_v27 }
 0x309   : > { %v1239_v9 = vand.u32 2147483647, %v10170_v27  ;;  %6844 = vrcp.f32 %v10282_v37  ;;  %v1223_v34 = vsel %vm10292_vm6, %v10209_v44, %v1219_v63  ;;  %v4354_v18 = vsel %vm10310_vm11, %v10211_v47, %v4350_v45  ;;  %vm10327_vm12 = vmor %vm1235_vm14, %vm1236_vm15 }
 0x30a   : > { %v4317_v27 = vmul.f32 %v10284_v57, %v10207_v38  ;;  %6846 = vrcp.f32 %v10248_v51  ;;  %v1238_v22 = vsel %vm10327_vm12, %v10213_v23, %v1234_v11  ;;  %v1292_v44 = vsub.f32 1.0, %v1291_v7 }
 0x30b   : > { %v4288_v63 = vsub.f32 1.0, %v4287_v61  ;;  %6848 = vrcp.f32 %v10304_v54  ;;  %v4358_v47 = vor.u32 1.1754944e-38, %v4357_v43  ;;  %v1242_v45 = vor.u32 1.1754944e-38, %v1241_v59 }
 0x30c   : > { %v1301_v50 = vand.u32 2147483648, %v10225_v28  ;;  %v4303_v3 = vsub.f32 1.0, %v4302_v15  ;;  %v10340_v16 = vmul.f32 %v1273_v41, %v9000_v2  ;;  %v1228_v19 = vsel %vm10296_vm10, %v1227_v13, %v1223_v34  ;;  %v15919_v34 = vld [vmem:[#allocation18_spill] sm:$0xff] }
 0x30d   : > { %vm4356_vm3 = vcmp.eq.f32.partialorder %v4355_v62, 8.507059e+37  ;;  %vm1240_vm15 = vcmp.eq.f32.partialorder %v1239_v9, 8.507059e+37  ;;  %v4295_v23 = vand.u32 2147483647, %v10184_v42  ;;  %v4318_v11 = vsub.f32 1.0, %v4317_v27 }
 0x30e   : > { %v4359_v12 = vsel %vm4356_vm3, %v4358_v47, %v4354_v18  ;;  %v1243_v39 = vsel %vm1240_vm15, %v1242_v45, %v1238_v22  ;;  %v10348_v61 = vmul.f32 %v4344_v58, %v9039_v48  ;;  %v1293_v43 = vmul.f32 %v10263_v60, %v1292_v44  ;;  %v15920_v18 = vld [vmem:[#allocation38_spill] sm:$0xff] }
 0x30f   : > { %v10345_v7 = vpop.eup %6844  ;;  %v1299_v41 = vand.u32 2147483647, %v10225_v28  ;;  %v4289_v59 = vmul.f32 %v10266_v52, %v4288_v63  ;;  %v1455_v62 = vmul.f32 %v1228_v19, %v8827_v33  ;;  %vm1295_vm6 = vweird.f32 %v10225_v28 }
 0x310   : > { %v10317_v4 = vpop.xlane.xlu1 %4264  ;;  %v10353_v5 = vpop.eup %6846  ;;  %v1302_v15 = vor.u32 1.1754944e-38, %v1301_v50  ;;  %v4304_v13 = vmul.f32 %v10272_v14, %v4303_v3  ;;  %v10361_v58 = vmul.f32 %v4359_v12, %v15919_v34  ;;  %v1456_v27 = vmul.f32 %v1243_v39, %v15920_v18 }
 0x311   : > { %v10358_v9 = vpop.eup %6848  ;;  %vm4291_vm10 = vweird.f32 %v10184_v42  ;;  %v4297_v22 = vand.u32 2147483648, %v10184_v42  ;;  %vm1296_vm11 = vweird.f32 %v10263_v60  ;;  %vm4292_vm14 = vweird.f32 %v10266_v52 }
 0x312   : > { %vm10368_vm12 = vcmp.eq.f32.partialorder %v4295_v23, 8.507059e+37  ;;  %v4319_v3 = vmul.f32 %v10284_v57, %v4318_v11  ;;  %v1294_v44 = vadd.f32 %v10263_v60, %v1293_v43  ;;  %vm10374_vm3 = vcmp.eq.f32.partialorder %v1299_v41, 8.507059e+37  ;;  %vm10394_vm5 = vmor %vm1295_vm6, %vm1296_vm11  ;;  %v10431_v43 = vpop.xlane.xlu0 %4268 }
 0x313   : > { %v4290_v63 = vadd.f32 %v10266_v52, %v4289_v59  ;;  %v1306_v47 = vmul.f32 %v10345_v7, %v10282_v37  ;;  %v1276_v45 = vmul.f32 %v10353_v5, %v10248_v51  ;;  %v4305_v39 = vadd.f32 %v10272_v14, %v4304_v13  ;;  %vm10404_vm4 = vmor %vm4291_vm10, %vm4292_vm14 }
 0x314   : > { %vm4307_vm15 = vweird.f32 %v10272_v14  ;;  %v4377_v23 = vmul.f32 %v10358_v9, %v10304_v54  ;;  %6850 = vrcp.f32 %v10317_v4  ;;  %v1471_v11 = vadd.f32 %v1456_v27, %v1455_v62 }
 0x315   : > { %v4298_v41 = vor.u32 1.1754944e-38, %v4297_v22  ;;  %v4312_v59 = vand.u32 2147483648, %v10192_v46  ;;  %v4310_v62 = vand.u32 2147483647, %v10192_v46  ;;  %v4320_v28 = vadd.f32 %v10284_v57, %v4319_v3  ;;  %v10412_v22 = vpop.xlane.xlu2 %1199  ;;  %vm10422_vm10 = vmor %vm4306_vm0, %vm4307_vm15 }
 0x316   : > { %vm4322_vm6 = vweird.f32 %v10284_v57  ;;  %v4327_v27 = vand.u32 2147483648, %v10207_v38  ;;  %v1298_v34 = vsel %vm10394_vm5, %v10263_v60, %v1294_v44  ;;  %v4294_v42 = vsel %vm10404_vm4, %v10266_v52, %v4290_v63 }
 0x317   : > { %v1307_v3 = vsub.f32 1.0, %v1306_v47  ;;  %v1277_v2 = vsub.f32 1.0, %v1276_v45  ;;  %v4309_v48 = vsel %vm10422_vm10, %v10272_v14, %v4305_v39  ;;  %vm4321_vm11 = vweird.f32 %v10207_v38 }
 0x318   : > { %v10383_v50 = vpop.xlane.xlu1 %1197  ;;  %v4325_v60 = vand.u32 2147483647, %v10207_v38  ;;  %v4378_v44 = vsub.f32 1.0, %v4377_v23  ;;  %v4313_v52 = vor.u32 1.1754944e-38, %v4312_v59  ;;  %vm1310_vm4 = vweird.f32 %v10282_v37  ;;  %vm10437_vm0 = vmor %vm4321_vm11, %vm4322_vm6 }
 0x319   : > { %v1314_v63 = vand.u32 2147483647, %v10282_v37  ;;  %6852 = vrcp.f32 %v10383_v50  ;;  %v4299_v38 = vsel %vm10368_vm12, %v4298_v41, %v4294_v42  ;;  %vm4311_vm5 = vcmp.eq.f32.partialorder %v4310_v62, 8.507059e+37 }
 0x31a   : > { %v10442_v14 = vpop.eup %6850  ;;  %v4324_v45 = vsel %vm10437_vm0, %v10284_v57, %v4320_v28  ;;  %v4328_v39 = vor.u32 1.1754944e-38, %v4327_v27  ;;  %v4314_v23 = vsel %vm4311_vm5, %v4313_v52, %v4309_v48  ;;  %v1308_v59 = vmul.f32 %v10345_v7, %v1307_v3 }
 0x31b   : > { %v1278_v13 = vmul.f32 %v10353_v5, %v1277_v2  ;;  %6854 = vrcp.f32 %v10431_v43  ;;  %v1472_v33 = vadd.f32 %v1471_v11, %v10269_v10  ;;  %v1303_v19 = vsel %vm10374_vm3, %v1302_v15, %v1298_v34 }
 0x31c   : > { %vm4326_vm14 = vcmp.eq.f32.partialorder %v4325_v60, 8.507059e+37  ;;  %v4379_v41 = vmul.f32 %v10358_v9, %v4378_v44  ;;  %vm10458_vm12 = vcmp.eq.f32.partialorder %v1314_v63, 8.507059e+37  ;;  %v1316_v48 = vand.u32 2147483648, %v10282_v37  ;;  %v10481_v44 = vpop.xlane.xlu0 %1201 }
 0x31d   : > { %v4329_v62 = vsel %vm4326_vm14, %v4328_v39, %v4324_v45  ;;  %v4362_v2 = vmul.f32 %v10442_v14, %v10317_v4  ;;  %v4526_v28 = vmul.f32 %v4299_v38, %v9269_v56  ;;  %v4527_v10 = vmul.f32 %v4314_v23, %v9336_v36  ;;  %v10469_v15 = vpop.xlane.xlu2 %4272 }
 0x31e   : > { %vm1311_vm15 = vweird.f32 %v10345_v7  ;;  %6856 = vrcp.f32 %v10412_v22  ;;  %v1309_v12 = vadd.f32 %v10345_v7, %v1308_v59  ;;  %v4385_v11 = vand.u32 2147483647, %v10304_v54 }
 0x31f   : > { %v10471_v34 = vpop.eup %6852  ;;  %v1279_v27 = vadd.f32 %v10353_v5, %v1278_v13  ;;  %vm1281_vm3 = vweird.f32 %v10353_v5  ;;  %v4528_v42 = vmul.f32 %v4329_v62, %v9395_v49  ;;  %v4380_v3 = vadd.f32 %v10358_v9, %v4379_v41  ;;  %vm10487_vm10 = vmor %vm1310_vm4, %vm1311_vm15 }
 0x320   : > { %v10452_v46 = vpop.xlane.xlu1 %4270  ;;  %vm4382_vm6 = vweird.f32 %v10358_v9  ;;  %v1286_v60 = vand.u32 2147483648, %v10248_v51  ;;  %v4387_v47 = vand.u32 2147483648, %v10304_v54  ;;  %vm1280_vm11 = vweird.f32 %v10248_v51 }
 0x321   : > { %v10483_v52 = vpop.eup %6854  ;;  %v1284_v38 = vand.u32 2147483647, %v10248_v51  ;;  %v4363_v45 = vsub.f32 1.0, %v4362_v2  ;;  %v4542_v39 = vadd.f32 %v4527_v10, %v4526_v28  ;;  %v1317_v23 = vor.u32 1.1754944e-38, %v1316_v48  ;;  %vm10497_vm5 = vmor %vm1280_vm11, %vm1281_vm3 }
 0x322   : > { %vm4381_vm0 = vweird.f32 %v10304_v54  ;;  %v1321_v37 = vmul.f32 %v10471_v34, %v10383_v50  ;;  %v1313_v13 = vsel %vm10487_vm10, %v10345_v7, %v1309_v12  ;;  %vm10512_vm14 = vcmp.eq.f32.partialorder %v4385_v11, 8.507059e+37 }
 0x323   : > { %vm10508_vm4 = vmor %vm4381_vm0, %vm4382_vm6  ;;  %v1283_v41 = vsel %vm10497_vm5, %v10353_v5, %v1279_v27  ;;  %6858 = vrcp.f32 %v10481_v44  ;;  %v4543_v62 = vadd.f32 %v4542_v39, %v4528_v42  ;;  %v1287_v2 = vor.u32 1.1754944e-38, %v1286_v60 }
 0x324   : > { %v10520_v48 = vpop.eup %6856  ;;  %v4384_v7 = vsel %vm10508_vm4, %v10358_v9, %v4380_v3  ;;  %v4392_v28 = vmul.f32 %v10483_v52, %v10431_v43  ;;  %v4388_v10 = vor.u32 1.1754944e-38, %v4387_v47  ;;  %vm1285_vm15 = vcmp.eq.f32.partialorder %v1284_v38, 8.507059e+37  ;;  %v15943_v9 = vld [vmem:[#allocation43_spill] sm:$0xff] }
 0x325   : > { %v4364_v12 = vmul.f32 %v10442_v14, %v4363_v45  ;;  %6860 = vrcp.f32 %v10452_v46  ;;  %v1318_v11 = vsel %vm10458_vm12, %v1317_v23, %v1313_v13  ;;  %v1288_v27 = vsel %vm1285_vm15, %v1287_v2, %v1283_v41  ;;  %v10543_v23 = vpop.xlane.xlu2 %1205 }
 0x326   : > { %v4370_v42 = vand.u32 2147483647, %v10317_v4  ;;  %v1322_v63 = vsub.f32 1.0, %v1321_v37  ;;  %v1460_v3 = vmul.f32 %v1303_v19, %v15943_v9  ;;  %v4389_v60 = vsel %vm10512_vm14, %v4388_v10, %v4384_v7  ;;  %v10564_v7 = vpop.xlane.xlu0 %4274 }
 0x327   : > { %v4372_v47 = vand.u32 2147483648, %v10317_v4  ;;  %v1336_v38 = vmul.f32 %v10520_v48, %v10412_v22  ;;  %v4544_v45 = vadd.f32 %v4543_v62, %v10348_v61  ;;  %v1473_v39 = vadd.f32 %v1472_v33, %v10340_v16 }
 0x328   : > { %v10529_v5 = vpop.xlane.xlu1 %1203  ;;  %v4393_v57 = vsub.f32 1.0, %v4392_v28  ;;  %v1461_v19 = vmul.f32 %v1318_v11, %v9358_v31  ;;  %v1459_v37 = vmul.f32 %v1288_v27, %v9451_v17  ;;  %v4365_v13 = vadd.f32 %v10442_v14, %v4364_v12 }
 0x329   : > { %6862 = vrcp.f32 %v10529_v5  ;;  %v10545_v59 = vpop.eup %6858  ;;  %vm4367_vm12 = vweird.f32 %v10442_v14  ;;  %v10552_v51 = vmul.f32 %v4389_v60, %v9427_v26  ;;  %vm4366_vm3 = vweird.f32 %v10317_v4 }
 0x32a   : > { %vm10555_vm6 = vcmp.eq.f32.partialorder %v4370_v42, 8.507059e+37  ;;  %v1323_v16 = vmul.f32 %v10471_v34, %v1322_v63  ;;  %v4373_v54 = vor.u32 1.1754944e-38, %v4372_v47  ;;  %vm4396_vm10 = vweird.f32 %v10431_v43  ;;  %vm10567_vm11 = vmor %vm4366_vm3, %vm4367_vm12 }
 0x32b   : > { %v10560_v61 = vpop.eup %6860  ;;  %v4400_v41 = vand.u32 2147483647, %v10431_v43  ;;  %v1337_v62 = vsub.f32 1.0, %v1336_v38  ;;  %v4545_v2 = vadd.f32 %v4544_v45, %v10361_v58  ;;  %v4394_v28 = vmul.f32 %v10483_v52, %v4393_v57 }
 0x32c   : > { %v4402_v10 = vand.u32 2147483648, %v10431_v43  ;;  %v1351_v12 = vmul.f32 %v10545_v59, %v10481_v44  ;;  %v1474_v11 = vadd.f32 %v1473_v39, %v1459_v37  ;;  %v4369_v27 = vsel %vm10567_vm11, %v10442_v14, %v4365_v13 }
 0x32d   : > { %v1329_v42 = vand.u32 2147483647, %v10383_v50  ;;  %6864 = vrcp.f32 %v10469_v15  ;;  %v1324_v63 = vadd.f32 %v10471_v34, %v1323_v16  ;;  %vm1326_vm0 = vweird.f32 %v10471_v34 }
 0x32e   : > { %v1331_v60 = vand.u32 2147483648, %v10383_v50  ;;  %v4407_v47 = vmul.f32 %v10560_v61, %v10452_v46  ;;  %vm4397_vm5 = vweird.f32 %v10483_v52  ;;  %vm10590_vm4 = vcmp.eq.f32.partialorder %v4400_v41, 8.507059e+37 }
 0x32f   : > { %v10580_v58 = vpop.eup %6862  ;;  %vm1325_vm14 = vweird.f32 %v10383_v50  ;;  %v1338_v45 = vmul.f32 %v10520_v48, %v1337_v62  ;;  %v4374_v39 = vsel %vm10555_vm6, %v4373_v54, %v4369_v27  ;;  %v4395_v57 = vadd.f32 %v10483_v52, %v4394_v28  ;;  %vm10621_vm3 = vmor %vm4396_vm10, %vm4397_vm5 }
 0x330   : > { %v10587_v38 = vpop.xlane.xlu1 %4276  ;;  %v1344_v37 = vand.u32 2147483647, %v10412_v22  ;;  %v1352_v13 = vsub.f32 1.0, %v1351_v12  ;;  %v1475_v4 = vadd.f32 %v1474_v11, %v1460_v3  ;;  %v4403_v31 = vor.u32 1.1754944e-38, %v4402_v10  ;;  %vm10604_vm15 = vmor %vm1325_vm14, %vm1326_vm0 }
 0x331   : > { %v1346_v50 = vand.u32 2147483648, %v10412_v22  ;;  %v1366_v33 = vmul.f32 %v10580_v58, %v10529_v5  ;;  %v1328_v54 = vsel %vm10604_vm15, %v10471_v34, %v1324_v63  ;;  %vm1330_vm12 = vcmp.eq.f32.partialorder %v1329_v42, 8.507059e+37 }
 0x332   : > { %v1332_v62 = vor.u32 1.1754944e-38, %v1331_v60  ;;  %v4408_v28 = vsub.f32 1.0, %v4407_v47  ;;  %v4531_v10 = vmul.f32 %v4374_v39, %v9564_v32  ;;  %v1339_v11 = vadd.f32 %v10520_v48, %v1338_v45 }
 0x333   : > { %v10614_v3 = vpop.eup %6864  ;;  %vm1341_vm6 = vweird.f32 %v10520_v48  ;;  %6866 = vrcp.f32 %v10543_v23  ;;  %v4399_v27 = vsel %vm10621_vm3, %v10483_v52, %v4395_v57  ;;  %vm1340_vm11 = vweird.f32 %v10412_v22 }
 0x334   : > { %vm10634_vm0 = vcmp.eq.f32.partialorder %v1344_v37, 8.507059e+37  ;;  %v1353_v42 = vmul.f32 %v10545_v59, %v1352_v13  ;;  %v1333_v63 = vsel %vm1330_vm12, %v1332_v62, %v1328_v54  ;;  %v1347_v60 = vor.u32 1.1754944e-38, %v1346_v50  ;;  %vm10639_vm10 = vmor %vm1340_vm11, %vm1341_vm6 }
 0x335   : > { %v1476_v47 = vadd.f32 %v1475_v4, %v1461_v19  ;;  %v1367_v45 = vsub.f32 1.0, %v1366_v33  ;;  %v4409_v41 = vmul.f32 %v10560_v61, %v4408_v28  ;;  %vm4411_vm5 = vweird.f32 %v10452_v46 }
 0x336   : > { %v4422_v22 = vmul.f32 %v10614_v3, %v10469_v15  ;;  %v4546_v57 = vadd.f32 %v4545_v2, %v4531_v10  ;;  %v4404_v19 = vsel %vm10590_vm4, %v4403_v31, %v4399_v27  ;;  %v1343_v37 = vsel %vm10639_vm10, %v10520_v48, %v1339_v11 }
 0x337   : > { %v10628_v34 = vpop.xlane.xlu0 %1207  ;;  %v4417_v13 = vand.u32 2147483648, %v10452_v46  ;;  %v1462_v4 = vmul.f32 %v1333_v63, %v9658_v40  ;;  %v1354_v50 = vadd.f32 %v10545_v59, %v1353_v42  ;;  %vm1355_vm14 = vweird.f32 %v10481_v44 }
 0x338   : > { %6868 = vrcp.f32 %v10628_v34  ;;  %vm1356_vm15 = vweird.f32 %v10545_v59  ;;  %vm4412_vm4 = vweird.f32 %v10560_v61  ;;  %v1361_v31 = vand.u32 2147483648, %v10481_v44 }
 0x339   : > { %v10662_v2 = vpop.eup %6866  ;;  %v1368_v48 = vmul.f32 %v10580_v58, %v1367_v45  ;;  %v1348_v14 = vsel %vm10634_vm0, %v1347_v60, %v1343_v37  ;;  %v4410_v54 = vadd.f32 %v10560_v61, %v4409_v41  ;;  %v1359_v62 = vand.u32 2147483647, %v10481_v44  ;;  %vm10677_vm12 = vmor %vm1355_vm14, %vm1356_vm15 }
 0x33a   : > { %v4423_v28 = vsub.f32 1.0, %v4422_v22  ;;  %v4533_v10 = vmul.f32 %v4404_v19, %v9582_v20  ;;  %v4547_v12 = vadd.f32 %v4546_v57, %v10552_v51  ;;  %v4415_v11 = vand.u32 2147483647, %v10452_v46  ;;  %vm10695_vm3 = vmor %vm4411_vm5, %vm4412_vm4 }
 0x33b   : > { %v4418_v42 = vor.u32 1.1754944e-38, %v4417_v13  ;;  %v1358_v63 = vsel %vm10677_vm12, %v10545_v59, %v1354_v50  ;;  %v1376_v60 = vand.u32 2147483648, %v10529_v5  ;;  %v1381_v51 = vmul.f32 %v10662_v2, %v10543_v23 }
 0x33c   : > { %v1463_v44 = vmul.f32 %v1348_v14, %v9663_v25  ;;  %v1362_v39 = vor.u32 1.1754944e-38, %v1361_v31  ;;  %v1369_v41 = vadd.f32 %v10580_v58, %v1368_v48  ;;  %vm1371_vm6 = vweird.f32 %v10580_v58 }
 0x33d   : > { %v10600_v16 = vpop.xlane.xlu2 %4278  ;;  %v1477_v59 = vadd.f32 %v1476_v47, %v1462_v4  ;;  %v4414_v22 = vsel %vm10695_vm3, %v10560_v61, %v4410_v54  ;;  %vm1360_vm11 = vcmp.eq.f32.partialorder %v1359_v62, 8.507059e+37  ;;  %v4424_v57 = vmul.f32 %v10614_v3, %v4423_v28 }
 0x33e   : > { %v10682_v43 = vpop.eup %6868  ;;  %v1363_v46 = vsel %vm1360_vm11, %v1362_v39, %v1358_v63  ;;  %vm1370_vm0 = vweird.f32 %v10529_v5  ;;  %v1374_v37 = vand.u32 2147483647, %v10529_v5  ;;  %vm4416_vm10 = vcmp.eq.f32.partialorder %v4415_v11, 8.507059e+37 }
 0x33f   : > { %v1396_v13 = vmul.f32 %v10682_v43, %v10628_v34  ;;  %vm10711_vm5 = vmor %vm1370_vm0, %vm1371_vm6  ;;  %v1377_v4 = vor.u32 1.1754944e-38, %v1376_v60  ;;  %v1382_v61 = vsub.f32 1.0, %v1381_v51  ;;  %v4419_v31 = vsel %vm4416_vm10, %v4418_v42, %v4414_v22 }
 0x340   : > { %v1373_v48 = vsel %vm10711_vm5, %v10580_v58, %v1369_v41  ;;  %v4430_v5 = vand.u32 2147483647, %v10469_v15  ;;  %v4432_v14 = vand.u32 2147483648, %v10469_v15  ;;  %v1464_v54 = vmul.f32 %v1363_v46, %v9752_v24 }
 0x341   : > { %v4425_v62 = vadd.f32 %v10614_v3, %v4424_v57  ;;  %vm4427_vm14 = vweird.f32 %v10614_v3  ;;  %v4548_v11 = vadd.f32 %v4547_v12, %v4533_v10  ;;  %v1478_v27 = vadd.f32 %v1477_v59, %v1463_v44 }
 0x342   : > { %vm1375_vm15 = vcmp.eq.f32.partialorder %v1374_v37, 8.507059e+37  ;;  %v1397_v42 = vsub.f32 1.0, %v1396_v13  ;;  %vm4426_vm4 = vweird.f32 %v10469_v15  ;;  %v1383_v58 = vmul.f32 %v10662_v2, %v1382_v61 }
 0x343   : > { %v1378_v63 = vsel %vm1375_vm15, %v1377_v4, %v1373_v48  ;;  %v4534_v45 = vmul.f32 %v4419_v31, %v9706_v0  ;;  %vm10735_vm12 = vmor %vm4426_vm4, %vm4427_vm14  ;;  %vm10739_vm3 = vcmp.eq.f32.partialorder %v4430_v5, 8.507059e+37  ;;  %v4433_v12 = vor.u32 1.1754944e-38, %v4432_v14 }
 0x344   : > { %v1389_v15 = vand.u32 2147483647, %v10543_v23  ;;  %v1479_v41 = vadd.f32 %v1478_v27, %v1464_v54  ;;  %v4429_v59 = vsel %vm10735_vm12, %v10614_v3, %v4425_v62  ;;  %v1465_v57 = vmul.f32 %v1378_v63, %v9762_v53  ;;  %v15976_v62 = vld [vmem:[#allocation11_spill] sm:$0xff] }
 0x345   : > { %v1391_v46 = vand.u32 2147483648, %v10543_v23  ;;  %v4447_v37 = vand.u32 2147483648, %v10564_v7  ;;  %v1398_v13 = vmul.f32 %v10682_v43, %v1397_v42  ;;  %v1384_v47 = vadd.f32 %v10662_v2, %v1383_v58 }
 0x346   : > { %vm1386_vm6 = vweird.f32 %v10662_v2  ;;  %v10757_v61 = vadd.f32 %v4548_v11, %v4534_v45  ;;  %v4434_v3 = vsel %vm10739_vm3, %v4433_v12, %v4429_v59  ;;  %vm1385_vm11 = vweird.f32 %v10543_v23 }
 0x347   : > { %v10764_v48 = vadd.f32 %v1479_v41, %v1465_v57  ;;  %vm10766_vm0 = vcmp.eq.f32.partialorder %v1389_v15, 8.507059e+37  ;;  %v4445_v14 = vand.u32 2147483647, %v10564_v7  ;;  %vm10772_vm10 = vmor %vm1385_vm11, %vm1386_vm6  ;;  %v10776_v11 = vor.u32 1.1754944e-38, %v4447_v37 }
 0x348   : > { %v1399_v23 = vadd.f32 %v10682_v43, %v1398_v13  ;;  %vm1401_vm5 = vweird.f32 %v10682_v43  ;;  %v10785_v63 = vmul.f32 %v4434_v3, %v9807_v29  ;;  %v1388_v58 = vsel %vm10772_vm10, %v10662_v2, %v1384_v47 }
 0x349   : > { %v10648_v52 = vpop.xlane.xlu1 %1209  ;;  %vm1400_vm14 = vweird.f32 %v10628_v34  ;;  %v1406_v10 = vand.u32 2147483648, %v10628_v34  ;;  %v1404_v2 = vand.u32 2147483647, %v10628_v34  ;;  %vm4441_vm6 = vweird.f32 %v10564_v7 }
 0x34a   : > { %6870 = vrcp.f32 %v10648_v52  ;;  %vm10799_vm15 = vmor %vm1400_vm14, %vm1401_vm5  ;;  %vm1415_vm12 = vweird.f32 %v10648_v52  ;;  %v1419_v34 = vand.u32 2147483647, %v10648_v52 }
 0x34b   : > { %v1403_v57 = vsel %vm10799_vm15, %v10682_v43, %v1399_v23  ;;  %v1407_v47 = vor.u32 1.1754944e-38, %v1406_v10 }
 0x34c   : > { %vm1420_vm15 = vcmp.eq.f32.partialorder %v1419_v34, 8.507059e+37 }
 0x350   : > { %v10705_v19 = vpop.eup %6870 }
 0x351   : > { %v1411_v28 = vmul.f32 %v10705_v19, %v10648_v52  ;;  %vm1416_vm4 = vweird.f32 %v10705_v19 }
 0x352   : > { %vm10823_vm11 = vmor %vm1415_vm12, %vm1416_vm4  ;;  %vm10852_vm4 = vcmp.eq.f32.partialorder %v4445_v14, 8.507059e+37 }
 0x353   : > { %v10730_v60 = vpop.xlane.xlu0 %4280  ;;  %v1412_v22 = vsub.f32 1.0, %v1411_v28  ;;  %v1392_v28 = vor.u32 1.1754944e-38, %v1391_v46  ;;  %v1421_v46 = vand.u32 2147483648, %v10648_v52 }
 0x355   : > { %v1413_v54 = vmul.f32 %v10705_v19, %v1412_v22  ;;  %v1393_v59 = vsel %vm10766_vm0, %v1392_v28, %v1388_v58  ;;  %vm1405_vm0 = vcmp.eq.f32.partialorder %v1404_v2, 8.507059e+37  ;;  %v1422_v58 = vor.u32 1.1754944e-38, %v1421_v46 }
 0x356   : > { %v1466_v28 = vmul.f32 %v1393_v59, %v15976_v62  ;;  %v1408_v23 = vsel %vm1405_vm0, %v1407_v47, %v1403_v57  ;;  %v4477_v46 = vand.u32 2147483648, %v10600_v16 }
 0x357   : > { %v1414_v41 = vadd.f32 %v10705_v19, %v1413_v54 }
 0x358   : > { %v10660_v33 = vpop.xlane.xlu2 %1211 }
 0x359   : > { %6872 = vrcp.f32 %v10660_v33  ;;  %v1436_v3 = vand.u32 2147483648, %v10660_v33  ;;  %v1418_v52 = vsel %vm10823_vm11, %v10705_v19, %v1414_v41  ;;  %vm1430_vm10 = vweird.f32 %v10660_v33 }
 0x35a   : > { %6874 = vrcp.f32 %v10564_v7  ;;  %v1434_v5 = vand.u32 2147483647, %v10660_v33  ;;  %v1423_v2 = vsel %vm1420_vm15, %v1422_v58, %v1418_v52  ;;  %vm4456_vm11 = vweird.f32 %v10587_v38 }
 0x35b   : > { %6876 = vrcp.f32 %v10587_v38  ;;  %v1437_v59 = vor.u32 1.1754944e-38, %v1436_v3  ;;  %v1468_v43 = vmul.f32 %v1423_v2, %v10088_v35 }
 0x35c   : > { %6878 = vrcp.f32 %v10600_v16  ;;  %vm1435_vm12 = vcmp.eq.f32.partialorder %v1434_v5, 8.507059e+37 }
 0x35d   : > { %6880 = vrcp.f32 %v10730_v60 }
 0x35f   : > { %v10716_v50 = vpop.eup %6872 }
 0x360   : > { %v1426_v51 = vmul.f32 %v10716_v50, %v10660_v33  ;;  %v10744_v44 = vpop.eup %6874  ;;  %v10780_v27 = vpop.xlane.xlu1 %4282  ;;  %vm1431_vm3 = vweird.f32 %v10716_v50 }
 0x361   : > { %v4437_v31 = vmul.f32 %v10744_v44, %v10564_v7  ;;  %v10782_v42 = vpop.eup %6876  ;;  %vm4442_vm5 = vweird.f32 %v10744_v44  ;;  %vm10839_vm14 = vmor %vm1430_vm10, %vm1431_vm3 }
 0x362   : > { %v1427_v4 = vsub.f32 1.0, %v1426_v51  ;;  %v10797_v12 = vpop.eup %6878  ;;  %v4452_v22 = vmul.f32 %v10782_v42, %v10587_v38  ;;  %vm10870_vm0 = vmor %vm4441_vm6, %vm4442_vm5  ;;  %vm4457_vm5 = vweird.f32 %v10782_v42 }
 0x363   : > { %v4438_v39 = vsub.f32 1.0, %v4437_v31  ;;  %v10828_v31 = vpop.eup %6880  ;;  %vm4472_vm15 = vweird.f32 %v10797_v12 }
 0x364   : > { %v1428_v51 = vmul.f32 %v10716_v50, %v1427_v4  ;;  %v4467_v4 = vmul.f32 %v10797_v12, %v10600_v16  ;;  %v4453_v19 = vsub.f32 1.0, %v4452_v22  ;;  %v4482_v41 = vmul.f32 %v10828_v31, %v10730_v60 }
 0x365   : > { %v4439_v13 = vmul.f32 %v10744_v44, %v4438_v39  ;;  %v1467_v22 = vmul.f32 %v1408_v23, %v10001_v21 }
 0x366   : > { %v1429_v37 = vadd.f32 %v10716_v50, %v1428_v51  ;;  %v4468_v15 = vsub.f32 1.0, %v4467_v4  ;;  %v4483_v5 = vsub.f32 1.0, %v4482_v41  ;;  %v4460_v51 = vand.u32 2147483647, %v10587_v38 }
 0x367   : > { %v10792_v45 = vpop.xlane.xlu0 %1213  ;;  %v4440_v57 = vadd.f32 %v10744_v44, %v4439_v13  ;;  %v4454_v13 = vmul.f32 %v10782_v42, %v4453_v19  ;;  %v4462_v19 = vand.u32 2147483648, %v10587_v38  ;;  %v4475_v38 = vand.u32 2147483647, %v10600_v16 }
 0x368   : > { %6882 = vrcp.f32 %v10792_v45  ;;  %v1433_v33 = vsel %vm10839_vm14, %v10716_v50, %v1429_v37  ;;  %v1481_v50 = vadd.f32 %v10764_v48, %v1466_v28  ;;  %v1451_v4 = vand.u32 2147483648, %v10792_v45 }
 0x369   : > { %6884 = vrcp.f32 %v10780_v27  ;;  %v1438_v37 = vsel %vm1435_vm12, %v1437_v59, %v1433_v33  ;;  %v1449_v14 = vand.u32 2147483647, %v10792_v45  ;;  %v4469_v52 = vmul.f32 %v10797_v12, %v4468_v15 }
 0x36a   : > { %v1482_v28 = vadd.f32 %v1481_v50, %v1467_v22  ;;  %v1469_v23 = vmul.f32 %v1438_v37, %v10135_v55  ;;  %vm1445_vm10 = vweird.f32 %v10792_v45  ;;  %v4444_v7 = vsel %vm10870_vm0, %v10744_v44, %v4440_v57 }
 0x36b   : > { %vm1450_vm6 = vcmp.eq.f32.partialorder %v1449_v14, 8.507059e+37  ;;  %v4455_v41 = vadd.f32 %v10782_v42, %v4454_v13  ;;  %v4470_v22 = vadd.f32 %v10797_v12, %v4469_v52  ;;  %v10887_v37 = vpop.xlane.xlu2 %4284  ;;  %v4449_v44 = vsel %vm10852_vm4, %v10776_v11, %v4444_v7  ;;  %v15989_v13 = vld [vmem:[#allocation15_spill] sm:$0xff] }
 0x36c   : > { %v1483_v15 = vadd.f32 %v1482_v28, %v1468_v43  ;;  %vm10892_vm12 = vcmp.eq.f32.partialorder %v4460_v51, 8.507059e+37  ;;  %6886 = vrcp.f32 %v10887_v37  ;;  %vm4471_vm0 = vweird.f32 %v10600_v16 }
 0x36d   : > { %vm10909_vm4 = vmor %vm4471_vm0, %vm4472_vm15  ;;  %v4536_v52 = vmul.f32 %v4449_v44, %v15989_v13  ;;  %v4492_v48 = vand.u32 2147483648, %v10730_v60  ;;  %vm4501_vm15 = vweird.f32 %v10780_v27 }
 0x36e   : > { %v6883_v54 = vpop.eup %6882 }
 0x36f   : > { %v10843_v39 = vpop.eup %6884  ;;  %v1441_v10 = vmul.f32 %v6883_v54, %v10792_v45  ;;  %vm1446_vm3 = vweird.f32 %v6883_v54  ;;  %v4484_v45 = vmul.f32 %v10828_v31, %v4483_v5  ;;  %v4474_v5 = vsel %vm10909_vm4, %v10797_v12, %v4470_v22 }
 0x370   : > { %v4497_v47 = vmul.f32 %v10843_v39, %v10780_v27  ;;  %vm1447_vm14 = vmor %vm1445_vm10, %vm1446_vm3  ;;  %vm4486_vm10 = vweird.f32 %v10730_v60  ;;  %v4507_v12 = vand.u32 2147483648, %v10780_v27 }
 0x371   : > { %v1442_v34 = vsub.f32 1.0, %v1441_v10  ;;  %v1452_v10 = vor.u32 1.1754944e-38, %v1451_v4  ;;  %vm10900_vm3 = vmor %vm4456_vm11, %vm4457_vm5  ;;  %v4463_v4 = vor.u32 1.1754944e-38, %v4462_v19  ;;  %v4485_v14 = vadd.f32 %v10828_v31, %v4484_v45 }
 0x372   : > { %v4498_v33 = vsub.f32 1.0, %v4497_v47  ;;  %v4459_v43 = vsel %vm10900_vm3, %v10782_v42, %v4455_v41  ;;  %vm4487_vm11 = vweird.f32 %v10828_v31  ;;  %v4490_v42 = vand.u32 2147483647, %v10730_v60 }
 0x373   : > { %v1443_v3 = vmul.f32 %v6883_v54, %v1442_v34  ;;  %v1484_v34 = vadd.f32 %v1483_v15, %v1469_v23  ;;  %v4464_v16 = vsel %vm10892_vm12, %v4463_v4, %v4459_v43  ;;  %vm4476_vm5 = vcmp.eq.f32.partialorder %v4475_v38, 8.507059e+37  ;;  %v15992_v38 = vld [vmem:[#allocation25_spill] sm:$0xff] }
 0x374   : > { %v4499_v57 = vmul.f32 %v10843_v39, %v4498_v33  ;;  %v6887_v33 = vpop.eup %6886  ;;  %v4493_v15 = vor.u32 1.1754944e-38, %v4492_v48  ;;  %v4550_v45 = vadd.f32 %v10757_v61, %v10785_v63  ;;  %vm4491_vm3 = vcmp.eq.f32.partialorder %v4490_v42, 8.507059e+37 }
 0x375   : > { %v1444_v58 = vadd.f32 %v6883_v54, %v1443_v3  ;;  %v4512_v41 = vmul.f32 %v6887_v33, %v10887_v37  ;;  %vm4517_vm4 = vweird.f32 %v6887_v33  ;;  %v4520_v63 = vand.u32 2147483647, %v10887_v37 }
 0x376   : > { %v4500_v23 = vadd.f32 %v10843_v39, %v4499_v57 }
 0x377   : > { %v1448_v2 = vsel %vm1447_vm14, %v6883_v54, %v1444_v58  ;;  %vm4502_vm14 = vweird.f32 %v10843_v39  ;;  %v4478_v58 = vor.u32 1.1754944e-38, %v4477_v46  ;;  %v4513_v44 = vsub.f32 1.0, %v4512_v41 }
 0x378   : > { %v1453_v59 = vsel %vm1450_vm6, %v1452_v10, %v1448_v2  ;;  %vm10927_vm6 = vmor %vm4486_vm10, %vm4487_vm11  ;;  %v4505_v10 = vand.u32 2147483647, %v10780_v27  ;;  %v4551_v54 = vadd.f32 %v4550_v45, %v4536_v52  ;;  %v4522_v46 = vand.u32 2147483648, %v10887_v37 }
 0x379   : > { %v1470_v50 = vmul.f32 %v1453_v59, %v10175_v8  ;;  %v4489_v60 = vsel %vm10927_vm6, %v10828_v31, %v4485_v14  ;;  %v4479_v7 = vsel %vm4476_vm5, %v4478_v58, %v4474_v5  ;;  %vm4503_vm12 = vmor %vm4501_vm15, %vm4502_vm14  ;;  %v4537_v59 = vmul.f32 %v4464_v16, %v9936_v30 }
 0x37a   : > { %v4504_v22 = vsel %vm4503_vm12, %v10843_v39, %v4500_v23  ;;  %v4508_v31 = vor.u32 1.1754944e-38, %v4507_v12  ;;  %v4538_v27 = vmul.f32 %v4479_v7, %v10025_v6  ;;  %vm4506_vm0 = vcmp.eq.f32.partialorder %v4505_v10, 8.507059e+37  ;;  %v15993_v23 = vld [vmem:[#allocation28_spill] sm:$0xff] }
 0x37b   : > { %v1485_v11 = vadd.f32 %v1484_v34, %v1470_v50  ;;  %v4494_v34 = vsel %vm4491_vm3, %v4493_v15, %v4489_v60  ;;  %v4514_v4 = vmul.f32 %v6887_v33, %v4513_v44  ;;  %vm4516_vm11 = vweird.f32 %v10887_v37  ;;  %v15994_v44 = vld [vmem:[#allocation35_spill] sm:$0xff] }
 0x37c   : > { %v4509_v57 = vsel %vm4506_vm0, %v4508_v31, %v4504_v22  ;;  %v4539_v61 = vmul.f32 %v4494_v34, %v10117_v1  ;;  %vm4518_vm10 = vmor %vm4516_vm11, %vm4517_vm4  ;;  %v4523_v52 = vor.u32 1.1754944e-38, %v4522_v46  ;;  %vm4521_vm14 = vcmp.eq.f32.partialorder %v4520_v63, 8.507059e+37 }
 0x37d   : > { %v1486_v28 = vrot.slane %v1485_v11, 4  ;;  %v4515_v43 = vadd.f32 %v6887_v33, %v4514_v4  ;;  %v4540_v14 = vmul.f32 %v4509_v57, %v15992_v38  ;;  %v15995_v57 = vld [vmem:[#allocation37_spill] sm:$0xff] }
 0x37f   : > { %v1487_v19 = vadd.f32 %v1486_v28, %v1485_v11  ;;  %v4552_v11 = vadd.f32 %v4551_v54, %v4537_v59  ;;  %v4519_v48 = vsel %vm4518_vm10, %v6887_v33, %v4515_v43 }
 0x380   : > { %v4524_v28 = vsel %vm4521_vm14, %v4523_v52, %v4519_v48  ;;  %v15996_v48 = vld [vmem:[#allocation41_spill] sm:$0xff] }
 0x381   : > { %v1488_v2 = vrot.slane %v1487_v19, 2  ;;  %v4553_v3 = vadd.f32 %v4552_v11, %v4538_v27  ;;  %v4541_v16 = vmul.f32 %v4524_v28, %v15993_v23 }
 0x383   : > { %v1489_v50 = vadd.f32 %v1488_v2, %v1487_v19  ;;  %v4554_v5 = vadd.f32 %v4553_v3, %v4539_v61 }
 0x385   : > { %v1490_v47 = vrot.slane %v1489_v50, 1  ;;  %v4555_v42 = vadd.f32 %v4554_v5, %v4540_v14 }
 0x387   : > { %v1491_v39 = vadd.f32 %v1490_v47, %v1489_v50  ;;  %v4556_v58 = vadd.f32 %v4555_v42, %v4541_v16  ;;  %v15997_v42 = vld [vmem:[#allocation40_spill] sm:$0xff] }
 0x389   : > { %6888 = vrcp.f32 %v1491_v39  ;;  %v4557_v19 = vrot.slane %v4556_v58, 4  ;;  %v1503_v7 = vand.u32 2147483648, %v1491_v39  ;;  %v1501_v37 = vand.u32 2147483647, %v1491_v39 }
 0x38a   : > { %vm1497_vm5 = vweird.f32 %v1491_v39 }
 0x38b   : > { %v4558_v10 = vadd.f32 %v4557_v19, %v4556_v58  ;;  %v1504_v33 = vor.u32 1.1754944e-38, %v1503_v7  ;;  %vm1502_vm12 = vcmp.eq.f32.partialorder %v1501_v37, 8.507059e+37  ;;  %v15999_v7 = vld [vmem:[#allocation46_spill] sm:$0xff] }
 0x38d   : > { %v4559_v2 = vrot.slane %v4558_v10, 2 }
 0x38f   : > { %v6889_v51 = vpop.eup %6888  ;;  %v4560_v45 = vadd.f32 %v4559_v2, %v4558_v10 }
 0x390   : > { %v1493_v12 = vmul.f32 %v6889_v51, %v1491_v39  ;;  %vm1498_vm6 = vweird.f32 %v6889_v51 }
 0x391   : > { %vm1499_vm15 = vmor %vm1497_vm5, %vm1498_vm6  ;;  %v4561_v22 = vrot.slane %v4560_v45, 1 }
 0x392   : > { %v1494_v60 = vsub.f32 1.0, %v1493_v12  ;;  %v15998_v12 = vld [vmem:[#allocation18_spill] sm:$0xff] }
 0x393   : > { %v4562_v31 = vadd.f32 %v4561_v22, %v4560_v45 }
 0x394   : > { %v1495_v15 = vmul.f32 %v6889_v51, %v1494_v60 }
 0x395   : > { %6890 = vrcp.f32 %v4562_v31  ;;  %v4574_v11 = vand.u32 2147483648, %v4562_v31  ;;  %v4572_v63 = vand.u32 2147483647, %v4562_v31  ;;  %vm4568_vm0 = vweird.f32 %v4562_v31 }
 0x396   : > { %v1496_v41 = vadd.f32 %v6889_v51, %v1495_v15 }
 0x397   : > { %v4575_v43 = vor.u32 1.1754944e-38, %v4574_v11  ;;  %vm4573_vm11 = vcmp.eq.f32.partialorder %v4572_v63, 8.507059e+37 }
 0x398   : > { %v1500_v59 = vsel %vm1499_vm15, %v6889_v51, %v1496_v41 }
 0x399   : > { %v10949_v34 = vsel %vm1502_vm12, %v1504_v33, %v1500_v59 }
 0x39a   : > { %v1508_v50 = vmul.f32 %v10949_v34, %v15920_v18  ;;  %v1507_v54 = vmul.f32 %v10949_v34, %v15994_v44  ;;  %v1509_v47 = vmul.f32 %v10949_v34, %v15995_v57  ;;  %v1510_v16 = vmul.f32 %v10949_v34, %v15997_v42 }
 0x39b   : > { %v6891_v27 = vpop.eup %6890  ;;  %v1512_v51 = vmul.f32 %v10949_v34, %v15943_v9  ;;  %v1511_v60 = vmul.f32 %v10949_v34, %v9451_v17  ;;  %v1513_v15 = vmul.f32 %v10949_v34, %v15999_v7  ;;  %v1515_v2 = vmul.f32 %v10949_v34, %v9663_v25 }
 0x39c   : > { %1525 = vadd.xlane.f32.xlu0 %v1508_v50  ;;  %1523 = vadd.xlane.f32.xlu1 %v1507_v54  ;;  %v4564_v4 = vmul.f32 %v6891_v27, %v4562_v31  ;;  %vm4569_vm3 = vweird.f32 %v6891_v27  ;;  %v1514_v45 = vmul.f32 %v10949_v34, %v9658_v40  ;;  %v1516_v59 = vmul.f32 %v10949_v34, %v9752_v24 }
 0x39d   : > { %vm4570_vm4 = vmor %vm4568_vm0, %vm4569_vm3  ;;  %v1518_v31 = vmul.f32 %v10949_v34, %v15976_v62  ;;  %v1517_v54 = vmul.f32 %v10949_v34, %v9762_v53 }
 0x39e   : > { %v4565_v46 = vsub.f32 1.0, %v4564_v4 }
 0x3a0   : > { %v4566_v61 = vmul.f32 %v6891_v27, %v4565_v46  ;;  %v1521_v46 = vmul.f32 %v10949_v34, %v10135_v55 }
 0x3a2   : > { %v4567_v39 = vadd.f32 %v6891_v27, %v4566_v61  ;;  %v1520_v61 = vmul.f32 %v10949_v34, %v10088_v35 }
 0x3a4   : > { %1527 = vadd.xlane.f32.xlu0 %v1509_v47  ;;  %v4571_v3 = vsel %vm4570_vm4, %v6891_v27, %v4567_v39  ;;  %v1519_v47 = vmul.f32 %v10949_v34, %v10001_v21  ;;  %v1522_v39 = vmul.f32 %v10949_v34, %v10175_v8 }
 0x3a5   : > { %v4576_v14 = vsel %vm4573_vm11, %v4575_v43, %v4571_v3 }
 0x3a6   : > { %v4579_v52 = vmul.f32 %v4576_v14, %v9336_v36  ;;  %v4578_v5 = vmul.f32 %v4576_v14, %v9269_v56  ;;  %v4581_v28 = vmul.f32 %v4576_v14, %v15996_v48  ;;  %v4580_v58 = vmul.f32 %v4576_v14, %v9395_v49 }
 0x3a7   : > { %v4582_v19 = vmul.f32 %v4576_v14, %v15998_v12  ;;  %v4584_v10 = vmul.f32 %v4576_v14, %v9427_v26  ;;  %v4583_v37 = vmul.f32 %v4576_v14, %v9564_v32  ;;  %v4585_v41 = vmul.f32 %v4576_v14, %v9582_v20 }
 0x3a8   : > { %4596 = vadd.xlane.f32.xlu1 %v4579_v52  ;;  %4594 = vadd.xlane.f32.xlu2 %v4578_v5  ;;  %v4587_v33 = vmul.f32 %v4576_v14, %v9807_v29  ;;  %v4586_v22 = vmul.f32 %v4576_v14, %v9706_v0  ;;  %v4588_v50 = vmul.f32 %v4576_v14, %v15989_v13 }
 0x3a9   : > { %v4590_v27 = vmul.f32 %v4576_v14, %v10025_v6  ;;  %v4589_v4 = vmul.f32 %v4576_v14, %v9936_v30  ;;  %v4591_v11 = vmul.f32 %v4576_v14, %v10117_v1  ;;  %v4593_v63 = vmul.f32 %v4576_v14, %v15993_v23 }
 0x3aa   : > { %v4592_v43 = vmul.f32 %v4576_v14, %v15992_v38 }
 0x3ac   : > { %4600 = vadd.xlane.f32.xlu0 %v4581_v28 }
 0x3b0   : > { %1529 = vadd.xlane.f32.xlu1 %v1510_v16  ;;  %4598 = vadd.xlane.f32.xlu2 %v4580_v58 }
 0x3b4   : > { %1533 = vadd.xlane.f32.xlu0 %v1512_v51 }
 0x3b8   : > { %4602 = vadd.xlane.f32.xlu1 %v4582_v19  ;;  %1531 = vadd.xlane.f32.xlu2 %v1511_v60 }
 0x3bc   : > { %4606 = vadd.xlane.f32.xlu0 %v4584_v10 }
 0x3c0   : > { %1535 = vadd.xlane.f32.xlu1 %v1513_v15  ;;  %4604 = vadd.xlane.f32.xlu2 %v4583_v37 }
 0x3c4   : > { %1539 = vadd.xlane.f32.xlu0 %v1515_v2 }
 0x3c8   : > { %4608 = vadd.xlane.f32.xlu1 %v4585_v41  ;;  %1537 = vadd.xlane.f32.xlu2 %v1514_v45 }
 0x3cc   : > { %4612 = vadd.xlane.f32.xlu0 %v4587_v33 }
 0x3d0   : > { %1541 = vadd.xlane.f32.xlu1 %v1516_v59  ;;  %4610 = vadd.xlane.f32.xlu2 %v4586_v22 }
 0x3d4   : > { %1545 = vadd.xlane.f32.xlu0 %v1518_v31 }
 0x3d8   : > { %4614 = vadd.xlane.f32.xlu1 %v4588_v50  ;;  %1543 = vadd.xlane.f32.xlu2 %v1517_v54 }
 0x3dc   : > { %4618 = vadd.xlane.f32.xlu0 %v4590_v27 }
 0x3e0   : > { %1547 = vadd.xlane.f32.xlu1 %v1519_v47  ;;  %4616 = vadd.xlane.f32.xlu2 %v4589_v4 }
 0x3e4   : > { %1551 = vadd.xlane.f32.xlu0 %v1521_v46 }
 0x3e8   : > { %4620 = vadd.xlane.f32.xlu1 %v4591_v11  ;;  %1549 = vadd.xlane.f32.xlu2 %v1520_v61 }
 0x3ec   : > { %4624 = vadd.xlane.f32.xlu0 %v4593_v63 }
 0x3f0   : > { %1553 = vadd.xlane.f32.xlu1 %v1522_v39  ;;  %4622 = vadd.xlane.f32.xlu2 %v4592_v43 }
 0x40f   : > { %v1526_v3 = vpop.xlane.xlu0 %1525  ;;  %v1524_v52 = vpop.xlane.xlu1 %1523 }
 0x410   : > { %6892 = vrcp.f32 %v1526_v3  ;;  %v1581_v60 = vand.u32 2147483648, %v1526_v3  ;;  %v1579_v14 = vand.u32 2147483647, %v1526_v3  ;;  %v1566_v15 = vand.u32 2147483648, %v1524_v52 }
 0x411   : > { %6894 = vrcp.f32 %v1524_v52  ;;  %v1564_v2 = vand.u32 2147483647, %v1524_v52  ;;  %vm1575_vm6 = vweird.f32 %v1526_v3  ;;  %vm1560_vm15 = vweird.f32 %v1524_v52 }
 0x412   : > { %v1582_v33 = vor.u32 1.1754944e-38, %v1581_v60  ;;  %vm1580_vm12 = vcmp.eq.f32.partialorder %v1579_v14, 8.507059e+37  ;;  %v1567_v31 = vor.u32 1.1754944e-38, %v1566_v15 }
 0x413   : > { %vm1565_vm0 = vcmp.eq.f32.partialorder %v1564_v2, 8.507059e+37 }
 0x416   : > { %v6893_v5 = vpop.eup %6892 }
 0x417   : > { %v6895_v28 = vpop.eup %6894  ;;  %v1571_v16 = vmul.f32 %v6893_v5, %v1526_v3  ;;  %v10999_v58 = vpop.xlane.xlu0 %1527  ;;  %vm1576_vm10 = vweird.f32 %v6893_v5 }
 0x418   : > { %v1556_v51 = vmul.f32 %v6895_v28, %v1524_v52  ;;  %6896 = vrcp.f32 %v10999_v58  ;;  %vm1561_vm14 = vweird.f32 %v6895_v28  ;;  %vm1577_vm5 = vmor %vm1575_vm6, %vm1576_vm10  ;;  %vm1590_vm11 = vweird.f32 %v10999_v58 }
 0x419   : > { %v1572_v19 = vsub.f32 1.0, %v1571_v16  ;;  %vm1562_vm3 = vmor %vm1560_vm15, %vm1561_vm14  ;;  %v1594_v15 = vand.u32 2147483647, %v10999_v58 }
 0x41a   : > { %v1557_v10 = vsub.f32 1.0, %v1556_v51 }
 0x41b   : > { %v1573_v34 = vmul.f32 %v6893_v5, %v1572_v19  ;;  %v11005_v11 = vpop.xlane.xlu2 %4594  ;;  %v11007_v61 = vpop.xlane.xlu1 %4596  ;;  %vm1595_vm14 = vcmp.eq.f32.partialorder %v1594_v15, 8.507059e+37 }
 0x41c   : > { %v1558_v37 = vmul.f32 %v6895_v28, %v1557_v10  ;;  %6898 = vrcp.f32 %v11005_v11  ;;  %vm4631_vm6 = vweird.f32 %v11005_v11 }
 0x41d   : > { %v1574_v41 = vadd.f32 %v6893_v5, %v1573_v34  ;;  %6900 = vrcp.f32 %v11007_v61  ;;  %v1596_v34 = vand.u32 2147483648, %v10999_v58 }
 0x41e   : > { %v6897_v45 = vpop.eup %6896  ;;  %v1559_v59 = vadd.f32 %v6895_v28, %v1558_v37 }
 0x41f   : > { %v1578_v22 = vsel %vm1577_vm5, %v6893_v5, %v1574_v41  ;;  %v1586_v27 = vmul.f32 %v6897_v45, %v10999_v58  ;;  %v11010_v63 = vpop.xlane.xlu0 %4600  ;;  %vm1591_vm4 = vweird.f32 %v6897_v45  ;;  %v4637_v58 = vand.u32 2147483648, %v11005_v11 }
 0x420   : > { %v1583_v50 = vsel %vm1580_vm12, %v1582_v33, %v1578_v22  ;;  %v1563_v54 = vsel %vm1562_vm3, %v6895_v28, %v1559_v59  ;;  %6902 = vrcp.f32 %v11010_v63  ;;  %vm11037_vm10 = vmor %vm1590_vm11, %vm1591_vm4  ;;  %vm4646_vm5 = vweird.f32 %v11007_v61 }
 0x421   : > { %v1796_v47 = vmul.f32 %v1583_v50, %v15920_v18  ;;  %v1568_v4 = vsel %vm1565_vm0, %v1567_v31, %v1563_v54  ;;  %v1587_v43 = vsub.f32 1.0, %v1586_v27  ;;  %v1597_v31 = vor.u32 1.1754944e-38, %v1596_v34 }
 0x422   : > { %v1795_v46 = vmul.f32 %v1568_v4, %v15994_v44  ;;  %v11016_v52 = vpop.eup %6898  ;;  %v4635_v50 = vand.u32 2147483647, %v11005_v11  ;;  %v4638_v15 = vor.u32 1.1754944e-38, %v4637_v58  ;;  %vm4676_vm12 = vweird.f32 %v11010_v63 }
 0x423   : > { %v1588_v3 = vmul.f32 %v6897_v45, %v1587_v43  ;;  %v11018_v5 = vpop.eup %6900  ;;  %v11020_v28 = vpop.xlane.xlu2 %4598  ;;  %v4627_v51 = vmul.f32 %v11016_v52, %v11005_v11  ;;  %v4680_v37 = vand.u32 2147483647, %v11010_v63  ;;  %vm4632_vm3 = vweird.f32 %v11016_v52 }
 0x424   : > { %v11012_v39 = vadd.f32 %v1796_v47, %v1795_v46  ;;  %v11022_v16 = vpop.xlane.xlu1 %1529  ;;  %v4642_v19 = vmul.f32 %v11018_v5, %v11007_v61  ;;  %6904 = vrcp.f32 %v11020_v28  ;;  %vm11064_vm15 = vcmp.eq.f32.partialorder %v4635_v50, 8.507059e+37  ;;  %vm11092_vm11 = vmor %vm4631_vm6, %vm4632_vm3 }
 0x425   : > { %v1589_v10 = vadd.f32 %v6897_v45, %v1588_v3  ;;  %6906 = vrcp.f32 %v11022_v16  ;;  %v4628_v2 = vsub.f32 1.0, %v4627_v51  ;;  %v4650_v3 = vand.u32 2147483647, %v11007_v61 }
 0x426   : > { %v11029_v60 = vpop.eup %6902  ;;  %v4643_v41 = vsub.f32 1.0, %v4642_v19  ;;  %v4652_v51 = vand.u32 2147483648, %v11007_v61  ;;  %vm4647_vm0 = vweird.f32 %v11018_v5  ;;  %vm11110_vm6 = vcmp.eq.f32.partialorder %v4680_v37, 8.507059e+37 }
 0x427   : > { %v11033_v14 = vpop.xlane.xlu0 %1533  ;;  %v4672_v33 = vmul.f32 %v11029_v60, %v11010_v63  ;;  %v1593_v59 = vsel %vm11037_vm10, %v6897_v45, %v1589_v10  ;;  %v4629_v47 = vmul.f32 %v11016_v52, %v4628_v2  ;;  %v4682_v2 = vand.u32 2147483648, %v11010_v63  ;;  %vm11105_vm10 = vmor %vm4646_vm5, %vm4647_vm0 }
 0x428   : > { %6908 = vrcp.f32 %v11033_v14  ;;  %v1598_v45 = vsel %vm1595_vm14, %v1597_v31, %v1593_v59  ;;  %v4644_v4 = vmul.f32 %v11018_v5, %v4643_v41  ;;  %v4665_v59 = vand.u32 2147483647, %v11020_v28 }
 0x429   : > { %v4673_v46 = vsub.f32 1.0, %v4672_v33  ;;  %v1797_v33 = vmul.f32 %v1598_v45, %v15995_v57  ;;  %v4630_v50 = vadd.f32 %v11016_v52, %v4629_v47  ;;  %vm11083_vm4 = vcmp.eq.f32.partialorder %v4650_v3, 8.507059e+37 }
 0x42a   : > { %v11046_v22 = vpop.eup %6904  ;;  %v4645_v58 = vadd.f32 %v11018_v5, %v4644_v4  ;;  %v4653_v4 = vor.u32 1.1754944e-38, %v4652_v51  ;;  %v4683_v8 = vor.u32 1.1754944e-38, %v4682_v2  ;;  %vm4677_vm14 = vweird.f32 %v11029_v60 }
 0x42b   : > { %v4657_v54 = vmul.f32 %v11046_v22, %v11020_v28  ;;  %v11054_v27 = vpop.eup %6906  ;;  %v11058_v43 = vpop.xlane.xlu2 %1531  ;;  %vm4661_vm3 = vweird.f32 %v11020_v28  ;;  %vm11115_vm1 = vcmp.eq.f32.partialorder %v4665_v59, 8.507059e+37  ;;  %v4634_v61 = vsel %vm11092_vm11, %v11016_v52, %v4630_v50  ;;  %vm11142_vm0 = vmor %vm4676_vm12, %vm4677_vm14 }
 0x42c   : > { %v1601_v10 = vmul.f32 %v11054_v27, %v11022_v16  ;;  %6910 = vrcp.f32 %v11058_v43  ;;  %v11077_v31 = vpop.xlane.xlu1 %4602  ;;  %vm4662_vm5 = vweird.f32 %v11046_v22  ;;  %v1609_v52 = vand.u32 2147483647, %v11022_v16 }
 0x42d   : > { %v4658_v19 = vsub.f32 1.0, %v4657_v54  ;;  %v4674_v54 = vmul.f32 %v11029_v60, %v4673_v46  ;;  %v4667_v46 = vand.u32 2147483648, %v11020_v28  ;;  %6912 = vrcp.f32 %v11077_v31 }
 0x42e   : > { %v11071_v41 = vpop.eup %6908  ;;  %v1602_v57 = vsub.f32 1.0, %v1601_v10  ;;  %v1611_v50 = vand.u32 2147483648, %v11022_v16  ;;  %vm1605_vm11 = vweird.f32 %v11022_v16  ;;  %vm1606_vm12 = vweird.f32 %v11054_v27 }
 0x42f   : > { %v4659_v45 = vmul.f32 %v11046_v22, %v4658_v19  ;;  %v1631_v18 = vmul.f32 %v11071_v41, %v11033_v14  ;;  %v11098_v3 = vpop.xlane.xlu0 %4606  ;;  %v11101_v19 = vadd.f32 %v11012_v39, %v1797_v33  ;;  %v4649_v39 = vsel %vm11105_vm10, %v11018_v5, %v4645_v58 }
 0x430   : > { %v4675_v2 = vadd.f32 %v11029_v60, %v4674_v54  ;;  %v1603_v59 = vmul.f32 %v11054_v27, %v1602_v57  ;;  %6914 = vrcp.f32 %v11098_v3  ;;  %v4668_v23 = vor.u32 1.1754944e-38, %v4667_v46 }
 0x431   : > { %v4660_v33 = vadd.f32 %v11046_v22, %v4659_v45  ;;  %v1632_v55 = vsub.f32 1.0, %v1631_v18  ;;  %v4639_v58 = vsel %vm11064_vm15, %v4638_v15, %v4634_v61  ;;  %v1639_v18 = vand.u32 2147483647, %v11033_v14  ;;  %vm11160_vm15 = vmor %vm4661_vm3, %vm4662_vm5 }
 0x432   : > { %v11127_v37 = vpop.eup %6910  ;;  %v1641_v54 = vand.u32 2147483648, %v11033_v14  ;;  %v4654_v34 = vsel %vm11083_vm4, %v4653_v4, %v4649_v39  ;;  %v4679_v15 = vsel %vm11142_vm0, %v11029_v60, %v4675_v2  ;;  %v1604_v4 = vadd.f32 %v11054_v27, %v1603_v59  ;;  %vm11199_vm3 = vmor %vm1605_vm11, %vm1606_vm12 }
 0x433   : > { %v1616_v5 = vmul.f32 %v11127_v37, %v11058_v43  ;;  %v11149_v45 = vpop.eup %6912  ;;  %v11165_v46 = vpop.xlane.xlu2 %4604  ;;  %v4664_v44 = vsel %vm11160_vm15, %v11046_v22, %v4660_v33  ;;  %v1633_v60 = vmul.f32 %v11071_v41, %v1632_v55  ;;  %vm11174_vm4 = vcmp.eq.f32.partialorder %v1609_v52, 8.507059e+37 }
 0x434   : > { %v4687_v28 = vmul.f32 %v11149_v45, %v11077_v31  ;;  %v1612_v61 = vor.u32 1.1754944e-38, %v1611_v50  ;;  %vm1635_vm10 = vweird.f32 %v11033_v14  ;;  %v11180_v2 = vpop.xlane.xlu1 %1535  ;;  %v4866_v22 = vmul.f32 %v4639_v58, %v9269_v56 }
 0x435   : > { %v1617_v47 = vsub.f32 1.0, %v1616_v5  ;;  %v4867_v55 = vmul.f32 %v4654_v34, %v9336_v36  ;;  %vm11186_vm14 = vcmp.eq.f32.partialorder %v1639_v18, 8.507059e+37  ;;  %v1642_v59 = vor.u32 1.1754944e-38, %v1641_v54 }
 0x436   : > { %v11182_v5 = vpop.eup %6914  ;;  %6916 = vrcp.f32 %v11165_v46  ;;  %v4684_v52 = vsel %vm11110_vm6, %v4683_v8, %v4679_v15  ;;  %v4669_v50 = vsel %vm11115_vm1, %v4668_v23, %v4664_v44  ;;  %vm1636_vm5 = vweird.f32 %v11071_v41 }
 0x437   : > { %v1618_v39 = vmul.f32 %v11127_v37, %v1617_v47  ;;  %v1624_v57 = vand.u32 2147483647, %v11058_v43  ;;  %v1608_v11 = vsel %vm11199_vm3, %v11054_v27, %v1604_v4  ;;  %v1634_v8 = vadd.f32 %v11071_v41, %v1633_v60  ;;  %v11210_v23 = vpop.xlane.xlu0 %1539  ;;  %vm11227_vm6 = vmor %vm1635_vm10, %vm1636_vm5 }
 0x438   : > { %v4688_v51 = vsub.f32 1.0, %v4687_v28  ;;  %6918 = vrcp.f32 %v11180_v2  ;;  %vm1621_vm1 = vweird.f32 %v11127_v37  ;;  %v1626_v18 = vand.u32 2147483648, %v11058_v43 }
 0x439   : > { %v1619_v16 = vadd.f32 %v11127_v37, %v1618_v39  ;;  %v4717_v54 = vmul.f32 %v11182_v5, %v11098_v3  ;;  %v4882_v34 = vadd.f32 %v4867_v55, %v4866_v22  ;;  %v4868_v15 = vmul.f32 %v4669_v50, %v9395_v49 }
 0x43a   : > { %v4695_v27 = vand.u32 2147483647, %v11077_v31  ;;  %v4697_v63 = vand.u32 2147483648, %v11077_v31  ;;  %v4869_v47 = vmul.f32 %v4684_v52, %v15996_v48  ;;  %v1613_v44 = vsel %vm11174_vm4, %v1612_v61, %v1608_v11 }
 0x43b   : > { %vm1620_vm0 = vweird.f32 %v11058_v43  ;;  %6920 = vrcp.f32 %v11210_v23  ;;  %v1638_v28 = vsel %vm11227_vm6, %v11071_v41, %v1634_v8  ;;  %vm11242_vm15 = vcmp.eq.f32.partialorder %v1624_v57, 8.507059e+37  ;;  %v11261_v8 = vpop.xlane.xlu2 %1537 }
 0x43c   : > { %v11233_v60 = vpop.eup %6916  ;;  %vm11238_vm11 = vmor %vm1620_vm0, %vm1621_vm1  ;;  %v4689_v61 = vmul.f32 %v11149_v45, %v4688_v51  ;;  %vm4691_vm12 = vweird.f32 %v11077_v31  ;;  %v1627_v39 = vor.u32 1.1754944e-38, %v1626_v18  ;;  %v4718_v22 = vsub.f32 1.0, %v4717_v54 }
 0x43d   : > { %v1623_v43 = vsel %vm11238_vm11, %v11127_v37, %v1619_v16  ;;  %v4702_v41 = vmul.f32 %v11233_v60, %v11165_v46  ;;  %v4883_v52 = vadd.f32 %v4882_v34, %v4868_v15  ;;  %v1798_v50 = vmul.f32 %v1613_v44, %v15997_v42  ;;  %v11273_v15 = vpop.xlane.xlu1 %4608 }
 0x43e   : > { %v11253_v55 = vpop.eup %6918  ;;  %vm11256_vm4 = vcmp.eq.f32.partialorder %v4695_v27, 8.507059e+37  ;;  %v4698_v57 = vor.u32 1.1754944e-38, %v4697_v63  ;;  %v4725_v11 = vand.u32 2147483647, %v11098_v3  ;;  %v1643_v37 = vsel %vm11186_vm14, %v1642_v59, %v1638_v28 }
 0x43f   : > { %v4727_v51 = vand.u32 2147483648, %v11098_v3  ;;  %v4703_v16 = vsub.f32 1.0, %v4702_v41  ;;  %v1646_v18 = vmul.f32 %v11253_v55, %v11180_v2  ;;  %v1628_v54 = vsel %vm11242_vm15, %v1627_v39, %v1623_v43 }
 0x440   : > { %v4690_v34 = vadd.f32 %v11149_v45, %v4689_v61  ;;  %vm4692_vm10 = vweird.f32 %v11149_v45  ;;  %vm4721_vm3 = vweird.f32 %v11098_v3  ;;  %v4719_v33 = vmul.f32 %v11182_v5, %v4718_v22 }
 0x441   : > { %v11275_v27 = vpop.eup %6920  ;;  %v4704_v59 = vmul.f32 %v11233_v60, %v4703_v16  ;;  %v1647_v63 = vsub.f32 1.0, %v1646_v18  ;;  %6922 = vrcp.f32 %v11261_v8  ;;  %v1813_v44 = vadd.f32 %v11101_v19, %v1798_v50  ;;  %vm11286_vm14 = vmor %vm4691_vm12, %vm4692_vm10 }
 0x442   : > { %v1800_v4 = vmul.f32 %v1643_v37, %v15943_v9  ;;  %v4884_v28 = vadd.f32 %v4883_v52, %v4869_v47  ;;  %v1676_v10 = vmul.f32 %v11275_v27, %v11210_v23  ;;  %vm4722_vm5 = vweird.f32 %v11182_v5  ;;  %v11297_v47 = vpop.xlane.xlu0 %4612 }
 0x443   : > { %vm11291_vm1 = vcmp.eq.f32.partialorder %v4725_v11, 8.507059e+37  ;;  %v4728_v43 = vor.u32 1.1754944e-38, %v4727_v51  ;;  %v4710_v19 = vand.u32 2147483647, %v11165_v46  ;;  %6924 = vrcp.f32 %v11273_v15  ;;  %vm11320_vm11 = vmor %vm4721_vm3, %vm4722_vm5 }
 0x444   : > { %v1799_v39 = vmul.f32 %v1628_v54, %v9451_v17  ;;  %v4694_v31 = vsel %vm11286_vm14, %v11149_v45, %v4690_v34  ;;  %v4712_v22 = vand.u32 2147483648, %v11165_v46  ;;  %v1648_v41 = vmul.f32 %v11253_v55, %v1647_v63 }
 0x445   : > { %v4720_v52 = vadd.f32 %v11182_v5, %v4719_v33  ;;  %v4705_v50 = vadd.f32 %v11233_v60, %v4704_v59  ;;  %vm4707_vm6 = vweird.f32 %v11233_v60  ;;  %v1677_v11 = vsub.f32 1.0, %v1676_v10  ;;  %v11338_v33 = vpop.xlane.xlu2 %4610 }
 0x446   : > { %vm4706_vm0 = vweird.f32 %v11165_v46  ;;  %v1654_v37 = vand.u32 2147483647, %v11180_v2  ;;  %v1656_v51 = vand.u32 2147483648, %v11180_v2  ;;  %6926 = vrcp.f32 %v11297_v47 }
 0x447   : > { %v11312_v45 = vpop.eup %6922  ;;  %v4699_v16 = vsel %vm11256_vm4, %v4698_v57, %v4694_v31  ;;  %vm11324_vm15 = vcmp.eq.f32.partialorder %v4710_v19, 8.507059e+37  ;;  %vm1650_vm12 = vweird.f32 %v11180_v2  ;;  %v1684_v54 = vand.u32 2147483647, %v11210_v23  ;;  %vm11330_vm10 = vmor %vm4706_vm0, %vm4707_vm6 }
 0x448   : > { %v1814_v34 = vadd.f32 %v1813_v44, %v1799_v39  ;;  %v1649_v57 = vadd.f32 %v11253_v55, %v1648_v41  ;;  %vm1651_vm4 = vweird.f32 %v11253_v55  ;;  %v1661_v3 = vmul.f32 %v11312_v45, %v11261_v8 }
 0x449   : > { %v11340_v59 = vpop.eup %6924  ;;  %v4724_v63 = vsel %vm11320_vm11, %v11182_v5, %v4720_v52  ;;  %v4709_v44 = vsel %vm11330_vm10, %v11233_v60, %v4705_v50  ;;  %v4713_v10 = vor.u32 1.1754944e-38, %v4712_v22  ;;  %v1678_v14 = vmul.f32 %v11275_v27, %v1677_v11  ;;  %vm11356_vm14 = vmor %vm1650_vm12, %vm1651_vm4 }
 0x44a   : > { %v4870_v19 = vmul.f32 %v4699_v16, %v15998_v12  ;;  %vm11350_vm3 = vcmp.eq.f32.partialorder %v1654_v37, 8.507059e+37  ;;  %v1657_v31 = vor.u32 1.1754944e-38, %v1656_v51  ;;  %v1662_v41 = vsub.f32 1.0, %v1661_v3  ;;  %v11377_v51 = vpop.xlane.xlu1 %1541 }
 0x44b   : > { %vm1680_vm5 = vweird.f32 %v11210_v23  ;;  %vm11361_vm6 = vcmp.eq.f32.partialorder %v1684_v54, 8.507059e+37  ;;  %v1686_v60 = vand.u32 2147483648, %v11210_v23  ;;  %v4732_v22 = vmul.f32 %v11340_v59, %v11273_v15 }
 0x44c   : > { %v11368_v52 = vpop.eup %6926  ;;  %v4729_v2 = vsel %vm11291_vm1, %v4728_v43, %v4724_v63  ;;  %v4714_v50 = vsel %vm11324_vm15, %v4713_v10, %v4709_v44  ;;  %v1815_v11 = vadd.f32 %v1814_v34, %v1800_v4  ;;  %v1653_v37 = vsel %vm11356_vm14, %v11253_v55, %v1649_v57  ;;  %v11391_v57 = vpop.xlane.xlu0 %1545 }
 0x44d   : > { %v1679_v16 = vadd.f32 %v11275_v27, %v1678_v14  ;;  %vm1681_vm0 = vweird.f32 %v11275_v27  ;;  %v1663_v54 = vmul.f32 %v11312_v45, %v1662_v41  ;;  %6928 = vrcp.f32 %v11338_v33  ;;  %v11414_v41 = vpop.xlane.xlu2 %1543 }
 0x44e   : > { %v4885_v61 = vadd.f32 %v4884_v28, %v4870_v19  ;;  %v1669_v43 = vand.u32 2147483647, %v11261_v8  ;;  %v1671_v46 = vand.u32 2147483648, %v11261_v8  ;;  %v4762_v4 = vmul.f32 %v11368_v52, %v11297_v47  ;;  %vm11396_vm1 = vmor %vm1680_vm5, %vm1681_vm0 }
 0x44f   : > { %v4871_v55 = vmul.f32 %v4714_v50, %v9564_v32  ;;  %v1658_v34 = vsel %vm11350_vm3, %v1657_v31, %v1653_v37  ;;  %v4733_v58 = vsub.f32 1.0, %v4732_v22  ;;  %6930 = vrcp.f32 %v11377_v51 }
 0x450   : > { %v4872_v3 = vmul.f32 %v4729_v2, %v9427_v26  ;;  %v1687_v63 = vor.u32 1.1754944e-38, %v1686_v60  ;;  %vm1665_vm11 = vweird.f32 %v11261_v8  ;;  %v4740_v44 = vand.u32 2147483647, %v11273_v15 }
 0x451   : > { %v1683_v10 = vsel %vm11396_vm1, %v11275_v27, %v1679_v16  ;;  %v1664_v14 = vadd.f32 %v11312_v45, %v1663_v54  ;;  %vm1666_vm15 = vweird.f32 %v11312_v45  ;;  %v4742_v19 = vand.u32 2147483648, %v11273_v15 }
 0x452   : > { %v1801_v23 = vmul.f32 %v1658_v34, %v15999_v7  ;;  %vm11409_vm12 = vcmp.eq.f32.partialorder %v1669_v43, 8.507059e+37  ;;  %v4763_v31 = vsub.f32 1.0, %v4762_v4  ;;  %6932 = vrcp.f32 %v11391_v57  ;;  %vm11424_vm4 = vmor %vm1665_vm11, %vm1666_vm15  ;;  %v11445_v34 = vpop.xlane.xlu1 %4614 }
 0x453   : > { %v11416_v18 = vpop.eup %6928  ;;  %v4886_v27 = vadd.f32 %v4885_v61, %v4871_v55  ;;  %v1672_v60 = vor.u32 1.1754944e-38, %v1671_v46  ;;  %v4734_v22 = vmul.f32 %v11340_v59, %v4733_v58  ;;  %vm4736_vm10 = vweird.f32 %v11273_v15 }
 0x454   : > { %v1688_v2 = vsel %vm11361_vm6, %v1687_v63, %v1683_v10  ;;  %v4770_v37 = vand.u32 2147483647, %v11297_v47  ;;  %v4772_v16 = vand.u32 2147483648, %v11297_v47  ;;  %v4747_v54 = vmul.f32 %v11416_v18, %v11338_v33 }
 0x455   : > { %v11432_v61 = vpop.eup %6930  ;;  %v1668_v5 = vsel %vm11424_vm4, %v11312_v45, %v1664_v14  ;;  %vm11437_vm3 = vcmp.eq.f32.partialorder %v4740_v44, 8.507059e+37  ;;  %v4743_v8 = vor.u32 1.1754944e-38, %v4742_v19  ;;  %vm4766_vm14 = vweird.f32 %v11297_v47 }
 0x456   : > { %6934 = vrcp.f32 %v11414_v41  ;;  %v1816_v46 = vadd.f32 %v1815_v11, %v1801_v23  ;;  %vm4737_vm5 = vweird.f32 %v11340_v59  ;;  %v4764_v4 = vmul.f32 %v11368_v52, %v4763_v31 }
 0x457   : > { %v4748_v55 = vsub.f32 1.0, %v4747_v54  ;;  %v11448_v58 = vmul.f32 %v1688_v2, %v9663_v25  ;;  %v11450_v45 = vadd.f32 %v4886_v27, %v4872_v3  ;;  %v4735_v28 = vadd.f32 %v11340_v59, %v4734_v22  ;;  %v11469_v22 = vpop.xlane.xlu0 %4618  ;;  %vm11475_vm0 = vmor %vm4736_vm10, %vm4737_vm5 }
 0x458   : > { %v1691_v63 = vmul.f32 %v11432_v61, %v11377_v51  ;;  %v11455_v44 = vpop.eup %6932  ;;  %v1673_v11 = vsel %vm11409_vm12, %v1672_v60, %v1668_v5  ;;  %vm11459_vm6 = vcmp.eq.f32.partialorder %v4770_v37, 8.507059e+37  ;;  %v4773_v14 = vor.u32 1.1754944e-38, %v4772_v16 }
 0x459   : > { %v4749_v19 = vmul.f32 %v11416_v18, %v4748_v55  ;;  %v4755_v3 = vand.u32 2147483647, %v11338_v33  ;;  %v4757_v23 = vand.u32 2147483648, %v11338_v33  ;;  %v1721_v27 = vmul.f32 %v11455_v44, %v11391_v57 }
 0x45a   : > { %v1692_v31 = vsub.f32 1.0, %v1691_v63  ;;  %6936 = vrcp.f32 %v11445_v34  ;;  %v4765_v60 = vadd.f32 %v11368_v52, %v4764_v4  ;;  %vm4767_vm1 = vweird.f32 %v11368_v52  ;;  %v11549_v63 = vpop.xlane.xlu1 %1547 }
 0x45b   : > { %v1699_v2 = vand.u32 2147483647, %v11377_v51  ;;  %v1701_v50 = vand.u32 2147483648, %v11377_v51  ;;  %v1802_v16 = vmul.f32 %v1673_v11, %v9658_v40  ;;  %v4739_v15 = vsel %vm11475_vm0, %v11340_v59, %v4735_v28  ;;  %vm11497_vm15 = vmor %vm4766_vm14, %vm4767_vm1 }
 0x45c   : > { %v11483_v37 = vpop.eup %6934  ;;  %v4750_v54 = vadd.f32 %v11416_v18, %v4749_v19  ;;  %vm4752_vm11 = vweird.f32 %v11416_v18  ;;  %v1693_v5 = vmul.f32 %v11432_v61, %v1692_v31  ;;  %v1722_v4 = vsub.f32 1.0, %v1721_v27  ;;  %v11528_v27 = vpop.xlane.xlu2 %4616 }
 0x45d   : > { %v1706_v55 = vmul.f32 %v11483_v37, %v11414_v41  ;;  %6938 = vrcp.f32 %v11469_v22  ;;  %vm4751_vm12 = vweird.f32 %v11338_v33  ;;  %vm11502_vm10 = vcmp.eq.f32.partialorder %v4755_v3, 8.507059e+37 }
 0x45e   : > { %v4758_v28 = vor.u32 1.1754944e-38, %v4757_v23  ;;  %vm1695_vm4 = vweird.f32 %v11377_v51  ;;  %v4744_v11 = vsel %vm11437_vm3, %v4743_v8, %v4739_v15  ;;  %v4769_v47 = vsel %vm11497_vm15, %v11368_v52, %v4765_v60  ;;  %vm11512_vm14 = vmor %vm4751_vm12, %vm4752_vm11 }
 0x45f   : > { %vm11516_vm5 = vcmp.eq.f32.partialorder %v1699_v2, 8.507059e+37  ;;  %vm1725_vm0 = vweird.f32 %v11391_v57  ;;  %v1729_v3 = vand.u32 2147483647, %v11391_v57  ;;  %v1707_v23 = vsub.f32 1.0, %v1706_v55 }
 0x460   : > { %v11522_v31 = vpop.eup %6936  ;;  %v1817_v43 = vadd.f32 %v1816_v46, %v1802_v16  ;;  %v4754_v52 = vsel %vm11512_vm14, %v11416_v18, %v4750_v54  ;;  %vm1696_vm3 = vweird.f32 %v11432_v61  ;;  %v1702_v8 = vor.u32 1.1754944e-38, %v1701_v50 }
 0x461   : > { %v1694_v39 = vadd.f32 %v11432_v61, %v1693_v5  ;;  %v1723_v60 = vmul.f32 %v11455_v44, %v1722_v4  ;;  %v1708_v2 = vmul.f32 %v11483_v37, %v1707_v23  ;;  %v4777_v15 = vmul.f32 %v11522_v31, %v11445_v34 }
 0x462   : > { %v4873_v46 = vmul.f32 %v4744_v11, %v9582_v20  ;;  %v4774_v16 = vsel %vm11459_vm6, %v4773_v14, %v4769_v47  ;;  %v1731_v18 = vand.u32 2147483648, %v11391_v57  ;;  %vm1710_vm1 = vweird.f32 %v11414_v41  ;;  %vm11557_vm6 = vmor %vm1695_vm4, %vm1696_vm3 }
 0x463   : > { %v11540_v50 = vpop.eup %6938  ;;  %vm11542_vm11 = vcmp.eq.f32.partialorder %v1729_v3, 8.507059e+37  ;;  %v1709_v5 = vadd.f32 %v11483_v37, %v1708_v2  ;;  %vm1711_vm15 = vweird.f32 %v11483_v37  ;;  %v1714_v4 = vand.u32 2147483647, %v11414_v41 }
 0x464   : > { %v4778_v55 = vsub.f32 1.0, %v4777_v15  ;;  %v4759_v10 = vsel %vm11502_vm10, %v4758_v28, %v4754_v52  ;;  %vm1726_vm12 = vweird.f32 %v11455_v44  ;;  %v1716_v11 = vand.u32 2147483648, %v11414_v41  ;;  %vm11577_vm10 = vmor %vm1710_vm1, %vm1711_vm15 }
 0x465   : > { %v4807_v47 = vmul.f32 %v11540_v50, %v11469_v22  ;;  %v1698_v59 = vsel %vm11557_vm6, %v11432_v61, %v1694_v39  ;;  %v1724_v28 = vadd.f32 %v11455_v44, %v1723_v60  ;;  %v4785_v19 = vand.u32 2147483647, %v11445_v34  ;;  %v11582_v39 = vpop.xlane.xlu0 %1551  ;;  %vm11596_vm4 = vmor %vm1725_vm0, %vm1726_vm12 }
 0x466   : > { %6940 = vrcp.f32 %v11528_v27  ;;  %v4888_v51 = vadd.f32 %v11450_v45, %v4873_v46  ;;  %v1818_v3 = vadd.f32 %v1817_v43, %v11448_v58  ;;  %v4779_v61 = vmul.f32 %v11522_v31, %v4778_v55 }
 0x467   : > { %v4808_v52 = vsub.f32 1.0, %v4807_v47  ;;  %v4875_v60 = vmul.f32 %v4774_v16, %v9807_v29  ;;  %v4874_v2 = vmul.f32 %v4759_v10, %v9706_v0  ;;  %v1713_v58 = vsel %vm11577_vm10, %v11483_v37, %v1709_v5 }
 0x468   : > { %6942 = vrcp.f32 %v11549_v63  ;;  %v1703_v41 = vsel %vm11516_vm5, %v1702_v8, %v1698_v59  ;;  %v1732_v43 = vor.u32 1.1754944e-38, %v1731_v18  ;;  %v1717_v15 = vor.u32 1.1754944e-38, %v1716_v11  ;;  %v11612_v18 = vpop.xlane.xlu2 %1549 }
 0x469   : > { %v4787_v46 = vand.u32 2147483648, %v11445_v34  ;;  %v1728_v37 = vsel %vm11596_vm4, %v11455_v44, %v1724_v28  ;;  %vm1715_vm14 = vcmp.eq.f32.partialorder %v1714_v4, 8.507059e+37  ;;  %vm4781_vm3 = vweird.f32 %v11445_v34 }
 0x46a   : > { %vm11605_vm5 = vcmp.eq.f32.partialorder %v4785_v19, 8.507059e+37  ;;  %v1718_v57 = vsel %vm1715_vm14, %v1717_v15, %v1713_v58  ;;  %v4780_v8 = vadd.f32 %v11522_v31, %v4779_v61  ;;  %vm4782_vm0 = vweird.f32 %v11522_v31  ;;  %v11636_v19 = vpop.xlane.xlu1 %4620 }
 0x46b   : > { %v4809_v16 = vmul.f32 %v11540_v50, %v4808_v52  ;;  %v4889_v55 = vadd.f32 %v4888_v51, %v4874_v2  ;;  %v1804_v44 = vmul.f32 %v1703_v41, %v9752_v24  ;;  %v4815_v4 = vand.u32 2147483647, %v11469_v22  ;;  %vm11629_vm15 = vmor %vm4781_vm3, %vm4782_vm0 }
 0x46c   : > { %v11614_v5 = vpop.eup %6940  ;;  %6944 = vrcp.f32 %v11582_v39  ;;  %v1733_v10 = vsel %vm11542_vm11, %v1732_v43, %v1728_v37  ;;  %v4788_v14 = vor.u32 1.1754944e-38, %v4787_v46  ;;  %vm4811_vm1 = vweird.f32 %v11469_v22 }
 0x46d   : > { %v4792_v11 = vmul.f32 %v11614_v5, %v11528_v27  ;;  %v1805_v59 = vmul.f32 %v1718_v57, %v9762_v53  ;;  %vm4812_vm6 = vweird.f32 %v11540_v50  ;;  %v4817_v54 = vand.u32 2147483648, %v11469_v22 }
 0x46e   : > { %v11624_v47 = vpop.eup %6942  ;;  %6946 = vrcp.f32 %v11612_v18  ;;  %v4784_v51 = vsel %vm11629_vm15, %v11522_v31, %v4780_v8  ;;  %v4810_v23 = vadd.f32 %v11540_v50, %v4809_v16  ;;  %v1819_v52 = vadd.f32 %v1818_v3, %v1804_v44  ;;  %v11652_v31 = vpop.xlane.xlu0 %4624  ;;  %vm11662_vm12 = vmor %vm4811_vm1, %vm4812_vm6 }
 0x46f   : > { %v4793_v61 = vsub.f32 1.0, %v4792_v11  ;;  %v1736_v34 = vmul.f32 %v11624_v47, %v11549_v63  ;;  %v1806_v2 = vmul.f32 %v1733_v10, %v15976_v62  ;;  %v4890_v58 = vadd.f32 %v4889_v55, %v4875_v60 }
 0x470   : > { %vm11645_vm11 = vcmp.eq.f32.partialorder %v4815_v4, 8.507059e+37  ;;  %v4800_v43 = vand.u32 2147483647, %v11528_v27  ;;  %6948 = vrcp.f32 %v11636_v19  ;;  %v4789_v3 = vsel %vm11605_vm5, %v4788_v14, %v4784_v51 }
 0x471   : > { %v4794_v45 = vmul.f32 %v11614_v5, %v4793_v61  ;;  %v1737_v15 = vsub.f32 1.0, %v1736_v34  ;;  %v4818_v37 = vor.u32 1.1754944e-38, %v4817_v54  ;;  %vm4796_vm10 = vweird.f32 %v11528_v27 }
 0x472   : > { %v11654_v46 = vpop.eup %6944  ;;  %v4802_v57 = vand.u32 2147483648, %v11528_v27  ;;  %v1820_v8 = vadd.f32 %v1819_v52, %v1805_v59  ;;  %v4814_v16 = vsel %vm11662_vm12, %v11540_v50, %v4810_v23  ;;  %v1744_v33 = vand.u32 2147483647, %v11549_v63  ;;  %v11744_v14 = vpop.xlane.xlu1 %1553 }
 0x473   : > { %v1746_v55 = vand.u32 2147483648, %v11549_v63  ;;  %v4795_v22 = vadd.f32 %v11614_v5, %v4794_v45  ;;  %vm4797_vm4 = vweird.f32 %v11614_v5  ;;  %v1738_v4 = vmul.f32 %v11624_v47, %v1737_v15  ;;  %v11706_v45 = vpop.xlane.xlu2 %4622 }
 0x474   : > { %v11673_v44 = vpop.eup %6946  ;;  %6950 = vrcp.f32 %v11652_v31  ;;  %v4876_v10 = vmul.f32 %v4789_v3, %v15989_v13  ;;  %vm11680_vm14 = vcmp.eq.f32.partialorder %v4800_v43, 8.507059e+37  ;;  %v1766_v50 = vmul.f32 %v11654_v46, %v11582_v39  ;;  %vm11696_vm5 = vmor %vm4796_vm10, %vm4797_vm4 }
 0x475   : > { %v1751_v11 = vmul.f32 %v11673_v44, %v11612_v18  ;;  %v4819_v59 = vsel %vm11645_vm11, %v4818_v37, %v4814_v16  ;;  %v4803_v28 = vor.u32 1.1754944e-38, %v4802_v57  ;;  %vm1740_vm3 = vweird.f32 %v11549_v63 }
 0x476   : > { %v1776_v54 = vand.u32 2147483648, %v11582_v39  ;;  %v11692_v51 = vpop.eup %6948  ;;  %v11700_v61 = vadd.f32 %v1820_v8, %v1806_v2  ;;  %vm11702_vm0 = vcmp.eq.f32.partialorder %v1744_v33, 8.507059e+37  ;;  %v1747_v52 = vor.u32 1.1754944e-38, %v1746_v55 }
 0x477   : > { %v1752_v41 = vsub.f32 1.0, %v1751_v11  ;;  %v4799_v43 = vsel %vm11696_vm5, %v11614_v5, %v4795_v22  ;;  %v1739_v27 = vadd.f32 %v11624_v47, %v1738_v4  ;;  %vm1741_vm1 = vweird.f32 %v11624_v47 }
 0x478   : > { %v4822_v2 = vmul.f32 %v11692_v51, %v11636_v19  ;;  %v4891_v15 = vadd.f32 %v4890_v58, %v4876_v10  ;;  %v11716_v3 = vmul.f32 %v4819_v59, %v10025_v6  ;;  %v1767_v60 = vsub.f32 1.0, %v1766_v50  ;;  %vm11729_vm15 = vmor %vm1740_vm3, %vm1741_vm1 }
 0x479   : > { %v1774_v37 = vand.u32 2147483647, %v11582_v39  ;;  %v11721_v8 = vor.u32 1.1754944e-38, %v1776_v54  ;;  %v1753_v5 = vmul.f32 %v11673_v44, %v1752_v41  ;;  %6952 = vrcp.f32 %v11706_v45 }
 0x47a   : > { %v11719_v57 = vpop.eup %6950  ;;  %v4823_v16 = vsub.f32 1.0, %v4822_v2  ;;  %v4804_v33 = vsel %vm11680_vm14, %v4803_v28, %v4799_v43  ;;  %vm1755_vm6 = vweird.f32 %v11612_v18  ;;  %v1759_v55 = vand.u32 2147483647, %v11612_v18 }
 0x47b   : > { %v1761_v22 = vand.u32 2147483648, %v11612_v18  ;;  %v1743_v4 = vsel %vm11729_vm15, %v11624_v47, %v1739_v27  ;;  %vm1770_vm11 = vweird.f32 %v11582_v39  ;;  %vm1771_vm12 = vweird.f32 %v11654_v46 }
 0x47c   : > { %v4824_v63 = vmul.f32 %v11692_v51, %v4823_v16  ;;  %v4852_v10 = vmul.f32 %v11719_v57, %v11652_v31  ;;  %v1768_v50 = vmul.f32 %v11654_v46, %v1767_v60  ;;  %vm1756_vm10 = vweird.f32 %v11673_v44 }
 0x47d   : > { %vm4827_vm4 = vweird.f32 %v11692_v51  ;;  %v4832_v11 = vand.u32 2147483648, %v11636_v19  ;;  %v4877_v47 = vmul.f32 %v4804_v33, %v9936_v30  ;;  %v1754_v59 = vadd.f32 %v11673_v44, %v1753_v5 }
 0x47e   : > { %v4825_v28 = vadd.f32 %v11692_v51, %v4824_v63  ;;  %v4853_v54 = vsub.f32 1.0, %v4852_v10  ;;  %v1748_v23 = vsel %vm11702_vm0, %v1747_v52, %v1743_v4  ;;  %vm4826_vm14 = vweird.f32 %v11636_v19  ;;  %vm11772_vm0 = vmor %vm1755_vm6, %vm1756_vm10 }
 0x47f   : > { %v4830_v41 = vand.u32 2147483647, %v11636_v19  ;;  %6954 = vrcp.f32 %v11744_v14  ;;  %v6953_v43 = vpop.eup %6952  ;;  %vm11758_vm3 = vcmp.eq.f32.partialorder %v1759_v55, 8.507059e+37  ;;  %v1762_v2 = vor.u32 1.1754944e-38, %v1761_v22  ;;  %vm11762_vm5 = vmor %vm4826_vm14, %vm4827_vm4 }
 0x480   : > { %v4854_v5 = vmul.f32 %v11719_v57, %v4853_v54  ;;  %v4860_v34 = vand.u32 2147483647, %v11652_v31  ;;  %v4829_v52 = vsel %vm11762_vm5, %v11692_v51, %v4825_v28  ;;  %v4833_v16 = vor.u32 1.1754944e-38, %v4832_v11  ;;  %vm11802_vm14 = vmor %vm1770_vm11, %vm1771_vm12 }
 0x481   : > { %vm4856_vm1 = vweird.f32 %v11652_v31  ;;  %v4837_v33 = vmul.f32 %v6953_v43, %v11706_v45  ;;  %v4892_v58 = vadd.f32 %v4891_v15, %v4877_v47  ;;  %v1807_v55 = vmul.f32 %v1748_v23, %v10001_v21  ;;  %v16107_v15 = vld [vmem:[#allocation26_spill] sm:$0xff] }
 0x482   : > { %v1769_v22 = vadd.f32 %v11654_v46, %v1768_v50  ;;  %vm11783_vm15 = vcmp.eq.f32.partialorder %v1774_v37, 8.507059e+37  ;;  %v1758_v4 = vsel %vm11772_vm0, %v11673_v44, %v1754_v59  ;;  %vm4831_vm6 = vcmp.eq.f32.partialorder %v4830_v41, 8.507059e+37 }
 0x483   : > { %v4855_v51 = vadd.f32 %v11719_v57, %v4854_v5  ;;  %vm4857_vm10 = vweird.f32 %v11719_v57  ;;  %v4838_v63 = vsub.f32 1.0, %v4837_v33  ;;  %v4834_v10 = vsel %vm4831_vm6, %v4833_v16, %v4829_v52 }
 0x484   : > { %vm11792_vm4 = vcmp.eq.f32.partialorder %v4860_v34, 8.507059e+37  ;;  %v4862_v37 = vand.u32 2147483648, %v11652_v31  ;;  %v4847_v50 = vand.u32 2147483648, %v11706_v45  ;;  %v1763_v47 = vsel %vm11758_vm3, %v1762_v2, %v1758_v4  ;;  %vm11818_vm11 = vmor %vm4856_vm1, %vm4857_vm10  ;;  %v16106_v4 = vld [vmem:[#allocation28_spill] sm:$0xff] }
 0x485   : > { %v6955_v11 = vpop.eup %6954  ;;  %v4839_v59 = vmul.f32 %v6953_v43, %v4838_v63  ;;  %vm4842_vm5 = vweird.f32 %v6953_v43  ;;  %v4845_v28 = vand.u32 2147483647, %v11706_v45  ;;  %v1822_v54 = vadd.f32 %v11700_v61, %v1807_v55 }
 0x486   : > { %v1773_v23 = vsel %vm11802_vm14, %v11654_v46, %v1769_v22  ;;  %v4893_v41 = vadd.f32 %v4892_v58, %v11716_v3  ;;  %v1781_v27 = vmul.f32 %v6955_v11, %v11744_v14  ;;  %v4879_v2 = vmul.f32 %v4834_v10, %v10117_v1 }
 0x487   : > { %v4859_v61 = vsel %vm11818_vm11, %v11719_v57, %v4855_v51  ;;  %v4840_v60 = vadd.f32 %v6953_v43, %v4839_v59  ;;  %vm4841_vm12 = vweird.f32 %v11706_v45  ;;  %v1808_v46 = vmul.f32 %v1763_v47, %v10088_v35 }
 0x488   : > { %v4863_v3 = vor.u32 1.1754944e-38, %v4862_v37  ;;  %vm4843_vm3 = vmor %vm4841_vm12, %vm4842_vm5  ;;  %v4848_v31 = vor.u32 1.1754944e-38, %v4847_v50  ;;  %v1782_v5 = vsub.f32 1.0, %v1781_v27  ;;  %vm4846_vm0 = vcmp.eq.f32.partialorder %v4845_v28, 8.507059e+37 }
 0x489   : > { %v4844_v34 = vsel %vm4843_vm3, %v6953_v43, %v4840_v60  ;;  %v1789_v19 = vand.u32 2147483647, %v11744_v14  ;;  %v1791_v52 = vand.u32 2147483648, %v11744_v14  ;;  %vm1786_vm1 = vweird.f32 %v6955_v11 }
 0x48a   : > { %v4864_v16 = vsel %vm11792_vm4, %v4863_v3, %v4859_v61  ;;  %v4849_v33 = vsel %vm4846_vm0, %v4848_v31, %v4844_v34  ;;  %v1783_v57 = vmul.f32 %v6955_v11, %v1782_v5  ;;  %v1778_v45 = vsel %vm11783_vm15, %v11721_v8, %v1773_v23  ;;  %v16108_v8 = vld [vmem:[#allocation13_spill] sm:$0xff] }
 0x48b   : > { %v4894_v58 = vadd.f32 %v4893_v41, %v4879_v2  ;;  %v4880_v55 = vmul.f32 %v4849_v33, %v15992_v38  ;;  %v1823_v22 = vadd.f32 %v1822_v54, %v1808_v46  ;;  %vm1785_vm6 = vweird.f32 %v11744_v14 }
 0x48c   : > { %v1784_v43 = vadd.f32 %v6955_v11, %v1783_v57  ;;  %v4881_v51 = vmul.f32 %v4864_v16, %v16106_v4  ;;  %vm1787_vm10 = vmor %vm1785_vm6, %vm1786_vm1  ;;  %v1792_v10 = vor.u32 1.1754944e-38, %v1791_v52  ;;  %v1809_v37 = vmul.f32 %v1778_v45, %v16107_v15 }
 0x48d   : > { %v4895_v63 = vadd.f32 %v4894_v58, %v4880_v55  ;;  %vm1790_vm4 = vcmp.eq.f32.partialorder %v1789_v19, 8.507059e+37 }
 0x48e   : > { %v1788_v50 = vsel %vm1787_vm10, %v6955_v11, %v1784_v43  ;;  %v1824_v18 = vadd.f32 %v1823_v22, %v1809_v37 }
 0x48f   : > { %v4896_v44 = vadd.f32 %v4895_v63, %v4881_v51  ;;  %v1793_v47 = vsel %vm1790_vm4, %v1792_v10, %v1788_v50 }
 0x490   : > { %v1810_v59 = vmul.f32 %v1793_v47, %v16108_v8 }
 0x491   : > { %v4897_v28 = vrot.slane %v4896_v44, 4 }
 0x492   : > { %v1825_v23 = vadd.f32 %v1824_v18, %v1810_v59  ;;  %v16109_v59 = vld [vmem:[#allocation38_spill] sm:$0xff] }
 0x493   : > { %v4898_v54 = vadd.f32 %v4897_v28, %v4896_v44 }
 0x494   : > { %v1826_v41 = vrot.slane %v1825_v23, 4 }
 0x495   : > { %v4899_v39 = vrot.slane %v4898_v54, 2 }
 0x496   : > { %v1827_v14 = vadd.f32 %v1826_v41, %v1825_v23  ;;  %v16110_v23 = vld [vmem:[#allocation35_spill] sm:$0xff] }
 0x497   : > { %v4900_v27 = vadd.f32 %v4899_v39, %v4898_v54  ;;  %v16111_v39 = vld [vmem:[#allocation37_spill] sm:$0xff] }
 0x498   : > { %v1828_v2 = vrot.slane %v1827_v14, 2 }
 0x499   : > { %v4901_v61 = vrot.slane %v4900_v27, 1 }
 0x49a   : > { %v1829_v60 = vadd.f32 %v1828_v2, %v1827_v14 }
 0x49b   : > { %v4902_v46 = vadd.f32 %v4901_v61, %v4900_v27 }
 0x49c   : > { %v1830_v3 = vrot.slane %v1829_v60, 1 }
 0x49d   : > { %6956 = vrcp.f32 %v4902_v46  ;;  %v4914_v52 = vand.u32 2147483648, %v4902_v46  ;;  %v4912_v57 = vand.u32 2147483647, %v4902_v46  ;;  %vm4908_vm14 = vweird.f32 %v4902_v46 }
 0x49e   : > { %v1831_v11 = vadd.f32 %v1830_v3, %v1829_v60 }
 0x49f   : > { %v4915_v22 = vor.u32 1.1754944e-38, %v4914_v52  ;;  %vm4913_vm12 = vcmp.eq.f32.partialorder %v4912_v57, 8.507059e+37 }
 0x4a0   : > { %6958 = vrcp.f32 %v1831_v11  ;;  %v1843_v55 = vand.u32 2147483648, %v1831_v11  ;;  %v1841_v51 = vand.u32 2147483647, %v1831_v11  ;;  %vm1837_vm3 = vweird.f32 %v1831_v11 }
 0x4a2   : > { %v1844_v50 = vor.u32 1.1754944e-38, %v1843_v55  ;;  %vm1842_vm1 = vcmp.eq.f32.partialorder %v1841_v51, 8.507059e+37 }
 0x4a3   : > { %v6957_v31 = vpop.eup %6956 }
 0x4a4   : > { %v4904_v5 = vmul.f32 %v6957_v31, %v4902_v46  ;;  %vm4909_vm15 = vweird.f32 %v6957_v31 }
 0x4a5   : > { %vm4910_vm5 = vmor %vm4908_vm14, %vm4909_vm15 }
 0x4a6   : > { %v6959_v34 = vpop.eup %6958  ;;  %v4905_v19 = vsub.f32 1.0, %v4904_v5 }
 0x4a7   : > { %v1833_v16 = vmul.f32 %v6959_v34, %v1831_v11  ;;  %vm1838_vm11 = vweird.f32 %v6959_v34 }
 0x4a8   : > { %v4906_v33 = vmul.f32 %v6957_v31, %v4905_v19  ;;  %vm1839_vm0 = vmor %vm1837_vm3, %vm1838_vm11 }
 0x4a9   : > { %v1834_v45 = vsub.f32 1.0, %v1833_v16 }
 0x4aa   : > { %v4907_v58 = vadd.f32 %v6957_v31, %v4906_v33 }
 0x4ab   : > { %v1835_v43 = vmul.f32 %v6959_v34, %v1834_v45 }
 0x4ac   : > { %v4911_v63 = vsel %vm4910_vm5, %v6957_v31, %v4907_v58 }
 0x4ad   : > { %v11841_v10 = vsel %vm4913_vm12, %v4915_v22, %v4911_v63  ;;  %v1836_v37 = vadd.f32 %v6959_v34, %v1835_v43 }
 0x4ae   : > { %v4918_v44 = vmul.f32 %v11841_v10, %v9269_v56  ;;  %v4920_v41 = vmul.f32 %v11841_v10, %v9395_v49  ;;  %v4919_v27 = vmul.f32 %v11841_v10, %v9336_v36  ;;  %v4921_v61 = vmul.f32 %v11841_v10, %v15996_v48 }
 0x4af   : > { %v1840_v47 = vsel %vm1839_vm0, %v6959_v34, %v1836_v37  ;;  %v4923_v46 = vmul.f32 %v11841_v10, %v9564_v32  ;;  %v4922_v11 = vmul.f32 %v11841_v10, %v15998_v12  ;;  %v4924_v5 = vmul.f32 %v11841_v10, %v9427_v26 }
 0x4b0   : > { %v1845_v18 = vsel %vm1842_vm1, %v1844_v50, %v1840_v47  ;;  %4934 = vadd.xlane.f32.xlu0 %v4918_v44  ;;  %v4926_v19 = vmul.f32 %v11841_v10, %v9706_v0  ;;  %v4925_v16 = vmul.f32 %v11841_v10, %v9582_v20  ;;  %v4927_v57 = vmul.f32 %v11841_v10, %v9807_v29 }
 0x4b1   : > { %v1848_v28 = vmul.f32 %v1845_v18, %v16109_v59  ;;  %v1847_v54 = vmul.f32 %v1845_v18, %v16110_v23  ;;  %v1849_v14 = vmul.f32 %v1845_v18, %v16111_v39  ;;  %v1851_v2 = vmul.f32 %v1845_v18, %v9451_v17 }
 0x4b2   : > { %v1850_v60 = vmul.f32 %v1845_v18, %v15997_v42  ;;  %v1852_v3 = vmul.f32 %v1845_v18, %v15943_v9  ;;  %v1854_v31 = vmul.f32 %v1845_v18, %v9658_v40  ;;  %v1853_v34 = vmul.f32 %v1845_v18, %v15999_v7 }
 0x4b3   : > { %1865 = vadd.xlane.f32.xlu1 %v1848_v28  ;;  %1863 = vadd.xlane.f32.xlu2 %v1847_v54  ;;  %v1855_v52 = vmul.f32 %v1845_v18, %v9663_v25  ;;  %v1857_v33 = vmul.f32 %v1845_v18, %v9762_v53  ;;  %v1856_v45 = vmul.f32 %v1845_v18, %v9752_v24 }
 0x4b4   : > { %v4929_v58 = vmul.f32 %v11841_v10, %v9936_v30  ;;  %v1858_v55 = vmul.f32 %v1845_v18, %v15976_v62  ;;  %v4928_v22 = vmul.f32 %v11841_v10, %v15989_v13  ;;  %v1860_v43 = vmul.f32 %v1845_v18, %v10088_v35 }
 0x4b5   : > { %v4930_v51 = vmul.f32 %v11841_v10, %v10025_v6  ;;  %v1859_v63 = vmul.f32 %v1845_v18, %v10001_v21  ;;  %v4932_v37 = vmul.f32 %v11841_v10, %v15992_v38  ;;  %v1861_v50 = vmul.f32 %v1845_v18, %v16107_v15 }
 0x4b6   : > { %v4931_v44 = vmul.f32 %v11841_v10, %v10117_v1  ;;  %v4933_v47 = vmul.f32 %v11841_v10, %v16106_v4  ;;  %v1862_v28 = vmul.f32 %v1845_v18, %v16108_v8 }
 0x4b8   : > { %4938 = vadd.xlane.f32.xlu0 %v4920_v41 }
 0x4bb   : > { %1867 = vadd.xlane.f32.xlu1 %v1849_v14  ;;  %4936 = vadd.xlane.f32.xlu2 %v4919_v27 }
 0x4c0   : > { %1871 = vadd.xlane.f32.xlu0 %v1851_v2 }
 0x4c3   : > { %4940 = vadd.xlane.f32.xlu1 %v4921_v61  ;;  %1869 = vadd.xlane.f32.xlu2 %v1850_v60 }
 0x4c8   : > { %4944 = vadd.xlane.f32.xlu0 %v4923_v46 }
 0x4cb   : > { %1873 = vadd.xlane.f32.xlu1 %v1852_v3  ;;  %4942 = vadd.xlane.f32.xlu2 %v4922_v11 }
 0x4d0   : > { %1877 = vadd.xlane.f32.xlu0 %v1854_v31 }
 0x4d3   : > { %4946 = vadd.xlane.f32.xlu1 %v4924_v5  ;;  %1875 = vadd.xlane.f32.xlu2 %v1853_v34 }
 0x4d8   : > { %4950 = vadd.xlane.f32.xlu0 %v4926_v19 }
 0x4db   : > { %1879 = vadd.xlane.f32.xlu1 %v1855_v52  ;;  %4948 = vadd.xlane.f32.xlu2 %v4925_v16 }
 0x4e0   : > { %1883 = vadd.xlane.f32.xlu0 %v1857_v33 }
 0x4e3   : > { %4952 = vadd.xlane.f32.xlu1 %v4927_v57  ;;  %1881 = vadd.xlane.f32.xlu2 %v1856_v45 }
 0x4e8   : > { %4956 = vadd.xlane.f32.xlu0 %v4929_v58 }
 0x4eb   : > { %1885 = vadd.xlane.f32.xlu1 %v1858_v55  ;;  %4954 = vadd.xlane.f32.xlu2 %v4928_v22 }
 0x4f0   : > { %1889 = vadd.xlane.f32.xlu0 %v1860_v43 }
 0x4f3   : > { %4958 = vadd.xlane.f32.xlu1 %v4930_v51  ;;  %1887 = vadd.xlane.f32.xlu2 %v1859_v63 }
 0x4f8   : > { %4962 = vadd.xlane.f32.xlu0 %v4932_v37 }
 0x4fb   : > { %1891 = vadd.xlane.f32.xlu1 %v1861_v50  ;;  %4960 = vadd.xlane.f32.xlu2 %v4931_v44 }
 0x503   : > { %4964 = vadd.xlane.f32.xlu1 %v4933_v47  ;;  %1893 = vadd.xlane.f32.xlu2 %v1862_v28 }
 0x523   : > { %v11891_v54 = vpop.xlane.xlu0 %4934 }
 0x524   : > { %6960 = vrcp.f32 %v11891_v54  ;;  %v4975_v58 = vand.u32 2147483647, %v11891_v54  ;;  %vm4971_vm0 = vweird.f32 %v11891_v54 }
 0x526   : > { %v1866_v41 = vpop.xlane.xlu1 %1865  ;;  %v1864_v14 = vpop.xlane.xlu2 %1863  ;;  %vm11936_vm1 = vcmp.eq.f32.partialorder %v4975_v58, 8.507059e+37 }
 0x527   : > { %6962 = vrcp.f32 %v1866_v41  ;;  %v1919_v31 = vand.u32 2147483647, %v1866_v41  ;;  %v1921_v5 = vand.u32 2147483648, %v1866_v41  ;;  %v1906_v33 = vand.u32 2147483648, %v1864_v14 }
 0x528   : > { %6964 = vrcp.f32 %v1864_v14  ;;  %v1904_v45 = vand.u32 2147483647, %v1864_v14  ;;  %vm1915_vm4 = vweird.f32 %v1866_v41  ;;  %vm1900_vm14 = vweird.f32 %v1864_v14 }
 0x529   : > { %vm1920_vm15 = vcmp.eq.f32.partialorder %v1919_v31, 8.507059e+37  ;;  %v1922_v51 = vor.u32 1.1754944e-38, %v1921_v5  ;;  %v1907_v47 = vor.u32 1.1754944e-38, %v1906_v33 }
 0x52a   : > { %v11896_v2 = vpop.eup %6960  ;;  %vm1905_vm12 = vcmp.eq.f32.partialorder %v1904_v45, 8.507059e+37 }
 0x52b   : > { %v11894_v27 = vpop.xlane.xlu0 %4938  ;;  %v4967_v19 = vmul.f32 %v11896_v2, %v11891_v54 }
 0x52c   : > { %6966 = vrcp.f32 %v11894_v27 }
 0x52d   : > { %v6963_v61 = vpop.eup %6962  ;;  %v4968_v37 = vsub.f32 1.0, %v4967_v19 }
 0x52e   : > { %v6965_v10 = vpop.eup %6964  ;;  %v1911_v60 = vmul.f32 %v6963_v61, %v1866_v41  ;;  %v11899_v18 = vpop.xlane.xlu1 %1867  ;;  %vm1916_vm6 = vweird.f32 %v6963_v61 }
 0x52f   : > { %v11901_v46 = vpop.xlane.xlu2 %4936  ;;  %v1896_v3 = vmul.f32 %v6965_v10, %v1864_v14  ;;  %6968 = vrcp.f32 %v11899_v18  ;;  %vm1901_vm10 = vweird.f32 %v6965_v10  ;;  %vm1917_vm5 = vmor %vm1915_vm4, %vm1916_vm6  ;;  %v1936_v33 = vand.u32 2147483648, %v11899_v18 }
 0x530   : > { %v1912_v11 = vsub.f32 1.0, %v1911_v60  ;;  %6970 = vrcp.f32 %v11901_v46  ;;  %vm1902_vm11 = vmor %vm1900_vm14, %vm1901_vm10  ;;  %v1934_v45 = vand.u32 2147483647, %v11899_v18  ;;  %vm1930_vm6 = vweird.f32 %v11899_v18 }
 0x531   : > { %v1897_v34 = vsub.f32 1.0, %v1896_v3  ;;  %vm4972_vm10 = vweird.f32 %v11896_v2 }
 0x532   : > { %v11907_v52 = vpop.eup %6966  ;;  %v1913_v16 = vmul.f32 %v6963_v61, %v1912_v11 }
 0x533   : > { %v1898_v57 = vmul.f32 %v6965_v10, %v1897_v34  ;;  %v11910_v55 = vpop.xlane.xlu0 %1871  ;;  %v4997_v50 = vmul.f32 %v11907_v52, %v11894_v27 }
 0x534   : > { %v1914_v22 = vadd.f32 %v6963_v61, %v1913_v16  ;;  %6972 = vrcp.f32 %v11910_v55  ;;  %v4969_v16 = vmul.f32 %v11896_v2, %v4968_v37 }
 0x535   : > { %v6969_v43 = vpop.eup %6968  ;;  %v1899_v63 = vadd.f32 %v6965_v10, %v1898_v57  ;;  %v4998_v57 = vsub.f32 1.0, %v4997_v50 }
 0x536   : > { %v1918_v44 = vsel %vm1917_vm5, %v6963_v61, %v1914_v22  ;;  %v1926_v28 = vmul.f32 %v6969_v43, %v11899_v18  ;;  %v11916_v60 = vpop.xlane.xlu1 %4940  ;;  %v11919_v41 = vpop.eup %6970  ;;  %vm1931_vm3 = vweird.f32 %v6969_v43  ;;  %vm11957_vm5 = vmor %vm4971_vm0, %vm4972_vm10  ;;  %vm5001_vm0 = vweird.f32 %v11894_v27 }
 0x537   : > { %v1923_v14 = vsel %vm1920_vm15, %v1922_v51, %v1918_v44  ;;  %v1903_v3 = vsel %vm1902_vm11, %v6965_v10, %v1899_v63  ;;  %6974 = vrcp.f32 %v11916_v60  ;;  %v4982_v5 = vmul.f32 %v11919_v41, %v11901_v46  ;;  %v11925_v34 = vpop.xlane.xlu2 %1869  ;;  %vm1932_vm4 = vmor %vm1930_vm6, %vm1931_vm3 }
 0x538   : > { %v2136_v11 = vmul.f32 %v1923_v14, %v16109_v59  ;;  %v1908_v31 = vsel %vm1905_vm12, %v1907_v47, %v1903_v3  ;;  %v1927_v61 = vsub.f32 1.0, %v1926_v28  ;;  %v4977_v63 = vand.u32 2147483648, %v11891_v54 }
 0x539   : > { %v2135_v19 = vmul.f32 %v1908_v31, %v16110_v23  ;;  %v4983_v22 = vsub.f32 1.0, %v4982_v5  ;;  %6976 = vrcp.f32 %v11925_v34  ;;  %v4970_v14 = vadd.f32 %v11896_v2, %v4969_v16 }
 0x53a   : > { %v1928_v10 = vmul.f32 %v6969_v43, %v1927_v61  ;;  %v11934_v44 = vpop.eup %6972  ;;  %v1937_v3 = vor.u32 1.1754944e-38, %v1936_v33  ;;  %vm1935_vm15 = vcmp.eq.f32.partialorder %v1934_v45, 8.507059e+37  ;;  %v5007_v31 = vand.u32 2147483648, %v11894_v27 }
 0x53b   : > { %v2151_v51 = vadd.f32 %v2136_v11, %v2135_v19  ;;  %v4984_v50 = vmul.f32 %v11919_v41, %v4983_v22  ;;  %v4999_v11 = vmul.f32 %v11907_v52, %v4998_v57  ;;  %vm4987_vm14 = vweird.f32 %v11919_v41 }
 0x53c   : > { %v1929_v37 = vadd.f32 %v6969_v43, %v1928_v10  ;;  %v1956_v19 = vmul.f32 %v11934_v44, %v11910_v55  ;;  %vm4986_vm11 = vweird.f32 %v11901_v46  ;;  %v4992_v33 = vand.u32 2147483648, %v11901_v46 }
 0x53d   : > { %v11942_v28 = vpop.eup %6974  ;;  %v4985_v5 = vadd.f32 %v11919_v41, %v4984_v50  ;;  %v4974_v22 = vsel %vm11957_vm5, %v11896_v2, %v4970_v14  ;;  %v4990_v54 = vand.u32 2147483647, %v11901_v46  ;;  %vm5002_vm12 = vweird.f32 %v11907_v52  ;;  %vm11976_vm3 = vmor %vm4986_vm11, %vm4987_vm14 }
 0x53e   : > { %v1933_v58 = vsel %vm1932_vm4, %v6969_v43, %v1929_v37  ;;  %v5012_v18 = vmul.f32 %v11942_v28, %v11916_v60  ;;  %v11964_v10 = vpop.xlane.xlu1 %1873  ;;  %v5000_v37 = vadd.f32 %v11907_v52, %v4999_v11  ;;  %v4978_v16 = vor.u32 1.1754944e-38, %v4977_v63  ;;  %vm11990_vm6 = vmor %vm5001_vm0, %vm5002_vm12 }
 0x53f   : > { %v1938_v61 = vsel %vm1935_vm15, %v1937_v3, %v1933_v58  ;;  %v11966_v45 = vpop.eup %6976  ;;  %v4989_v2 = vsel %vm11976_vm3, %v11919_v41, %v4985_v5  ;;  %v5005_v46 = vand.u32 2147483647, %v11894_v27  ;;  %v4993_v14 = vor.u32 1.1754944e-38, %v4992_v33  ;;  %v12001_v5 = vpop.xlane.xlu0 %4944 }
 0x540   : > { %v2137_v43 = vmul.f32 %v1938_v61, %v16111_v39  ;;  %v5013_v57 = vsub.f32 1.0, %v5012_v18  ;;  %v1941_v18 = vmul.f32 %v11966_v45, %v11925_v34  ;;  %v1957_v61 = vsub.f32 1.0, %v1956_v19 }
 0x541   : > { %6978 = vrcp.f32 %v11964_v10  ;;  %v4979_v63 = vsel %vm11936_vm1, %v4978_v16, %v4974_v22  ;;  %vm4991_vm10 = vcmp.eq.f32.partialorder %v4990_v54, 8.507059e+37  ;;  %v5004_v41 = vsel %vm11990_vm6, %v11907_v52, %v5000_v37 }
 0x542   : > { %v11974_v50 = vadd.f32 %v2151_v51, %v2137_v43  ;;  %v5014_v58 = vmul.f32 %v11942_v28, %v5013_v57  ;;  %v11988_v51 = vpop.xlane.xlu2 %4942  ;;  %v5008_v43 = vor.u32 1.1754944e-38, %v5007_v31  ;;  %v1942_v57 = vsub.f32 1.0, %v1941_v18 }
 0x543   : > { %v5022_v27 = vand.u32 2147483648, %v11916_v60  ;;  %v4994_v19 = vsel %vm4991_vm10, %v4993_v14, %v4989_v2  ;;  %vm5017_vm4 = vweird.f32 %v11942_v28  ;;  %v1958_v31 = vmul.f32 %v11934_v44, %v1957_v61 }
 0x544   : > { %v5015_v33 = vadd.f32 %v11942_v28, %v5014_v58  ;;  %vm5006_vm15 = vcmp.eq.f32.partialorder %v5005_v46, 8.507059e+37  ;;  %v1943_v47 = vmul.f32 %v11966_v45, %v1942_v57  ;;  %6980 = vrcp.f32 %v11988_v51 }
 0x545   : > { %v5206_v22 = vmul.f32 %v4979_v63, %v9269_v56  ;;  %v5009_v54 = vsel %vm5006_vm15, %v5008_v43, %v5004_v41  ;;  %vm5016_vm1 = vweird.f32 %v11916_v60  ;;  %v5020_v52 = vand.u32 2147483647, %v11916_v60 }
 0x546   : > { %v5207_v37 = vmul.f32 %v4994_v19, %v9336_v36  ;;  %vm12012_vm14 = vmor %vm5016_vm1, %vm5017_vm4  ;;  %v5023_v58 = vor.u32 1.1754944e-38, %v5022_v27  ;;  %v1949_v18 = vand.u32 2147483647, %v11925_v34  ;;  %v1951_v61 = vand.u32 2147483648, %v11925_v34  ;;  %v12026_v60 = vpop.xlane.xlu1 %4946 }
 0x547   : > { %v12018_v16 = vpop.eup %6978  ;;  %v5019_v2 = vsel %vm12012_vm14, %v11942_v28, %v5015_v33  ;;  %v1959_v46 = vadd.f32 %v11934_v44, %v1958_v31  ;;  %vm1961_vm5 = vweird.f32 %v11934_v44  ;;  %6982 = vrcp.f32 %v12001_v5 }
 0x548   : > { %v1944_v14 = vadd.f32 %v11966_v45, %v1943_v47  ;;  %vm1946_vm11 = vweird.f32 %v11966_v45  ;;  %v1966_v11 = vand.u32 2147483648, %v11910_v55  ;;  %v1971_v43 = vmul.f32 %v12018_v16, %v11964_v10 }
 0x549   : > { %vm5021_vm12 = vcmp.eq.f32.partialorder %v5020_v52, 8.507059e+37  ;;  %vm1945_vm3 = vweird.f32 %v11925_v34  ;;  %vm1960_vm0 = vweird.f32 %v11910_v55  ;;  %v1964_v28 = vand.u32 2147483647, %v11910_v55 }
 0x54a   : > { %v12036_v57 = vpop.eup %6980  ;;  %v5222_v63 = vadd.f32 %v5207_v37, %v5206_v22  ;;  %v5208_v41 = vmul.f32 %v5009_v54, %v9395_v49  ;;  %v5024_v27 = vsel %vm5021_vm12, %v5023_v58, %v5019_v2  ;;  %vm12041_vm6 = vmor %vm1960_vm0, %vm1961_vm5  ;;  %6984 = vrcp.f32 %v12026_v60  ;;  %v12046_v33 = vpop.xlane.xlu2 %1875 }
 0x54b   : > { %vm12048_vm10 = vmor %vm1945_vm3, %vm1946_vm11  ;;  %vm12052_vm4 = vcmp.eq.f32.partialorder %v1949_v18, 8.507059e+37  ;;  %v1963_v31 = vsel %vm12041_vm6, %v11934_v44, %v1959_v46  ;;  %v1981_v47 = vand.u32 2147483648, %v11964_v10  ;;  %v5027_v22 = vmul.f32 %v12036_v57, %v11988_v51  ;;  %v12065_v58 = vpop.xlane.xlu0 %1877 }
 0x54c   : > { %v1948_v54 = vsel %vm12048_vm10, %v11966_v45, %v1944_v14  ;;  %v1952_v52 = vor.u32 1.1754944e-38, %v1951_v61  ;;  %v1967_v37 = vor.u32 1.1754944e-38, %v1966_v11  ;;  %v1972_v3 = vsub.f32 1.0, %v1971_v43 }
 0x54d   : > { %v12067_v18 = vpop.eup %6982  ;;  %v5209_v2 = vmul.f32 %v5024_v27, %v15996_v48  ;;  %vm1965_vm15 = vcmp.eq.f32.partialorder %v1964_v28, 8.507059e+37  ;;  %v5028_v44 = vsub.f32 1.0, %v5027_v22  ;;  %6986 = vrcp.f32 %v12046_v33 }
 0x54e   : > { %v5223_v46 = vadd.f32 %v5222_v63, %v5208_v41  ;;  %v1968_v19 = vsel %vm1965_vm15, %v1967_v37, %v1963_v31  ;;  %vm1975_vm1 = vweird.f32 %v11964_v10  ;;  %v1979_v34 = vand.u32 2147483647, %v11964_v10 }
 0x54f   : > { %v5042_v45 = vmul.f32 %v12067_v18, %v12001_v5  ;;  %v1953_v61 = vsel %vm12052_vm4, %v1952_v52, %v1948_v54  ;;  %v1982_v14 = vor.u32 1.1754944e-38, %v1981_v47  ;;  %v5029_v11 = vmul.f32 %v12036_v57, %v5028_v44 }
 0x550   : > { %6988 = vrcp.f32 %v12065_v58  ;;  %v12079_v43 = vpop.eup %6984  ;;  %v1973_v28 = vmul.f32 %v12018_v16, %v1972_v3  ;;  %v5035_v63 = vand.u32 2147483647, %v11988_v51  ;;  %v5037_v41 = vand.u32 2147483648, %v11988_v51 }
 0x551   : > { %v5043_v27 = vsub.f32 1.0, %v5042_v45  ;;  %v12084_v31 = vadd.f32 %v5223_v46, %v5209_v2  ;;  %v2139_v22 = vmul.f32 %v1968_v19, %v9451_v17  ;;  %vm5031_vm14 = vweird.f32 %v11988_v51 }
 0x552   : > { %v5057_v55 = vmul.f32 %v12079_v43, %v12026_v60  ;;  %v2138_v47 = vmul.f32 %v1953_v61, %v15997_v42  ;;  %vm1976_vm5 = vweird.f32 %v12018_v16  ;;  %vm12092_vm11 = vcmp.eq.f32.partialorder %v1979_v34, 8.507059e+37  ;;  %v12110_v61 = vpop.xlane.xlu1 %1879  ;;  %v12131_v17 = vpop.xlane.xlu2 %4948 }
 0x553   : > { %vm5046_vm12 = vweird.f32 %v12001_v5  ;;  %v5050_v52 = vand.u32 2147483647, %v12001_v5  ;;  %v12098_v37 = vpop.eup %6986  ;;  %v5030_v3 = vadd.f32 %v12036_v57, %v5029_v11  ;;  %vm5032_vm3 = vweird.f32 %v12036_v57  ;;  %vm12137_vm15 = vmor %vm1975_vm1, %vm1976_vm5 }
 0x554   : > { %v5044_v2 = vmul.f32 %v12067_v18, %v5043_v27  ;;  %v5058_v44 = vsub.f32 1.0, %v5057_v55  ;;  %v1974_v46 = vadd.f32 %v12018_v16, %v1973_v28  ;;  %vm12104_vm0 = vcmp.eq.f32.partialorder %v5035_v63, 8.507059e+37  ;;  %vm12121_vm10 = vmor %vm5031_vm14, %vm5032_vm3 }
 0x555   : > { %v5038_v34 = vor.u32 1.1754944e-38, %v5037_v41  ;;  %v1986_v45 = vmul.f32 %v12098_v37, %v12046_v33  ;;  %v5052_v11 = vand.u32 2147483648, %v12001_v5  ;;  %vm5061_vm6 = vweird.f32 %v12026_v60 }
 0x556   : > { %v12112_v42 = vpop.eup %6988  ;;  %v5059_v48 = vmul.f32 %v12079_v43, %v5058_v44  ;;  %v5065_v28 = vand.u32 2147483647, %v12026_v60  ;;  %v2153_v63 = vadd.f32 %v11974_v50, %v2138_v47  ;;  %vm12125_vm4 = vcmp.eq.f32.partialorder %v5050_v52, 8.507059e+37 }
 0x557   : > { %v1987_v55 = vsub.f32 1.0, %v1986_v45  ;;  %v2001_v44 = vmul.f32 %v12112_v42, %v12065_v58  ;;  %v5034_v51 = vsel %vm12121_vm10, %v12036_v57, %v5030_v3  ;;  %v5045_v47 = vadd.f32 %v12067_v18, %v5044_v2 }
 0x558   : > { %vm5047_vm14 = vweird.f32 %v12067_v18  ;;  %6990 = vrcp.f32 %v12110_v61  ;;  %v1978_v52 = vsel %vm12137_vm15, %v12018_v16, %v1974_v46  ;;  %v5067_v10 = vand.u32 2147483648, %v12026_v60  ;;  %v12169_v46 = vpop.xlane.xlu0 %4950 }
 0x559   : > { %v1988_v45 = vmul.f32 %v12098_v37, %v1987_v55  ;;  %v2002_v36 = vsub.f32 1.0, %v2001_v44  ;;  %v5053_v39 = vor.u32 1.1754944e-38, %v5052_v11  ;;  %v5060_v49 = vadd.f32 %v12079_v43, %v5059_v48  ;;  %vm12159_vm5 = vmor %vm5046_vm12, %vm5047_vm14 }
 0x55a   : > { %vm5062_vm1 = vweird.f32 %v12079_v43  ;;  %6992 = vrcp.f32 %v12131_v17  ;;  %v5039_v57 = vsel %vm12104_vm0, %v5038_v34, %v5034_v51  ;;  %vm12163_vm3 = vcmp.eq.f32.partialorder %v5065_v28, 8.507059e+37  ;;  %v12204_v44 = vpop.xlane.xlu1 %4952 }
 0x55b   : > { %v1994_v2 = vand.u32 2147483647, %v12046_v33  ;;  %v1996_v48 = vand.u32 2147483648, %v12046_v33  ;;  %v1983_v19 = vsel %vm12092_vm11, %v1982_v14, %v1978_v52  ;;  %v5049_v5 = vsel %vm12159_vm5, %v12067_v18, %v5045_v47  ;;  %vm12180_vm0 = vmor %vm5061_vm6, %vm5062_vm1  ;;  %v12218_v52 = vpop.xlane.xlu2 %1881 }
 0x55c   : > { %v1989_v34 = vadd.f32 %v12098_v37, %v1988_v45  ;;  %vm1991_vm12 = vweird.f32 %v12098_v37  ;;  %v2154_v11 = vadd.f32 %v2153_v63, %v2139_v22  ;;  %v5068_v41 = vor.u32 1.1754944e-38, %v5067_v10 }
 0x55d   : > { %vm1990_vm10 = vweird.f32 %v12046_v33  ;;  %v2003_v14 = vmul.f32 %v12112_v42, %v2002_v36  ;;  %v5210_v18 = vmul.f32 %v5039_v57, %v15998_v12  ;;  %v5064_v55 = vsel %vm12180_vm0, %v12079_v43, %v5060_v49 }
 0x55e   : > { %v12186_v54 = vpop.eup %6990  ;;  %vm2005_vm11 = vweird.f32 %v12065_v58  ;;  %6994 = vrcp.f32 %v12169_v46  ;;  %v2140_v60 = vmul.f32 %v1983_v19, %v15943_v9  ;;  %v5054_v22 = vsel %vm12125_vm4, %v5053_v39, %v5049_v5  ;;  %vm12197_vm6 = vmor %vm1990_vm10, %vm1991_vm12 }
 0x55f   : > { %v2009_v36 = vand.u32 2147483647, %v12065_v58  ;;  %v2016_v63 = vmul.f32 %v12186_v54, %v12110_v61  ;;  %v1993_v43 = vsel %vm12197_vm6, %v12098_v37, %v1989_v34  ;;  %vm1995_vm15 = vcmp.eq.f32.partialorder %v1994_v2, 8.507059e+37 }
 0x560   : > { %v12206_v49 = vpop.eup %6992  ;;  %v1997_v27 = vor.u32 1.1754944e-38, %v1996_v48  ;;  %v2011_v39 = vand.u32 2147483648, %v12065_v58  ;;  %v5069_v50 = vsel %vm12163_vm3, %v5068_v41, %v5064_v55  ;;  %v2004_v51 = vadd.f32 %v12112_v42, %v2003_v14 }
 0x561   : > { %vm2006_vm4 = vweird.f32 %v12112_v42  ;;  %v5072_v47 = vmul.f32 %v12206_v49, %v12131_v17  ;;  %v5225_v10 = vadd.f32 %v12084_v31, %v5210_v18  ;;  %v5211_v37 = vmul.f32 %v5054_v22, %v9564_v32  ;;  %v12245_v18 = vpop.xlane.xlu0 %1883 }
 0x562   : > { %v2026_v45 = vand.u32 2147483648, %v12110_v61  ;;  %6996 = vrcp.f32 %v12204_v44  ;;  %v1998_v57 = vsel %vm1995_vm15, %v1997_v27, %v1993_v43  ;;  %vm12224_vm14 = vcmp.eq.f32.partialorder %v2009_v36, 8.507059e+37  ;;  %vm12233_vm1 = vmor %vm2005_vm11, %vm2006_vm4 }
 0x563   : > { %v2017_v16 = vsub.f32 1.0, %v2016_v63  ;;  %v5073_v2 = vsub.f32 1.0, %v5072_v47  ;;  %v2155_v19 = vadd.f32 %v2154_v11, %v2140_v60  ;;  %v5212_v5 = vmul.f32 %v5069_v50, %v9427_v26 }
 0x564   : > { %v12228_v48 = vpop.eup %6994  ;;  %v2012_v34 = vor.u32 1.1754944e-38, %v2011_v39  ;;  %6998 = vrcp.f32 %v12218_v52  ;;  %v2008_v28 = vsel %vm12233_vm1, %v12112_v42, %v2004_v51  ;;  %v2024_v41 = vand.u32 2147483647, %v12110_v61 }
 0x565   : > { %v5074_v14 = vmul.f32 %v12206_v49, %v5073_v2  ;;  %v5087_v11 = vmul.f32 %v12228_v48, %v12169_v46  ;;  %v5226_v58 = vadd.f32 %v5225_v10, %v5211_v37  ;;  %v2141_v55 = vmul.f32 %v1998_v57, %v15999_v7  ;;  %v12274_v57 = vpop.xlane.xlu1 %1885 }
 0x566   : > { %vm2020_vm5 = vweird.f32 %v12110_v61  ;;  %v2027_v60 = vor.u32 1.1754944e-38, %v2026_v45  ;;  %v2018_v22 = vmul.f32 %v12186_v54, %v2017_v16  ;;  %vm5076_vm3 = vweird.f32 %v12131_v17 }
 0x567   : > { %v5080_v42 = vand.u32 2147483647, %v12131_v17  ;;  %v5088_v33 = vsub.f32 1.0, %v5087_v11  ;;  %v12254_v63 = vadd.f32 %v5226_v58, %v5212_v5  ;;  %v2013_v43 = vsel %vm12224_vm14, %v2012_v34, %v2008_v28  ;;  %v12298_v11 = vpop.xlane.xlu2 %4954 }
 0x568   : > { %v12252_v36 = vpop.eup %6996  ;;  %v5082_v27 = vand.u32 2147483648, %v12131_v17  ;;  %7000 = vrcp.f32 %v12245_v18  ;;  %vm12260_vm12 = vcmp.eq.f32.partialorder %v2024_v41, 8.507059e+37  ;;  %v5075_v50 = vadd.f32 %v12206_v49, %v5074_v14 }
 0x569   : > { %vm5077_vm0 = vweird.f32 %v12206_v49  ;;  %v5089_v51 = vmul.f32 %v12228_v48, %v5088_v33  ;;  %v5102_v47 = vmul.f32 %v12252_v36, %v12204_v44  ;;  %v2156_v37 = vadd.f32 %v2155_v19, %v2141_v55 }
 0x56a   : > { %v12269_v10 = vpop.eup %6998  ;;  %vm2021_vm10 = vweird.f32 %v12186_v54  ;;  %vm5091_vm11 = vweird.f32 %v12169_v46  ;;  %v5095_v45 = vand.u32 2147483647, %v12169_v46  ;;  %v2142_v3 = vmul.f32 %v2013_v43, %v9658_v40  ;;  %vm12281_vm6 = vmor %vm5076_vm3, %vm5077_vm0 }
 0x56b   : > { %v2019_v16 = vadd.f32 %v12186_v54, %v2018_v22  ;;  %v5097_v2 = vand.u32 2147483648, %v12169_v46  ;;  %v5103_v5 = vsub.f32 1.0, %v5102_v47  ;;  %vm12285_vm15 = vcmp.eq.f32.partialorder %v5080_v42, 8.507059e+37  ;;  %vm12306_vm14 = vmor %vm2020_vm5, %vm2021_vm10 }
 0x56c   : > { %v5090_v34 = vadd.f32 %v12228_v48, %v5089_v51  ;;  %vm5092_vm4 = vweird.f32 %v12228_v48  ;;  %v2031_v28 = vmul.f32 %v12269_v10, %v12218_v52  ;;  %v5079_v41 = vsel %vm12281_vm6, %v12206_v49, %v5075_v50 }
 0x56d   : > { %v5083_v17 = vor.u32 1.1754944e-38, %v5082_v27  ;;  %v5104_v14 = vmul.f32 %v12252_v36, %v5103_v5  ;;  %7002 = vrcp.f32 %v12274_v57  ;;  %vm12310_vm1 = vcmp.eq.f32.partialorder %v5095_v45, 8.507059e+37  ;;  %vm12323_vm5 = vmor %vm5091_vm11, %vm5092_vm4  ;;  %v12373_v22 = vpop.xlane.xlu1 %4958 }
 0x56e   : > { %v12300_v58 = vpop.eup %7000  ;;  %v5110_v49 = vand.u32 2147483647, %v12204_v44  ;;  %v5112_v42 = vand.u32 2147483648, %v12204_v44  ;;  %v2032_v33 = vsub.f32 1.0, %v2031_v28  ;;  %v2157_v43 = vadd.f32 %v2156_v37, %v2142_v3 }
 0x56f   : > { %v2023_v27 = vsel %vm12306_vm14, %v12186_v54, %v2019_v16  ;;  %v5098_v50 = vor.u32 1.1754944e-38, %v5097_v2  ;;  %v2046_v51 = vmul.f32 %v12300_v58, %v12245_v18  ;;  %v5084_v47 = vsel %vm12285_vm15, %v5083_v17, %v5079_v41  ;;  %v12339_v16 = vpop.xlane.xlu0 %4956 }
 0x570   : > { %v5094_v37 = vsel %vm12323_vm5, %v12228_v48, %v5090_v34  ;;  %v2033_v54 = vmul.f32 %v12269_v10, %v2032_v33  ;;  %7004 = vrcp.f32 %v12298_v11  ;;  %v5105_v46 = vadd.f32 %v12252_v36, %v5104_v14 }
 0x571   : > { %vm5107_vm3 = vweird.f32 %v12252_v36  ;;  %v2039_v45 = vand.u32 2147483647, %v12218_v52  ;;  %v2047_v3 = vsub.f32 1.0, %v2046_v51  ;;  %v2028_v2 = vsel %vm12260_vm12, %v2027_v60, %v2023_v27 }
 0x572   : > { %vm5106_vm0 = vweird.f32 %v12204_v44  ;;  %vm12344_vm10 = vcmp.eq.f32.partialorder %v5110_v49, 8.507059e+37  ;;  %v5113_v5 = vor.u32 1.1754944e-38, %v5112_v42  ;;  %v5213_v19 = vmul.f32 %v5084_v47, %v9582_v20 }
 0x573   : > { %v12348_v31 = vpop.eup %7002  ;;  %v5099_v34 = vsel %vm12310_vm1, %v5098_v50, %v5094_v37  ;;  %vm2036_vm11 = vweird.f32 %v12269_v10  ;;  %v2041_v28 = vand.u32 2147483648, %v12218_v52  ;;  %vm12355_vm6 = vmor %vm5106_vm0, %vm5107_vm3  ;;  %v2034_v44 = vadd.f32 %v12269_v10, %v2033_v54 }
 0x574   : > { %v2048_v39 = vmul.f32 %v12300_v58, %v2047_v3  ;;  %v2061_v41 = vmul.f32 %v12348_v31, %v12274_v57  ;;  %7006 = vrcp.f32 %v12339_v16  ;;  %v2143_v17 = vmul.f32 %v2028_v2, %v9663_v25  ;;  %v12399_v3 = vpop.xlane.xlu2 %1887 }
 0x575   : > { %v5109_v14 = vsel %vm12355_vm6, %v12252_v36, %v5105_v46  ;;  %vm2035_vm12 = vweird.f32 %v12218_v52  ;;  %vm12369_vm15 = vcmp.eq.f32.partialorder %v2039_v45, 8.507059e+37  ;;  %vm2050_vm4 = vweird.f32 %v12245_v18 }
 0x576   : > { %v12375_v49 = vpop.eup %7004  ;;  %v2054_v42 = vand.u32 2147483647, %v12245_v18  ;;  %v2056_v33 = vand.u32 2147483648, %v12245_v18  ;;  %v2062_v27 = vsub.f32 1.0, %v2061_v41  ;;  %v5228_v61 = vadd.f32 %v12254_v63, %v5213_v19  ;;  %vm12384_vm14 = vmor %vm2035_vm12, %vm2036_vm11 }
 0x577   : > { %v5214_v36 = vmul.f32 %v5099_v34, %v9706_v0  ;;  %v2042_v50 = vor.u32 1.1754944e-38, %v2041_v28  ;;  %v5117_v51 = vmul.f32 %v12375_v49, %v12298_v11  ;;  %v5114_v47 = vsel %vm12344_vm10, %v5113_v5, %v5109_v14 }
 0x578   : > { %v2038_v37 = vsel %vm12384_vm14, %v12269_v10, %v2034_v44  ;;  %v2049_v63 = vadd.f32 %v12300_v58, %v2048_v39  ;;  %vm2051_vm1 = vweird.f32 %v12300_v58  ;;  %v2158_v54 = vadd.f32 %v2157_v43, %v2143_v17  ;;  %v12426_v17 = vpop.xlane.xlu0 %1889 }
 0x579   : > { %v2063_v46 = vmul.f32 %v12348_v31, %v2062_v27  ;;  %v5118_v45 = vsub.f32 1.0, %v5117_v51  ;;  %7008 = vrcp.f32 %v12373_v22  ;;  %vm12403_vm5 = vcmp.eq.f32.partialorder %v2054_v42, 8.507059e+37  ;;  %vm12414_vm3 = vmor %vm2050_vm4, %vm2051_vm1 }
 0x57a   : > { %v12401_v2 = vpop.eup %7006  ;;  %v2057_v5 = vor.u32 1.1754944e-38, %v2056_v33  ;;  %v2069_v10 = vand.u32 2147483647, %v12274_v57  ;;  %v2071_v19 = vand.u32 2147483648, %v12274_v57  ;;  %v5215_v43 = vmul.f32 %v5114_v47, %v9807_v29 }
 0x57b   : > { %v2043_v34 = vsel %vm12369_vm15, %v2042_v50, %v2038_v37  ;;  %vm2065_vm0 = vweird.f32 %v12274_v57  ;;  %v5132_v60 = vmul.f32 %v12401_v2, %v12339_v16  ;;  %v5229_v44 = vadd.f32 %v5228_v61, %v5214_v36  ;;  %v12445_v50 = vpop.xlane.xlu1 %1891 }
 0x57c   : > { %v2053_v39 = vsel %vm12414_vm3, %v12300_v58, %v2049_v63  ;;  %v5119_v41 = vmul.f32 %v12375_v49, %v5118_v45  ;;  %7010 = vrcp.f32 %v12399_v3  ;;  %v2064_v18 = vadd.f32 %v12348_v31, %v2063_v46 }
 0x57d   : > { %vm2066_vm10 = vweird.f32 %v12348_v31  ;;  %v5125_v14 = vand.u32 2147483647, %v12298_v11  ;;  %v5133_v55 = vsub.f32 1.0, %v5132_v60  ;;  %v2144_v42 = vmul.f32 %v2043_v34, %v9752_v24 }
 0x57e   : > { %vm12432_vm11 = vcmp.eq.f32.partialorder %v2069_v10, 8.507059e+37  ;;  %v2072_v58 = vor.u32 1.1754944e-38, %v2071_v19  ;;  %vm5121_vm6 = vweird.f32 %v12298_v11  ;;  %v12439_v61 = vadd.f32 %v5229_v44, %v5215_v43  ;;  %vm12449_vm12 = vmor %vm2065_vm0, %vm2066_vm10 }
 0x57f   : > { %v12437_v27 = vpop.eup %7008  ;;  %v2058_v36 = vsel %vm12403_vm5, %v2057_v5, %v2053_v39  ;;  %v5127_v52 = vand.u32 2147483648, %v12298_v11  ;;  %7012 = vrcp.f32 %v12426_v17  ;;  %v5120_v47 = vadd.f32 %v12375_v49, %v5119_v41  ;;  %v12488_v41 = vpop.xlane.xlu2 %4960 }
 0x580   : > { %vm5122_vm15 = vweird.f32 %v12375_v49  ;;  %v5134_v37 = vmul.f32 %v12401_v2, %v5133_v55  ;;  %v5147_v63 = vmul.f32 %v12437_v27, %v12373_v22  ;;  %v2068_v46 = vsel %vm12449_vm12, %v12348_v31, %v2064_v18  ;;  %v12523_v45 = vpop.xlane.xlu0 %4962 }
 0x581   : > { %vm12461_vm4 = vcmp.eq.f32.partialorder %v5125_v14, 8.507059e+37  ;;  %v5140_v57 = vand.u32 2147483647, %v12339_v16  ;;  %v5142_v48 = vand.u32 2147483648, %v12339_v16  ;;  %v2159_v10 = vadd.f32 %v2158_v54, %v2144_v42  ;;  %vm12473_vm14 = vmor %vm5121_vm6, %vm5122_vm15 }
 0x582   : > { %v12467_v5 = vpop.eup %7010  ;;  %v2145_v19 = vmul.f32 %v2058_v36, %v9762_v53  ;;  %v5148_v43 = vsub.f32 1.0, %v5147_v63  ;;  %7014 = vrcp.f32 %v12445_v50  ;;  %v5128_v34 = vor.u32 1.1754944e-38, %v5127_v52 }
 0x583   : > { %vm5137_vm1 = vweird.f32 %v12401_v2  ;;  %v5155_v28 = vand.u32 2147483647, %v12373_v22  ;;  %v2076_v60 = vmul.f32 %v12467_v5, %v12399_v3  ;;  %v2073_v54 = vsel %vm12432_vm11, %v2072_v58, %v2068_v46 }
 0x584   : > { %v5124_v44 = vsel %vm12473_vm14, %v12375_v49, %v5120_v47  ;;  %v5135_v11 = vadd.f32 %v12401_v2, %v5134_v37  ;;  %v5149_v39 = vmul.f32 %v12437_v27, %v5148_v43  ;;  %vm5136_vm5 = vweird.f32 %v12339_v16 }
 0x585   : > { %v12490_v18 = vpop.eup %7012  ;;  %vm12493_vm3 = vcmp.eq.f32.partialorder %v5140_v57, 8.507059e+37  ;;  %v5143_v55 = vor.u32 1.1754944e-38, %v5142_v48  ;;  %v2077_v42 = vsub.f32 1.0, %v2076_v60  ;;  %v2160_v33 = vadd.f32 %v2159_v10, %v2145_v19  ;;  %vm12506_vm10 = vmor %vm5136_vm5, %vm5137_vm1 }
 0x586   : > { %vm5151_vm0 = vweird.f32 %v12373_v22  ;;  %v5157_v49 = vand.u32 2147483648, %v12373_v22  ;;  %v2091_v58 = vmul.f32 %v12490_v18, %v12426_v17  ;;  %v2146_v36 = vmul.f32 %v2073_v54, %v15976_v62 }
 0x587   : > { %v5129_v52 = vsel %vm12461_vm4, %v5128_v34, %v5124_v44  ;;  %vm12510_vm11 = vcmp.eq.f32.partialorder %v5155_v28, 8.507059e+37  ;;  %7016 = vrcp.f32 %v12488_v41  ;;  %v5139_v37 = vsel %vm12506_vm10, %v12401_v2, %v5135_v11 }
 0x588   : > { %v12515_v47 = vpop.eup %7014  ;;  %v5150_v63 = vadd.f32 %v12437_v27, %v5149_v39  ;;  %vm5152_vm6 = vweird.f32 %v12437_v27  ;;  %v2078_v46 = vmul.f32 %v12467_v5, %v2077_v42  ;;  %v2084_v57 = vand.u32 2147483647, %v12399_v3 }
 0x589   : > { %v2086_v48 = vand.u32 2147483648, %v12399_v3  ;;  %v2092_v10 = vsub.f32 1.0, %v2091_v58  ;;  %v2106_v19 = vmul.f32 %v12515_v47, %v12445_v50  ;;  %v5216_v43 = vmul.f32 %v5129_v52, %v15989_v13  ;;  %vm12536_vm15 = vmor %vm5151_vm0, %vm5152_vm6 }
 0x58a   : > { %v5158_v31 = vor.u32 1.1754944e-38, %v5157_v49  ;;  %vm2080_vm12 = vweird.f32 %v12399_v3  ;;  %v2101_v2 = vand.u32 2147483648, %v12426_v17  ;;  %v5144_v34 = vsel %vm12493_vm3, %v5143_v55, %v5139_v37  ;;  %v12555_v49 = vpop.xlane.xlu1 %4964 }
 0x58b   : > { %vm2095_vm4 = vweird.f32 %v12426_v17  ;;  %v2099_v60 = vand.u32 2147483647, %v12426_v17  ;;  %7018 = vrcp.f32 %v12523_v45  ;;  %v12543_v54 = vadd.f32 %v2160_v33, %v2146_v36 }
 0x58c   : > { %v5154_v44 = vsel %vm12536_vm15, %v12437_v27, %v5150_v63  ;;  %v2079_v11 = vadd.f32 %v12467_v5, %v2078_v46  ;;  %vm2081_vm14 = vweird.f32 %v12467_v5  ;;  %vm12550_vm1 = vcmp.eq.f32.partialorder %v2084_v57, 8.507059e+37 }
 0x58d   : > { %v7017_v22 = vpop.eup %7016  ;;  %v2087_v14 = vor.u32 1.1754944e-38, %v2086_v48  ;;  %v2093_v55 = vmul.f32 %v12490_v18, %v2092_v10  ;;  %v2107_v42 = vsub.f32 1.0, %v2106_v19  ;;  %v5231_v33 = vadd.f32 %v12439_v61, %v5216_v43  ;;  %vm12564_vm5 = vmor %vm2080_vm12, %vm2081_vm14  ;;  %v12584_v43 = vpop.xlane.xlu2 %1893 }
 0x58e   : > { %v5217_v58 = vmul.f32 %v5144_v34, %v9936_v30  ;;  %v2102_v27 = vor.u32 1.1754944e-38, %v2101_v2  ;;  %v5162_v36 = vmul.f32 %v7017_v22, %v12488_v41  ;;  %v5159_v52 = vsel %vm12510_vm11, %v5158_v31, %v5154_v44 }
 0x58f   : > { %vm2096_vm3 = vweird.f32 %v12490_v18  ;;  %vm12569_vm0 = vcmp.eq.f32.partialorder %v2099_v60, 8.507059e+37  ;;  %vm2110_vm10 = vweird.f32 %v12445_v50  ;;  %v2114_v61 = vand.u32 2147483647, %v12445_v50 }
 0x590   : > { %v2083_v51 = vsel %vm12564_vm5, %v12467_v5, %v2079_v11  ;;  %v5163_v63 = vsub.f32 1.0, %v5162_v36  ;;  %v5170_v3 = vand.u32 2147483647, %v12488_v41  ;;  %7020 = vrcp.f32 %v12555_v49  ;;  %vm12600_vm14 = vmor %vm2095_vm4, %vm2096_vm3 }
 0x591   : > { %v7019_v46 = vpop.eup %7018  ;;  %v2094_v57 = vadd.f32 %v12490_v18, %v2093_v55  ;;  %v2108_v48 = vmul.f32 %v12515_v47, %v2107_v42  ;;  %v2116_v10 = vand.u32 2147483648, %v12445_v50  ;;  %v5172_v19 = vand.u32 2147483648, %v12488_v41 }
 0x592   : > { %v5232_v31 = vadd.f32 %v5231_v33, %v5217_v58  ;;  %v5164_v2 = vmul.f32 %v7017_v22, %v5163_v63  ;;  %vm5167_vm11 = vweird.f32 %v7017_v22  ;;  %v5177_v5 = vmul.f32 %v7019_v46, %v12523_v45 }
 0x593   : > { %v5218_v34 = vmul.f32 %v5159_v52, %v10025_v6  ;;  %v2088_v28 = vsel %vm12550_vm1, %v2087_v14, %v2083_v51  ;;  %vm2111_vm6 = vweird.f32 %v12515_v47  ;;  %vm12591_vm12 = vcmp.eq.f32.partialorder %v2114_v61, 8.507059e+37 }
 0x594   : > { %vm5166_vm15 = vweird.f32 %v12488_v41  ;;  %v5165_v11 = vadd.f32 %v7017_v22, %v5164_v2  ;;  %vm5171_vm5 = vcmp.eq.f32.partialorder %v5170_v3, 8.507059e+37  ;;  %v5178_v39 = vsub.f32 1.0, %v5177_v5 }
 0x595   : > { %7022 = vrcp.f32 %v12584_v43  ;;  %v2098_v14 = vsel %vm12600_vm14, %v12490_v18, %v2094_v57  ;;  %v2109_v55 = vadd.f32 %v12515_v47, %v2108_v48  ;;  %vm5168_vm1 = vmor %vm5166_vm15, %vm5167_vm11  ;;  %v5173_v41 = vor.u32 1.1754944e-38, %v5172_v19 }
 0x596   : > { %v5187_v42 = vand.u32 2147483648, %v12523_v45  ;;  %v7021_v17 = vpop.eup %7020  ;;  %v5169_v33 = vsel %vm5168_vm1, %v7017_v22, %v5165_v11  ;;  %v5179_v58 = vmul.f32 %v7019_v46, %v5178_v39  ;;  %vm5182_vm4 = vweird.f32 %v7019_v46  ;;  %vm12620_vm11 = vmor %vm2110_vm10, %vm2111_vm6 }
 0x597   : > { %v5185_v36 = vand.u32 2147483647, %v12523_v45  ;;  %v2117_v52 = vor.u32 1.1754944e-38, %v2116_v10  ;;  %v5174_v16 = vsel %vm5171_vm5, %v5173_v41, %v5169_v33  ;;  %vm5181_vm3 = vweird.f32 %v12523_v45 }
 0x598   : > { %v5192_v61 = vmul.f32 %v7021_v17, %v12555_v49  ;;  %v5233_v51 = vadd.f32 %v5232_v31, %v5218_v34  ;;  %v2147_v18 = vmul.f32 %v2088_v28, %v10001_v21  ;;  %v2103_v63 = vsel %vm12569_vm0, %v2102_v27, %v2098_v14  ;;  %vm5183_vm15 = vmor %vm5181_vm3, %vm5182_vm4 }
 0x599   : > { %v5180_v3 = vadd.f32 %v7019_v46, %v5179_v58  ;;  %v2113_v45 = vsel %vm12620_vm11, %v12515_v47, %v2109_v55  ;;  %v5219_v57 = vmul.f32 %v5174_v16, %v10117_v1  ;;  %v5188_v48 = vor.u32 1.1754944e-38, %v5187_v42 }
 0x59a   : > { %v5193_v10 = vsub.f32 1.0, %v5192_v61  ;;  %vm5186_vm0 = vcmp.eq.f32.partialorder %v5185_v36, 8.507059e+37  ;;  %v5200_v19 = vand.u32 2147483647, %v12555_v49  ;;  %v5202_v50 = vand.u32 2147483648, %v12555_v49 }
 0x59b   : > { %v7023_v37 = vpop.eup %7022  ;;  %v5184_v27 = vsel %vm5183_vm15, %v7019_v46, %v5180_v3  ;;  %vm5197_vm10 = vweird.f32 %v7021_v17  ;;  %v2162_v34 = vadd.f32 %v12543_v54, %v2147_v18  ;;  %v2118_v47 = vsel %vm12591_vm12, %v2117_v52, %v2113_v45 }
 0x59c   : > { %v5189_v31 = vsel %vm5186_vm0, %v5188_v48, %v5184_v27  ;;  %v5194_v2 = vmul.f32 %v7021_v17, %v5193_v10  ;;  %v2121_v5 = vmul.f32 %v7023_v37, %v12584_v43  ;;  %vm5196_vm6 = vweird.f32 %v12555_v49 }
 0x59d   : > { %v5234_v28 = vadd.f32 %v5233_v51, %v5219_v57  ;;  %v5220_v46 = vmul.f32 %v5189_v31, %v15992_v38  ;;  %v2148_v39 = vmul.f32 %v2103_v63, %v10088_v35  ;;  %vm5198_vm14 = vmor %vm5196_vm6, %vm5197_vm10  ;;  %vm5201_vm5 = vcmp.eq.f32.partialorder %v5200_v19, 8.507059e+37 }
 0x59e   : > { %v5195_v44 = vadd.f32 %v7021_v17, %v5194_v2  ;;  %v2122_v11 = vsub.f32 1.0, %v2121_v5  ;;  %v5203_v14 = vor.u32 1.1754944e-38, %v5202_v50  ;;  %v2131_v55 = vand.u32 2147483648, %v12584_v43 }
 0x59f   : > { %vm2126_vm1 = vweird.f32 %v7023_v37  ;;  %v2129_v54 = vand.u32 2147483647, %v12584_v43  ;;  %v2149_v60 = vmul.f32 %v2118_v47, %v16107_v15  ;;  %v5235_v33 = vadd.f32 %v5234_v28, %v5220_v46 }
 0x5a0   : > { %v5199_v41 = vsel %vm5198_vm14, %v7021_v17, %v5195_v44  ;;  %v2123_v42 = vmul.f32 %v7023_v37, %v2122_v11  ;;  %vm2125_vm12 = vweird.f32 %v12584_v43  ;;  %v2132_v52 = vor.u32 1.1754944e-38, %v2131_v55 }
 0x5a1   : > { %v5204_v49 = vsel %vm5201_vm5, %v5203_v14, %v5199_v41  ;;  %vm2127_vm4 = vmor %vm2125_vm12, %vm2126_vm1  ;;  %v2163_v16 = vadd.f32 %v2162_v34, %v2148_v39  ;;  %vm2130_vm3 = vcmp.eq.f32.partialorder %v2129_v54, 8.507059e+37 }
 0x5a2   : > { %v5221_v58 = vmul.f32 %v5204_v49, %v16106_v4  ;;  %v2124_v36 = vadd.f32 %v7023_v37, %v2123_v42 }
 0x5a3   : > { %v2164_v18 = vadd.f32 %v2163_v16, %v2149_v60 }
 0x5a4   : > { %v5236_v61 = vadd.f32 %v5235_v33, %v5221_v58  ;;  %v2128_v51 = vsel %vm2127_vm4, %v7023_v37, %v2124_v36 }
 0x5a5   : > { %v2133_v17 = vsel %vm2130_vm3, %v2132_v52, %v2128_v51 }
 0x5a6   : > { %v5237_v63 = vrot.slane %v5236_v61, 4  ;;  %v2150_v22 = vmul.f32 %v2133_v17, %v16108_v8 }
 0x5a8   : > { %v5238_v3 = vadd.f32 %v5237_v63, %v5236_v61  ;;  %v2165_v45 = vadd.f32 %v2164_v18, %v2150_v22  ;;  %v16202_v18 = vld [vmem:[#allocation47_spill] sm:$0xff]  ;;  %v16203_v22 = vld [vmem:[#allocation37_spill] sm:$0xff] }
 0x5aa   : > { %v5239_v57 = vrot.slane %v5238_v3, 2  ;;  %v2166_v48 = vrot.slane %v2165_v45, 4 }
 0x5ac   : > { %v5240_v10 = vadd.f32 %v5239_v57, %v5238_v3  ;;  %v2167_v27 = vadd.f32 %v2166_v48, %v2165_v45  ;;  %v16204_v45 = vld [vmem:[#allocation45_spill] sm:$0xff]  ;;  %v16205_v48 = vld [vmem:[#allocation48_spill] sm:$0xff] }
 0x5ae   : > { %v5241_v19 = vrot.slane %v5240_v10, 1  ;;  %v2168_v50 = vrot.slane %v2167_v27, 2 }
 0x5b0   : > { %v5242_v43 = vadd.f32 %v5241_v19, %v5240_v10  ;;  %v2169_v31 = vadd.f32 %v2168_v50, %v2167_v27  ;;  %v16206_v27 = vld [vmem:[#allocation41_spill] sm:$0xff]  ;;  %v16207_v50 = vld [vmem:[#allocation40_spill] sm:$0xff] }
 0x5b2   : > { %7024 = vrcp.f32 %v5242_v43  ;;  %v2170_v2 = vrot.slane %v2169_v31, 1  ;;  %v5254_v28 = vand.u32 2147483648, %v5242_v43  ;;  %v5252_v11 = vand.u32 2147483647, %v5242_v43 }
 0x5b3   : > { %vm5248_vm15 = vweird.f32 %v5242_v43 }
 0x5b4   : > { %v2171_v5 = vadd.f32 %v2170_v2, %v2169_v31  ;;  %v5255_v55 = vor.u32 1.1754944e-38, %v5254_v28  ;;  %vm5253_vm10 = vcmp.eq.f32.partialorder %v5252_v11, 8.507059e+37 }
 0x5b6   : > { %7026 = vrcp.f32 %v2171_v5  ;;  %v2183_v54 = vand.u32 2147483648, %v2171_v5  ;;  %v2181_v33 = vand.u32 2147483647, %v2171_v5  ;;  %vm2177_vm14 = vweird.f32 %v2171_v5 }
 0x5b8   : > { %v7025_v37 = vpop.eup %7024  ;;  %v2184_v52 = vor.u32 1.1754944e-38, %v2183_v54  ;;  %vm2182_vm1 = vcmp.eq.f32.partialorder %v2181_v33, 8.507059e+37 }
 0x5b9   : > { %v5244_v34 = vmul.f32 %v7025_v37, %v5242_v43  ;;  %vm5249_vm11 = vweird.f32 %v7025_v37 }
 0x5ba   : > { %vm5250_vm0 = vmor %vm5248_vm15, %vm5249_vm11 }
 0x5bb   : > { %v5245_v47 = vsub.f32 1.0, %v5244_v34 }
 0x5bc   : > { %v7027_v46 = vpop.eup %7026 }
 0x5bd   : > { %v5246_v44 = vmul.f32 %v7025_v37, %v5245_v47  ;;  %v2173_v39 = vmul.f32 %v7027_v46, %v2171_v5  ;;  %vm2178_vm6 = vweird.f32 %v7027_v46 }
 0x5be   : > { %vm2179_vm5 = vmor %vm2177_vm14, %vm2178_vm6 }
 0x5bf   : > { %v5247_v14 = vadd.f32 %v7025_v37, %v5246_v44  ;;  %v2174_v41 = vsub.f32 1.0, %v2173_v39 }
 0x5c1   : > { %v5251_v42 = vsel %vm5250_vm0, %v7025_v37, %v5247_v14  ;;  %v2175_v49 = vmul.f32 %v7027_v46, %v2174_v41 }
 0x5c2   : > { %v12643_v60 = vsel %vm5253_vm10, %v5255_v55, %v5251_v42 }
 0x5c3   : > { %v5258_v58 = vmul.f32 %v12643_v60, %v9269_v56  ;;  %v2176_v36 = vadd.f32 %v7027_v46, %v2175_v49  ;;  %v5260_v63 = vmul.f32 %v12643_v60, %v16202_v18  ;;  %v5259_v57 = vmul.f32 %v12643_v60, %v16204_v45 }
 0x5c4   : > { %v5261_v19 = vmul.f32 %v12643_v60, %v16206_v27  ;;  %v5263_v31 = vmul.f32 %v12643_v60, %v9564_v32  ;;  %v5262_v5 = vmul.f32 %v12643_v60, %v15998_v12  ;;  %v5264_v34 = vmul.f32 %v12643_v60, %v9427_v26 }
 0x5c5   : > { %5274 = vadd.xlane.f32.xlu1 %v5258_v58  ;;  %v2180_v16 = vsel %vm2179_vm5, %v7027_v46, %v2176_v36  ;;  %v5266_v28 = vmul.f32 %v12643_v60, %v9706_v0  ;;  %v5265_v44 = vmul.f32 %v12643_v60, %v9582_v20  ;;  %v5267_v39 = vmul.f32 %v12643_v60, %v9807_v29 }
 0x5c6   : > { %v2185_v61 = vsel %vm2182_vm1, %v2184_v52, %v2180_v16  ;;  %v5269_v55 = vmul.f32 %v12643_v60, %v9936_v30  ;;  %v5268_v42 = vmul.f32 %v12643_v60, %v15989_v13  ;;  %v5270_v49 = vmul.f32 %v12643_v60, %v10025_v6 }
 0x5c7   : > { %v2188_v51 = vmul.f32 %v2185_v61, %v16109_v59  ;;  %v2187_v17 = vmul.f32 %v2185_v61, %v16110_v23  ;;  %v2189_v3 = vmul.f32 %v2185_v61, %v16203_v22  ;;  %v2191_v10 = vmul.f32 %v2185_v61, %v16205_v48 }
 0x5c8   : > { %v2190_v43 = vmul.f32 %v2185_v61, %v16207_v50  ;;  %v2192_v2 = vmul.f32 %v2185_v61, %v15943_v9  ;;  %v2194_v37 = vmul.f32 %v2185_v61, %v9658_v40  ;;  %v2193_v47 = vmul.f32 %v2185_v61, %v15999_v7 }
 0x5c9   : > { %2205 = vadd.xlane.f32.xlu2 %v2188_v51  ;;  %2203 = vadd.xlane.f32.xlu0 %v2187_v17  ;;  %v2195_v46 = vmul.f32 %v2185_v61, %v9663_v25  ;;  %v2197_v11 = vmul.f32 %v2185_v61, %v9762_v53  ;;  %v2196_v14 = vmul.f32 %v2185_v61, %v9752_v24 }
 0x5ca   : > { %v2198_v41 = vmul.f32 %v2185_v61, %v15976_v62  ;;  %v2200_v54 = vmul.f32 %v2185_v61, %v10088_v35  ;;  %v2199_v33 = vmul.f32 %v2185_v61, %v10001_v21  ;;  %v5272_v58 = vmul.f32 %v12643_v60, %v15992_v38 }
 0x5cb   : > { %v2201_v36 = vmul.f32 %v2185_v61, %v16107_v15  ;;  %v5271_v52 = vmul.f32 %v12643_v60, %v10117_v1  ;;  %v5273_v16 = vmul.f32 %v12643_v60, %v16106_v4  ;;  %v2202_v51 = vmul.f32 %v2185_v61, %v16108_v8 }
 0x5cd   : > { %5278 = vadd.xlane.f32.xlu1 %v5260_v63 }
 0x5d1   : > { %2207 = vadd.xlane.f32.xlu2 %v2189_v3  ;;  %5276 = vadd.xlane.f32.xlu0 %v5259_v57 }
 0x5d5   : > { %2211 = vadd.xlane.f32.xlu1 %v2191_v10 }
 0x5d9   : > { %5280 = vadd.xlane.f32.xlu2 %v5261_v19  ;;  %2209 = vadd.xlane.f32.xlu0 %v2190_v43 }
 0x5dd   : > { %5284 = vadd.xlane.f32.xlu1 %v5263_v31 }
 0x5e1   : > { %2213 = vadd.xlane.f32.xlu2 %v2192_v2  ;;  %5282 = vadd.xlane.f32.xlu0 %v5262_v5 }
 0x5e5   : > { %2217 = vadd.xlane.f32.xlu1 %v2194_v37 }
 0x5e9   : > { %5286 = vadd.xlane.f32.xlu2 %v5264_v34  ;;  %2215 = vadd.xlane.f32.xlu0 %v2193_v47 }
 0x5ed   : > { %5290 = vadd.xlane.f32.xlu1 %v5266_v28 }
 0x5f1   : > { %2219 = vadd.xlane.f32.xlu2 %v2195_v46  ;;  %5288 = vadd.xlane.f32.xlu0 %v5265_v44 }
 0x5f5   : > { %2223 = vadd.xlane.f32.xlu1 %v2197_v11 }
 0x5f9   : > { %5292 = vadd.xlane.f32.xlu2 %v5267_v39  ;;  %2221 = vadd.xlane.f32.xlu0 %v2196_v14 }
 0x5fd   : > { %5296 = vadd.xlane.f32.xlu1 %v5269_v55 }
 0x601   : > { %2225 = vadd.xlane.f32.xlu2 %v2198_v41  ;;  %5294 = vadd.xlane.f32.xlu0 %v5268_v42 }
 0x605   : > { %2229 = vadd.xlane.f32.xlu1 %v2200_v54 }
 0x609   : > { %5298 = vadd.xlane.f32.xlu2 %v5270_v49  ;;  %2227 = vadd.xlane.f32.xlu0 %v2199_v33 }
 0x60d   : > { %5302 = vadd.xlane.f32.xlu1 %v5272_v58 }
 0x611   : > { %2231 = vadd.xlane.f32.xlu2 %v2201_v36  ;;  %5300 = vadd.xlane.f32.xlu0 %v5271_v52 }
 0x619   : > { %5304 = vadd.xlane.f32.xlu2 %v5273_v16  ;;  %2233 = vadd.xlane.f32.xlu0 %v2202_v51 }
 0x638   : > { %v12693_v17 = vpop.xlane.xlu1 %5274 }
 0x639   : > { %7028 = vrcp.f32 %v12693_v17  ;;  %vm5311_vm12 = vweird.f32 %v12693_v17  ;;  %v5315_v34 = vand.u32 2147483647, %v12693_v17 }
 0x63c   : > { %v2206_v63 = vpop.xlane.xlu2 %2205  ;;  %v2204_v3 = vpop.xlane.xlu0 %2203 }
 0x63d   : > { %7030 = vrcp.f32 %v2206_v63  ;;  %v2259_v28 = vand.u32 2147483647, %v2206_v63  ;;  %v2261_v44 = vand.u32 2147483648, %v2206_v63  ;;  %v2244_v39 = vand.u32 2147483647, %v2204_v3 }
 0x63e   : > { %7032 = vrcp.f32 %v2204_v3  ;;  %v2246_v42 = vand.u32 2147483648, %v2204_v3  ;;  %vm2255_vm15 = vweird.f32 %v2206_v63  ;;  %vm2240_vm0 = vweird.f32 %v2204_v3 }
 0x63f   : > { %v12696_v57 = vpop.eup %7028  ;;  %vm2260_vm6 = vcmp.eq.f32.partialorder %v2259_v28, 8.507059e+37  ;;  %v2262_v52 = vor.u32 1.1754944e-38, %v2261_v44  ;;  %vm2245_vm5 = vcmp.eq.f32.partialorder %v2244_v39, 8.507059e+37  ;;  %v5317_v28 = vand.u32 2147483648, %v12693_v17 }
 0x640   : > { %v12698_v10 = vpop.xlane.xlu1 %5278  ;;  %v5307_v19 = vmul.f32 %v12696_v57, %v12693_v17  ;;  %vm5312_vm11 = vweird.f32 %v12696_v57 }
 0x641   : > { %7034 = vrcp.f32 %v12698_v10  ;;  %vm12737_vm1 = vmor %vm5311_vm12, %vm5312_vm11  ;;  %v5345_v39 = vand.u32 2147483647, %v12698_v10 }
 0x642   : > { %v5308_v43 = vsub.f32 1.0, %v5307_v19 }
 0x643   : > { %v7031_v60 = vpop.eup %7030  ;;  %vm12767_vm11 = vcmp.eq.f32.partialorder %v5345_v39, 8.507059e+37 }
 0x644   : > { %v7033_v61 = vpop.eup %7032  ;;  %v2251_v31 = vmul.f32 %v7031_v60, %v2206_v63  ;;  %v12703_v2 = vpop.xlane.xlu2 %2207  ;;  %v5309_v55 = vmul.f32 %v12696_v57, %v5308_v43  ;;  %vm2256_vm4 = vweird.f32 %v7031_v60  ;;  %v2247_v43 = vor.u32 1.1754944e-38, %v2246_v42 }
 0x645   : > { %v2236_v5 = vmul.f32 %v7033_v61, %v2204_v3  ;;  %7036 = vrcp.f32 %v12703_v2  ;;  %v12710_v46 = vpop.xlane.xlu0 %5276  ;;  %vm2241_vm3 = vweird.f32 %v7033_v61  ;;  %vm2257_vm10 = vmor %vm2255_vm15, %vm2256_vm4  ;;  %vm12748_vm4 = vcmp.eq.f32.partialorder %v5315_v34, 8.507059e+37 }
 0x646   : > { %v2252_v47 = vsub.f32 1.0, %v2251_v31  ;;  %7038 = vrcp.f32 %v12710_v46  ;;  %v5310_v51 = vadd.f32 %v12696_v57, %v5309_v55  ;;  %vm2242_vm14 = vmor %vm2240_vm0, %vm2241_vm3  ;;  %v2274_v17 = vand.u32 2147483647, %v12703_v2 }
 0x647   : > { %v12706_v37 = vpop.eup %7034  ;;  %v2237_v11 = vsub.f32 1.0, %v2236_v5  ;;  %v5318_v34 = vor.u32 1.1754944e-38, %v5317_v28  ;;  %vm5341_vm3 = vweird.f32 %v12698_v10  ;;  %vm2270_vm15 = vweird.f32 %v12703_v2 }
 0x648   : > { %v5337_v14 = vmul.f32 %v12706_v37, %v12698_v10  ;;  %v2253_v41 = vmul.f32 %v7031_v60, %v2252_v47  ;;  %v12715_v54 = vpop.xlane.xlu1 %2211  ;;  %v5314_v42 = vsel %vm12737_vm1, %v12696_v57, %v5310_v51  ;;  %vm5342_vm12 = vweird.f32 %v12706_v37 }
 0x649   : > { %v2238_v49 = vmul.f32 %v7033_v61, %v2237_v11  ;;  %7040 = vrcp.f32 %v12715_v54  ;;  %vm12775_vm0 = vmor %vm5341_vm3, %vm5342_vm12  ;;  %v2276_v28 = vand.u32 2147483648, %v12703_v2  ;;  %vm5326_vm1 = vweird.f32 %v12710_v46 }
 0x64a   : > { %v5338_v33 = vsub.f32 1.0, %v5337_v14  ;;  %v2254_v58 = vadd.f32 %v7031_v60, %v2253_v41  ;;  %v5347_v41 = vand.u32 2147483648, %v12698_v10  ;;  %vm2300_vm12 = vweird.f32 %v12715_v54 }
 0x64b   : > { %v12719_v36 = vpop.eup %7036  ;;  %v2239_v16 = vadd.f32 %v7033_v61, %v2238_v49 }
 0x64c   : > { %v2258_v19 = vsel %vm2257_vm10, %v7031_v60, %v2254_v58  ;;  %v2266_v31 = vmul.f32 %v12719_v36, %v12703_v2  ;;  %v12726_v5 = vpop.xlane.xlu2 %5280  ;;  %v5339_v47 = vmul.f32 %v12706_v37, %v5338_v33  ;;  %v12731_v60 = vpop.eup %7038  ;;  %vm12779_vm10 = vcmp.eq.f32.partialorder %v2274_v17, 8.507059e+37 }
 0x64d   : > { %v2263_v63 = vsel %vm2260_vm6, %v2262_v52, %v2258_v19  ;;  %v2243_v3 = vsel %vm2242_vm14, %v7033_v61, %v2239_v16  ;;  %7042 = vrcp.f32 %v12726_v5  ;;  %v5322_v33 = vmul.f32 %v12731_v60, %v12710_v46  ;;  %v12755_v58 = vpop.xlane.xlu0 %2209 }
 0x64e   : > { %v2476_v44 = vmul.f32 %v2263_v63, %v16109_v59  ;;  %v2248_v11 = vsel %vm2245_vm5, %v2247_v43, %v2243_v3  ;;  %v2267_v14 = vsub.f32 1.0, %v2266_v31  ;;  %v5340_v19 = vadd.f32 %v12706_v37, %v5339_v47 }
 0x64f   : > { %v2475_v61 = vmul.f32 %v2248_v11, %v16110_v23  ;;  %v12757_v52 = vpop.eup %7040  ;;  %v5323_v51 = vsub.f32 1.0, %v5322_v33  ;;  %v5348_v63 = vor.u32 1.1754944e-38, %v5347_v41  ;;  %7044 = vrcp.f32 %v12755_v58 }
 0x650   : > { %v2268_v57 = vmul.f32 %v12719_v36, %v2267_v14  ;;  %v2296_v43 = vmul.f32 %v12757_v52, %v12715_v54  ;;  %v5319_v3 = vsel %vm12748_vm4, %v5318_v34, %v5314_v42  ;;  %v12785_v11 = vpop.xlane.xlu1 %5284  ;;  %v5344_v55 = vsel %vm12775_vm0, %v12706_v37, %v5340_v19 }
 0x651   : > { %v12759_v16 = vadd.f32 %v2476_v44, %v2475_v61  ;;  %v5324_v44 = vmul.f32 %v12731_v60, %v5323_v51  ;;  %vm2271_vm6 = vweird.f32 %v12719_v36  ;;  %vm5327_vm14 = vweird.f32 %v12731_v60 }
 0x652   : > { %v2269_v61 = vadd.f32 %v12719_v36, %v2268_v57  ;;  %v2297_v39 = vsub.f32 1.0, %v2296_v43  ;;  %v5330_v42 = vand.u32 2147483647, %v12710_v46  ;;  %v5332_v17 = vand.u32 2147483648, %v12710_v46  ;;  %vm12807_vm5 = vmor %vm2270_vm15, %vm2271_vm6 }
 0x653   : > { %v12787_v14 = vpop.eup %7042  ;;  %v5325_v41 = vadd.f32 %v12731_v60, %v5324_v44  ;;  %v2304_v33 = vand.u32 2147483647, %v12715_v54  ;;  %v2306_v37 = vand.u32 2147483648, %v12715_v54  ;;  %7046 = vrcp.f32 %v12785_v11  ;;  %vm12822_vm4 = vmor %vm5326_vm1, %vm5327_vm14 }
 0x654   : > { %v5352_v49 = vmul.f32 %v12787_v14, %v12726_v5  ;;  %v5349_v19 = vsel %vm12767_vm11, %v5348_v63, %v5344_v55  ;;  %v2277_v34 = vor.u32 1.1754944e-38, %v2276_v28  ;;  %v12812_v43 = vpop.xlane.xlu2 %2213  ;;  %v5546_v44 = vmul.f32 %v5319_v3, %v9269_v56 }
 0x655   : > { %v12814_v47 = vpop.eup %7044  ;;  %v2273_v31 = vsel %vm12807_vm5, %v12719_v36, %v2269_v61  ;;  %v2298_v63 = vmul.f32 %v12757_v52, %v2297_v39  ;;  %v5329_v46 = vsel %vm12822_vm4, %v12731_v60, %v5325_v41  ;;  %vm5331_vm3 = vcmp.eq.f32.partialorder %v5330_v42, 8.507059e+37 }
 0x656   : > { %v5353_v51 = vsub.f32 1.0, %v5352_v49  ;;  %v2281_v36 = vmul.f32 %v12814_v47, %v12755_v58  ;;  %v12835_v28 = vmul.f32 %v5349_v19, %v16202_v18  ;;  %v5333_v55 = vor.u32 1.1754944e-38, %v5332_v17 }
 0x657   : > { %vm12837_vm11 = vcmp.eq.f32.partialorder %v2304_v33, 8.507059e+37  ;;  %v2307_v39 = vor.u32 1.1754944e-38, %v2306_v37  ;;  %v2278_v49 = vsel %vm12779_vm10, %v2277_v34, %v2273_v31  ;;  %vm2301_vm15 = vweird.f32 %v12757_v52  ;;  %v12850_v33 = vpop.xlane.xlu0 %5282 }
 0x658   : > { %v5354_v3 = vmul.f32 %v12787_v14, %v5353_v51  ;;  %v5360_v60 = vand.u32 2147483647, %v12726_v5  ;;  %v2282_v41 = vsub.f32 1.0, %v2281_v36  ;;  %v5334_v57 = vsel %vm5331_vm3, %v5333_v55, %v5329_v46  ;;  %v12861_v2 = vpop.xlane.xlu1 %2217  ;;  %vm12868_vm14 = vmor %vm2300_vm12, %vm2301_vm15 }
 0x659   : > { %v12845_v42 = vpop.eup %7046  ;;  %v2299_v19 = vadd.f32 %v12757_v52, %v2298_v63  ;;  %v5362_v17 = vand.u32 2147483648, %v12726_v5  ;;  %7048 = vrcp.f32 %v12812_v43  ;;  %vm5357_vm0 = vweird.f32 %v12787_v14 }
 0x65a   : > { %v5355_v37 = vadd.f32 %v12787_v14, %v5354_v3  ;;  %v2283_v10 = vmul.f32 %v12814_v47, %v2282_v41  ;;  %v5382_v34 = vmul.f32 %v12845_v42, %v12785_v11  ;;  %v2477_v51 = vmul.f32 %v2278_v49, %v16203_v22 }
 0x65b   : > { %vm5356_vm10 = vweird.f32 %v12726_v5  ;;  %vm2285_vm6 = vweird.f32 %v12755_v58  ;;  %v2289_v31 = vand.u32 2147483647, %v12755_v58  ;;  %v5547_v63 = vmul.f32 %v5334_v57, %v16204_v45 }
 0x65c   : > { %v2291_v3 = vand.u32 2147483648, %v12755_v58  ;;  %v5383_v36 = vsub.f32 1.0, %v5382_v34  ;;  %7050 = vrcp.f32 %v12850_v33  ;;  %v2303_v5 = vsel %vm12868_vm14, %v12757_v52, %v2299_v19  ;;  %vm12877_vm5 = vmor %vm5356_vm10, %vm5357_vm0  ;;  %v12892_v52 = vpop.xlane.xlu2 %5286 }
 0x65d   : > { %vm12881_vm1 = vcmp.eq.f32.partialorder %v5360_v60, 8.507059e+37  ;;  %v5363_v54 = vor.u32 1.1754944e-38, %v5362_v17  ;;  %vm2286_vm4 = vweird.f32 %v12814_v47  ;;  %v5359_v41 = vsel %vm12877_vm5, %v12787_v14, %v5355_v37 }
 0x65e   : > { %v2284_v57 = vadd.f32 %v12814_v47, %v2283_v10  ;;  %v5384_v34 = vmul.f32 %v12845_v42, %v5383_v36  ;;  %7052 = vrcp.f32 %v12861_v2  ;;  %v12897_v60 = vadd.f32 %v12759_v16, %v2477_v51  ;;  %vm12915_vm3 = vmor %vm2285_vm6, %vm2286_vm4 }
 0x65f   : > { %v12894_v19 = vpop.eup %7048  ;;  %vm12899_vm12 = vcmp.eq.f32.partialorder %v2289_v31, 8.507059e+37  ;;  %v5390_v46 = vand.u32 2147483647, %v12785_v11  ;;  %v5392_v14 = vand.u32 2147483648, %v12785_v11  ;;  %v5562_v37 = vadd.f32 %v5547_v63, %v5546_v44 }
 0x660   : > { %v2308_v10 = vsel %vm12837_vm11, %v2307_v39, %v2303_v5  ;;  %v2292_v36 = vor.u32 1.1754944e-38, %v2291_v3  ;;  %v2311_v55 = vmul.f32 %v12894_v19, %v12812_v43  ;;  %v5364_v16 = vsel %vm12881_vm1, %v5363_v54, %v5359_v41  ;;  %v12938_v54 = vpop.xlane.xlu0 %2215 }
 0x661   : > { %vm5386_vm15 = vweird.f32 %v12785_v11  ;;  %v2321_v44 = vand.u32 2147483648, %v12812_v43  ;;  %7054 = vrcp.f32 %v12892_v52  ;;  %v2288_v39 = vsel %vm12915_vm3, %v12814_v47, %v2284_v57 }
 0x662   : > { %v12922_v61 = vpop.eup %7050  ;;  %v5385_v31 = vadd.f32 %v12845_v42, %v5384_v34  ;;  %vm5387_vm11 = vweird.f32 %v12845_v42  ;;  %v2312_v58 = vsub.f32 1.0, %v2311_v55  ;;  %v12930_v63 = vmul.f32 %v2308_v10, %v16205_v48 }
 0x663   : > { %vm12932_vm0 = vcmp.eq.f32.partialorder %v5390_v46, 8.507059e+37  ;;  %v5393_v5 = vor.u32 1.1754944e-38, %v5392_v14  ;;  %v5367_v49 = vmul.f32 %v12922_v61, %v12850_v33  ;;  %v5549_v47 = vmul.f32 %v5364_v16, %v16206_v27  ;;  %vm12950_vm6 = vmor %vm5386_vm15, %vm5387_vm11 }
 0x664   : > { %v12940_v41 = vpop.eup %7052  ;;  %v5563_v57 = vadd.f32 %v5562_v37, %v12835_v28  ;;  %vm2315_vm10 = vweird.f32 %v12812_v43  ;;  %v2319_v34 = vand.u32 2147483647, %v12812_v43  ;;  %v2293_v46 = vsel %vm12899_vm12, %v2292_v36, %v2288_v39  ;;  %v12967_v39 = vpop.xlane.xlu1 %5290 }
 0x665   : > { %v2322_v10 = vor.u32 1.1754944e-38, %v2321_v44  ;;  %v5368_v55 = vsub.f32 1.0, %v5367_v49  ;;  %v2341_v16 = vmul.f32 %v12940_v41, %v12861_v2  ;;  %v5389_v28 = vsel %vm12950_vm6, %v12845_v42, %v5385_v31 }
 0x666   : > { %v2313_v37 = vmul.f32 %v12894_v19, %v2312_v58  ;;  %vm5371_vm14 = vweird.f32 %v12850_v33  ;;  %7056 = vrcp.f32 %v12938_v54  ;;  %v5375_v36 = vand.u32 2147483647, %v12850_v33 }
 0x667   : > { %v12962_v11 = vpop.eup %7054  ;;  %v5369_v17 = vmul.f32 %v12922_v61, %v5368_v55  ;;  %v5377_v51 = vand.u32 2147483648, %v12850_v33  ;;  %v2342_v44 = vsub.f32 1.0, %v2341_v16  ;;  %v12969_v49 = vadd.f32 %v5563_v57, %v5549_v47 }
 0x668   : > { %v2478_v42 = vmul.f32 %v2293_v46, %v16207_v50  ;;  %vm12972_vm5 = vcmp.eq.f32.partialorder %v2319_v34, 8.507059e+37  ;;  %vm5372_vm1 = vweird.f32 %v12922_v61  ;;  %v5397_v58 = vmul.f32 %v12962_v11, %v12892_v52  ;;  %v13037_v16 = vpop.xlane.xlu0 %5288 }
 0x669   : > { %v5394_v14 = vsel %vm12932_vm0, %v5393_v5, %v5389_v28  ;;  %vm2316_vm4 = vweird.f32 %v12894_v19  ;;  %v5370_v55 = vadd.f32 %v12922_v61, %v5369_v17  ;;  %v2349_v47 = vand.u32 2147483647, %v12861_v2  ;;  %vm12989_vm12 = vmor %vm5371_vm14, %vm5372_vm1 }
 0x66a   : > { %v2314_v57 = vadd.f32 %v12894_v19, %v2313_v37  ;;  %v2343_v34 = vmul.f32 %v12940_v41, %v2342_v44  ;;  %v5398_v46 = vsub.f32 1.0, %v5397_v58  ;;  %7058 = vrcp.f32 %v12967_v39  ;;  %v12999_v37 = vpop.xlane.xlu2 %2219  ;;  %vm13016_vm0 = vmor %vm2315_vm10, %vm2316_vm4 }
 0x66b   : > { %vm12993_vm3 = vcmp.eq.f32.partialorder %v5375_v36, 8.507059e+37  ;;  %v5378_v5 = vor.u32 1.1754944e-38, %v5377_v51  ;;  %vm2345_vm15 = vweird.f32 %v12861_v2  ;;  %v2351_v28 = vand.u32 2147483648, %v12861_v2 }
 0x66c   : > { %v13001_v17 = vpop.eup %7056  ;;  %v2493_v44 = vadd.f32 %v12897_v60, %v2478_v42  ;;  %v5374_v33 = vsel %vm12989_vm12, %v12922_v61, %v5370_v55  ;;  %v5399_v36 = vmul.f32 %v12962_v11, %v5398_v46  ;;  %vm5401_vm11 = vweird.f32 %v12892_v52 }
 0x66d   : > { %v13010_v51 = vmul.f32 %v5394_v14, %v9564_v32  ;;  %vm13020_vm6 = vcmp.eq.f32.partialorder %v2349_v47, 8.507059e+37  ;;  %v5405_v61 = vand.u32 2147483647, %v12892_v52  ;;  %v2326_v42 = vmul.f32 %v13001_v17, %v12938_v54 }
 0x66e   : > { %v2318_v14 = vsel %vm13016_vm0, %v12894_v19, %v2314_v57  ;;  %v2344_v55 = vadd.f32 %v12940_v41, %v2343_v34  ;;  %vm2346_vm10 = vweird.f32 %v12940_v41  ;;  %vm5402_vm14 = vweird.f32 %v12962_v11 }
 0x66f   : > { %v5379_v43 = vsel %vm12993_vm3, %v5378_v5, %v5374_v33  ;;  %v5400_v47 = vadd.f32 %v12962_v11, %v5399_v36  ;;  %v2327_v46 = vsub.f32 1.0, %v2326_v42  ;;  %7060 = vrcp.f32 %v12999_v37  ;;  %vm13048_vm1 = vmor %vm2345_vm15, %vm2346_vm10 }
 0x670   : > { %v13039_v32 = vpop.eup %7058  ;;  %v2494_v19 = vadd.f32 %v2493_v44, %v12930_v63  ;;  %v2352_v57 = vor.u32 1.1754944e-38, %v2351_v28  ;;  %v5407_v34 = vand.u32 2147483648, %v12892_v52  ;;  %v2334_v58 = vand.u32 2147483647, %v12938_v54  ;;  %v13056_v28 = vpop.xlane.xlu1 %2223 }
 0x671   : > { %v2323_v3 = vsel %vm12972_vm5, %v2322_v10, %v2318_v14  ;;  %v2328_v33 = vmul.f32 %v13001_v17, %v2327_v46  ;;  %v2336_v36 = vand.u32 2147483648, %v12938_v54  ;;  %v5427_v63 = vmul.f32 %v13039_v32, %v12967_v39  ;;  %vm13066_vm5 = vmor %vm5401_vm11, %vm5402_vm14 }
 0x672   : > { %v5550_v44 = vmul.f32 %v5379_v43, %v15998_v12  ;;  %v2348_v10 = vsel %vm13048_vm1, %v12940_v41, %v2344_v55  ;;  %vm13070_vm4 = vcmp.eq.f32.partialorder %v5405_v61, 8.507059e+37  ;;  %vm2331_vm12 = vweird.f32 %v13001_v17  ;;  %v13091_v5 = vpop.xlane.xlu2 %5292 }
 0x673   : > { %v5404_v42 = vsel %vm13066_vm5, %v12962_v11, %v5400_v47  ;;  %v2329_v41 = vadd.f32 %v13001_v17, %v2328_v33  ;;  %v5428_v14 = vsub.f32 1.0, %v5427_v63  ;;  %7062 = vrcp.f32 %v13037_v16 }
 0x674   : > { %v2480_v52 = vmul.f32 %v2323_v3, %v15943_v9  ;;  %v5408_v55 = vor.u32 1.1754944e-38, %v5407_v34  ;;  %vm2330_vm3 = vweird.f32 %v12938_v54  ;;  %7064 = vrcp.f32 %v13056_v28 }
 0x675   : > { %v13083_v61 = vpop.eup %7060  ;;  %vm13085_vm15 = vcmp.eq.f32.partialorder %v2334_v58, 8.507059e+37  ;;  %v2337_v46 = vor.u32 1.1754944e-38, %v2336_v36  ;;  %v5435_v11 = vand.u32 2147483647, %v12967_v39  ;;  %v5437_v47 = vand.u32 2147483648, %v12967_v39  ;;  %vm13100_vm11 = vmor %vm2330_vm3, %vm2331_vm12 }
 0x676   : > { %v5565_v3 = vadd.f32 %v12969_v49, %v5550_v44  ;;  %v2353_v54 = vsel %vm13020_vm6, %v2352_v57, %v2348_v10  ;;  %v5409_v34 = vsel %vm13070_vm4, %v5408_v55, %v5404_v42  ;;  %v2356_v33 = vmul.f32 %v13083_v61, %v12999_v37 }
 0x677   : > { %v2333_v36 = vsel %vm13100_vm11, %v13001_v17, %v2329_v41  ;;  %v5429_v49 = vmul.f32 %v13039_v32, %v5428_v14  ;;  %vm5431_vm0 = vweird.f32 %v12967_v39  ;;  %v2366_v60 = vand.u32 2147483648, %v12999_v37 }
 0x678   : > { %v2495_v57 = vadd.f32 %v2494_v19, %v2480_v52  ;;  %v2357_v63 = vsub.f32 1.0, %v2356_v33  ;;  %v2364_v44 = vand.u32 2147483647, %v12999_v37  ;;  %7066 = vrcp.f32 %v13091_v5  ;;  %v13125_v19 = vpop.xlane.xlu0 %2221 }
 0x679   : > { %v13114_v10 = vpop.eup %7062  ;;  %v13117_v2 = vmul.f32 %v2353_v54, %v9658_v40  ;;  %v5552_v31 = vmul.f32 %v5409_v34, %v9427_v26  ;;  %vm13120_vm6 = vcmp.eq.f32.partialorder %v5435_v11, 8.507059e+37  ;;  %v5438_v42 = vor.u32 1.1754944e-38, %v5437_v47 }
 0x67a   : > { %vm2360_vm10 = vweird.f32 %v12999_v37  ;;  %v13127_v41 = vpop.eup %7064  ;;  %v5566_v14 = vadd.f32 %v5565_v3, %v13010_v51  ;;  %v2338_v52 = vsel %vm13085_vm15, %v2337_v46, %v2333_v36  ;;  %v2358_v55 = vmul.f32 %v13083_v61, %v2357_v63 }
 0x67b   : > { %v5412_v11 = vmul.f32 %v13114_v10, %v13037_v16  ;;  %v5430_v54 = vadd.f32 %v13039_v32, %v5429_v49  ;;  %vm5432_vm14 = vweird.f32 %v13039_v32  ;;  %v2367_v47 = vor.u32 1.1754944e-38, %v2366_v60 }
 0x67c   : > { %v2386_v34 = vmul.f32 %v13127_v41, %v13056_v28  ;;  %vm13139_vm1 = vcmp.eq.f32.partialorder %v2364_v44, 8.507059e+37  ;;  %vm5416_vm5 = vweird.f32 %v13037_v16  ;;  %v5420_v43 = vand.u32 2147483647, %v13037_v16  ;;  %vm13154_vm4 = vmor %vm5431_vm0, %vm5432_vm14 }
 0x67d   : > { %v5413_v51 = vsub.f32 1.0, %v5412_v11  ;;  %v5422_v46 = vand.u32 2147483648, %v13037_v16  ;;  %v13146_v3 = vadd.f32 %v5566_v14, %v5552_v31  ;;  %v2481_v33 = vmul.f32 %v2338_v52, %v15999_v7  ;;  %v13162_v31 = vpop.xlane.xlu1 %5296  ;;  %v13177_v7 = vpop.xlane.xlu2 %2225 }
 0x67e   : > { %v2387_v36 = vsub.f32 1.0, %v2386_v34  ;;  %7068 = vrcp.f32 %v13125_v19  ;;  %v13150_v49 = vpop.eup %7066  ;;  %v2359_v63 = vadd.f32 %v13083_v61, %v2358_v55  ;;  %vm2361_vm12 = vweird.f32 %v13083_v61 }
 0x67f   : > { %v5414_v44 = vmul.f32 %v13114_v10, %v5413_v51  ;;  %vm2390_vm3 = vweird.f32 %v13056_v28  ;;  %v5434_v14 = vsel %vm13154_vm4, %v13039_v32, %v5430_v54  ;;  %vm5417_vm15 = vweird.f32 %v13114_v10  ;;  %vm13181_vm0 = vmor %vm2360_vm10, %vm2361_vm12 }
 0x680   : > { %v2388_v39 = vmul.f32 %v13127_v41, %v2387_v36  ;;  %v5442_v52 = vmul.f32 %v13150_v49, %v13091_v5  ;;  %vm13172_vm11 = vcmp.eq.f32.partialorder %v5420_v43, 8.507059e+37  ;;  %v5423_v34 = vor.u32 1.1754944e-38, %v5422_v46  ;;  %vm13196_vm10 = vmor %vm5416_vm5, %vm5417_vm15  ;;  %v13210_v16 = vpop.xlane.xlu0 %5294 }
 0x681   : > { %v5415_v55 = vadd.f32 %v13114_v10, %v5414_v44  ;;  %v2394_v51 = vand.u32 2147483647, %v13056_v28  ;;  %v2496_v60 = vadd.f32 %v2495_v57, %v2481_v33  ;;  %v2396_v54 = vand.u32 2147483648, %v13056_v28 }
 0x682   : > { %v5443_v36 = vsub.f32 1.0, %v5442_v52  ;;  %7070 = vrcp.f32 %v13162_v31  ;;  %v5439_v43 = vsel %vm13120_vm6, %v5438_v42, %v5434_v14  ;;  %v2363_v46 = vsel %vm13181_vm0, %v13083_v61, %v2359_v63 }
 0x683   : > { %v5450_v57 = vand.u32 2147483647, %v13091_v5  ;;  %v5452_v33 = vand.u32 2147483648, %v13091_v5  ;;  %v5419_v17 = vsel %vm13196_vm10, %v13114_v10, %v5415_v55  ;;  %v2389_v61 = vadd.f32 %v13127_v41, %v2388_v39 }
 0x684   : > { %v13202_v44 = vpop.eup %7068  ;;  %vm2391_vm6 = vweird.f32 %v13127_v41  ;;  %7072 = vrcp.f32 %v13177_v7  ;;  %vm13212_vm14 = vcmp.eq.f32.partialorder %v2394_v51, 8.507059e+37  ;;  %v5444_v63 = vmul.f32 %v13150_v49, %v5443_v36 }
 0x685   : > { %vm5446_vm5 = vweird.f32 %v13091_v5  ;;  %v2371_v14 = vmul.f32 %v13202_v44, %v13125_v19  ;;  %v5554_v10 = vmul.f32 %v5439_v43, %v9706_v0  ;;  %v2368_v39 = vsel %vm13139_vm1, %v2367_v47, %v2363_v46  ;;  %vm13228_vm4 = vmor %vm2390_vm3, %vm2391_vm6  ;;  %v13250_v46 = vpop.xlane.xlu1 %2229 }
 0x686   : > { %v2497_v52 = vadd.f32 %v2496_v60, %v13117_v2  ;;  %v2397_v55 = vor.u32 1.1754944e-38, %v2396_v54  ;;  %v5424_v51 = vsel %vm13172_vm11, %v5423_v34, %v5419_v17  ;;  %vm13232_vm12 = vcmp.eq.f32.partialorder %v5450_v57, 8.507059e+37 }
 0x687   : > { %v5453_v43 = vor.u32 1.1754944e-38, %v5452_v33  ;;  %v2372_v37 = vsub.f32 1.0, %v2371_v14  ;;  %v2379_v47 = vand.u32 2147483647, %v13125_v19  ;;  %v2393_v2 = vsel %vm13228_vm4, %v13127_v41, %v2389_v61 }
 0x688   : > { %v13237_v58 = vpop.eup %7070  ;;  %vm5447_vm1 = vweird.f32 %v13150_v49  ;;  %v2381_v28 = vand.u32 2147483648, %v13125_v19  ;;  %7074 = vrcp.f32 %v13210_v16  ;;  %v2483_v11 = vmul.f32 %v2368_v39, %v9663_v25 }
 0x689   : > { %v5445_v34 = vadd.f32 %v13150_v49, %v5444_v63  ;;  %v2373_v60 = vmul.f32 %v13202_v44, %v2372_v37  ;;  %v5472_v54 = vmul.f32 %v13237_v58, %v13162_v31  ;;  %v5553_v41 = vmul.f32 %v5424_v51, %v9582_v20  ;;  %vm13267_vm15 = vmor %vm5446_vm5, %vm5447_vm1 }
 0x68a   : > { %v13252_v57 = vpop.eup %7072  ;;  %vm2376_vm3 = vweird.f32 %v13202_v44  ;;  %v5480_v33 = vand.u32 2147483647, %v13162_v31  ;;  %v5482_v17 = vand.u32 2147483648, %v13162_v31  ;;  %v2398_v61 = vsel %vm13212_vm14, %v2397_v55, %v2393_v2  ;;  %v13277_v55 = vpop.xlane.xlu2 %5298 }
 0x68b   : > { %v2374_v63 = vadd.f32 %v13202_v44, %v2373_v60  ;;  %v5473_v14 = vsub.f32 1.0, %v5472_v54  ;;  %v2401_v39 = vmul.f32 %v13252_v57, %v13177_v7  ;;  %vm2375_vm11 = vweird.f32 %v13125_v19 }
 0x68c   : > { %vm13272_vm0 = vcmp.eq.f32.partialorder %v2379_v47, 8.507059e+37  ;;  %v2382_v42 = vor.u32 1.1754944e-38, %v2381_v28  ;;  %7076 = vrcp.f32 %v13250_v46  ;;  %v5449_v37 = vsel %vm13267_vm15, %v13150_v49, %v5445_v34  ;;  %vm13282_vm10 = vmor %vm2375_vm11, %vm2376_vm3  ;;  %v13297_v34 = vpop.xlane.xlu0 %2227 }
 0x68d   : > { %v5474_v2 = vmul.f32 %v13237_v58, %v5473_v14  ;;  %vm5476_vm6 = vweird.f32 %v13162_v31  ;;  %v2402_v19 = vsub.f32 1.0, %v2401_v39  ;;  %v2498_v28 = vadd.f32 %v2497_v52, %v2483_v11 }
 0x68e   : > { %v13288_v47 = vpop.eup %7074  ;;  %v5568_v60 = vadd.f32 %v13146_v3, %v5553_v41  ;;  %v13292_v54 = vmul.f32 %v2398_v61, %v9762_v53  ;;  %v2378_v49 = vsel %vm13282_vm10, %v13202_v44, %v2374_v63  ;;  %vm13299_vm14 = vcmp.eq.f32.partialorder %v5480_v33, 8.507059e+37 }
 0x68f   : > { %v5483_v14 = vor.u32 1.1754944e-38, %v5482_v17  ;;  %v2403_v39 = vmul.f32 %v13252_v57, %v2402_v19  ;;  %v5457_v52 = vmul.f32 %v13288_v47, %v13210_v16  ;;  %v5454_v3 = vsel %vm13232_vm12, %v5453_v43, %v5449_v37 }
 0x690   : > { %v5475_v11 = vadd.f32 %v13237_v58, %v5474_v2  ;;  %vm5477_vm5 = vweird.f32 %v13237_v58  ;;  %7078 = vrcp.f32 %v13277_v55  ;;  %v2383_v44 = vsel %vm13272_vm0, %v2382_v42, %v2378_v49 }
 0x691   : > { %v2404_v41 = vadd.f32 %v13252_v57, %v2403_v39  ;;  %vm2406_vm4 = vweird.f32 %v13252_v57  ;;  %v5458_v33 = vsub.f32 1.0, %v5457_v52  ;;  %v5569_v61 = vadd.f32 %v5568_v60, %v5554_v10  ;;  %vm13323_vm12 = vmor %vm5476_vm6, %vm5477_vm5 }
 0x692   : > { %v13315_v17 = vpop.eup %7076  ;;  %vm2405_vm1 = vweird.f32 %v13177_v7  ;;  %v2409_v36 = vand.u32 2147483647, %v13177_v7  ;;  %v2411_v43 = vand.u32 2147483648, %v13177_v7  ;;  %v5555_v63 = vmul.f32 %v5454_v3, %v9807_v29  ;;  %v13350_v3 = vpop.xlane.xlu1 %5302 }
 0x693   : > { %v5459_v42 = vmul.f32 %v13288_v47, %v5458_v33  ;;  %v5465_v37 = vand.u32 2147483647, %v13210_v16  ;;  %v5467_v10 = vand.u32 2147483648, %v13210_v16  ;;  %v2484_v5 = vmul.f32 %v2383_v44, %v9752_v24  ;;  %vm13334_vm3 = vmor %vm2405_vm1, %vm2406_vm4 }
 0x694   : > { %v5479_v7 = vsel %vm13323_vm12, %v13237_v58, %v5475_v11  ;;  %vm5462_vm15 = vweird.f32 %v13288_v47  ;;  %v2431_v31 = vmul.f32 %v13315_v17, %v13250_v46  ;;  %v2408_v19 = vsel %vm13334_vm3, %v13252_v57, %v2404_v41  ;;  %v13352_v11 = vpop.xlane.xlu2 %2231 }
 0x695   : > { %v5460_v60 = vadd.f32 %v13288_v47, %v5459_v42  ;;  %v2441_v49 = vand.u32 2147483648, %v13250_v46  ;;  %7080 = vrcp.f32 %v13297_v34  ;;  %vm2410_vm11 = vcmp.eq.f32.partialorder %v2409_v36, 8.507059e+37 }
 0x696   : > { %v13347_v58 = vpop.eup %7078  ;;  %v2412_v39 = vor.u32 1.1754944e-38, %v2411_v43  ;;  %vm5461_vm0 = vweird.f32 %v13210_v16  ;;  %v2432_v52 = vsub.f32 1.0, %v2431_v31  ;;  %v5570_v44 = vadd.f32 %v5569_v61, %v5555_v63 }
 0x697   : > { %v5484_v57 = vsel %vm13299_vm14, %v5483_v14, %v5479_v7  ;;  %vm13356_vm10 = vcmp.eq.f32.partialorder %v5465_v37, 8.507059e+37  ;;  %v5487_v33 = vmul.f32 %v13347_v58, %v13277_v55  ;;  %v2499_v36 = vadd.f32 %v2498_v28, %v2484_v5  ;;  %vm13364_vm6 = vmor %vm5461_vm0, %vm5462_vm15  ;;  %v13370_v14 = vpop.xlane.xlu0 %5300 }
 0x698   : > { %v2413_v43 = vsel %vm2410_vm11, %v2412_v39, %v2408_v19  ;;  %v5468_v32 = vor.u32 1.1754944e-38, %v5467_v10  ;;  %vm2435_vm5 = vweird.f32 %v13250_v46  ;;  %v2439_v51 = vand.u32 2147483647, %v13250_v46 }
 0x699   : > { %v5464_v61 = vsel %vm13364_vm6, %v13288_v47, %v5460_v60  ;;  %v2442_v63 = vor.u32 1.1754944e-38, %v2441_v49  ;;  %v5488_v28 = vsub.f32 1.0, %v5487_v33  ;;  %7082 = vrcp.f32 %v13350_v3 }
 0x69a   : > { %v13377_v42 = vmul.f32 %v5484_v57, %v9936_v30  ;;  %v2433_v37 = vmul.f32 %v13315_v17, %v2432_v52  ;;  %vm5491_vm14 = vweird.f32 %v13277_v55  ;;  %v5495_v10 = vand.u32 2147483647, %v13277_v55 }
 0x69b   : > { %v7081_v5 = vpop.eup %7080  ;;  %v2486_v7 = vmul.f32 %v2413_v43, %v15976_v62  ;;  %v5489_v2 = vmul.f32 %v13347_v58, %v5488_v28  ;;  %v5497_v47 = vand.u32 2147483648, %v13277_v55  ;;  %7084 = vrcp.f32 %v13352_v11 }
 0x69c   : > { %v2500_v31 = vadd.f32 %v2499_v36, %v13292_v54  ;;  %v5469_v19 = vsel %vm13356_vm10, %v5468_v32, %v5464_v61  ;;  %vm13389_vm4 = vcmp.eq.f32.partialorder %v2439_v51, 8.507059e+37  ;;  %v2416_v49 = vmul.f32 %v7081_v5, %v13297_v34 }
 0x69d   : > { %v2424_v39 = vand.u32 2147483647, %v13297_v34  ;;  %vm2436_vm1 = vweird.f32 %v13315_v17  ;;  %v5490_v52 = vadd.f32 %v13347_v58, %v5489_v2  ;;  %vm5492_vm12 = vweird.f32 %v13347_v58 }
 0x69e   : > { %v2426_v57 = vand.u32 2147483648, %v13297_v34  ;;  %v2434_v54 = vadd.f32 %v13315_v17, %v2433_v37  ;;  %vm13400_vm3 = vcmp.eq.f32.partialorder %v5495_v10, 8.507059e+37  ;;  %v2417_v33 = vsub.f32 1.0, %v2416_v49  ;;  %vm13413_vm11 = vmor %vm5491_vm14, %vm5492_vm12  ;;  %v13423_v10 = vpop.xlane.xlu2 %5304 }
 0x69f   : > { %vm2420_vm15 = vweird.f32 %v13297_v34  ;;  %v13405_v36 = vpop.eup %7082  ;;  %v13407_v43 = vadd.f32 %v2500_v31, %v2486_v7  ;;  %v5556_v16 = vmul.f32 %v5469_v19, %v15989_v13  ;;  %v5498_v32 = vor.u32 1.1754944e-38, %v5497_v47  ;;  %vm13431_vm6 = vmor %vm2435_vm5, %vm2436_vm1 }
 0x6a0   : > { %7086 = vrcp.f32 %v13370_v14  ;;  %v2418_v61 = vmul.f32 %v7081_v5, %v2417_v33  ;;  %vm2421_vm0 = vweird.f32 %v7081_v5  ;;  %vm13417_vm10 = vcmp.eq.f32.partialorder %v2424_v39, 8.507059e+37  ;;  %v13445_v33 = vpop.xlane.xlu0 %2233 }
 0x6a1   : > { %v5517_v37 = vmul.f32 %v13405_v36, %v13350_v3  ;;  %v13425_v7 = vpop.eup %7084  ;;  %v5494_v2 = vsel %vm13413_vm11, %v13347_v58, %v5490_v52  ;;  %v2427_v47 = vor.u32 1.1754944e-38, %v2426_v57  ;;  %vm5521_vm14 = vweird.f32 %v13350_v3  ;;  %vm2422_vm5 = vmor %vm2420_vm15, %vm2421_vm0 }
 0x6a2   : > { %v5525_v31 = vand.u32 2147483647, %v13350_v3  ;;  %v2438_v19 = vsel %vm13431_vm6, %v13315_v17, %v2434_v54  ;;  %v2419_v49 = vadd.f32 %v7081_v5, %v2418_v61  ;;  %v2446_v46 = vmul.f32 %v13425_v7, %v13352_v11 }
 0x6a3   : > { %v5518_v39 = vsub.f32 1.0, %v5517_v37  ;;  %v5571_v13 = vadd.f32 %v5570_v44, %v5556_v16  ;;  %v5527_v58 = vand.u32 2147483648, %v13350_v3  ;;  %vm2450_vm1 = vweird.f32 %v13352_v11 }
 0x6a4   : > { %7088 = vrcp.f32 %v13423_v10  ;;  %v5499_v17 = vsel %vm13400_vm3, %v5498_v32, %v5494_v2  ;;  %v2423_v52 = vsel %vm2422_vm5, %v7081_v5, %v2419_v49  ;;  %v2447_v54 = vsub.f32 1.0, %v2446_v46 }
 0x6a5   : > { %v5519_v57 = vmul.f32 %v13405_v36, %v5518_v39  ;;  %v2443_v44 = vsel %vm13389_vm4, %v2442_v63, %v2438_v19  ;;  %vm13458_vm12 = vcmp.eq.f32.partialorder %v5525_v31, 8.507059e+37  ;;  %v2454_v16 = vand.u32 2147483647, %v13352_v11 }
 0x6a6   : > { %v7087_v51 = vpop.eup %7086  ;;  %7090 = vrcp.f32 %v13445_v33  ;;  %v2428_v41 = vsel %vm13417_vm10, %v2427_v47, %v2423_v52  ;;  %v2448_v5 = vmul.f32 %v13425_v7, %v2447_v54  ;;  %v2456_v32 = vand.u32 2147483648, %v13352_v11 }
 0x6a7   : > { %v5502_v61 = vmul.f32 %v7087_v51, %v13370_v14  ;;  %v5558_v60 = vmul.f32 %v5499_v17, %v10025_v6  ;;  %v5520_v63 = vadd.f32 %v13405_v36, %v5519_v57  ;;  %vm5522_vm4 = vweird.f32 %v13405_v36 }
 0x6a8   : > { %v5510_v37 = vand.u32 2147483647, %v13370_v14  ;;  %v5572_v55 = vadd.f32 %v5571_v13, %v13377_v42  ;;  %v2449_v2 = vadd.f32 %v13425_v7, %v2448_v5  ;;  %vm2451_vm3 = vweird.f32 %v13425_v7  ;;  %vm13481_vm11 = vmor %vm5521_vm14, %vm5522_vm4 }
 0x6a9   : > { %v5503_v28 = vsub.f32 1.0, %v5502_v61  ;;  %v2487_v31 = vmul.f32 %v2428_v41, %v10001_v21  ;;  %v5528_v19 = vor.u32 1.1754944e-38, %v5527_v58  ;;  %vm5506_vm15 = vweird.f32 %v13370_v14  ;;  %vm13496_vm6 = vmor %vm2450_vm1, %vm2451_vm3 }
 0x6aa   : > { %v7089_v47 = vpop.eup %7088  ;;  %v5512_v49 = vand.u32 2147483648, %v13370_v14  ;;  %vm13485_vm0 = vcmp.eq.f32.partialorder %v2454_v16, 8.507059e+37  ;;  %v2457_v42 = vor.u32 1.1754944e-38, %v2456_v32  ;;  %vm5507_vm10 = vweird.f32 %v7087_v51 }
 0x6ab   : > { %v5504_v46 = vmul.f32 %v7087_v51, %v5503_v28  ;;  %v5573_v52 = vadd.f32 %v5572_v55, %v5558_v60  ;;  %v5524_v58 = vsel %vm13481_vm11, %v13405_v36, %v5520_v63  ;;  %vm13500_vm14 = vcmp.eq.f32.partialorder %v5510_v37, 8.507059e+37  ;;  %vm5508_vm5 = vmor %vm5506_vm15, %vm5507_vm10 }
 0x6ac   : > { %v7091_v17 = vpop.eup %7090  ;;  %v5532_v54 = vmul.f32 %v7089_v47, %v13423_v10  ;;  %v2453_v16 = vsel %vm13496_vm6, %v13425_v7, %v2449_v2  ;;  %v5540_v36 = vand.u32 2147483647, %v13423_v10  ;;  %v2502_v11 = vadd.f32 %v13407_v43, %v2487_v31 }
 0x6ad   : > { %v5505_v41 = vadd.f32 %v7087_v51, %v5504_v46  ;;  %v2461_v5 = vmul.f32 %v7091_v17, %v13445_v33  ;;  %v5513_v32 = vor.u32 1.1754944e-38, %v5512_v49  ;;  %v5542_v60 = vand.u32 2147483648, %v13423_v10 }
 0x6ae   : > { %v5533_v61 = vsub.f32 1.0, %v5532_v54  ;;  %v5529_v63 = vsel %vm13458_vm12, %v5528_v19, %v5524_v58  ;;  %v2471_v7 = vand.u32 2147483648, %v13445_v33  ;;  %v2458_v2 = vsel %vm13485_vm0, %v2457_v42, %v2453_v16 }
 0x6af   : > { %v5509_v37 = vsel %vm5508_vm5, %v7087_v51, %v5505_v41  ;;  %v2462_v55 = vsub.f32 1.0, %v2461_v5  ;;  %vm5537_vm1 = vweird.f32 %v7089_v47  ;;  %vm2466_vm4 = vweird.f32 %v7091_v17 }
 0x6b0   : > { %v5514_v43 = vsel %vm13500_vm14, %v5513_v32, %v5509_v37  ;;  %v5534_v28 = vmul.f32 %v7089_v47, %v5533_v61  ;;  %v2469_v49 = vand.u32 2147483647, %v13445_v33  ;;  %v2488_v34 = vmul.f32 %v2443_v44, %v10088_v35 }
 0x6b1   : > { %v5559_v14 = vmul.f32 %v5514_v43, %v10117_v1  ;;  %v2463_v31 = vmul.f32 %v7091_v17, %v2462_v55  ;;  %vm5536_vm12 = vweird.f32 %v13423_v10  ;;  %v5543_v19 = vor.u32 1.1754944e-38, %v5542_v60 }
 0x6b2   : > { %v5535_v51 = vadd.f32 %v7089_v47, %v5534_v28  ;;  %v2489_v39 = vmul.f32 %v2458_v2, %v16107_v15  ;;  %vm5538_vm3 = vmor %vm5536_vm12, %vm5537_vm1  ;;  %vm2465_vm15 = vweird.f32 %v13445_v33  ;;  %v5560_v46 = vmul.f32 %v5529_v63, %v15992_v38 }
 0x6b3   : > { %v5574_v13 = vadd.f32 %v5573_v52, %v5559_v14  ;;  %v2464_v42 = vadd.f32 %v7091_v17, %v2463_v31  ;;  %vm5541_vm11 = vcmp.eq.f32.partialorder %v5540_v36, 8.507059e+37  ;;  %vm2467_vm0 = vmor %vm2465_vm15, %vm2466_vm4  ;;  %v2472_v3 = vor.u32 1.1754944e-38, %v2471_v7 }
 0x6b4   : > { %v5539_v58 = vsel %vm5538_vm3, %v7089_v47, %v5535_v51  ;;  %v2503_v57 = vadd.f32 %v2502_v11, %v2488_v34  ;;  %vm2470_vm10 = vcmp.eq.f32.partialorder %v2469_v49, 8.507059e+37 }
 0x6b5   : > { %v5544_v54 = vsel %vm5541_vm11, %v5543_v19, %v5539_v58  ;;  %v2468_v44 = vsel %vm2467_vm0, %v7091_v17, %v2464_v42  ;;  %v5575_v16 = vadd.f32 %v5574_v13, %v5560_v46 }
 0x6b6   : > { %v5561_v10 = vmul.f32 %v5544_v54, %v16106_v4  ;;  %v2473_v41 = vsel %vm2470_vm10, %v2472_v3, %v2468_v44  ;;  %v2504_v5 = vadd.f32 %v2503_v57, %v2489_v39 }
 0x6b7   : > { %v2490_v52 = vmul.f32 %v2473_v41, %v16108_v8 }
 0x6b8   : > { %v5576_v32 = vadd.f32 %v5575_v16, %v5561_v10 }
 0x6b9   : > { %v2505_v61 = vadd.f32 %v2504_v5, %v2490_v52 }
 0x6ba   : > { %v5577_v33 = vrot.slane %v5576_v32, 4 }
 0x6bb   : > { %v2506_v60 = vrot.slane %v2505_v61, 4 }
 0x6bc   : > { %v5578_v63 = vadd.f32 %v5577_v33, %v5576_v32 }
 0x6bd   : > { %v2507_v47 = vadd.f32 %v2506_v60, %v2505_v61 }
 0x6be   : > { %v5579_v36 = vrot.slane %v5578_v63, 2 }
 0x6bf   : > { %v2508_v37 = vrot.slane %v2507_v47, 2 }
 0x6c0   : > { %v5580_v55 = vadd.f32 %v5579_v36, %v5578_v63 }
 0x6c1   : > { %v2509_v11 = vadd.f32 %v2508_v37, %v2507_v47 }
 0x6c2   : > { %v5581_v7 = vrot.slane %v5580_v55, 1 }
 0x6c3   : > { %v2510_v17 = vrot.slane %v2509_v11, 1 }
 0x6c4   : > { %v5582_v2 = vadd.f32 %v5581_v7, %v5580_v55  ;;  %v16312_v55 = vld [vmem:[#allocation20_spill] sm:$0xff] }
 0x6c5   : > { %v2511_v43 = vadd.f32 %v2510_v17, %v2509_v11 }
 0x6c6   : > { %7092 = vrcp.f32 %v5582_v2  ;;  %v5594_v51 = vand.u32 2147483648, %v5582_v2  ;;  %v5592_v13 = vand.u32 2147483647, %v5582_v2  ;;  %vm5588_vm5 = vweird.f32 %v5582_v2 }
 0x6c7   : > { %7094 = vrcp.f32 %v2511_v43  ;;  %v2523_v42 = vand.u32 2147483648, %v2511_v43  ;;  %v2521_v58 = vand.u32 2147483647, %v2511_v43  ;;  %vm2517_vm4 = vweird.f32 %v2511_v43 }
 0x6c8   : > { %v5595_v57 = vor.u32 1.1754944e-38, %v5594_v51  ;;  %vm5593_vm12 = vcmp.eq.f32.partialorder %v5592_v13, 8.507059e+37 }
 0x6c9   : > { %v2524_v10 = vor.u32 1.1754944e-38, %v2523_v42  ;;  %vm2522_vm15 = vcmp.eq.f32.partialorder %v2521_v58, 8.507059e+37 }
 0x6cc   : > { %v7093_v28 = vpop.eup %7092 }
 0x6cd   : > { %v7095_v14 = vpop.eup %7094  ;;  %v5584_v31 = vmul.f32 %v7093_v28, %v5582_v2  ;;  %vm5589_vm6 = vweird.f32 %v7093_v28 }
 0x6ce   : > { %v2513_v49 = vmul.f32 %v7095_v14, %v2511_v43  ;;  %vm2518_vm14 = vweird.f32 %v7095_v14  ;;  %vm5590_vm1 = vmor %vm5588_vm5, %vm5589_vm6 }
 0x6cf   : > { %v5585_v34 = vsub.f32 1.0, %v5584_v31  ;;  %vm2519_vm3 = vmor %vm2517_vm4, %vm2518_vm14 }
 0x6d0   : > { %v2514_v19 = vsub.f32 1.0, %v2513_v49 }
 0x6d1   : > { %v5586_v39 = vmul.f32 %v7093_v28, %v5585_v34 }
 0x6d2   : > { %v2515_v46 = vmul.f32 %v7095_v14, %v2514_v19 }
 0x6d3   : > { %v5587_v3 = vadd.f32 %v7093_v28, %v5586_v39 }
 0x6d4   : > { %v2516_v54 = vadd.f32 %v7095_v14, %v2515_v46  ;;  %v16314_v46 = vld [vmem:[#allocation15_spill] sm:$0xff] }
 0x6d5   : > { %v5591_v44 = vsel %vm5590_vm1, %v7093_v28, %v5587_v3  ;;  %v16313_v28 = vld [vmem:[#allocation46_spill] sm:$0xff] }
 0x6d6   : > { %v13530_v16 = vsel %vm5593_vm12, %v5595_v57, %v5591_v44  ;;  %v2520_v41 = vsel %vm2519_vm3, %v7095_v14, %v2516_v54 }
 0x6d7   : > { %v2525_v5 = vsel %vm2522_vm15, %v2524_v10, %v2520_v41  ;;  %v5598_v52 = vmul.f32 %v13530_v16, %v9269_v56  ;;  %v5600_v33 = vmul.f32 %v13530_v16, %v16202_v18  ;;  %v5599_v63 = vmul.f32 %v13530_v16, %v16204_v45 }
 0x6d8   : > { %v2528_v32 = vmul.f32 %v2525_v5, %v16109_v59  ;;  %v2527_v61 = vmul.f32 %v2525_v5, %v16110_v23  ;;  %v2529_v60 = vmul.f32 %v2525_v5, %v16203_v22  ;;  %v2531_v47 = vmul.f32 %v2525_v5, %v16205_v48 }
 0x6d9   : > { %5614 = vadd.xlane.f32.xlu2 %v5598_v52  ;;  %v5601_v36 = vmul.f32 %v13530_v16, %v16206_v27  ;;  %v2530_v37 = vmul.f32 %v2525_v5, %v16207_v50  ;;  %v5603_v11 = vmul.f32 %v13530_v16, %v16312_v55  ;;  %v2532_v7 = vmul.f32 %v2525_v5, %v15943_v9 }
 0x6da   : > { %2545 = vadd.xlane.f32.xlu0 %v2528_v32  ;;  %2543 = vadd.xlane.f32.xlu1 %v2527_v61  ;;  %v5602_v17 = vmul.f32 %v13530_v16, %v15998_v12  ;;  %v2534_v2 = vmul.f32 %v2525_v5, %v9658_v40  ;;  %v5604_v43 = vmul.f32 %v13530_v16, %v9427_v26 }
 0x6db   : > { %v2533_v14 = vmul.f32 %v2525_v5, %v16313_v28  ;;  %v5606_v31 = vmul.f32 %v13530_v16, %v9706_v0  ;;  %v2535_v49 = vmul.f32 %v2525_v5, %v9663_v25  ;;  %v5605_v34 = vmul.f32 %v13530_v16, %v9582_v20 }
 0x6dc   : > { %v2537_v51 = vmul.f32 %v2525_v5, %v9762_v53  ;;  %v5607_v19 = vmul.f32 %v13530_v16, %v9807_v29  ;;  %v2536_v39 = vmul.f32 %v2525_v5, %v9752_v24  ;;  %v5609_v13 = vmul.f32 %v13530_v16, %v9936_v30 }
 0x6dd   : > { %v2538_v42 = vmul.f32 %v2525_v5, %v15976_v62  ;;  %v5608_v58 = vmul.f32 %v13530_v16, %v16314_v46  ;;  %v2540_v3 = vmul.f32 %v2525_v5, %v10088_v35  ;;  %v5610_v57 = vmul.f32 %v13530_v16, %v10025_v6 }
 0x6de   : > { %v2539_v54 = vmul.f32 %v2525_v5, %v10001_v21  ;;  %v5612_v44 = vmul.f32 %v13530_v16, %v15992_v38  ;;  %v2541_v10 = vmul.f32 %v2525_v5, %v16107_v15  ;;  %v5611_v41 = vmul.f32 %v13530_v16, %v10117_v1 }
 0x6df   : > { %v5613_v52 = vmul.f32 %v13530_v16, %v16106_v4  ;;  %v2542_v32 = vmul.f32 %v2525_v5, %v16108_v8 }
 0x6e1   : > { %5618 = vadd.xlane.f32.xlu2 %v5600_v33 }
 0x6e2   : > { %2547 = vadd.xlane.f32.xlu0 %v2529_v60  ;;  %5616 = vadd.xlane.f32.xlu1 %v5599_v63 }
 0x6e9   : > { %2551 = vadd.xlane.f32.xlu2 %v2531_v47 }
 0x6ea   : > { %5620 = vadd.xlane.f32.xlu0 %v5601_v36  ;;  %2549 = vadd.xlane.f32.xlu1 %v2530_v37 }
 0x6f1   : > { %5624 = vadd.xlane.f32.xlu2 %v5603_v11 }
 0x6f2   : > { %2553 = vadd.xlane.f32.xlu0 %v2532_v7  ;;  %5622 = vadd.xlane.f32.xlu1 %v5602_v17 }
 0x6f9   : > { %2557 = vadd.xlane.f32.xlu2 %v2534_v2 }
 0x6fa   : > { %5626 = vadd.xlane.f32.xlu0 %v5604_v43  ;;  %2555 = vadd.xlane.f32.xlu1 %v2533_v14 }
 0x701   : > { %5630 = vadd.xlane.f32.xlu2 %v5606_v31 }
 0x702   : > { %2559 = vadd.xlane.f32.xlu0 %v2535_v49  ;;  %5628 = vadd.xlane.f32.xlu1 %v5605_v34 }
 0x709   : > { %2563 = vadd.xlane.f32.xlu2 %v2537_v51 }
 0x70a   : > { %5632 = vadd.xlane.f32.xlu0 %v5607_v19  ;;  %2561 = vadd.xlane.f32.xlu1 %v2536_v39 }
 0x711   : > { %5636 = vadd.xlane.f32.xlu2 %v5609_v13 }
 0x712   : > { %2565 = vadd.xlane.f32.xlu0 %v2538_v42  ;;  %5634 = vadd.xlane.f32.xlu1 %v5608_v58 }
 0x719   : > { %2569 = vadd.xlane.f32.xlu2 %v2540_v3 }
 0x71a   : > { %5638 = vadd.xlane.f32.xlu0 %v5610_v57  ;;  %2567 = vadd.xlane.f32.xlu1 %v2539_v54 }
 0x721   : > { %5642 = vadd.xlane.f32.xlu2 %v5612_v44 }
 0x722   : > { %2571 = vadd.xlane.f32.xlu0 %v2541_v10  ;;  %5640 = vadd.xlane.f32.xlu1 %v5611_v41 }
 0x72a   : > { %5644 = vadd.xlane.f32.xlu0 %v5613_v52  ;;  %2573 = vadd.xlane.f32.xlu1 %v2542_v32 }
 0x74c   : > { %v13580_v61 = vpop.xlane.xlu2 %5614 }
 0x74d   : > { %7096 = vrcp.f32 %v13580_v61  ;;  %v2546_v33 = vpop.xlane.xlu0 %2545  ;;  %v2544_v60 = vpop.xlane.xlu1 %2543  ;;  %v5655_v7 = vand.u32 2147483647, %v13580_v61  ;;  %v5657_v14 = vand.u32 2147483648, %v13580_v61  ;;  %vm5651_vm0 = vweird.f32 %v13580_v61 }
 0x74e   : > { %7098 = vrcp.f32 %v2546_v33  ;;  %v2599_v49 = vand.u32 2147483647, %v2546_v33  ;;  %v2601_v34 = vand.u32 2147483648, %v2546_v33  ;;  %v2584_v19 = vand.u32 2147483647, %v2544_v60 }
 0x74f   : > { %7100 = vrcp.f32 %v2544_v60  ;;  %v2586_v13 = vand.u32 2147483648, %v2544_v60  ;;  %v5658_v57 = vor.u32 1.1754944e-38, %v5657_v14  ;;  %vm2595_vm6 = vweird.f32 %v2546_v33 }
 0x750   : > { %v2602_v44 = vor.u32 1.1754944e-38, %v2601_v34  ;;  %vm2580_vm5 = vweird.f32 %v2544_v60  ;;  %vm13604_vm1 = vcmp.eq.f32.partialorder %v5655_v7, 8.507059e+37  ;;  %vm2600_vm4 = vcmp.eq.f32.partialorder %v2599_v49, 8.507059e+37 }
 0x751   : > { %vm2585_vm3 = vcmp.eq.f32.partialorder %v2584_v19, 8.507059e+37 }
 0x753   : > { %v13583_v63 = vpop.eup %7096 }
 0x754   : > { %v7099_v47 = vpop.eup %7098  ;;  %v5647_v36 = vmul.f32 %v13583_v63, %v13580_v61  ;;  %v13587_v37 = vpop.xlane.xlu2 %5618  ;;  %vm5652_vm15 = vweird.f32 %v13583_v63 }
 0x755   : > { %v7101_v16 = vpop.eup %7100  ;;  %v2591_v5 = vmul.f32 %v7099_v47, %v2546_v33  ;;  %7102 = vrcp.f32 %v13587_v37  ;;  %v13590_v11 = vpop.xlane.xlu0 %2547  ;;  %vm2596_vm11 = vweird.f32 %v7099_v47 }
 0x756   : > { %v2576_v17 = vmul.f32 %v7101_v16, %v2544_v60  ;;  %v13593_v2 = vpop.xlane.xlu1 %5616  ;;  %v5648_v43 = vsub.f32 1.0, %v5647_v36  ;;  %7104 = vrcp.f32 %v13590_v11  ;;  %vm2581_vm10 = vweird.f32 %v7101_v16  ;;  %vm2597_vm14 = vmor %vm2595_vm6, %vm2596_vm11 }
 0x757   : > { %v2592_v31 = vsub.f32 1.0, %v2591_v5  ;;  %7106 = vrcp.f32 %v13593_v2  ;;  %vm2582_vm12 = vmor %vm2580_vm5, %vm2581_vm10  ;;  %v2587_v5 = vor.u32 1.1754944e-38, %v2586_v13  ;;  %vm5681_vm11 = vweird.f32 %v13587_v37 }
 0x758   : > { %v2577_v51 = vsub.f32 1.0, %v2576_v17  ;;  %v5649_v3 = vmul.f32 %v13583_v63, %v5648_v43  ;;  %vm13635_vm10 = vmor %vm5651_vm0, %vm5652_vm15  ;;  %vm5666_vm15 = vweird.f32 %v13593_v2 }
 0x759   : > { %v2593_v39 = vmul.f32 %v7099_v47, %v2592_v31 }
 0x75a   : > { %v2578_v42 = vmul.f32 %v7101_v16, %v2577_v51  ;;  %v5650_v7 = vadd.f32 %v13583_v63, %v5649_v3  ;;  %v5685_v51 = vand.u32 2147483647, %v13587_v37 }
 0x75b   : > { %v13599_v58 = vpop.eup %7102  ;;  %v2594_v54 = vadd.f32 %v7099_v47, %v2593_v39 }
 0x75c   : > { %v2579_v10 = vadd.f32 %v7101_v16, %v2578_v42  ;;  %v5677_v41 = vmul.f32 %v13599_v58, %v13587_v37  ;;  %v7105_v52 = vpop.eup %7104  ;;  %v13610_v60 = vpop.xlane.xlu2 %2551  ;;  %vm13649_vm0 = vcmp.eq.f32.partialorder %v5685_v51, 8.507059e+37  ;;  %vm5682_vm5 = vweird.f32 %v13599_v58 }
 0x75d   : > { %v2598_v36 = vsel %vm2597_vm14, %v7099_v47, %v2594_v54  ;;  %v13612_v14 = vpop.eup %7106  ;;  %v2606_v49 = vmul.f32 %v7105_v52, %v13590_v11  ;;  %v13626_v39 = vpop.xlane.xlu0 %5620  ;;  %7108 = vrcp.f32 %v13610_v60  ;;  %v2616_v54 = vand.u32 2147483648, %v13590_v11 }
 0x75e   : > { %v2603_v33 = vsel %vm2600_vm4, %v2602_v44, %v2598_v36  ;;  %v2583_v17 = vsel %vm2582_vm12, %v7101_v16, %v2579_v10  ;;  %v5678_v43 = vsub.f32 1.0, %v5677_v41  ;;  %v5687_v16 = vand.u32 2147483648, %v13587_v37  ;;  %v13643_v10 = vpop.xlane.xlu1 %2549 }
 0x75f   : > { %v13616_v31 = vmul.f32 %v2603_v33, %v16109_v59  ;;  %v2588_v47 = vsel %vm2585_vm3, %v2587_v5, %v2583_v17  ;;  %v5662_v19 = vmul.f32 %v13612_v14, %v13593_v2  ;;  %v2607_v13 = vsub.f32 1.0, %v2606_v49 }
 0x760   : > { %v13620_v34 = vmul.f32 %v2588_v47, %v16110_v23  ;;  %v2614_v59 = vand.u32 2147483647, %v13590_v11  ;;  %v5679_v3 = vmul.f32 %v13599_v58, %v5678_v43  ;;  %v5654_v41 = vsel %vm13635_vm10, %v13583_v63, %v5650_v7 }
 0x761   : > { %16317 = vst [vmem:[#allocation19_spill] sm:$0xff] %v13616_v31  ;;  %v5663_v44 = vsub.f32 1.0, %v5662_v19  ;;  %v2608_v36 = vmul.f32 %v7105_v52, %v2607_v13  ;;  %vm2611_vm6 = vweird.f32 %v7105_v52  ;;  %7110 = vrcp.f32 %v13626_v39 }
 0x762   : > { %v2831_v42 = vadd.f32 %v13616_v31, %v13620_v34  ;;  %v5688_v5 = vor.u32 1.1754944e-38, %v5687_v16  ;;  %vm2610_vm14 = vweird.f32 %v13590_v11  ;;  %v5670_v43 = vand.u32 2147483647, %v13593_v2 }
 0x763   : > { %v5664_v33 = vmul.f32 %v13612_v14, %v5663_v44  ;;  %v2609_v17 = vadd.f32 %v7105_v52, %v2608_v36  ;;  %v5672_v47 = vand.u32 2147483648, %v13593_v2  ;;  %7112 = vrcp.f32 %v13643_v10  ;;  %vm2612_vm4 = vmor %vm2610_vm14, %vm2611_vm6  ;;  %v13662_v51 = vpop.eup %7108 }
 0x764   : > { %v5659_v63 = vsel %vm13604_vm1, %v5658_v57, %v5654_v41  ;;  %v5680_v7 = vadd.f32 %v13599_v58, %v5679_v3  ;;  %v2617_v49 = vor.u32 1.1754944e-38, %v2616_v54  ;;  %vm2615_vm12 = vcmp.eq.f32.partialorder %v2614_v59, 8.507059e+37  ;;  %v13670_v13 = vpop.xlane.xlu2 %5624  ;;  %vm13681_vm1 = vmor %vm5681_vm11, %vm5682_vm5 }
 0x765   : > { %v2613_v11 = vsel %vm2612_vm4, %v7105_v52, %v2609_v17  ;;  %v5665_v16 = vadd.f32 %v13612_v14, %v5664_v33  ;;  %vm5667_vm3 = vweird.f32 %v13612_v14  ;;  %v2636_v57 = vmul.f32 %v13662_v51, %v13610_v60  ;;  %v13702_v41 = vpop.xlane.xlu0 %2553 }
 0x766   : > { %v2618_v19 = vsel %vm2615_vm12, %v2617_v49, %v2613_v11  ;;  %v2644_v32 = vand.u32 2147483647, %v13610_v60  ;;  %v13675_v3 = vmul.f32 %v5659_v63, %v9269_v56  ;;  %vm13688_vm10 = vcmp.eq.f32.partialorder %v5670_v43, 8.507059e+37  ;;  %vm13695_vm6 = vmor %vm5666_vm15, %vm5667_vm3  ;;  %v13721_v49 = vpop.xlane.xlu1 %5622 }
 0x767   : > { %v13672_v23 = vpop.eup %7110  ;;  %v13686_v2 = vmul.f32 %v2618_v19, %v16203_v22  ;;  %v5673_v54 = vor.u32 1.1754944e-38, %v5672_v47  ;;  %v5684_v56 = vsel %vm13681_vm1, %v13599_v58, %v5680_v7  ;;  %v2637_v37 = vsub.f32 1.0, %v2636_v57 }
 0x768   : > { %vm2640_vm11 = vweird.f32 %v13610_v60  ;;  %v5692_v22 = vmul.f32 %v13672_v23, %v13626_v39  ;;  %v5669_v17 = vsel %vm13695_vm6, %v13612_v14, %v5665_v16  ;;  %v2646_v58 = vand.u32 2147483648, %v13610_v60 }
 0x769   : > { %16324 = vst [vmem:[#allocation7_spill] sm:$0xff] %v13686_v2  ;;  %v7113_v36 = vpop.eup %7112  ;;  %v2832_v33 = vadd.f32 %v2831_v42, %v13686_v2  ;;  %7114 = vrcp.f32 %v13670_v13  ;;  %v2638_v43 = vmul.f32 %v13662_v51, %v2637_v37  ;;  %vm13711_vm14 = vcmp.eq.f32.partialorder %v2644_v32, 8.507059e+37 }
 0x76a   : > { %v5693_v63 = vsub.f32 1.0, %v5692_v22  ;;  %v2621_v7 = vmul.f32 %v7113_v36, %v13643_v10  ;;  %v5689_v42 = vsel %vm13649_vm0, %v5688_v5, %v5684_v56  ;;  %vm2641_vm5 = vweird.f32 %v13662_v51 }
 0x76b   : > { %v5700_v14 = vand.u32 2147483647, %v13626_v39  ;;  %7116 = vrcp.f32 %v13702_v41  ;;  %v5674_v11 = vsel %vm13688_vm10, %v5673_v54, %v5669_v17  ;;  %v2639_v16 = vadd.f32 %v13662_v51, %v2638_v43  ;;  %vm13733_vm4 = vmor %vm2640_vm11, %vm2641_vm5 }
 0x76c   : > { %v5702_v19 = vand.u32 2147483648, %v13626_v39  ;;  %v2622_v57 = vsub.f32 1.0, %v2621_v7  ;;  %v5694_v32 = vmul.f32 %v13672_v23, %v5693_v63  ;;  %vm5696_vm0 = vweird.f32 %v13626_v39 }
 0x76d   : > { %v2629_v61 = vand.u32 2147483647, %v13643_v10  ;;  %v2631_v5 = vand.u32 2147483648, %v13643_v10  ;;  %v2647_v59 = vor.u32 1.1754944e-38, %v2646_v58  ;;  %vm2626_vm12 = vweird.f32 %v7113_v36 }
 0x76e   : > { %v2623_v54 = vmul.f32 %v7113_v36, %v2622_v57  ;;  %7118 = vrcp.f32 %v13721_v49  ;;  %v13741_v44 = vmul.f32 %v5689_v42, %v16202_v18  ;;  %v13744_v37 = vmul.f32 %v5674_v11, %v16204_v45  ;;  %v13756_v18 = vpop.xlane.xlu2 %2557 }
 0x76f   : > { %v13738_v56 = vpop.eup %7114  ;;  %v2643_v60 = vsel %vm13733_vm4, %v13662_v51, %v2639_v16  ;;  %vm13749_vm3 = vcmp.eq.f32.partialorder %v5700_v14, 8.507059e+37  ;;  %v5703_v17 = vor.u32 1.1754944e-38, %v5702_v19  ;;  %vm2625_vm15 = vweird.f32 %v13643_v10 }
 0x770   : > { %v2624_v58 = vadd.f32 %v7113_v36, %v2623_v54  ;;  %v5722_v43 = vmul.f32 %v13738_v56, %v13670_v13  ;;  %v5695_v45 = vadd.f32 %v13672_v23, %v5694_v32  ;;  %vm5697_vm1 = vweird.f32 %v13672_v23  ;;  %vm2627_vm10 = vmor %vm2625_vm15, %vm2626_vm12 }
 0x771   : > { %v7117_v63 = vpop.eup %7116  ;;  %vm2630_vm6 = vcmp.eq.f32.partialorder %v2629_v61, 8.507059e+37  ;;  %v2632_v51 = vor.u32 1.1754944e-38, %v2631_v5  ;;  %v2648_v7 = vsel %vm13711_vm14, %v2647_v59, %v2643_v60  ;;  %v5902_v11 = vadd.f32 %v13744_v37, %v13675_v3  ;;  %vm13772_vm11 = vmor %vm5696_vm0, %vm5697_vm1  ;;  %v13782_v59 = vpop.xlane.xlu0 %5626 }
 0x772   : > { %v2628_v42 = vsel %vm2627_vm10, %v7113_v36, %v2624_v58  ;;  %v5723_v14 = vsub.f32 1.0, %v5722_v43  ;;  %v2651_v10 = vmul.f32 %v7117_v63, %v13702_v41  ;;  %v5730_v19 = vand.u32 2147483647, %v13670_v13 }
 0x773   : > { %v2633_v16 = vsel %vm2630_vm6, %v2632_v51, %v2628_v42  ;;  %v5732_v57 = vand.u32 2147483648, %v13670_v13  ;;  %vm5726_vm14 = vweird.f32 %v13670_v13  ;;  %v2659_v5 = vand.u32 2147483647, %v13702_v41 }
 0x774   : > { %v13768_v32 = vpop.eup %7118  ;;  %v13777_v36 = vmul.f32 %v2633_v16, %v16207_v50  ;;  %v2652_v47 = vsub.f32 1.0, %v2651_v10  ;;  %v2661_v52 = vand.u32 2147483648, %v13702_v41  ;;  %v13785_v54 = vmul.f32 %v2648_v7, %v16205_v48  ;;  %v13797_v7 = vpop.xlane.xlu1 %2555 }
 0x775   : > { %v5699_v39 = vsel %vm13772_vm11, %v13672_v23, %v5695_v45  ;;  %v5707_v50 = vmul.f32 %v13768_v32, %v13721_v49  ;;  %7120 = vrcp.f32 %v13756_v18  ;;  %v5724_v58 = vmul.f32 %v13738_v56, %v5723_v14 }
 0x776   : > { %16337 = vst [vmem:[#allocation10_spill] sm:$0xff] %v13777_v36  ;;  %v2833_v60 = vadd.f32 %v2832_v33, %v13777_v36  ;;  %v2653_v43 = vmul.f32 %v7117_v63, %v2652_v47  ;;  %vm2656_vm5 = vweird.f32 %v7117_v63  ;;  %v5903_v51 = vadd.f32 %v5902_v11, %v13741_v44 }
 0x777   : > { %16338 = vst [vmem:[#allocation8_spill] sm:$0xff] %v13785_v54  ;;  %v5733_v42 = vor.u32 1.1754944e-38, %v5732_v57  ;;  %v5708_v48 = vsub.f32 1.0, %v5707_v50  ;;  %7122 = vrcp.f32 %v13782_v59  ;;  %v5704_v23 = vsel %vm13749_vm3, %v5703_v17, %v5699_v39  ;;  %v13812_v17 = vpop.xlane.xlu2 %5630 }
 0x778   : > { %vm13801_vm0 = vcmp.eq.f32.partialorder %v5730_v19, 8.507059e+37  ;;  %v2654_v33 = vadd.f32 %v7117_v63, %v2653_v43  ;;  %vm2655_vm4 = vweird.f32 %v13702_v41  ;;  %v2834_v14 = vadd.f32 %v2833_v60, %v13785_v54 }
 0x779   : > { %vm2657_vm12 = vmor %vm2655_vm4, %vm2656_vm5  ;;  %vm2660_vm15 = vcmp.eq.f32.partialorder %v2659_v5, 8.507059e+37  ;;  %v2662_v10 = vor.u32 1.1754944e-38, %v2661_v52  ;;  %v5709_v11 = vmul.f32 %v13768_v32, %v5708_v48  ;;  %v5715_v16 = vand.u32 2147483647, %v13721_v49 }
 0x77a   : > { %v5725_v57 = vadd.f32 %v13738_v56, %v5724_v58  ;;  %vm5727_vm3 = vweird.f32 %v13738_v56  ;;  %v2658_v22 = vsel %vm2657_vm12, %v7117_v63, %v2654_v33  ;;  %7124 = vrcp.f32 %v13797_v7 }
 0x77b   : > { %v13814_v19 = vpop.eup %7120  ;;  %v13817_v41 = vmul.f32 %v5704_v23, %v16206_v27  ;;  %v2663_v61 = vsel %vm2660_vm15, %v2662_v10, %v2658_v22  ;;  %vm5712_vm1 = vweird.f32 %v13768_v32  ;;  %v5717_v47 = vand.u32 2147483648, %v13721_v49  ;;  %vm13832_vm10 = vmor %vm5726_vm14, %vm5727_vm3 }
 0x77c   : > { %v13822_v5 = vmul.f32 %v2663_v61, %v15943_v9  ;;  %v5710_v52 = vadd.f32 %v13768_v32, %v5709_v11  ;;  %v2681_v63 = vmul.f32 %v13814_v19, %v13756_v18  ;;  %v2689_v39 = vand.u32 2147483647, %v13756_v18 }
 0x77d   : > { %v13828_v50 = vpop.eup %7122  ;;  %vm5711_vm6 = vweird.f32 %v13721_v49  ;;  %vm13837_vm11 = vcmp.eq.f32.partialorder %v5715_v16, 8.507059e+37  ;;  %v2691_v60 = vand.u32 2147483648, %v13756_v18  ;;  %7126 = vrcp.f32 %v13812_v17 }
 0x77e   : > { %16341 = vst [vmem:[#allocation31_spill] sm:$0xff] %v13822_v5  ;;  %v5729_v58 = vsel %vm13832_vm10, %v13738_v56, %v5725_v57  ;;  %v13847_v13 = vadd.f32 %v2834_v14, %v13822_v5  ;;  %v2682_v43 = vsub.f32 1.0, %v2681_v63  ;;  %v5737_v48 = vmul.f32 %v13828_v50, %v13782_v59  ;;  %vm13854_vm14 = vmor %vm5711_vm6, %vm5712_vm1  ;;  %v13860_v56 = vpop.xlane.xlu0 %2559 }
 0x77f   : > { %v5904_v49 = vadd.f32 %v5903_v51, %v13817_v41  ;;  %v5718_v33 = vor.u32 1.1754944e-38, %v5717_v47  ;;  %vm2685_vm5 = vweird.f32 %v13756_v18  ;;  %vm5741_vm4 = vweird.f32 %v13782_v59 }
 0x780   : > { %v7125_v14 = vpop.eup %7124  ;;  %v5714_v10 = vsel %vm13854_vm14, %v13768_v32, %v5710_v52  ;;  %v2683_v51 = vmul.f32 %v13814_v19, %v2682_v43  ;;  %vm13866_vm12 = vcmp.eq.f32.partialorder %v2689_v39, 8.507059e+37  ;;  %v5738_v16 = vsub.f32 1.0, %v5737_v48 }
 0x781   : > { %v5734_v57 = vsel %vm13801_vm0, %v5733_v42, %v5729_v58  ;;  %vm2686_vm15 = vweird.f32 %v13814_v19  ;;  %v2692_v22 = vor.u32 1.1754944e-38, %v2691_v60  ;;  %v2666_v61 = vmul.f32 %v7125_v14, %v13797_v7  ;;  %v13884_v60 = vpop.xlane.xlu1 %5628 }
 0x782   : > { %v2684_v47 = vadd.f32 %v13814_v19, %v2683_v51  ;;  %v5739_v63 = vmul.f32 %v13828_v50, %v5738_v16  ;;  %v5745_v32 = vand.u32 2147483647, %v13782_v59  ;;  %7128 = vrcp.f32 %v13860_v56  ;;  %vm13891_vm0 = vmor %vm2685_vm5, %vm2686_vm15 }
 0x783   : > { %v13878_v52 = vpop.eup %7126  ;;  %v5719_v39 = vsel %vm13837_vm11, %v5718_v33, %v5714_v10  ;;  %v5747_v42 = vand.u32 2147483648, %v13782_v59  ;;  %v2667_v45 = vsub.f32 1.0, %v2666_v61  ;;  %v2674_v27 = vand.u32 2147483647, %v13797_v7 }
 0x784   : > { %v13887_v58 = vmul.f32 %v5734_v57, %v16312_v55  ;;  %vm5742_vm3 = vweird.f32 %v13828_v50  ;;  %v2676_v9 = vand.u32 2147483648, %v13797_v7  ;;  %v5767_v48 = vmul.f32 %v13878_v52, %v13812_v17 }
 0x785   : > { %v2688_v23 = vsel %vm13891_vm0, %v13814_v19, %v2684_v47  ;;  %v5740_v55 = vadd.f32 %v13828_v50, %v5739_v63  ;;  %v2668_v33 = vmul.f32 %v7125_v14, %v2667_v45  ;;  %vm2671_vm1 = vweird.f32 %v7125_v14  ;;  %vm13913_vm6 = vmor %vm5741_vm4, %vm5742_vm3 }
 0x786   : > { %v13904_v18 = vmul.f32 %v5719_v39, %v15998_v12  ;;  %vm13906_vm10 = vcmp.eq.f32.partialorder %v5745_v32, 8.507059e+37  ;;  %v5768_v51 = vsub.f32 1.0, %v5767_v48  ;;  %7130 = vrcp.f32 %v13884_v60  ;;  %v13918_v12 = vpop.xlane.xlu2 %2563 }
 0x787   : > { %v5748_v19 = vor.u32 1.1754944e-38, %v5747_v42  ;;  %v2669_v57 = vadd.f32 %v7125_v14, %v2668_v33  ;;  %vm2670_vm11 = vweird.f32 %v13797_v7  ;;  %vm2675_vm14 = vcmp.eq.f32.partialorder %v2674_v27, 8.507059e+37 }
 0x788   : > { %v7129_v61 = vpop.eup %7128  ;;  %v2693_v47 = vsel %vm13866_vm12, %v2692_v22, %v2688_v23  ;;  %vm2672_vm5 = vmor %vm2670_vm11, %vm2671_vm1  ;;  %v2677_v63 = vor.u32 1.1754944e-38, %v2676_v9  ;;  %vm5771_vm15 = vweird.f32 %v13812_v17  ;;  %v5775_v59 = vand.u32 2147483647, %v13812_v17 }
 0x789   : > { %v5744_v32 = vsel %vm13913_vm6, %v13828_v50, %v5740_v55  ;;  %v2673_v39 = vsel %vm2672_vm5, %v7125_v14, %v2669_v57  ;;  %v5769_v7 = vmul.f32 %v13878_v52, %v5768_v51  ;;  %v2696_v42 = vmul.f32 %v7129_v61, %v13860_v56  ;;  %v13937_v50 = vpop.xlane.xlu0 %5632  ;;  %v13952_v16 = vpop.xlane.xlu1 %2561 }
 0x78a   : > { %v5905_v45 = vadd.f32 %v5904_v49, %v13904_v18  ;;  %v2678_v27 = vsel %vm2675_vm14, %v2677_v63, %v2673_v39  ;;  %v5777_v11 = vand.u32 2147483648, %v13812_v17  ;;  %v2704_v22 = vand.u32 2147483647, %v13860_v56 }
 0x78b   : > { %v13933_v43 = vmul.f32 %v2678_v27, %v16313_v28  ;;  %vm5772_vm4 = vweird.f32 %v13878_v52  ;;  %v2697_v9 = vsub.f32 1.0, %v2696_v42  ;;  %7132 = vrcp.f32 %v13918_v12 }
 0x78c   : > { %v13939_v14 = vpop.eup %7130  ;;  %v13942_v48 = vmul.f32 %v2693_v47, %v9658_v40  ;;  %v5749_v49 = vsel %vm13906_vm10, %v5748_v19, %v5744_v32  ;;  %vm2701_vm12 = vweird.f32 %v7129_v61  ;;  %v2706_v23 = vand.u32 2147483648, %v13860_v56  ;;  %vm13968_vm10 = vmor %vm5771_vm15, %vm5772_vm4 }
 0x78d   : > { %16356 = vst [vmem:[#allocation16_spill] sm:$0xff] %v13933_v43  ;;  %v2836_v28 = vadd.f32 %v13847_v13, %v13933_v43  ;;  %v5770_v55 = vadd.f32 %v13878_v52, %v5769_v7  ;;  %v2698_v33 = vmul.f32 %v7129_v61, %v2697_v9  ;;  %v5752_v51 = vmul.f32 %v13939_v14, %v13884_v60 }
 0x78e   : > { %16357 = vst [vmem:[#allocation9_spill] sm:$0xff] %v13942_v48  ;;  %v5906_v40 = vadd.f32 %v5905_v45, %v13887_v58  ;;  %vm13955_vm0 = vcmp.eq.f32.partialorder %v5775_v59, 8.507059e+37  ;;  %vm2700_vm3 = vweird.f32 %v13860_v56  ;;  %vm13960_vm1 = vcmp.eq.f32.partialorder %v2704_v22, 8.507059e+37 }
 0x78f   : > { %v2699_v19 = vadd.f32 %v7129_v61, %v2698_v33  ;;  %v2837_v47 = vadd.f32 %v2836_v28, %v13942_v48  ;;  %v5753_v63 = vsub.f32 1.0, %v5752_v51  ;;  %7134 = vrcp.f32 %v13937_v50  ;;  %vm2702_vm6 = vmor %vm2700_vm3, %vm2701_vm12 }
 0x790   : > { %v13975_v56 = vmul.f32 %v5749_v49, %v9427_v26  ;;  %v2707_v59 = vor.u32 1.1754944e-38, %v2706_v23  ;;  %v5760_v32 = vand.u32 2147483647, %v13884_v60  ;;  %7136 = vrcp.f32 %v13952_v16  ;;  %v13987_v26 = vpop.xlane.xlu2 %5636 }
 0x791   : > { %v13980_v17 = vpop.eup %7132  ;;  %v5774_v39 = vsel %vm13968_vm10, %v13878_v52, %v5770_v55  ;;  %v2703_v7 = vsel %vm2702_vm6, %v7129_v61, %v2699_v19  ;;  %v5754_v42 = vmul.f32 %v13939_v14, %v5753_v63  ;;  %v5762_v45 = vand.u32 2147483648, %v13884_v60 }
 0x792   : > { %v5778_v27 = vor.u32 1.1754944e-38, %v5777_v11  ;;  %v2708_v22 = vsel %vm13960_vm1, %v2707_v59, %v2703_v7  ;;  %vm5757_vm11 = vweird.f32 %v13939_v14  ;;  %v2726_v9 = vmul.f32 %v13980_v17, %v13918_v12 }
 0x793   : > { %v13995_v49 = vmul.f32 %v2708_v22, %v9663_v25  ;;  %v5755_v52 = vadd.f32 %v13939_v14, %v5754_v42  ;;  %vm5756_vm14 = vweird.f32 %v13884_v60  ;;  %v2734_v61 = vand.u32 2147483647, %v13918_v12 }
 0x794   : > { %v5907_v23 = vadd.f32 %v5906_v40, %v13975_v56  ;;  %v5779_v11 = vsel %vm13955_vm0, %v5778_v27, %v5774_v39  ;;  %v2727_v28 = vsub.f32 1.0, %v2726_v9  ;;  %7138 = vrcp.f32 %v13987_v26  ;;  %vm14009_vm5 = vmor %vm5756_vm14, %vm5757_vm11  ;;  %v14018_v40 = vpop.xlane.xlu0 %2565 }
 0x795   : > { %16364 = vst [vmem:[#allocation14_spill] sm:$0xff] %v13995_v49  ;;  %v14004_v55 = vpop.eup %7134  ;;  %v14007_v33 = vadd.f32 %v2837_v47, %v13995_v49  ;;  %vm14013_vm15 = vcmp.eq.f32.partialorder %v5760_v32, 8.507059e+37  ;;  %v5763_v51 = vor.u32 1.1754944e-38, %v5762_v45  ;;  %vm2730_vm4 = vweird.f32 %v13918_v12  ;;  %v14039_v45 = vpop.xlane.xlu1 %5634 }
 0x796   : > { %v7137_v57 = vpop.eup %7136  ;;  %v5759_v10 = vsel %vm14009_vm5, %v13939_v14, %v5755_v52  ;;  %v2728_v13 = vmul.f32 %v13980_v17, %v2727_v28  ;;  %v2736_v19 = vand.u32 2147483648, %v13918_v12  ;;  %v5782_v47 = vmul.f32 %v14004_v55, %v13937_v50 }
 0x797   : > { %v14028_v63 = vmul.f32 %v5779_v11, %v9706_v0  ;;  %vm2731_vm12 = vweird.f32 %v13980_v17  ;;  %vm14031_vm0 = vcmp.eq.f32.partialorder %v2734_v61, 8.507059e+37  ;;  %v2711_v32 = vmul.f32 %v7137_v57, %v13952_v16 }
 0x798   : > { %v2729_v14 = vadd.f32 %v13980_v17, %v2728_v13  ;;  %v5783_v39 = vsub.f32 1.0, %v5782_v47  ;;  %v5792_v7 = vand.u32 2147483648, %v13937_v50  ;;  %v2719_v42 = vand.u32 2147483647, %v13952_v16  ;;  %vm14049_vm3 = vmor %vm2730_vm4, %vm2731_vm12 }
 0x799   : > { %v5764_v0 = vsel %vm14013_vm15, %v5763_v51, %v5759_v10  ;;  %v5790_v27 = vand.u32 2147483647, %v13937_v50  ;;  %v2712_v22 = vsub.f32 1.0, %v2711_v32  ;;  %7140 = vrcp.f32 %v14018_v40 }
 0x79a   : > { %v14045_v9 = vpop.eup %7138  ;;  %v2737_v61 = vor.u32 1.1754944e-38, %v2736_v19  ;;  %vm5786_vm1 = vweird.f32 %v13937_v50  ;;  %vm2716_vm10 = vweird.f32 %v7137_v57  ;;  %v2721_v11 = vand.u32 2147483648, %v13952_v16  ;;  %v14069_v19 = vpop.xlane.xlu2 %2569 }
 0x79b   : > { %v2733_v28 = vsel %vm14049_vm3, %v13980_v17, %v2729_v14  ;;  %v5784_v25 = vmul.f32 %v14004_v55, %v5783_v39  ;;  %v2713_v60 = vmul.f32 %v7137_v57, %v2712_v22  ;;  %v5812_v12 = vmul.f32 %v14045_v9, %v13987_v26 }
 0x79c   : > { %v14062_v51 = vmul.f32 %v5764_v0, %v9582_v20  ;;  %v5793_v10 = vor.u32 1.1754944e-38, %v5792_v7  ;;  %vm2715_vm6 = vweird.f32 %v13952_v16  ;;  %vm14065_vm11 = vcmp.eq.f32.partialorder %v2719_v42, 8.507059e+37  ;;  %v14085_v22 = vpop.xlane.xlu0 %5638 }
 0x79d   : > { %vm14071_vm14 = vcmp.eq.f32.partialorder %v5790_v27, 8.507059e+37  ;;  %v2714_v47 = vadd.f32 %v7137_v57, %v2713_v60  ;;  %v5813_v32 = vsub.f32 1.0, %v5812_v12  ;;  %v5822_v14 = vand.u32 2147483648, %v13987_v26  ;;  %vm2717_vm15 = vmor %vm2715_vm6, %vm2716_vm10  ;;  %v14114_v13 = vpop.xlane.xlu1 %2567 }
 0x79e   : > { %7142 = vrcp.f32 %v14039_v45  ;;  %v2738_v20 = vsel %vm14031_vm0, %v2737_v61, %v2733_v28  ;;  %vm5787_vm5 = vweird.f32 %v14004_v55  ;;  %v2722_v16 = vor.u32 1.1754944e-38, %v2721_v11 }
 0x79f   : > { %v5820_v39 = vand.u32 2147483647, %v13987_v26  ;;  %v7141_v7 = vpop.eup %7140  ;;  %v5785_v42 = vadd.f32 %v14004_v55, %v5784_v25  ;;  %v2718_v0 = vsel %vm2717_vm15, %v7137_v57, %v2714_v47  ;;  %v5814_v27 = vmul.f32 %v14045_v9, %v5813_v32  ;;  %vm14104_vm12 = vmor %vm5786_vm1, %vm5787_vm5 }
 0x7a0   : > { %7144 = vrcp.f32 %v14069_v19  ;;  %v5908_v59 = vadd.f32 %v5907_v23, %v14062_v51  ;;  %v2723_v52 = vsel %vm14065_vm11, %v2722_v16, %v2718_v0  ;;  %vm5816_vm4 = vweird.f32 %v13987_v26 }
 0x7a1   : > { %v2741_v61 = vmul.f32 %v7141_v7, %v14018_v40  ;;  %v14093_v11 = vmul.f32 %v2723_v52, %v9752_v24  ;;  %v5823_v28 = vor.u32 1.1754944e-38, %v5822_v14  ;;  %v2749_v57 = vand.u32 2147483647, %v14018_v40 }
 0x7a2   : > { %v2751_v25 = vand.u32 2147483648, %v14018_v40  ;;  %v14098_v60 = vmul.f32 %v2738_v20, %v9762_v53  ;;  %vm5817_vm0 = vweird.f32 %v14045_v9  ;;  %vm14109_vm3 = vcmp.eq.f32.partialorder %v5820_v39, 8.507059e+37 }
 0x7a3   : > { %16377 = vst [vmem:[#allocation6_spill] sm:$0xff] %v14093_v11  ;;  %v2742_v12 = vsub.f32 1.0, %v2741_v61  ;;  %vm2745_vm10 = vweird.f32 %v14018_v40  ;;  %v5789_v50 = vsel %vm14104_vm12, %v14004_v55, %v5785_v42  ;;  %v2839_v47 = vadd.f32 %v14007_v33, %v14093_v11  ;;  %vm14139_vm11 = vmor %vm5816_vm4, %vm5817_vm0 }
 0x7a4   : > { %16378 = vst [vmem:[#allocation5_spill] sm:$0xff] %v14098_v60  ;;  %v7143_v53 = vpop.eup %7142  ;;  %v5815_v32 = vadd.f32 %v14045_v9, %v5814_v27  ;;  %7146 = vrcp.f32 %v14085_v22  ;;  %v5909_v14 = vadd.f32 %v5908_v59, %v14028_v63  ;;  %vm2746_vm1 = vweird.f32 %v7141_v7 }
 0x7a5   : > { %v2743_v20 = vmul.f32 %v7141_v7, %v2742_v12  ;;  %v5797_v16 = vmul.f32 %v7143_v53, %v14039_v45  ;;  %vm14127_vm6 = vcmp.eq.f32.partialorder %v2749_v57, 8.507059e+37  ;;  %v2752_v55 = vor.u32 1.1754944e-38, %v2751_v25  ;;  %v14153_v12 = vpop.xlane.xlu2 %5642 }
 0x7a6   : > { %v14125_v39 = vpop.eup %7144  ;;  %v2840_v42 = vadd.f32 %v2839_v47, %v14098_v60  ;;  %v5807_v33 = vand.u32 2147483648, %v14039_v45  ;;  %v5794_v27 = vsel %vm14071_vm14, %v5793_v10, %v5789_v50  ;;  %v5819_v25 = vsel %vm14139_vm11, %v14045_v9, %v5815_v32  ;;  %vm2747_vm14 = vmor %vm2745_vm10, %vm2746_vm1 }
 0x7a7   : > { %v2744_v52 = vadd.f32 %v7141_v7, %v2743_v20  ;;  %v5798_v61 = vsub.f32 1.0, %v5797_v16  ;;  %v2771_v57 = vmul.f32 %v14125_v39, %v14069_v19  ;;  %vm5801_vm5 = vweird.f32 %v14039_v45  ;;  %v14163_v20 = vpop.xlane.xlu0 %2571 }
 0x7a8   : > { %v5805_v26 = vand.u32 2147483647, %v14039_v45  ;;  %7148 = vrcp.f32 %v14114_v13  ;;  %vm5802_vm15 = vweird.f32 %v7143_v53  ;;  %v14158_v47 = vmul.f32 %v5794_v27, %v9807_v29 }
 0x7a9   : > { %v2748_v10 = vsel %vm2747_vm14, %v7141_v7, %v2744_v52  ;;  %v5799_v17 = vmul.f32 %v7143_v53, %v5798_v61  ;;  %v2772_v23 = vsub.f32 1.0, %v2771_v57  ;;  %v5808_v9 = vor.u32 1.1754944e-38, %v5807_v33  ;;  %vm5803_vm4 = vmor %vm5801_vm5, %vm5802_vm15  ;;  %v14182_v61 = vpop.xlane.xlu1 %5640 }
 0x7aa   : > { %v14155_v50 = vpop.eup %7146  ;;  %v2753_v40 = vsel %vm14127_vm6, %v2752_v55, %v2748_v10  ;;  %v2779_v32 = vand.u32 2147483647, %v14069_v19  ;;  %v5824_v29 = vsel %vm14109_vm3, %v5823_v28, %v5819_v25  ;;  %vm2776_vm12 = vweird.f32 %v14125_v39 }
 0x7ab   : > { %v14166_v7 = vmul.f32 %v2753_v40, %v15976_v62  ;;  %v5800_v16 = vadd.f32 %v7143_v53, %v5799_v17  ;;  %v2773_v59 = vmul.f32 %v14125_v39, %v2772_v23  ;;  %v5827_v52 = vmul.f32 %v14155_v50, %v14085_v22 }
 0x7ac   : > { %v2781_v0 = vand.u32 2147483648, %v14069_v19  ;;  %7150 = vrcp.f32 %v14153_v12  ;;  %v5910_v28 = vadd.f32 %v5909_v14, %v14158_v47  ;;  %vm5806_vm0 = vcmp.eq.f32.partialorder %v5805_v26, 8.507059e+37 }
 0x7ad   : > { %16387 = vst [vmem:[#allocation43_spill] sm:$0xff] %v14166_v7  ;;  %v14179_v62 = vadd.f32 %v2840_v42, %v14166_v7  ;;  %v5804_v55 = vsel %vm5803_vm4, %v7143_v53, %v5800_v16  ;;  %v2774_v33 = vadd.f32 %v14125_v39, %v2773_v59  ;;  %v5828_v27 = vsub.f32 1.0, %v5827_v52 }
 0x7ae   : > { %v7149_v24 = vpop.eup %7148  ;;  %vm2775_vm3 = vweird.f32 %v14069_v19  ;;  %v14187_v45 = vmul.f32 %v5824_v29, %v9936_v30  ;;  %v5809_v57 = vsel %vm5806_vm0, %v5808_v9, %v5804_v55  ;;  %vm14197_vm1 = vcmp.eq.f32.partialorder %v2779_v32, 8.507059e+37 }
 0x7af   : > { %v5829_v25 = vmul.f32 %v14155_v50, %v5828_v27  ;;  %v2756_v42 = vmul.f32 %v7149_v24, %v14114_v13  ;;  %vm14193_vm10 = vmor %vm2775_vm3, %vm2776_vm12  ;;  %v2782_v14 = vor.u32 1.1754944e-38, %v2781_v0  ;;  %v5835_v19 = vand.u32 2147483647, %v14085_v22  ;;  %v14226_v0 = vpop.xlane.xlu0 %5644 }
 0x7b0   : > { %v5837_v30 = vand.u32 2147483648, %v14085_v22  ;;  %v2778_v26 = vsel %vm14193_vm10, %v14125_v39, %v2774_v33  ;;  %vm5831_vm6 = vweird.f32 %v14085_v22  ;;  %v2764_v23 = vand.u32 2147483647, %v14114_v13 }
 0x7b1   : > { %v2757_v17 = vsub.f32 1.0, %v2756_v42  ;;  %v14211_v9 = vmul.f32 %v5809_v57, %v16314_v46  ;;  %vm5832_vm11 = vweird.f32 %v14155_v50  ;;  %v2766_v32 = vand.u32 2147483648, %v14114_v13  ;;  %v14243_v10 = vpop.xlane.xlu1 %2573 }
 0x7b2   : > { %v14208_v40 = vpop.eup %7150  ;;  %7152 = vrcp.f32 %v14163_v20  ;;  %v5830_v16 = vadd.f32 %v14155_v50, %v5829_v25  ;;  %vm2761_vm14 = vweird.f32 %v7149_v24  ;;  %v2783_v52 = vsel %vm14197_vm1, %v2782_v14, %v2778_v26  ;;  %vm14230_vm4 = vmor %vm5831_vm6, %vm5832_vm11 }
 0x7b3   : > { %v2758_v59 = vmul.f32 %v7149_v24, %v2757_v17  ;;  %v5857_v39 = vmul.f32 %v14208_v40, %v14153_v12  ;;  %vm14221_vm5 = vcmp.eq.f32.partialorder %v5835_v19, 8.507059e+37  ;;  %v5838_v46 = vor.u32 1.1754944e-38, %v5837_v30 }
 0x7b4   : > { %vm2760_vm15 = vweird.f32 %v14114_v13  ;;  %v5867_v57 = vand.u32 2147483648, %v14153_v12  ;;  %7154 = vrcp.f32 %v14182_v61  ;;  %v5911_v25 = vadd.f32 %v5910_v28, %v14211_v9 }
 0x7b5   : > { %v2759_v33 = vadd.f32 %v7149_v24, %v2758_v59  ;;  %v5858_v27 = vsub.f32 1.0, %v5857_v39  ;;  %vm2762_vm12 = vmor %vm2760_vm15, %vm2761_vm14  ;;  %vm2765_vm0 = vcmp.eq.f32.partialorder %v2764_v23, 8.507059e+37  ;;  %v2767_v42 = vor.u32 1.1754944e-38, %v2766_v32 }
 0x7b6   : > { %v5865_v13 = vand.u32 2147483647, %v14153_v12  ;;  %v5834_v22 = vsel %vm14230_vm4, %v14155_v50, %v5830_v16  ;;  %vm5861_vm3 = vweird.f32 %v14153_v12  ;;  %7156 = vrcp.f32 %v14226_v0 }
 0x7b7   : > { %v2763_v53 = vsel %vm2762_vm12, %v7149_v24, %v2759_v33  ;;  %v14246_v19 = vmul.f32 %v2783_v52, %v10088_v35  ;;  %v5859_v30 = vmul.f32 %v14208_v40, %v5858_v27  ;;  %v2794_v26 = vand.u32 2147483647, %v14163_v20 }
 0x7b8   : > { %v7153_v14 = vpop.eup %7152  ;;  %v2768_v28 = vsel %vm2765_vm0, %v2767_v42, %v2763_v53  ;;  %v5868_v50 = vor.u32 1.1754944e-38, %v5867_v57  ;;  %vm2790_vm10 = vweird.f32 %v14163_v20  ;;  %v5839_v23 = vsel %vm14221_vm5, %v5838_v46, %v5834_v22 }
 0x7b9   : > { %16396 = vst [vmem:[#allocation11_spill] sm:$0xff] %v14246_v19  ;;  %v14251_v17 = vmul.f32 %v2768_v28, %v10001_v21  ;;  %v2786_v24 = vmul.f32 %v7153_v14, %v14163_v20  ;;  %v5912_v32 = vadd.f32 %v5911_v25, %v14187_v45  ;;  %vm14258_vm1 = vcmp.eq.f32.partialorder %v5865_v13, 8.507059e+37 }
 0x7ba   : > { %v2796_v16 = vand.u32 2147483648, %v14163_v20  ;;  %7158 = vrcp.f32 %v14243_v10  ;;  %v7155_v21 = vpop.eup %7154  ;;  %v5850_v52 = vand.u32 2147483647, %v14182_v61  ;;  %v5852_v29 = vand.u32 2147483648, %v14182_v61 }
 0x7bb   : > { %16397 = vst [vmem:[#allocation25_spill] sm:$0xff] %v14251_v17  ;;  %v2842_v59 = vadd.f32 %v14179_v62, %v14251_v17  ;;  %v2787_v39 = vsub.f32 1.0, %v2786_v24  ;;  %v5860_v46 = vadd.f32 %v14208_v40, %v5859_v30  ;;  %vm5862_vm6 = vweird.f32 %v14208_v40 }
 0x7bc   : > { %vm14270_vm11 = vcmp.eq.f32.partialorder %v2794_v26, 8.507059e+37  ;;  %v5842_v33 = vmul.f32 %v7155_v21, %v14182_v61  ;;  %v7157_v27 = vpop.eup %7156  ;;  %v14276_v57 = vmul.f32 %v5839_v23, %v10025_v6  ;;  %vm2791_vm14 = vweird.f32 %v7153_v14  ;;  %vm14283_vm15 = vmor %vm5861_vm3, %vm5862_vm6 }
 0x7bd   : > { %v2788_v62 = vmul.f32 %v7153_v14, %v2787_v39  ;;  %v2843_v25 = vadd.f32 %v2842_v59, %v14246_v19  ;;  %v2797_v42 = vor.u32 1.1754944e-38, %v2796_v16  ;;  %vm5846_vm5 = vweird.f32 %v14182_v61  ;;  %vm2792_vm12 = vmor %vm2790_vm10, %vm2791_vm14 }
 0x7be   : > { %v5843_v13 = vsub.f32 1.0, %v5842_v33  ;;  %v5872_v22 = vmul.f32 %v7157_v27, %v14226_v0  ;;  %vm14287_vm4 = vcmp.eq.f32.partialorder %v5850_v52, 8.507059e+37  ;;  %v5853_v30 = vor.u32 1.1754944e-38, %v5852_v29 }
 0x7bf   : > { %v2789_v28 = vadd.f32 %v7153_v14, %v2788_v62  ;;  %v5882_v26 = vand.u32 2147483648, %v14226_v0  ;;  %v5864_v23 = vsel %vm14283_vm15, %v14208_v40, %v5860_v46  ;;  %vm5847_vm0 = vweird.f32 %v7155_v21 }
 0x7c0   : > { %v7159_v24 = vpop.eup %7158  ;;  %v5844_v12 = vmul.f32 %v7155_v21, %v5843_v13  ;;  %v5873_v16 = vsub.f32 1.0, %v5872_v22  ;;  %vm5876_vm3 = vweird.f32 %v14226_v0  ;;  %v5880_v39 = vand.u32 2147483647, %v14226_v0  ;;  %vm5848_vm10 = vmor %vm5846_vm5, %vm5847_vm0 }
 0x7c1   : > { %v2793_v59 = vsel %vm2792_vm12, %v7153_v14, %v2789_v28  ;;  %v2801_v52 = vmul.f32 %v7159_v24, %v14243_v10  ;;  %vm5877_vm6 = vweird.f32 %v7157_v27  ;;  %v5869_v20 = vsel %vm14258_vm1, %v5868_v50, %v5864_v23 }
 0x7c2   : > { %v2798_v29 = vsel %vm14270_vm11, %v2797_v42, %v2793_v59  ;;  %v5845_v33 = vadd.f32 %v7155_v21, %v5844_v12  ;;  %v5874_v62 = vmul.f32 %v7157_v27, %v5873_v16  ;;  %v2809_v46 = vand.u32 2147483647, %v14243_v10  ;;  %vm5878_vm1 = vmor %vm5876_vm3, %vm5877_vm6 }
 0x7c3   : > { %v14305_v40 = vmul.f32 %v2798_v29, %v16107_v15  ;;  %v2802_v14 = vsub.f32 1.0, %v2801_v52  ;;  %v5883_v53 = vor.u32 1.1754944e-38, %v5882_v26  ;;  %v2811_v55 = vand.u32 2147483648, %v14243_v10 }
 0x7c4   : > { %v5849_v13 = vsel %vm5848_vm10, %v7155_v21, %v5845_v33  ;;  %v5875_v22 = vadd.f32 %v7157_v27, %v5874_v62  ;;  %vm2806_vm11 = vweird.f32 %v7159_v24  ;;  %v5913_v61 = vadd.f32 %v5912_v32, %v14276_v57 }
 0x7c5   : > { %16406 = vst [vmem:[#allocation18_spill] sm:$0xff] %v14305_v40  ;;  %v2844_v42 = vadd.f32 %v2843_v25, %v14305_v40  ;;  %v5854_v35 = vsel %vm14287_vm4, %v5853_v30, %v5849_v13  ;;  %v2803_v15 = vmul.f32 %v7159_v24, %v2802_v14  ;;  %vm5881_vm14 = vcmp.eq.f32.partialorder %v5880_v39, 8.507059e+37 }
 0x7c6   : > { %v14318_v50 = vmul.f32 %v5854_v35, %v10117_v1  ;;  %v5879_v21 = vsel %vm5878_vm1, %v7157_v27, %v5875_v22  ;;  %vm2805_vm5 = vweird.f32 %v14243_v10  ;;  %v14322_v25 = vmul.f32 %v5869_v20, %v15992_v38 }
 0x7c7   : > { %v5884_v28 = vsel %vm5881_vm14, %v5883_v53, %v5879_v21  ;;  %v2804_v26 = vadd.f32 %v7159_v24, %v2803_v15  ;;  %vm2807_vm15 = vmor %vm2805_vm5, %vm2806_vm11  ;;  %v2812_v30 = vor.u32 1.1754944e-38, %v2811_v55  ;;  %vm2810_vm4 = vcmp.eq.f32.partialorder %v2809_v46, 8.507059e+37 }
 0x7c8   : > { %v5914_v6 = vadd.f32 %v5913_v61, %v14318_v50  ;;  %v5901_v0 = vmul.f32 %v5884_v28, %v16106_v4 }
 0x7c9   : > { %v2808_v23 = vsel %vm2807_vm15, %v7159_v24, %v2804_v26 }
 0x7ca   : > { %v5915_v1 = vadd.f32 %v5914_v6, %v14322_v25  ;;  %v2813_v32 = vsel %vm2810_vm4, %v2812_v30, %v2808_v23 }
 0x7cb   : > { %v14328_v27 = vmul.f32 %v2813_v32, %v16108_v8 }
 0x7cc   : > { %v5916_v12 = vadd.f32 %v5915_v1, %v5901_v0 }
 0x7cd   : > { %16407 = vst [vmem:[#allocation28_spill] sm:$0xff] %v14328_v27  ;;  %v2845_v10 = vadd.f32 %v2844_v42, %v14328_v27 }
 0x7ce   : > { %v5917_v16 = vrot.slane %v5916_v12, 4 }
 0x7cf   : > { %v2846_v38 = vrot.slane %v2845_v10, 4 }
 0x7d0   : > { %v5918_v59 = vadd.f32 %v5917_v16, %v5916_v12 }
 0x7d1   : > { %v2847_v39 = vadd.f32 %v2846_v38, %v2845_v10 }
 0x7d2   : > { %v5919_v52 = vrot.slane %v5918_v59, 2 }
 0x7d3   : > { %v2848_v29 = vrot.slane %v2847_v39, 2 }
 0x7d4   : > { %v5920_v4 = vadd.f32 %v5919_v52, %v5918_v59 }
 0x7d5   : > { %v2849_v33 = vadd.f32 %v2848_v29, %v2847_v39 }
 0x7d6   : > { %v5921_v62 = vrot.slane %v5920_v4, 1 }
 0x7d7   : > { %v2850_v24 = vrot.slane %v2849_v33, 1 }
 0x7d8   : > { %v5922_v20 = vadd.f32 %v5921_v62, %v5920_v4 }
 0x7d9   : > { %v2851_v14 = vadd.f32 %v2850_v24, %v2849_v33 }
 0x7da   : > { %7160 = vrcp.f32 %v5922_v20  ;;  %v5934_v55 = vand.u32 2147483648, %v5922_v20  ;;  %v5932_v15 = vand.u32 2147483647, %v5922_v20  ;;  %vm5928_vm0 = vweird.f32 %v5922_v20 }
 0x7db   : > { %7162 = vrcp.f32 %v2851_v14  ;;  %v2861_v12 = vand.u32 2147483647, %v2851_v14  ;;  %v2863_v10 = vand.u32 2147483648, %v2851_v14  ;;  %vm2857_vm1 = vweird.f32 %v2851_v14 }
 0x7dc   : > { %v5935_v21 = vor.u32 1.1754944e-38, %v5934_v55  ;;  %vm5933_vm6 = vcmp.eq.f32.partialorder %v5932_v15, 8.507059e+37 }
 0x7dd   : > { %vm2862_vm14 = vcmp.eq.f32.partialorder %v2861_v12, 8.507059e+37  ;;  %v2864_v39 = vor.u32 1.1754944e-38, %v2863_v10 }
 0x7e0   : > { %v7161_v46 = vpop.eup %7160 }
 0x7e1   : > { %v7163_v8 = vpop.eup %7162  ;;  %v5924_v13 = vmul.f32 %v7161_v46, %v5922_v20  ;;  %vm5929_vm12 = vweird.f32 %v7161_v46 }
 0x7e2   : > { %v2853_v22 = vmul.f32 %v7163_v8, %v2851_v14  ;;  %vm5930_vm3 = vmor %vm5928_vm0, %vm5929_vm12  ;;  %vm2858_vm10 = vweird.f32 %v7163_v8 }
 0x7e3   : > { %v5925_v53 = vsub.f32 1.0, %v5924_v13  ;;  %vm2859_vm11 = vmor %vm2857_vm1, %vm2858_vm10 }
 0x7e4   : > { %v2854_v42 = vsub.f32 1.0, %v2853_v22 }
 0x7e5   : > { %v5926_v35 = vmul.f32 %v7161_v46, %v5925_v53 }
 0x7e6   : > { %v2855_v28 = vmul.f32 %v7163_v8, %v2854_v42 }
 0x7e7   : > { %v5927_v61 = vadd.f32 %v7161_v46, %v5926_v35 }
 0x7e8   : > { %v2856_v1 = vadd.f32 %v7163_v8, %v2855_v28 }
 0x7e9   : > { %v5931_v26 = vsel %vm5930_vm3, %v7161_v46, %v5927_v61 }
 0x7ea   : > { %v5936_v6 = vsel %vm5933_vm6, %v5935_v21, %v5931_v26  ;;  %v2860_v59 = vsel %vm2859_vm11, %v7163_v8, %v2856_v1 }
 0x7eb   : > { %v14331_v30 = vmul.f32 %v5936_v6, %v5901_v0  ;;  %v14334_v23 = vmul.f32 %v5936_v6, %v13675_v3  ;;  %v14337_v32 = vmul.f32 %v5936_v6, %v13744_v37  ;;  %v14340_v16 = vmul.f32 %v5936_v6, %v13741_v44 }
 0x7ec   : > { %v14346_v0 = vmul.f32 %v5936_v6, %v13817_v41  ;;  %v14355_v44 = vmul.f32 %v5936_v6, %v13904_v18  ;;  %v14362_v41 = vmul.f32 %v5936_v6, %v13887_v58  ;;  %v14365_v29 = vmul.f32 %v5936_v6, %v13975_v56 }
 0x7ed   : > { %16408 = vst [vmem:[#allocation26_spill] sm:$0xff] %v14331_v30  ;;  %v14343_v38 = vadd.f32 1.0, %v14331_v30  ;;  %v14349_v3 = vadd.f32 1.0, %v14334_v23  ;;  %v14352_v37 = vadd.f32 1.0, %v14337_v32  ;;  %v14358_v52 = vadd.f32 1.0, %v14340_v16 }
 0x7ee   : > { %v14368_v4 = vmul.f32 %v5936_v6, %v14062_v51  ;;  %v14370_v33 = vsel %vm2862_vm14, %v2864_v39, %v2860_v59  ;;  %v14373_v62 = vmul.f32 %v5936_v6, %v14028_v63  ;;  %v14376_v18 = vadd.f32 1.0, %v14346_v0 }
 0x7ef   : > { %7164 = vrcp.f32 %v14343_v38  ;;  %v14380_v24 = vmul.f32 %v5936_v6, %v14158_v47  ;;  %v14383_v58 = vmul.f32 %v5936_v6, %v14211_v9  ;;  %v14386_v56 = vmul.f32 %v5936_v6, %v14187_v45 }
 0x7f0   : > { %7166 = vrcp.f32 %v14349_v3  ;;  %v14390_v51 = vmul.f32 %v5936_v6, %v14276_v57  ;;  %v14393_v63 = vmul.f32 %v5936_v6, %v14318_v50  ;;  %v14396_v20 = vadd.f32 1.0, %v14355_v44 }
 0x7f1   : > { %7168 = vrcp.f32 %v14352_v37  ;;  %v14400_v47 = vmul.f32 %v5936_v6, %v14322_v25  ;;  %v14403_v9 = vadd.f32 1.0, %v14362_v41  ;;  %v14406_v45 = vadd.f32 1.0, %v14365_v29 }
 0x7f2   : > { %7170 = vrcp.f32 %v14358_v52  ;;  %v14409_v57 = vadd.f32 1.0, %v14368_v4  ;;  %v14412_v50 = vadd.f32 1.0, %v14373_v62  ;;  %v5981_v14 = vand.u32 2147483648, %v14349_v3 }
 0x7f3   : > { %16409 = vst [vmem:[#allocation13_spill] sm:$0xff] %v14400_v47  ;;  %v5996_v46 = vand.u32 2147483648, %v14352_v37  ;;  %7172 = vrcp.f32 %v14376_v18  ;;  %v14420_v8 = vadd.f32 1.0, %v14380_v24  ;;  %v14423_v13 = vadd.f32 1.0, %v14383_v58 }
 0x7f4   : > { %v5979_v22 = vand.u32 2147483647, %v14349_v3  ;;  %v6011_v53 = vand.u32 2147483648, %v14358_v52  ;;  %v14430_v42 = vadd.f32 1.0, %v14386_v56  ;;  %v14433_v35 = vadd.f32 1.0, %v14390_v51 }
 0x7f5   : > { %v14417_v25 = vpop.eup %7164  ;;  %v14436_v15 = vadd.f32 1.0, %v14393_v63  ;;  %7174 = vrcp.f32 %v14396_v20  ;;  %v14442_v21 = vadd.f32 1.0, %v14400_v47  ;;  %vm5975_vm5 = vweird.f32 %v14349_v3 }
 0x7f6   : > { %v14427_v55 = vpop.eup %7166  ;;  %v5994_v26 = vand.u32 2147483647, %v14352_v37  ;;  %v5982_v1 = vor.u32 1.1754944e-38, %v5981_v14  ;;  %vm5990_vm15 = vweird.f32 %v14352_v37  ;;  %v14453_v10 = vor.u32 1.1754944e-38, %v5996_v46 }
 0x7f7   : > { %v14439_v61 = vpop.eup %7168  ;;  %v5971_v28 = vmul.f32 %v14427_v55, %v14349_v3  ;;  %v6009_v59 = vand.u32 2147483647, %v14358_v52  ;;  %vm14456_vm4 = vcmp.eq.f32.partialorder %v5979_v22, 8.507059e+37  ;;  %vm6005_vm12 = vweird.f32 %v14358_v52 }
 0x7f8   : > { %v14448_v6 = vpop.eup %7170  ;;  %v5986_v12 = vmul.f32 %v14439_v61, %v14352_v37  ;;  %v14463_v14 = vor.u32 1.1754944e-38, %v6011_v53  ;;  %7176 = vrcp.f32 %v14403_v9  ;;  %vm6020_vm0 = vweird.f32 %v14376_v18 }
 0x7f9   : > { %v5972_v39 = vsub.f32 1.0, %v5971_v28  ;;  %v6001_v40 = vmul.f32 %v14448_v6, %v14358_v52  ;;  %v14466_v19 = vpop.eup %7172  ;;  %v6024_v28 = vand.u32 2147483647, %v14376_v18  ;;  %v6026_v22 = vand.u32 2147483648, %v14376_v18 }
 0x7fa   : > { %v5987_v46 = vsub.f32 1.0, %v5986_v12  ;;  %v6039_v17 = vand.u32 2147483647, %v14396_v20  ;;  %vm5976_vm3 = vweird.f32 %v14427_v55  ;;  %v6016_v53 = vmul.f32 %v14466_v19, %v14376_v18 }
 0x7fb   : > { %v5973_v47 = vmul.f32 %v14427_v55, %v5972_v39  ;;  %v6002_v7 = vsub.f32 1.0, %v6001_v40  ;;  %v14476_v60 = vpop.eup %7174  ;;  %vm6035_vm6 = vweird.f32 %v14396_v20  ;;  %v6041_v11 = vand.u32 2147483648, %v14396_v20  ;;  %vm14499_vm11 = vmor %vm5975_vm5, %vm5976_vm3 }
 0x7fc   : > { %v5988_v12 = vmul.f32 %v14439_v61, %v5987_v46  ;;  %v6056_v49 = vand.u32 2147483648, %v14403_v9  ;;  %7178 = vrcp.f32 %v14406_v45  ;;  %vm14484_vm10 = vcmp.eq.f32.partialorder %v5994_v26, 8.507059e+37 }
 0x7fd   : > { %v5974_v39 = vadd.f32 %v14427_v55, %v5973_v47  ;;  %v6003_v40 = vmul.f32 %v14448_v6, %v6002_v7  ;;  %vm14489_vm1 = vcmp.eq.f32.partialorder %v6009_v59, 8.507059e+37  ;;  %v6017_v46 = vsub.f32 1.0, %v6016_v53 }
 0x7fe   : > { %v6031_v5 = vmul.f32 %v14476_v60, %v14396_v20  ;;  %v5989_v26 = vadd.f32 %v14439_v61, %v5988_v12  ;;  %vm5991_vm14 = vweird.f32 %v14439_v61  ;;  %vm6006_vm7 = vweird.f32 %v14448_v6  ;;  %v7177_v53 = vpop.eup %7176 }
 0x7ff   : > { %vm14506_vm13 = vcmp.eq.f32.partialorder %v6024_v28, 8.507059e+37  ;;  %v6054_v59 = vand.u32 2147483647, %v14403_v9  ;;  %v5978_v3 = vsel %vm14499_vm11, %v14427_v55, %v5974_v39  ;;  %v6004_v54 = vadd.f32 %v14448_v6, %v6003_v40  ;;  %vm14524_vm8 = vmor %vm5990_vm15, %vm5991_vm14 }
 0x800   : > { %v6018_v36 = vmul.f32 %v14466_v19, %v6017_v46  ;;  %v6032_v12 = vsub.f32 1.0, %v6031_v5  ;;  %vm6021_vm5 = vweird.f32 %v14466_v19  ;;  %v6027_v30 = vor.u32 1.1754944e-38, %v6026_v22  ;;  %vm14536_vm2 = vmor %vm6005_vm12, %vm6006_vm7 }
 0x801   : > { %vm14517_vm3 = vcmp.eq.f32.partialorder %v6039_v17, 8.507059e+37  ;;  %v6046_v2 = vmul.f32 %v7177_v53, %v14403_v9  ;;  %v6042_v39 = vor.u32 1.1754944e-38, %v6041_v11  ;;  %vm6050_vm11 = vweird.f32 %v14403_v9  ;;  %vm14556_vm7 = vmor %vm6020_vm0, %vm6021_vm5 }
 0x802   : > { %v6019_v55 = vadd.f32 %v14466_v19, %v6018_v36  ;;  %v6057_v5 = vor.u32 1.1754944e-38, %v6056_v49  ;;  %v7179_v40 = vpop.eup %7178  ;;  %v5983_v17 = vsel %vm14456_vm4, %v5982_v1, %v5978_v3  ;;  %v6033_v22 = vmul.f32 %v14476_v60, %v6032_v12 }
 0x803   : > { %vm6036_vm15 = vweird.f32 %v14476_v60  ;;  %v6047_v36 = vsub.f32 1.0, %v6046_v2  ;;  %vm14542_vm14 = vcmp.eq.f32.partialorder %v6054_v59, 8.507059e+37  ;;  %v5993_v49 = vsel %vm14524_vm8, %v14439_v61, %v5989_v26 }
 0x804   : > { %v6008_v27 = vsel %vm14536_vm2, %v14448_v6, %v6004_v54  ;;  %v6061_v2 = vmul.f32 %v7179_v40, %v14406_v45  ;;  %vm6065_vm4 = vweird.f32 %v14406_v45  ;;  %v6023_v31 = vsel %vm14556_vm7, %v14466_v19, %v6019_v55  ;;  %vm6037_vm8 = vmor %vm6035_vm6, %vm6036_vm15 }
 0x805   : > { %v6034_v61 = vadd.f32 %v14476_v60, %v6033_v22  ;;  %v6048_v1 = vmul.f32 %v7177_v53, %v6047_v36  ;;  %vm6051_vm2 = vweird.f32 %v7177_v53  ;;  %v14567_v54 = vmul.f32 %v5983_v17, %v14334_v23 }
 0x806   : > { %v6062_v18 = vsub.f32 1.0, %v6061_v2  ;;  %v6069_v6 = vand.u32 2147483647, %v14406_v45  ;;  %7180 = vrcp.f32 %v14409_v57  ;;  %v5998_v46 = vsel %vm14484_vm10, %v14453_v10, %v5993_v49  ;;  %vm14584_vm12 = vmor %vm6050_vm11, %vm6051_vm2 }
 0x807   : > { %v6013_v19 = vsel %vm14489_vm1, %v14463_v14, %v6008_v27  ;;  %v6038_v47 = vsel %vm6037_vm8, %v14476_v60, %v6034_v61  ;;  %v6049_v23 = vadd.f32 %v7177_v53, %v6048_v1  ;;  %v6028_v20 = vsel %vm14506_vm13, %v6027_v30, %v6023_v31 }
 0x808   : > { %v6063_v59 = vmul.f32 %v7179_v40, %v6062_v18  ;;  %vm6066_vm0 = vweird.f32 %v7179_v40  ;;  %v6071_v48 = vand.u32 2147483648, %v14406_v45  ;;  %v6043_v43 = vsel %vm14517_vm3, %v6042_v39, %v6038_v47 }
 0x809   : > { %v6053_v60 = vsel %vm14584_vm12, %v7177_v53, %v6049_v23  ;;  %v6084_v10 = vand.u32 2147483647, %v14409_v57  ;;  %7182 = vrcp.f32 %v14412_v50  ;;  %v14596_v30 = vmul.f32 %v5998_v46, %v14337_v32  ;;  %vm6067_vm13 = vmor %vm6065_vm4, %vm6066_vm0 }
 0x80a   : > { %v14599_v9 = vmul.f32 %v6013_v19, %v14340_v16  ;;  %v6064_v14 = vadd.f32 %v7179_v40, %v6063_v59  ;;  %v6086_v7 = vand.u32 2147483648, %v14409_v57  ;;  %v14603_v3 = vmul.f32 %v6028_v20, %v14346_v0 }
 0x80b   : > { %16432 = vst [vmem:[#allocation38_spill] sm:$0xff] %v14596_v30  ;;  %vm6070_vm6 = vcmp.eq.f32.partialorder %v6069_v6, 8.507059e+37  ;;  %vm6080_vm10 = vweird.f32 %v14409_v57  ;;  %7184 = vrcp.f32 %v14420_v8  ;;  %v14610_v32 = vmul.f32 %v6043_v43, %v14355_v44 }
 0x80c   : > { %16433 = vst [vmem:[#allocation35_spill] sm:$0xff] %v14599_v9  ;;  %v7181_v53 = vpop.eup %7180  ;;  %v6058_v16 = vsel %vm14542_vm14, %v6057_v5, %v6053_v60  ;;  %v6068_v12 = vsel %vm6067_vm13, %v7179_v40, %v6064_v14  ;;  %v6072_v28 = vor.u32 1.1754944e-38, %v6071_v48  ;;  %vm14615_vm1 = vcmp.eq.f32.partialorder %v6084_v10, 8.507059e+37 }
 0x80d   : > { %16434 = vst [vmem:[#allocation47_spill] sm:$0xff] %v14603_v3  ;;  %v6076_v0 = vmul.f32 %v7181_v53, %v14409_v57  ;;  %v6099_v45 = vand.u32 2147483647, %v14412_v50  ;;  %v6101_v39 = vand.u32 2147483648, %v14412_v50  ;;  %v6087_v37 = vor.u32 1.1754944e-38, %v6086_v7 }
 0x80e   : > { %16435 = vst [vmem:[#allocation37_spill] sm:$0xff] %v14610_v32  ;;  %v6073_v17 = vsel %vm6070_vm6, %v6072_v28, %v6068_v12  ;;  %v6114_v44 = vand.u32 2147483647, %v14420_v8  ;;  %v6116_v22 = vand.u32 2147483648, %v14420_v8  ;;  %v14624_v5 = vmul.f32 %v6058_v16, %v14362_v41 }
 0x80f   : > { %v7183_v36 = vpop.eup %7182  ;;  %v6077_v40 = vsub.f32 1.0, %v6076_v0  ;;  %vm6095_vm5 = vweird.f32 %v14412_v50  ;;  %7186 = vrcp.f32 %v14423_v13  ;;  %vm6081_vm3 = vweird.f32 %v7181_v53 }
 0x810   : > { %16438 = vst [vmem:[#allocation45_spill] sm:$0xff] %v14624_v5  ;;  %v6091_v11 = vmul.f32 %v7183_v36, %v14412_v50  ;;  %vm6110_vm11 = vweird.f32 %v14420_v8  ;;  %7188 = vrcp.f32 %v14430_v42  ;;  %v14632_v27 = vmul.f32 %v6073_v17, %v14365_v29  ;;  %vm6082_vm7 = vmor %vm6080_vm10, %vm6081_vm3 }
 0x811   : > { %v7185_v49 = vpop.eup %7184  ;;  %v6078_v52 = vmul.f32 %v7181_v53, %v6077_v40  ;;  %vm14634_vm15 = vcmp.eq.f32.partialorder %v6099_v45, 8.507059e+37  ;;  %v6102_v2 = vor.u32 1.1754944e-38, %v6101_v39  ;;  %vm14639_vm14 = vcmp.eq.f32.partialorder %v6114_v44, 8.507059e+37 }
 0x812   : > { %16439 = vst [vmem:[#allocation48_spill] sm:$0xff] %v14632_v27  ;;  %v6092_v31 = vsub.f32 1.0, %v6091_v11  ;;  %v6106_v61 = vmul.f32 %v7185_v49, %v14420_v8  ;;  %v6117_v18 = vor.u32 1.1754944e-38, %v6116_v22  ;;  %v6129_v6 = vand.u32 2147483647, %v14423_v13 }
 0x813   : > { %v6079_v46 = vadd.f32 %v7181_v53, %v6078_v52  ;;  %v6131_v29 = vand.u32 2147483648, %v14423_v13  ;;  %v6144_v19 = vand.u32 2147483647, %v14430_v42  ;;  %7190 = vrcp.f32 %v14433_v35 }
 0x814   : > { %v6093_v47 = vmul.f32 %v7183_v36, %v6092_v31  ;;  %vm6096_vm4 = vweird.f32 %v7183_v36  ;;  %v6107_v23 = vsub.f32 1.0, %v6106_v61  ;;  %vm6125_vm2 = vweird.f32 %v14423_v13 }
 0x815   : > { %v6146_v20 = vand.u32 2147483648, %v14430_v42  ;;  %v7187_v26 = vpop.eup %7186  ;;  %v6083_v59 = vsel %vm6082_vm7, %v7181_v53, %v6079_v46  ;;  %vm6111_vm8 = vweird.f32 %v7185_v49  ;;  %vm6140_vm12 = vweird.f32 %v14430_v42  ;;  %vm14665_vm13 = vmor %vm6095_vm5, %vm6096_vm4 }
 0x816   : > { %v6159_v48 = vand.u32 2147483647, %v14433_v35  ;;  %7192 = vrcp.f32 %v14436_v15  ;;  %v7189_v43 = vpop.eup %7188  ;;  %v6088_v57 = vsel %vm14615_vm1, %v6087_v37, %v6083_v59  ;;  %v6094_v60 = vadd.f32 %v7183_v36, %v6093_v47  ;;  %vm6112_vm1 = vmor %vm6110_vm11, %vm6111_vm8 }
 0x817   : > { %v6108_v10 = vmul.f32 %v7185_v49, %v6107_v23  ;;  %v6121_v14 = vmul.f32 %v7187_v26, %v14423_v13  ;;  %vm14658_vm0 = vcmp.eq.f32.partialorder %v6129_v6, 8.507059e+37  ;;  %v6132_v16 = vor.u32 1.1754944e-38, %v6131_v29 }
 0x818   : > { %v6136_v12 = vmul.f32 %v7189_v43, %v14430_v42  ;;  %vm14670_vm6 = vcmp.eq.f32.partialorder %v6144_v19, 8.507059e+37  ;;  %v6161_v0 = vand.u32 2147483648, %v14433_v35  ;;  %v6098_v55 = vsel %vm14665_vm13, %v7183_v36, %v6094_v60 }
 0x819   : > { %v6109_v45 = vadd.f32 %v7185_v49, %v6108_v10  ;;  %v6122_v39 = vsub.f32 1.0, %v6121_v14  ;;  %v6147_v17 = vor.u32 1.1754944e-38, %v6146_v20  ;;  %vm6155_vm10 = vweird.f32 %v14433_v35  ;;  %v7191_v50 = vpop.eup %7190 }
 0x81a   : > { %v14679_v37 = vmul.f32 %v6088_v57, %v14368_v4  ;;  %vm6126_vm5 = vweird.f32 %v7187_v26  ;;  %v6137_v44 = vsub.f32 1.0, %v6136_v12  ;;  %vm6141_vm3 = vweird.f32 %v7189_v43 }
 0x81b   : > { %v6103_v22 = vsel %vm14634_vm15, %v6102_v2, %v6098_v55  ;;  %v6113_v36 = vsel %vm6112_vm1, %v7185_v49, %v6109_v45  ;;  %v6123_v40 = vmul.f32 %v7187_v26, %v6122_v39  ;;  %v6151_v11 = vmul.f32 %v7191_v50, %v14433_v35  ;;  %vm6127_vm15 = vmor %vm6125_vm2, %vm6126_vm5 }
 0x81c   : > { %16450 = vst [vmem:[#allocation41_spill] sm:$0xff] %v14679_v37  ;;  %vm14687_vm7 = vcmp.eq.f32.partialorder %v6159_v48, 8.507059e+37  ;;  %v7193_v4 = vpop.eup %7192  ;;  %v6118_v31 = vsel %vm14639_vm14, %v6117_v18, %v6113_v36  ;;  %v6138_v8 = vmul.f32 %v7189_v43, %v6137_v44  ;;  %v6162_v61 = vor.u32 1.1754944e-38, %v6161_v0  ;;  %vm6142_vm14 = vmor %vm6140_vm12, %vm6141_vm3 }
 0x81d   : > { %vm6170_vm11 = vweird.f32 %v14436_v15  ;;  %v6124_v6 = vadd.f32 %v7187_v26, %v6123_v40  ;;  %v6152_v46 = vsub.f32 1.0, %v6151_v11  ;;  %v6166_v41 = vmul.f32 %v7193_v4, %v14436_v15 }
 0x81e   : > { %v6174_v49 = vand.u32 2147483647, %v14436_v15  ;;  %v14697_v2 = vmul.f32 %v6103_v22, %v14373_v62  ;;  %v6139_v29 = vadd.f32 %v7189_v43, %v6138_v8  ;;  %vm6156_vm4 = vweird.f32 %v7191_v50 }
 0x81f   : > { %v6176_v1 = vand.u32 2147483648, %v14436_v15  ;;  %v6128_v18 = vsel %vm6127_vm15, %v7187_v26, %v6124_v6  ;;  %v6153_v19 = vmul.f32 %v7191_v50, %v6152_v46  ;;  %v6167_v47 = vsub.f32 1.0, %v6166_v41  ;;  %vm6157_vm12 = vmor %vm6155_vm10, %vm6156_vm4 }
 0x820   : > { %16453 = vst [vmem:[#allocation40_spill] sm:$0xff] %v14697_v2  ;;  %7194 = vrcp.f32 %v14442_v21  ;;  %v14708_v62 = vmul.f32 %v6118_v31, %v14380_v24  ;;  %v6133_v13 = vsel %vm14658_vm0, %v6132_v16, %v6128_v18  ;;  %v6143_v23 = vsel %vm6142_vm14, %v7189_v43, %v6139_v29 }
 0x821   : > { %vm6171_vm2 = vweird.f32 %v7193_v4  ;;  %v6148_v20 = vsel %vm14670_vm6, %v6147_v17, %v6143_v23  ;;  %v6154_v26 = vadd.f32 %v7191_v50, %v6153_v19  ;;  %v6168_v59 = vmul.f32 %v7193_v4, %v6167_v47  ;;  %v16467_v47 = vld [vmem:[#allocation10_spill] sm:$0xff] }
 0x822   : > { %16454 = vst [vmem:[#allocation20_spill] sm:$0xff] %v14708_v62  ;;  %vm14714_vm8 = vcmp.eq.f32.partialorder %v6174_v49, 8.507059e+37  ;;  %v6177_v24 = vor.u32 1.1754944e-38, %v6176_v1  ;;  %v6189_v48 = vand.u32 2147483647, %v14442_v21  ;;  %v6191_v57 = vand.u32 2147483648, %v14442_v21  ;;  %vm6172_vm0 = vmor %vm6170_vm11, %vm6171_vm2 }
 0x823   : > { %v6196_v43 = vmul.f32 %v14417_v25, %v14343_v38  ;;  %v14726_v60 = vmul.f32 %v6133_v13, %v14383_v58  ;;  %v14729_v10 = vmul.f32 %v6148_v20, %v14386_v56  ;;  %v6158_v14 = vsel %vm6157_vm12, %v7191_v50, %v6154_v26  ;;  %v16464_v49 = vld [vmem:[#allocation7_spill] sm:$0xff]  ;;  %v16465_v1 = vld [vmem:[#allocation26_spill] sm:$0xff]  ;;  %v16468_v13 = vld [vmem:[#allocation8_spill] sm:$0xff] }
 0x824   : > { %v6169_v7 = vadd.f32 %v7193_v4, %v6168_v59  ;;  %v6163_v35 = vsel %vm14687_vm7, %v6162_v61, %v6158_v14  ;;  %vm6185_vm13 = vweird.f32 %v14442_v21  ;;  %vm6200_vm6 = vweird.f32 %v14343_v38  ;;  %v16469_v20 = vld [vmem:[#allocation31_spill] sm:$0xff]  ;;  %v16470_v59 = vld [vmem:[#allocation16_spill] sm:$0xff]  ;;  %v16472_v14 = vld [vmem:[#allocation14_spill] sm:$0xff] }
 0x825   : > { %16457 = vst [vmem:[#allocation46_spill] sm:$0xff] %v14726_v60  ;;  %v6197_v53 = vsub.f32 1.0, %v6196_v43  ;;  %vm6201_vm10 = vweird.f32 %v14417_v25  ;;  %v14740_v56 = vmul.f32 %v6163_v35, %v14390_v51  ;;  %v6192_v12 = vor.u32 1.1754944e-38, %v6191_v57 }
 0x826   : > { %16458 = vst [vmem:[#allocation15_spill] sm:$0xff] %v14729_v10  ;;  %v7195_v58 = vpop.eup %7194  ;;  %v6173_v16 = vsel %vm6172_vm0, %v7193_v4, %v6169_v7  ;;  %v6206_v28 = vand.u32 2147483648, %v14343_v38  ;;  %vm14746_vm1 = vcmp.eq.f32.partialorder %v6189_v48, 8.507059e+37  ;;  %v6204_v39 = vand.u32 2147483647, %v14343_v38  ;;  %vm6202_vm3 = vmor %vm6200_vm6, %vm6201_vm10  ;;  %v16463_v4 = vld [vmem:[#allocation19_spill] sm:$0xff] }
 0x827   : > { %16459 = vst [vmem:[#allocation50_spill] sm:$0xff] %v14740_v56  ;;  %v6178_v0 = vsel %vm14714_vm8, %v6177_v24, %v6173_v16  ;;  %v6181_v15 = vmul.f32 %v7195_v58, %v14442_v21  ;;  %v6198_v45 = vmul.f32 %v14417_v25, %v6197_v53  ;;  %vm6186_vm5 = vweird.f32 %v7195_v58  ;;  %v16471_v24 = vld [vmem:[#allocation9_spill] sm:$0xff]  ;;  %v16473_v53 = vld [vmem:[#allocation6_spill] sm:$0xff] }
 0x828   : > { %v14753_v51 = vmul.f32 %v6178_v0, %v14393_v63  ;;  %v6207_v17 = vor.u32 1.1754944e-38, %v6206_v28  ;;  %v6210_v50 = vmax.f32 %v14567_v54, %v14610_v32  ;;  %v6211_v36 = vmax.f32 %v14596_v30, %v14624_v5  ;;  %vm6187_vm11 = vmor %vm6185_vm13, %vm6186_vm5  ;;  %v16474_v28 = vld [vmem:[#allocation5_spill] sm:$0xff] }
 0x829   : > { %v6182_v44 = vsub.f32 1.0, %v6181_v15  ;;  %v6199_v22 = vadd.f32 %v14417_v25, %v6198_v45  ;;  %v6212_v40 = vmax.f32 %v14599_v9, %v14632_v27  ;;  %v6213_v63 = vmax.f32 %v14603_v3, %v14679_v37  ;;  %v16476_v45 = vld [vmem:[#allocation13_spill] sm:$0xff] }
 0x82a   : > { %16462 = vst [vmem:[#allocation51_spill] sm:$0xff] %v14753_v51  ;;  %v6214_v11 = vmax.f32 %v6210_v50, %v14697_v2  ;;  %v14771_v52 = vmul.f32 %v14370_v33, %v13620_v34  ;;  %v14775_v31 = vmul.f32 %v14370_v33, %v16463_v4  ;;  %vm6205_vm7 = vcmp.eq.f32.partialorder %v6204_v39, 8.507059e+37 }
 0x82b   : > { %v6183_v8 = vmul.f32 %v7195_v58, %v6182_v44  ;;  %v6203_v61 = vsel %vm6202_vm3, %v14417_v25, %v6199_v22  ;;  %v6215_v38 = vmax.f32 %v6211_v36, %v14708_v62  ;;  %v6216_v46 = vmax.f32 %v6212_v40, %v14726_v60  ;;  %v16480_v44 = vld [vmem:[#allocation18_spill] sm:$0xff] }
 0x82c   : > { %v6208_v6 = vsel %vm6205_vm7, %v6207_v17, %v6203_v61  ;;  %v6217_v41 = vmax.f32 %v6213_v63, %v14729_v10  ;;  %v14783_v29 = vmul.f32 %v14370_v33, %v16464_v49  ;;  %v6218_v19 = vmax.f32 %v6214_v11, %v14740_v56  ;;  %v16478_v17 = vld [vmem:[#allocation25_spill] sm:$0xff]  ;;  %v16481_v49 = vld [vmem:[#allocation28_spill] sm:$0xff] }
 0x82d   : > { %v6184_v34 = vadd.f32 %v7195_v58, %v6183_v8  ;;  %v14786_v18 = vmul.f32 %v6208_v6, %v16465_v1  ;;  %v14791_v25 = vmul.f32 %v14370_v33, %v16467_v47  ;;  %v14798_v23 = vmul.f32 %v14370_v33, %v16468_v13 }
 0x82e   : > { %v14802_v26 = vmul.f32 %v14370_v33, %v16469_v20  ;;  %v14806_v42 = vmul.f32 %v14370_v33, %v16470_v59  ;;  %v14810_v48 = vmul.f32 %v14370_v33, %v16471_v24  ;;  %v6219_v21 = vmax.f32 %v6215_v38, %v14753_v51 }
 0x82f   : > { %16466 = vst [vmem:[#allocation19_spill] sm:$0xff] %v14786_v18  ;;  %v6188_v57 = vsel %vm6187_vm11, %v7195_v58, %v6184_v34  ;;  %v6221_v43 = vmax.f32 %v6217_v41, %v14786_v18  ;;  %v14816_v7 = vmul.f32 %v14370_v33, %v16472_v14  ;;  %v14822_v16 = vmul.f32 %v14370_v33, %v16473_v53  ;;  %v16475_v58 = vld [vmem:[#allocation43_spill] sm:$0xff] }
 0x830   : > { %v6193_v35 = vsel %vm14746_vm1, %v6192_v12, %v6188_v57  ;;  %v14826_v0 = vmul.f32 %v14370_v33, %v16474_v28  ;;  %v14830_v15 = vmul.f32 %v14370_v33, %v16475_v58  ;;  %v14837_v50 = vmul.f32 %v14370_v33, %v16478_v17  ;;  %v16479_v12 = vld [vmem:[#allocation11_spill] sm:$0xff] }
 0x831   : > { %v14833_v39 = vmul.f32 %v6193_v35, %v16476_v45  ;;  %v14841_v55 = vmul.f32 %v14370_v33, %v16479_v12  ;;  %v14845_v22 = vmul.f32 %v14370_v33, %v16480_v44  ;;  %v14848_v36 = vadd.f32 1.0, %v14771_v52 }
 0x832   : > { %v6222_v63 = vmax.f32 %v6218_v19, %v6219_v21  ;;  %v14852_v11 = vadd.f32 1.0, %v14775_v31  ;;  %v14855_v8 = vadd.f32 1.0, %v14783_v29  ;;  %v14859_v38 = vadd.f32 1.0, %v14791_v25 }
 0x833   : > { %16477 = vst [vmem:[#allocation7_spill] sm:$0xff] %v14833_v39  ;;  %v6220_v40 = vmax.f32 %v6216_v46, %v14833_v39  ;;  %7196 = vrcp.f32 %v14848_v36  ;;  %v14862_v6 = vadd.f32 1.0, %v14798_v23  ;;  %v14867_v46 = vadd.f32 1.0, %v14802_v26 }
 0x834   : > { %7198 = vrcp.f32 %v14852_v11  ;;  %v14875_v34 = vmul.f32 %v14370_v33, %v16481_v49  ;;  %v14880_v19 = vadd.f32 1.0, %v14806_v42  ;;  %v14888_v20 = vadd.f32 1.0, %v14810_v48 }
 0x835   : > { %v6223_v4 = vmax.f32 %v6220_v40, %v6221_v43  ;;  %7200 = vrcp.f32 %v14855_v8  ;;  %v14891_v59 = vadd.f32 1.0, %v14816_v7  ;;  %v14894_v33 = vadd.f32 1.0, %v14822_v16 }
 0x836   : > { %7202 = vrcp.f32 %v14859_v38  ;;  %v14899_v57 = vadd.f32 1.0, %v14826_v0  ;;  %v14902_v21 = vadd.f32 1.0, %v14830_v15  ;;  %v2910_v43 = vand.u32 2147483648, %v14848_v36 }
 0x837   : > { %v6224_v61 = vmax.f32 %v6222_v63, %v6223_v4  ;;  %7204 = vrcp.f32 %v14862_v6  ;;  %v14910_v53 = vadd.f32 1.0, %v14837_v50  ;;  %v14913_v28 = vadd.f32 1.0, %v14841_v55 }
 0x838   : > { %7206 = vrcp.f32 %v14867_v46  ;;  %v14916_v58 = vadd.f32 1.0, %v14845_v22  ;;  %v14919_v45 = vadd.f32 1.0, %v14875_v34  ;;  %vm2904_vm15 = vweird.f32 %v14848_v36 }
 0x839   : > { %6225 = vmax.xlane.f32.xlu1 %v6224_v61  ;;  %v14870_v41 = vpop.eup %7196  ;;  %7208 = vrcp.f32 %v14880_v19  ;;  %v2908_v63 = vand.u32 2147483647, %v14848_v36  ;;  %v2925_v4 = vand.u32 2147483648, %v14852_v11  ;;  %v14933_v39 = vor.u32 1.1754944e-38, %v2910_v43 }
 0x83a   : > { %v14877_v1 = vpop.eup %7198  ;;  %v2900_v47 = vmul.f32 %v14870_v41, %v14848_v36  ;;  %vm2919_vm4 = vweird.f32 %v14852_v11  ;;  %v2938_v56 = vand.u32 2147483647, %v14855_v8  ;;  %v2955_v10 = vand.u32 2147483648, %v14859_v38 }
 0x83b   : > { %v14885_v13 = vpop.eup %7200  ;;  %v2915_v24 = vmul.f32 %v14877_v1, %v14852_v11  ;;  %vm2934_vm14 = vweird.f32 %v14855_v8  ;;  %v2953_v2 = vand.u32 2147483647, %v14859_v38  ;;  %v2926_v37 = vor.u32 1.1754944e-38, %v2925_v4 }
 0x83c   : > { %v2930_v14 = vmul.f32 %v14885_v13, %v14855_v8  ;;  %v14907_v35 = vpop.eup %7202  ;;  %v2901_v12 = vsub.f32 1.0, %v2900_v47  ;;  %v2923_v47 = vand.u32 2147483647, %v14852_v11  ;;  %vm2949_vm2 = vweird.f32 %v14859_v38 }
 0x83d   : > { %v14921_v17 = vpop.eup %7204  ;;  %v2916_v44 = vsub.f32 1.0, %v2915_v24  ;;  %v2945_v40 = vmul.f32 %v14907_v35, %v14859_v38  ;;  %v2940_v24 = vand.u32 2147483648, %v14855_v8  ;;  %vm2905_vm8 = vweird.f32 %v14870_v41 }
 0x83e   : > { %v2931_v61 = vsub.f32 1.0, %v2930_v14  ;;  %v2960_v49 = vmul.f32 %v14921_v17, %v14862_v6  ;;  %v14931_v18 = vpop.eup %7206  ;;  %v2902_v62 = vmul.f32 %v14870_v41, %v2901_v12  ;;  %vm14951_vm12 = vcmp.eq.f32.partialorder %v2908_v63, 8.507059e+37  ;;  %vm14985_vm3 = vmor %vm2904_vm15, %vm2905_vm8 }
 0x83f   : > { %v2946_v51 = vsub.f32 1.0, %v2945_v40  ;;  %v2975_v14 = vmul.f32 %v14931_v18, %v14867_v46  ;;  %v2917_v43 = vmul.f32 %v14877_v1, %v2916_v44  ;;  %v14948_v5 = vpop.eup %7208  ;;  %v2941_v12 = vor.u32 1.1754944e-38, %v2940_v24 }
 0x840   : > { %v2961_v60 = vsub.f32 1.0, %v2960_v49  ;;  %v2932_v27 = vmul.f32 %v14885_v13, %v2931_v61  ;;  %vm2964_vm0 = vweird.f32 %v14862_v6  ;;  %vm14957_vm13 = vcmp.eq.f32.partialorder %v2923_v47, 8.507059e+37 }
 0x841   : > { %v2976_v40 = vsub.f32 1.0, %v2975_v14  ;;  %v2947_v44 = vmul.f32 %v14907_v35, %v2946_v51  ;;  %vm14961_vm6 = vcmp.eq.f32.partialorder %v2938_v56, 8.507059e+37  ;;  %v2956_v14 = vor.u32 1.1754944e-38, %v2955_v10 }
 0x842   : > { %v2962_v32 = vmul.f32 %v14921_v17, %v2961_v60  ;;  %v2968_v63 = vand.u32 2147483647, %v14862_v6  ;;  %v2970_v3 = vand.u32 2147483648, %v14862_v6  ;;  %v2903_v24 = vadd.f32 %v14870_v41, %v2902_v62 }
 0x843   : > { %v2918_v51 = vadd.f32 %v14877_v1, %v2917_v43  ;;  %vm2920_vm10 = vweird.f32 %v14877_v1  ;;  %vm14971_vm1 = vcmp.eq.f32.partialorder %v2953_v2, 8.507059e+37  ;;  %v2990_v56 = vmul.f32 %v14948_v5, %v14880_v19 }
 0x844   : > { %v2933_v10 = vadd.f32 %v14885_v13, %v2932_v27  ;;  %vm2935_vm5 = vweird.f32 %v14885_v13  ;;  %v2977_v60 = vmul.f32 %v14931_v18, %v2976_v40  ;;  %v2983_v9 = vand.u32 2147483647, %v14867_v46  ;;  %vm14994_vm11 = vmor %vm2919_vm4, %vm2920_vm10 }
 0x845   : > { %v2948_v62 = vadd.f32 %v14907_v35, %v2947_v44  ;;  %vm2950_vm7 = vweird.f32 %v14907_v35  ;;  %v2985_v27 = vand.u32 2147483648, %v14867_v46  ;;  %v2991_v43 = vsub.f32 1.0, %v2990_v56  ;;  %vm15012_vm4 = vmor %vm2934_vm14, %vm2935_vm5 }
 0x846   : > { %v2963_v30 = vadd.f32 %v14921_v17, %v2962_v32  ;;  %vm2965_vm15 = vweird.f32 %v14921_v17  ;;  %vm2979_vm8 = vweird.f32 %v14867_v46  ;;  %7210 = vrcp.f32 %v14888_v20 }
 0x847   : > { %v2907_v36 = vsel %vm14985_vm3, %v14870_v41, %v2903_v24  ;;  %v2922_v11 = vsel %vm14994_vm11, %v14877_v1, %v2918_v51  ;;  %vm15016_vm10 = vcmp.eq.f32.partialorder %v2968_v63, 8.507059e+37  ;;  %vm2980_vm9 = vweird.f32 %v14931_v18  ;;  %vm15026_vm3 = vmor %vm2949_vm2, %vm2950_vm7 }
 0x848   : > { %v2937_v41 = vsel %vm15012_vm4, %v14885_v13, %v2933_v10  ;;  %v2978_v8 = vadd.f32 %v14931_v18, %v2977_v60  ;;  %v2992_v24 = vmul.f32 %v14948_v5, %v2991_v43  ;;  %7212 = vrcp.f32 %v14891_v59  ;;  %vm15038_vm14 = vmor %vm2964_vm0, %vm2965_vm15 }
 0x849   : > { %v2952_v63 = vsel %vm15026_vm3, %v14907_v35, %v2948_v62  ;;  %v2971_v38 = vor.u32 1.1754944e-38, %v2970_v3  ;;  %vm15042_vm2 = vcmp.eq.f32.partialorder %v2983_v9, 8.507059e+37  ;;  %v2986_v56 = vor.u32 1.1754944e-38, %v2985_v27  ;;  %vm15062_vm0 = vmor %vm2979_vm8, %vm2980_vm9 }
 0x84a   : > { %v2912_v10 = vsel %vm14951_vm12, %v14933_v39, %v2907_v36  ;;  %v2967_v35 = vsel %vm15038_vm14, %v14921_v17, %v2963_v30  ;;  %vm2994_vm5 = vweird.f32 %v14880_v19  ;;  %7214 = vrcp.f32 %v14894_v33 }
 0x84b   : > { %v2927_v3 = vsel %vm14957_vm13, %v2926_v37, %v2922_v11  ;;  %v2942_v9 = vsel %vm14961_vm6, %v2941_v12, %v2937_v41  ;;  %vm2995_vm12 = vweird.f32 %v14948_v5  ;;  %v2998_v30 = vand.u32 2147483647, %v14880_v19 }
 0x84c   : > { %v15068_v6 = vpop.eup %7210  ;;  %v2957_v37 = vsel %vm14971_vm1, %v2956_v14, %v2952_v63  ;;  %v2982_v17 = vsel %vm15062_vm0, %v14931_v18, %v2978_v8  ;;  %v2993_v49 = vadd.f32 %v14948_v5, %v2992_v24  ;;  %7216 = vrcp.f32 %v14899_v57  ;;  %vm15104_vm9 = vmor %vm2994_vm5, %vm2995_vm12 }
 0x84d   : > { %v15078_v46 = vmul.f32 %v2912_v10, %v14771_v52  ;;  %v2972_v12 = vsel %vm15016_vm10, %v2971_v38, %v2967_v35  ;;  %v3000_v4 = vand.u32 2147483648, %v14880_v19  ;;  %v3005_v61 = vmul.f32 %v15068_v6, %v14888_v20 }
 0x84e   : > { %v15085_v14 = vpop.eup %7212  ;;  %v15088_v47 = vmul.f32 %v2927_v3, %v14775_v31  ;;  %v15091_v18 = vmul.f32 %v2942_v9, %v14783_v29  ;;  %v3015_v60 = vand.u32 2147483648, %v14888_v20  ;;  %7218 = vrcp.f32 %v14902_v21 }
 0x84f   : > { %v15096_v52 = vmul.f32 %v2957_v37, %v14791_v25  ;;  %v2987_v2 = vsel %vm15042_vm2, %v2986_v56, %v2982_v17  ;;  %vm15108_vm13 = vcmp.eq.f32.partialorder %v2998_v30, 8.507059e+37  ;;  %v3020_v62 = vmul.f32 %v15085_v14, %v14891_v59 }
 0x850   : > { %v15114_v25 = vpop.eup %7214  ;;  %v15117_v27 = vmul.f32 %v2972_v12, %v14798_v23  ;;  %v2997_v19 = vsel %vm15104_vm9, %v14948_v5, %v2993_v49  ;;  %v3006_v43 = vsub.f32 1.0, %v3005_v61  ;;  %7220 = vrcp.f32 %v14910_v53 }
 0x851   : > { %v3001_v40 = vor.u32 1.1754944e-38, %v3000_v4  ;;  %v3021_v36 = vsub.f32 1.0, %v3020_v62  ;;  %v3030_v11 = vand.u32 2147483648, %v14891_v59  ;;  %v3035_v32 = vmul.f32 %v15114_v25, %v14894_v33 }
 0x852   : > { %v15126_v44 = vpop.eup %7216  ;;  %v15129_v41 = vmul.f32 %v2987_v2, %v14802_v26  ;;  %vm3009_vm6 = vweird.f32 %v14888_v20  ;;  %v3013_v23 = vand.u32 2147483647, %v14888_v20  ;;  %v15133_v5 = vor.u32 1.1754944e-38, %v3015_v60 }
 0x853   : > { %v3028_v1 = vand.u32 2147483647, %v14891_v59  ;;  %v3002_v8 = vsel %vm15108_vm13, %v3001_v40, %v2997_v19  ;;  %vm3024_vm1 = vweird.f32 %v14891_v59  ;;  %v3036_v24 = vsub.f32 1.0, %v3035_v32 }
 0x854   : > { %v3045_v63 = vand.u32 2147483648, %v14894_v33  ;;  %v3050_v26 = vmul.f32 %v15126_v44, %v14899_v57  ;;  %v15142_v13 = vpop.eup %7218  ;;  %v3007_v38 = vmul.f32 %v15068_v6, %v3006_v43  ;;  %vm3039_vm7 = vweird.f32 %v14894_v33 }
 0x855   : > { %v3043_v51 = vand.u32 2147483647, %v14894_v33  ;;  %7222 = vrcp.f32 %v14913_v28  ;;  %v3022_v56 = vmul.f32 %v15085_v14, %v3021_v36  ;;  %v3031_v10 = vor.u32 1.1754944e-38, %v3030_v11 }
 0x856   : > { %v3051_v35 = vsub.f32 1.0, %v3050_v26  ;;  %v3058_v3 = vand.u32 2147483647, %v14899_v57  ;;  %v15150_v9 = vpop.eup %7220  ;;  %v15153_v39 = vmul.f32 %v3002_v8, %v14806_v42  ;;  %v3037_v30 = vmul.f32 %v15114_v25, %v3036_v24 }
 0x857   : > { %vm3054_vm11 = vweird.f32 %v14899_v57  ;;  %v3065_v37 = vmul.f32 %v15142_v13, %v14902_v21  ;;  %vm3010_vm15 = vweird.f32 %v15068_v6  ;;  %vm15160_vm8 = vcmp.eq.f32.partialorder %v3013_v23, 8.507059e+37 }
 0x858   : > { %vm15164_vm4 = vcmp.eq.f32.partialorder %v3028_v1, 8.507059e+37  ;;  %v3046_v12 = vor.u32 1.1754944e-38, %v3045_v63  ;;  %v3052_v42 = vmul.f32 %v15126_v44, %v3051_v35  ;;  %v3060_v4 = vand.u32 2147483648, %v14899_v57  ;;  %vm15194_vm0 = vmor %vm3009_vm6, %vm3010_vm15 }
 0x859   : > { %v3008_v61 = vadd.f32 %v15068_v6, %v3007_v38  ;;  %vm15171_vm10 = vcmp.eq.f32.partialorder %v3043_v51, 8.507059e+37  ;;  %v3066_v2 = vsub.f32 1.0, %v3065_v37  ;;  %v3073_v31 = vand.u32 2147483647, %v14902_v21 }
 0x85a   : > { %v3080_v29 = vmul.f32 %v15150_v9, %v14910_v53  ;;  %v3023_v62 = vadd.f32 %v15085_v14, %v3022_v56  ;;  %vm3025_vm3 = vweird.f32 %v15085_v14  ;;  %vm15180_vm14 = vcmp.eq.f32.partialorder %v3058_v3, 8.507059e+37 }
 0x85b   : > { %vm3069_vm2 = vweird.f32 %v14902_v21  ;;  %v15185_v43 = vpop.eup %7222  ;;  %v3038_v40 = vadd.f32 %v15114_v25, %v3037_v30  ;;  %vm3040_vm5 = vweird.f32 %v15114_v25  ;;  %v3067_v36 = vmul.f32 %v15142_v13, %v3066_v2  ;;  %vm15208_vm9 = vmor %vm3024_vm1, %vm3025_vm3 }
 0x85c   : > { %v3081_v11 = vsub.f32 1.0, %v3080_v29  ;;  %v3053_v23 = vadd.f32 %v15126_v44, %v3052_v42  ;;  %vm3055_vm12 = vweird.f32 %v15126_v44  ;;  %v3075_v1 = vand.u32 2147483648, %v14902_v21  ;;  %vm15222_vm6 = vmor %vm3039_vm7, %vm3040_vm5 }
 0x85d   : > { %v3095_v8 = vmul.f32 %v15185_v43, %v14913_v28  ;;  %v3012_v24 = vsel %vm15194_vm0, %v15068_v6, %v3008_v61  ;;  %v3061_v63 = vor.u32 1.1754944e-38, %v3060_v4  ;;  %vm15212_vm13 = vcmp.eq.f32.partialorder %v3073_v31, 8.507059e+37  ;;  %vm15233_vm1 = vmor %vm3054_vm11, %vm3055_vm12 }
 0x85e   : > { %v3088_v38 = vand.u32 2147483647, %v14910_v53  ;;  %v3027_v51 = vsel %vm15208_vm9, %v15085_v14, %v3023_v62  ;;  %v3082_v59 = vmul.f32 %v15150_v9, %v3081_v11  ;;  %7224 = vrcp.f32 %v14916_v58 }
 0x85f   : > { %v3096_v56 = vsub.f32 1.0, %v3095_v8  ;;  %v3042_v35 = vsel %vm15222_vm6, %v15114_v25, %v3038_v40  ;;  %v3068_v33 = vadd.f32 %v15142_v13, %v3067_v36  ;;  %vm3070_vm7 = vweird.f32 %v15142_v13 }
 0x860   : > { %v3090_v14 = vand.u32 2147483648, %v14910_v53  ;;  %v3057_v30 = vsel %vm15233_vm1, %v15126_v44, %v3053_v23  ;;  %v3076_v37 = vor.u32 1.1754944e-38, %v3075_v1  ;;  %vm3084_vm15 = vweird.f32 %v14910_v53  ;;  %vm15256_vm11 = vmor %vm3069_vm2, %vm3070_vm7 }
 0x861   : > { %v3097_v25 = vmul.f32 %v15185_v43, %v3096_v56  ;;  %v3017_v57 = vsel %vm15160_vm8, %v15133_v5, %v3012_v24  ;;  %v3032_v42 = vsel %vm15164_vm4, %v3031_v10, %v3027_v51  ;;  %v3103_v4 = vand.u32 2147483647, %v14913_v28 }
 0x862   : > { %7226 = vrcp.f32 %v14919_v45  ;;  %v3047_v61 = vsel %vm15171_vm10, %v3046_v12, %v3042_v35  ;;  %v3083_v2 = vadd.f32 %v15150_v9, %v3082_v59  ;;  %vm3085_vm8 = vweird.f32 %v15150_v9 }
 0x863   : > { %vm15262_vm3 = vcmp.eq.f32.partialorder %v3088_v38, 8.507059e+37  ;;  %v3062_v10 = vsel %vm15180_vm14, %v3061_v63, %v3057_v30  ;;  %v3072_v17 = vsel %vm15256_vm11, %v15142_v13, %v3068_v33  ;;  %v3091_v21 = vor.u32 1.1754944e-38, %v3090_v14  ;;  %vm15285_vm10 = vmor %vm3084_vm15, %vm3085_vm8 }
 0x864   : > { %v3105_v49 = vand.u32 2147483648, %v14913_v28  ;;  %v7225_v12 = vpop.eup %7224  ;;  %v15273_v60 = vmul.f32 %v3017_v57, %v14810_v48  ;;  %v15276_v31 = vmul.f32 %v3032_v42, %v14816_v7  ;;  %v3098_v29 = vadd.f32 %v15185_v43, %v3097_v25 }
 0x865   : > { %vm3100_vm4 = vweird.f32 %v15185_v43  ;;  %v15281_v62 = vmul.f32 %v3047_v61, %v14822_v16  ;;  %vm3099_vm14 = vweird.f32 %v14913_v28  ;;  %vm15290_vm2 = vcmp.eq.f32.partialorder %v3103_v4, 8.507059e+37 }
 0x866   : > { %v3110_v7 = vmul.f32 %v7225_v12, %v14916_v58  ;;  %v15296_v19 = vmul.f32 %v3062_v10, %v14826_v0  ;;  %v3077_v16 = vsel %vm15212_vm13, %v3076_v37, %v3072_v17  ;;  %v3087_v53 = vsel %vm15285_vm10, %v15150_v9, %v3083_v2  ;;  %vm15304_vm5 = vmor %vm3099_vm14, %vm3100_vm4 }
 0x867   : > { %v3120_v40 = vand.u32 2147483648, %v14916_v58  ;;  %v3106_v11 = vor.u32 1.1754944e-38, %v3105_v49  ;;  %vm3114_vm0 = vweird.f32 %v14916_v58  ;;  %v3118_v0 = vand.u32 2147483647, %v14916_v58 }
 0x868   : > { %v7227_v36 = vpop.eup %7226  ;;  %v3111_v32 = vsub.f32 1.0, %v3110_v7  ;;  %v3102_v23 = vsel %vm15304_vm5, %v15185_v43, %v3098_v29  ;;  %v3139_v9 = vmax.f32 %v15078_v46, %v15117_v27  ;;  %v3140_v8 = vmax.f32 %v15088_v47, %v15129_v41 }
 0x869   : > { %v3125_v1 = vmul.f32 %v7227_v36, %v14919_v45  ;;  %v15319_v24 = vmul.f32 %v3077_v16, %v14830_v15  ;;  %v3092_v20 = vsel %vm15262_vm3, %v3091_v21, %v3087_v53  ;;  %vm3115_vm12 = vweird.f32 %v7225_v12 }
 0x86a   : > { %v3112_v63 = vmul.f32 %v7225_v12, %v3111_v32  ;;  %v3121_v26 = vor.u32 1.1754944e-38, %v3120_v40  ;;  %v3133_v43 = vand.u32 2147483647, %v14919_v45  ;;  %v3141_v51 = vmax.f32 %v15091_v18, %v15153_v39  ;;  %vm3116_vm9 = vmor %vm3114_vm0, %vm3115_vm12 }
 0x86b   : > { %v3126_v38 = vsub.f32 1.0, %v3125_v1  ;;  %v3107_v6 = vsel %vm15290_vm2, %v3106_v11, %v3102_v23  ;;  %v3135_v56 = vand.u32 2147483648, %v14919_v45  ;;  %v3142_v15 = vmax.f32 %v15096_v52, %v15273_v60 }
 0x86c   : > { %v3113_v59 = vadd.f32 %v7225_v12, %v3112_v63  ;;  %vm3130_vm13 = vweird.f32 %v7227_v36  ;;  %v3143_v3 = vmax.f32 %v3139_v9, %v15276_v31  ;;  %v3144_v33 = vmax.f32 %v3140_v8, %v15281_v62 }
 0x86d   : > { %v3127_v35 = vmul.f32 %v7227_v36, %v3126_v38  ;;  %v15336_v14 = vmul.f32 %v3092_v20, %v14837_v50  ;;  %vm3119_vm6 = vcmp.eq.f32.partialorder %v3118_v0, 8.507059e+37  ;;  %vm3129_vm1 = vweird.f32 %v14919_v45 }
 0x86e   : > { %v3117_v30 = vsel %vm3116_vm9, %v7225_v12, %v3113_v59  ;;  %v15340_v37 = vmul.f32 %v3107_v6, %v14841_v55  ;;  %v3145_v58 = vmax.f32 %v3141_v51, %v15296_v19  ;;  %vm3131_vm7 = vmor %vm3129_vm1, %vm3130_vm13  ;;  %vm3134_vm15 = vcmp.eq.f32.partialorder %v3133_v43, 8.507059e+37 }
 0x86f   : > { %v3122_v25 = vsel %vm3119_vm6, %v3121_v26, %v3117_v30  ;;  %v3128_v57 = vadd.f32 %v7227_v36, %v3127_v35  ;;  %v3136_v42 = vor.u32 1.1754944e-38, %v3135_v56  ;;  %v3146_v4 = vmax.f32 %v3142_v15, %v15319_v24 }
 0x870   : > { %v15345_v61 = vmul.f32 %v3122_v25, %v14845_v22  ;;  %v3147_v44 = vmax.f32 %v3143_v3, %v15336_v14  ;;  %v3148_v45 = vmax.f32 %v3144_v33, %v15340_v37 }
 0x871   : > { %v3132_v50 = vsel %vm3131_vm7, %v7227_v36, %v3128_v57 }
 0x872   : > { %v3137_v2 = vsel %vm3134_vm15, %v3136_v42, %v3132_v50  ;;  %v3149_v5 = vmax.f32 %v3145_v58, %v15345_v61  ;;  %v3151_v17 = vmax.f32 %v3147_v44, %v3148_v45  ;;  %v16538_v50 = vld [vmem:[#allocation32_spill] sm:$0xff]  ;;  %v16539_v44 = vld [vmem:[#allocation33_spill] sm:$0xff] }
 0x873   : > { %v15350_v55 = vmul.f32 %v3137_v2, %v14875_v34  ;;  %vm16540_vm14 = vcmp.eq.s32.totalorder %v16538_v50, %v16539_v44  ;;  %v16541_v2 = vld [vmem:[#allocation34_spill] sm:$0xff] }
 0x874   : > { %vm16542_vm2 = vcmp.eq.s32.totalorder %v16541_v2, %v16539_v44 }
 0x875   : > { %v3150_v10 = vmax.f32 %v3146_v4, %v15350_v55 }
 0x877   : > { %v3152_v21 = vmax.f32 %v3149_v5, %v3150_v10  ;;  %v16547_v10 = vld [vmem:[#allocation17_spill] sm:$0xff] }
 0x878   : > { %vm16548_vm12 = vcmp.eq.s32.totalorder %v16547_v10, %v16539_v44 }
 0x879   : > { %v3153_v49 = vmax.f32 %v3151_v17, %v3152_v21 }
 0x87b   : > { %3154 = vmax.xlane.f32.xlu2 %v3153_v49  ;;  %v16549_v49 = vld [vmem:[#allocation42_spill] sm:$0xff] }
 0x87c   : > { %vm16550_vm13 = vcmp.eq.s32.totalorder %v16549_v49, %v16539_v44 }
 0x8ac   : > { %v6226_v12 = vpop.xlane.xlu1 %6225 }
 0x8ad   : > { %v6227_v22 = vrot.slane %v6226_v12, 4 }
 0x8af   : > { %v6228_v29 = vmax.f32 %v6226_v12, %v6227_v22 }
 0x8b1   : > { %v6229_v13 = vrot.slane %v6228_v29, 2 }
 0x8b3   : > { %v6230_v16 = vmax.f32 %v6228_v29, %v6229_v13  ;;  %v16553_v29 = vld [vmem:[#allocation44_spill] sm:$0xff] }
 0x8b4   : > { %vm16554_vm1 = vcmp.eq.s32.totalorder %v16553_v29, %v16539_v44 }
 0x8b5   : > { %v6231_v36 = vrot.slane %v6230_v16, 1 }
 0x8b7   : > { %v6232_v11 = vmax.f32 %v6230_v16, %v6231_v36 }
 0x8ee   : > { %v3155_v48 = vpop.xlane.xlu2 %3154 }
 0x8ef   : > { %v3156_v7 = vrot.slane %v3155_v48, 4 }
 0x8f1   : > { %v3157_v53 = vmax.f32 %v3155_v48, %v3156_v7  ;;  %v16555_v7 = vld [vmem:[#allocation49_spill] sm:$0xff] }
 0x8f2   : > { %vm16556_vm7 = vcmp.eq.s32.totalorder %v16555_v7, %v16539_v44 }
 0x8f3   : > { %v3158_v40 = vrot.slane %v3157_v53, 2 }
 0x8f5   : > { %v3159_v34 = vmax.f32 %v3157_v53, %v3158_v40  ;;  %v16557_v40 = vld [vmem:[#allocation21_spill] sm:$0xff] }
 0x8f6   : > { %vm16558_vm15 = vcmp.eq.s32.totalorder %v16557_v40, %v16539_v44 }
 0x8f7   : > { %v3160_v28 = vrot.slane %v3159_v34, 1 }
 0x8f9   : > { %v3161_v32 = vmax.f32 %v3159_v34, %v3160_v28 }
 0x8fb   : > { %6523 = vpush %v3161_v32 }
 0x8fc   : > { %6525 = vpush %v6232_v11 }
 0x92c   : > { %s6524_s23 = spop %6523 }
 0x92d   : > { %v3163_v0 = vstv %s6524_s23  ;;  %s6526_s24 = spop %6525 }
 0x92e   : > { %7228 = vrcp.f32 %v3163_v0  ;;  %v6234_v23 = vstv %s6526_s24  ;;  %v3175_v26 = vand.u32 2147483648, %v3163_v0  ;;  %v3173_v43 = vand.u32 2147483647, %v3163_v0 }
 0x92f   : > { %7230 = vrcp.f32 %v6234_v23  ;;  %vm3169_vm8 = vweird.f32 %v3163_v0  ;;  %vm6240_vm9 = vweird.f32 %v6234_v23 }
 0x930   : > { %v3176_v59 = vor.u32 1.1754944e-38, %v3175_v26  ;;  %vm3174_vm4 = vcmp.eq.f32.partialorder %v3173_v43, 8.507059e+37 }
 0x934   : > { %v7229_v1 = vpop.eup %7228 }
 0x935   : > { %v3165_v9 = vmul.f32 %v7229_v1, %v3163_v0  ;;  %v7231_v8 = vpop.eup %7230  ;;  %vm3170_vm11 = vweird.f32 %v7229_v1  ;;  %v16561_v0 = vld [vmem:[#allocation29_spill] sm:$0xff] }
 0x936   : > { %v6236_v63 = vmul.f32 %v7231_v8, %v6234_v23  ;;  %vm3171_vm3 = vmor %vm3169_vm8, %vm3170_vm11  ;;  %vm6241_vm10 = vweird.f32 %v7231_v8 }
 0x937   : > { %v3166_v20 = vsub.f32 1.0, %v3165_v9  ;;  %vm15391_vm6 = vmor %vm6240_vm9, %vm6241_vm10  ;;  %v16565_v9 = vld [vmem:[#allocation30_spill] sm:$0xff] }
 0x938   : > { %v6237_v51 = vsub.f32 1.0, %v6236_v63  ;;  %vm16566_vm10 = vcmp.eq.s32.totalorder %v16565_v9, %v16539_v44 }
 0x939   : > { %v3167_v38 = vmul.f32 %v7229_v1, %v3166_v20  ;;  %v16567_v20 = vld [vmem:[#allocation27_spill] sm:$0xff] }
 0x93a   : > { %v6238_v35 = vmul.f32 %v7231_v8, %v6237_v51  ;;  %v16572_v51 = vld [vmem:[#allocation35_spill] sm:$0xff] }
 0x93b   : > { %v3168_v6 = vadd.f32 %v7229_v1, %v3167_v38  ;;  %v16570_v38 = vld [vmem:[#allocation24_spill] sm:$0xff] }
 0x93c   : > { %v6239_v42 = vadd.f32 %v7231_v8, %v6238_v35  ;;  %v16576_v35 = vld [vmem:[#allocation37_spill] sm:$0xff] }
 0x93d   : > { %v3172_v56 = vsel %vm3171_vm3, %v7229_v1, %v3168_v6  ;;  %vm16562_vm3 = vcmp.eq.s32.totalorder %v16561_v0, %v16539_v44  ;;  %v16563_v1 = vld [vmem:[#allocation22_spill] sm:$0xff] }
 0x93e   : > { %v3177_v15 = vsel %vm3174_vm4, %v3176_v59, %v3172_v56  ;;  %vm16564_vm4 = vcmp.eq.s32.totalorder %v16563_v1, %v16539_v44  ;;  %v16573_v59 = vld [vmem:[#allocation12_spill] sm:$0xff]  ;;  %v16575_v56 = vld [vmem:[#allocation47_spill] sm:$0xff] }
 0x93f   : > { %v3179_v3 = vmul.f32 %v3177_v15, %v15078_v46  ;;  %v3180_v33 = vmul.f32 %v3177_v15, %v15088_v47  ;;  %v3181_v30 = vmul.f32 %v3177_v15, %v15091_v18  ;;  %v3182_v25 = vmul.f32 %v3177_v15, %v15096_v52  ;;  %v16543_v47 = vld [vmem:[#allocation36_spill] sm:$0xff] }
 0x940   : > { %v3183_v57 = vmul.f32 %v3177_v15, %v15117_v27  ;;  %v3184_v58 = vmul.f32 %v3177_v15, %v15129_v41  ;;  %v3185_v4 = vmul.f32 %v3177_v15, %v15153_v39  ;;  %vm16544_vm5 = vcmp.eq.s32.totalorder %v16543_v47, %v16539_v44  ;;  %v16545_v27 = vld [vmem:[#allocation39_spill] sm:$0xff] }
 0x941   : > { %v3195_v45 = vsel %vm16540_vm14, 1.0, %v3179_v3  ;;  %v3196_v46 = vsel %vm16542_vm2, 1.0, %v3180_v33  ;;  %v3197_v18 = vsel %vm16544_vm5, 1.0, %v3181_v30  ;;  %v3186_v52 = vmul.f32 %v3177_v15, %v15273_v60  ;;  %v16578_v30 = vld [vmem:[#allocation45_spill] sm:$0xff] }
 0x942   : > { %vm16546_vm0 = vcmp.eq.s32.totalorder %v16545_v27, %v16539_v44  ;;  %3211 = vst [vmem:[%s15377_s27] sm:$0xff] %v3195_v45  ;;  %v6246_v39 = vand.u32 2147483648, %v6234_v23  ;;  %v3187_v5 = vmul.f32 %v3177_v15, %v15276_v31  ;;  %v3199_v17 = vsel %vm16548_vm12, 1.0, %v3183_v57  ;;  %v16582_v45 = vld [vmem:[#allocation41_spill] sm:$0xff] }
 0x943   : > { %v3198_v41 = vsel %vm16546_vm0, 1.0, %v3182_v25  ;;  %3212 = vst [vmem:[%s15377_s27 + $0x8] sm:$0xff] %v3196_v46  ;;  %v6244_v60 = vand.u32 2147483647, %v6234_v23  ;;  %v3188_v21 = vmul.f32 %v3177_v15, %v15281_v62  ;;  %v3200_v12 = vsel %vm16550_vm13, 1.0, %v3184_v58  ;;  %v16580_v58 = vld [vmem:[#allocation48_spill] sm:$0xff] }
 0x944   : > { %3213 = vst [vmem:[%s15377_s27 + $0x10] sm:$0xff] %v3197_v18  ;;  %v3189_v31 = vmul.f32 %v3177_v15, %v15296_v19  ;;  %v3201_v13 = vsel %vm16554_vm1, 1.0, %v3185_v4  ;;  %v6243_v62 = vsel %vm15391_vm6, %v7231_v8, %v6239_v42  ;;  %v3190_v48 = vmul.f32 %v3177_v15, %v15319_v24  ;;  %v16559_v24 = vld [vmem:[#allocation23_spill] sm:$0xff]  ;;  %v16584_v18 = vld [vmem:[#allocation40_spill] sm:$0xff] }
 0x945   : > { %3214 = vst [vmem:[%s15377_s27 + $0x18] sm:$0xff] %v3198_v41  ;;  %v3202_v16 = vsel %vm16556_vm7, 1.0, %v3186_v52  ;;  %v6247_v53 = vor.u32 1.1754944e-38, %v6246_v39  ;;  %v3191_v19 = vmul.f32 %v3177_v15, %v15336_v14  ;;  %v3203_v36 = vsel %vm16558_vm15, 1.0, %v3187_v5  ;;  %v16586_v41 = vld [vmem:[#allocation20_spill] sm:$0xff]  ;;  %v16588_v5 = vld [vmem:[#allocation46_spill] sm:$0xff] }
 0x946   : > { %3215 = vst [vmem:[%s15377_s27 + $0x20] sm:$0xff] %v3199_v17  ;;  %vm6245_vm11 = vcmp.eq.f32.partialorder %v6244_v60, 8.507059e+37  ;;  %v3192_v34 = vmul.f32 %v3177_v15, %v15340_v37  ;;  %vm16560_vm8 = vcmp.eq.s32.totalorder %v16559_v24, %v16539_v44  ;;  %v3193_v32 = vmul.f32 %v3177_v15, %v15345_v61 }
 0x947   : > { %3216 = vst [vmem:[%s15377_s27 + $0x28] sm:$0xff] %v3200_v12  ;;  %v3204_v28 = vsel %vm16560_vm8, 1.0, %v3188_v21  ;;  %v6248_v11 = vsel %vm6245_vm11, %v6247_v53, %v6243_v62  ;;  %v3205_v14 = vsel %vm16562_vm3, 1.0, %v3189_v31  ;;  %v3194_v23 = vmul.f32 %v3177_v15, %v15350_v55  ;;  %v16569_v55 = vld [vmem:[#allocation38_spill] sm:$0xff]  ;;  %v16594_v31 = vld [vmem:[#allocation51_spill] sm:$0xff] }
 0x948   : > { %3217 = vst [vmem:[%s15377_s27 + $0x30] sm:$0xff] %v3201_v13  ;;  %v3206_v37 = vsel %vm16564_vm4, 1.0, %v3190_v48  ;;  %v3207_v8 = vsel %vm16566_vm10, 1.0, %v3191_v19  ;;  %v6250_v61 = vmul.f32 %v6248_v11, %v14567_v54  ;;  %vm16568_vm14 = vcmp.eq.s32.totalorder %v16567_v20, %v16539_v44  ;;  %v16595_v62 = vld [vmem:[#allocation7_spill] sm:$0xff] }
 0x949   : > { %3218 = vst [vmem:[%s15377_s27 + $0x38] sm:$0xff] %v3202_v16  ;;  %v3208_v63 = vsel %vm16568_vm14, 1.0, %v3192_v34  ;;  %v6251_v26 = vmul.f32 %v6248_v11, %v16569_v55  ;;  %vm16571_vm2 = vcmp.eq.s32.totalorder %v16570_v38, %v16539_v44  ;;  %v6252_v6 = vmul.f32 %v6248_v11, %v16572_v51  ;;  %v16596_v16 = vld [vmem:[#allocation19_spill] sm:$0xff] }
 0x94a   : > { %3219 = vst [vmem:[%s15377_s27 + $0x40] sm:$0xff] %v3203_v36  ;;  %v3209_v43 = vsel %vm16571_vm2, 1.0, %v3193_v32  ;;  %vm16574_vm5 = vcmp.eq.s32.totalorder %v16573_v59, %v16539_v44  ;;  %v6253_v15 = vmul.f32 %v6248_v11, %v16575_v56  ;;  %v6254_v3 = vmul.f32 %v6248_v11, %v16576_v35 }
 0x94b   : > { %3220 = vst [vmem:[%s15377_s27 + $0x48] sm:$0xff] %v3204_v28  ;;  %v3210_v54 = vsel %vm16574_vm5, 1.0, %v3194_v23  ;;  %vm16577_vm0 = vcmp.eq.s32.totalorder %v16538_v50, %v16539_v44  ;;  %v6255_v25 = vmul.f32 %v6248_v11, %v16578_v30  ;;  %vm16579_vm12 = vcmp.eq.s32.totalorder %v16541_v2, %v16539_v44 }
 0x94c   : > { %3221 = vst [vmem:[%s15377_s27 + $0x50] sm:$0xff] %v3205_v14  ;;  %v6266_v33 = vsel %vm16577_vm0, 1.0, %v6250_v61  ;;  %v6267_v57 = vsel %vm16579_vm12, 1.0, %v6251_v26  ;;  %v6256_v42 = vmul.f32 %v6248_v11, %v16580_v58  ;;  %vm16581_vm9 = vcmp.eq.s32.totalorder %v16543_v47, %v16539_v44 }
 0x94d   : > { %3222 = vst [vmem:[%s15377_s27 + $0x58] sm:$0xff] %v3206_v37  ;;  %v6268_v4 = vsel %vm16581_vm9, 1.0, %v6252_v6  ;;  %v6257_v50 = vmul.f32 %v6248_v11, %v16582_v45  ;;  %vm16583_vm13 = vcmp.eq.s32.totalorder %v16545_v27, %v16539_v44  ;;  %v6258_v2 = vmul.f32 %v6248_v11, %v16584_v18 }
 0x94e   : > { %3223 = vst [vmem:[%s15377_s27 + $0x60] sm:$0xff] %v3207_v8  ;;  %v6269_v46 = vsel %vm16583_vm13, 1.0, %v6253_v15  ;;  %vm16585_vm6 = vcmp.eq.s32.totalorder %v16547_v10, %v16539_v44  ;;  %v6259_v47 = vmul.f32 %v6248_v11, %v16586_v41  ;;  %vm16587_vm1 = vcmp.eq.s32.totalorder %v16549_v49, %v16539_v44  ;;  %v16590_v10 = vld [vmem:[#allocation15_spill] sm:$0xff]  ;;  %v16592_v49 = vld [vmem:[#allocation50_spill] sm:$0xff] }
 0x94f   : > { %3224 = vst [vmem:[%s15377_s27 + $0x68] sm:$0xff] %v3208_v63  ;;  %v6270_v52 = vsel %vm16585_vm6, 1.0, %v6254_v3  ;;  %v6271_v39 = vsel %vm16587_vm1, 1.0, %v6255_v25  ;;  %v6260_v27 = vmul.f32 %v6248_v11, %v16588_v5  ;;  %vm16589_vm7 = vcmp.eq.s32.totalorder %v16553_v29, %v16539_v44 }
 0x950   : > { %3225 = vst [vmem:[%s15377_s27 + $0x70] sm:$0xff] %v3209_v43  ;;  %v6272_v17 = vsel %vm16589_vm7, 1.0, %v6256_v42  ;;  %v6261_v60 = vmul.f32 %v6248_v11, %v16590_v10  ;;  %vm16591_vm15 = vcmp.eq.s32.totalorder %v16555_v7, %v16539_v44  ;;  %v6262_v12 = vmul.f32 %v6248_v11, %v16592_v49 }
 0x951   : > { %3226 = vst [vmem:[%s15377_s27 + $0x78] sm:$0xff] %v3210_v54  ;;  %v6273_v21 = vsel %vm16591_vm15, 1.0, %v6257_v50  ;;  %vm16593_vm11 = vcmp.eq.s32.totalorder %v16557_v40, %v16539_v44  ;;  %v6263_v29 = vmul.f32 %v6248_v11, %v16594_v31  ;;  %v6275_v13 = vsel %vm16560_vm8, 1.0, %v6259_v47 }
 0x952   : > { %6466 = vst [vmem:[%s15377_s27 + $0x80] sm:$0xff] %v6266_v33  ;;  %v6274_v22 = vsel %vm16593_vm11, 1.0, %v6258_v2  ;;  %v6264_v48 = vmul.f32 %v6248_v11, %v16595_v62  ;;  %v6276_v7 = vsel %vm16562_vm3, 1.0, %v6260_v27  ;;  %v6265_v53 = vmul.f32 %v6248_v11, %v16596_v16 }
 0x953   : > { %6467 = vst [vmem:[%s15377_s27 + $0x88] sm:$0xff] %v6267_v57  ;;  %v6277_v19 = vsel %vm16564_vm4, 1.0, %v6261_v60  ;;  %v6278_v40 = vsel %vm16566_vm10, 1.0, %v6262_v12  ;;  %v6279_v36 = vsel %vm16568_vm14, 1.0, %v6263_v29 }
 0x954   : > { %6468 = vst [vmem:[%s15377_s27 + $0x90] sm:$0xff] %v6268_v4  ;;  %v6280_v34 = vsel %vm16571_vm2, 1.0, %v6264_v48  ;;  %v6281_v24 = vsel %vm16574_vm5, 1.0, %v6265_v53 }
 0x955   : > { %6469 = vst [vmem:[%s15377_s27 + $0x98] sm:$0xff] %v6269_v46 }
 0x956   : > { %6470 = vst [vmem:[%s15377_s27 + $0xa0] sm:$0xff] %v6270_v52 }
 0x957   : > { %6471 = vst [vmem:[%s15377_s27 + $0xa8] sm:$0xff] %v6271_v39 }
 0x958   : > { %6472 = vst [vmem:[%s15377_s27 + $0xb0] sm:$0xff] %v6272_v17 }
 0x959   : > { %6473 = vst [vmem:[%s15377_s27 + $0xb8] sm:$0xff] %v6273_v21 }
 0x95a   : > { %6474 = vst [vmem:[%s15377_s27 + $0xc0] sm:$0xff] %v6274_v22 }
 0x95b   : > { %6475 = vst [vmem:[%s15377_s27 + $0xc8] sm:$0xff] %v6275_v13 }
 0x95c   : > { %6476 = vst [vmem:[%s15377_s27 + $0xd0] sm:$0xff] %v6276_v7 }
 0x95d   : > { %6477 = vst [vmem:[%s15377_s27 + $0xd8] sm:$0xff] %v6277_v19 }
 0x95e   : > { %6478 = vst [vmem:[%s15377_s27 + $0xe0] sm:$0xff] %v6278_v40 }
 0x95f   : > { %6479 = vst [vmem:[%s15377_s27 + $0xe8] sm:$0xff] %v6279_v36 }
 0x960   : > { %6480 = vst [vmem:[%s15377_s27 + $0xf0] sm:$0xff] %v6280_v34 }
 0x961   : > { %6481 = vst [vmem:[%s15377_s27 + $0xf8] sm:$0xff] %v6281_v24 }
 0x962   : > { %7259 = shalt.err (!%p7256_p3)
}
 0x963   : > { %s7296_s21 = smov 128   ;;  %s7297_s22 = smov 8  }
 0x964   : > { %6527 = dma.vmem_to_hbm [thread:$0]  (%p7346_p5), %s6314_s3, 4096, %s6316_s4, %s6300_s5, %s7296_s21, %s7296_s21, %s7297_s22  }
 0x965 PF: > { %p6533_p4 = scmp.ge.s32.totalorder %s7294_s9, 2  ;;  %s6330_s23 = sand.u32 1, %s7282_s6  }
 0x966   : > { %s6331_s24 = scalar_lea.sflag [#allocation3], %s6330_s23 }
 0x967   : > { %p6530_p7 = pnand %p6533_p4, %p7350_p6 }
 0x969   : > { %p6531_p8 = pneg %p6530_p7 }
 0x96b   : > { %7277 = dma.done.wait (%p6531_p8), %s6331_s24, 4096  }
 0x96c   : > { %7279 = vsyncadd (%p6531_p8), %s6331_s24, 4294963200  ;;  %p11_p9 = scmp.ge.s32.totalorder %s7333_s12, 4   ;;  %s16597_s6 = smov %s7286_s7 }
 0x96d   : > { %s16598_s7 = smov %s7290_s8  ;;  %s16599_s8 = smov %s7344_s15 }
 0x96e   : > { %s16600_s9 = smov %s7333_s12  ;;  %13 = sbr.rel (!%p11_p9) target bundleno = 3 (0x3), region = 61 }
 0x973   :  { %6337 = vsyncpa [#allocation3], 1 }
 0x974   :  { %6339 = vsyncpa [#allocation3 + $0x1], 1 }

</bundles_post_ra>
